<compile_context>
chip_gen: v7x
topology: tpu7x:2x2x1
jax: 0.10.0
libtpu: 0.0.40
codegen_flags: <defaults>
</compile_context>

<pallas_src>
import functools

import jax
import jax.numpy as jnp
from jax import lax
from jax.experimental import pallas as pl
from jax.experimental.pallas import tpu as pltpu

_HI = lax.Precision.HIGHEST  # only used by the pure-JAX reference


# ---------- small helpers ----------
def _dot(a, b):
  """a @ b, f32 accumulation (bf16 or f32 inputs, default precision)."""
  return lax.dot_general(a, b, (((1,), (0,)), ((), ())),
                         preferred_element_type=jnp.float32)


def _dot_tb(a, b):
  """a @ b.T, f32 accumulation."""
  return lax.dot_general(a, b, (((1,), (1,)), ((), ())),
                         preferred_element_type=jnp.float32)


def _dot_ta(a, b):
  """a.T @ b, f32 accumulation."""
  return lax.dot_general(a, b, (((0,), (0,)), ((), ())),
                         preferred_element_type=jnp.float32)


def _softmax(x, axis):
  m = jnp.max(x, axis=axis, keepdims=True)
  e = jnp.exp(x - m)
  return e * pl.reciprocal(jnp.sum(e, axis=axis, keepdims=True), approx=True)


def _attn_logit(x, w):
  """Row-batched 'sum_c x * (softmax(100*x) @ w)' -> [rows, 1] (lane-major)."""
  sm = _softmax(x * 100.0, -1)
  return jnp.sum(x * _dot(sm, w), axis=-1, keepdims=True)


# ---------- fused kernel ----------
def _loss_kernel(sent_ref, traj_ref, word_ref, frame_ref,
                 wg_ref, wloc_ref, wwl_ref, wfl_ref,
                 wfm_ref, wwm_ref, wfm2_ref, wwm2_ref,
                 eft_ref, ewt_ref, selhi_ref, sello_ref,
                 loss_ref,
                 vw_s, sf_s, f2_s, w2_s, pun_s, qun_s, flx_s, s2f_s,
                 *, bs, nw, nf, denom, ts_w, vw_w, sf_w, fw_w):
  f32 = jnp.float32
  bf16 = jnp.bfloat16

  sent = sent_ref[...]                       # [bs, dim]      bf16
  traj = traj_ref[...]                       # [bs, dim]      bf16
  word = word_ref[...]                       # [bs*nw, dim]   bf16
  frame = frame_ref[...]                     # [bs*nf, dim]   bf16

  # ---- MXU: reassociated projections + all score matrices (bf16 in / f32 acc) ----
  pt = _dot_tb(wg_ref[...], traj)            # [dim, bs]     = Wg @ traj.T
  qf = _dot_tb(wloc_ref[...], frame)         # [dim, bs*nf]  = Wloc @ frame.T
  sim_ts = _dot(sent, pt.astype(bf16))       # [bs, bs]        sent @ Wg @ traj.T
  a_t = _dot_tb(traj, word)                  # [bs, bs*nw]     a_t[j, i*nw+w]
  b_sc = _dot_tb(sent, frame)                # [bs, bs*nf]     b_sc[s, j*nf+f]
  fine = _dot(word, qf.astype(bf16))         # [bs*nw, bs*nf]  fine[(i,w),(j,f)]
  fine_t = jnp.transpose(fine)               # [bs*nf, bs*nw]  fine_t[(j,f),(i,w)]

  # ---- restack into lane-major per-group matrices (static slice copies) ----
  for i in range(bs):
    vw_s[i * bs:(i + 1) * bs, :] = a_t[:, i * nw:(i + 1) * nw]          # rows (i,j)
    w2_s[i * bs * nf:(i + 1) * bs * nf, :] = fine_t[:, i * nw:(i + 1) * nw]  # rows (i,j,f)
  for j in range(bs):
    sf_s[j * bs:(j + 1) * bs, :] = b_sc[:, j * nf:(j + 1) * nf]         # rows (j,s)
    f2_s[j * bs * nw:(j + 1) * bs * nw, :] = fine[:, j * nf:(j + 1) * nf]    # rows (j,i,w)

  wwl = wwl_ref[...]
  wfl = wfl_ref[...]
  wfm = wfm_ref[...]
  wwm = wwm_ref[...]
  wfm2 = wfm2_ref[...]
  wwm2 = wwm2_ref[...]

  # ---- first-level logits, fully batched, softmax over lanes ----
  vw_col = _attn_logit(vw_s[...], wwl)       # [bs*bs, 1] rows (i,j)  video_word
  sf_col = _attn_logit(sf_s[...], wfl)       # [bs*bs, 1] rows (j,s)  sentence_frame

  # ---- fine-grained frame-level logit (softmax over f), batched ----
  f2 = f2_s[...]                             # [bs*bs*nw, nf]  rows (j,i,w)
  p = _dot(_softmax(f2 * 100.0, -1), wfm)    # [bs*bs*nw, nf]
  for j in range(bs):                        # unstack back to fine's layout
    pun_s[:, j * nf:(j + 1) * nf] = p[j * bs * nw:(j + 1) * bs * nw, :]
  g = fine * pun_s[...]                      # [bs*nw, bs*nf]
  fl_t = _dot_tb(eft_ref[...], g)            # [bs, bs*nw]  rows j, cols (i,w)
  for i in range(bs):
    flx_s[i * bs:(i + 1) * bs, :] = fl_t[:, i * nw:(i + 1) * nw]        # rows (i,j)
  v2w_col = _attn_logit(flx_s[...], wwm2)    # [bs*bs, 1] rows (i,j)  video2word

  # ---- fine-grained word-level logit (softmax over w), batched ----
  w2 = w2_s[...]                             # [bs*bs*nf, nw]  rows (i,j,f)
  q = _dot(_softmax(w2 * 100.0, -1), wwm)    # [bs*bs*nf, nw]
  for i in range(bs):                        # unstack back to fine_t's layout
    qun_s[:, i * nw:(i + 1) * nw] = q[i * bs * nf:(i + 1) * bs * nf, :]
  h = fine_t * qun_s[...]                    # [bs*nf, bs*nw]
  wl = _dot_tb(ewt_ref[...], h)              # [bs, bs*nf]  rows i, cols (j,f)
  for j in range(bs):
    s2f_s[j * bs:(j + 1) * bs, :] = wl[:, j * nf:(j + 1) * nf]          # rows (j,i)
  s2f_col = _attn_logit(s2f_s[...], wfm2)    # [bs*bs, 1] rows (j,i)  sent2frame

  # ---- assemble sim [bs, bs] (rows = text, cols = video) with 2 scatter matmuls ----
  col_ij = vw_w * vw_col + (0.5 * fw_w) * v2w_col          # rows (i,j)
  col_ji = sf_w * sf_col + (0.5 * fw_w) * s2f_col          # rows (j,i)
  sel_hi = selhi_ref[...]                    # [bs*bs, bs]  [p // bs == x]
  sel_lo = sello_ref[...]                    # [bs*bs, bs]  [p %  bs == x]
  m_ij = _dot_ta(sel_hi * col_ij, sel_lo)    # [bs, bs]
  m_ji = _dot_ta(sel_lo * col_ji, sel_hi)    # [bs, bs]
  sim = (ts_w * sim_ts + m_ij + m_ji) * (1.0 / denom)

  # ---- fused CrossEn: 0.5 * (CrossEn(sim) + CrossEn(sim.T)) ----
  row_ids = lax.broadcasted_iota(jnp.int32, (bs, bs), 0)
  col_ids = lax.broadcasted_iota(jnp.int32, (bs, bs), 1)
  eye = (row_ids == col_ids).astype(f32)
  diag_sum = jnp.sum(sim * eye)
  mr = jnp.max(sim, axis=1, keepdims=True)
  lse_rows = jnp.sum(jnp.log(jnp.sum(jnp.exp(sim - mr), axis=1, keepdims=True)) + mr)
  mc = jnp.max(sim, axis=0, keepdims=True)
  lse_cols = jnp.sum(jnp.log(jnp.sum(jnp.exp(sim - mc), axis=0, keepdims=True)) + mc)
  loss_ref[0] = 0.5 * ((lse_rows - diag_sum) + (lse_cols - diag_sum)) / bs


_WEIGHT_ORDER = ("global_mat", "word_logit", "frame_logit", "local_mat",
                 "frame_mat", "word_mat", "frame_mat2", "word_mat2")


def prepare_contrastive_params(params):
  """Cast the two 768x768 weights to bf16 ONCE (cache across calls)."""
  f32, bf16 = jnp.float32, jnp.bfloat16
  out = {k: params[k].astype(f32) for k in _WEIGHT_ORDER}
  out["global_mat"] = params["global_mat"].astype(bf16)
  out["local_mat"] = params["local_mat"].astype(bf16)
  return out


def contrastive_loss_pallas(traj, frame, sent, word, params, flags):
  bs, dim = traj.shape
  nf = frame.shape[1]
  nw = word.shape[1]
  f32, bf16 = jnp.float32, jnp.bfloat16
  denom = float(flags["traj_sent"] + flags["video_word"]
                + flags["sentence_frame"] + flags["frame_word"])

  sent_bf = sent.astype(bf16)
  traj_bf = traj.astype(bf16)
  word_bf = word.reshape(bs * nw, dim).astype(bf16)
  frame_bf = frame.reshape(bs * nf, dim).astype(bf16)
  wg = params["global_mat"].astype(bf16)      # no-op if prepared params are passed
  wloc = params["local_mat"].astype(bf16)
  wwl = params["word_logit"].astype(f32)
  wfl = params["frame_logit"].astype(f32)
  wfm = params["frame_mat"].astype(f32)
  wwm = params["word_mat"].astype(f32)
  wfm2 = params["frame_mat2"].astype(f32)
  wwm2 = params["word_mat2"].astype(f32)

  # Constant 0/1 selection matrices (group-sum over lane groups, and the
  # [bs*bs,1] -> [bs,bs] scatter) built once on the host side.
  ar_b = jnp.arange(bs, dtype=jnp.int32)
  e_f_t = ((jnp.arange(bs * nf, dtype=jnp.int32) // nf)[None, :]
           == ar_b[:, None]).astype(f32)                     # [bs, bs*nf]
  e_w_t = ((jnp.arange(bs * nw, dtype=jnp.int32) // nw)[None, :]
           == ar_b[:, None]).astype(f32)                     # [bs, bs*nw]
  pidx = jnp.arange(bs * bs, dtype=jnp.int32)
  sel_hi = ((pidx[:, None] // bs) == ar_b[None, :]).astype(f32)   # [bs*bs, bs]
  sel_lo = ((pidx[:, None] % bs) == ar_b[None, :]).astype(f32)    # [bs*bs, bs]

  def full(shape):
    return pl.BlockSpec(shape, lambda i, _s=shape: tuple(0 for _ in _s))

  loss = pl.pallas_call(
      functools.partial(_loss_kernel, bs=bs, nw=nw, nf=nf, denom=denom,
                        ts_w=float(flags["traj_sent"]),
                        vw_w=float(flags["video_word"]),
                        sf_w=float(flags["sentence_frame"]),
                        fw_w=float(flags["frame_word"])),
      out_shape=jax.ShapeDtypeStruct((1,), jnp.float32),
      grid=(1,),
      in_specs=[
          full((bs, dim)),        # sentence_output (bf16)
          full((bs, dim)),        # traj_output (bf16)
          full((bs * nw, dim)),   # word_features, flattened (bf16)
          full((bs * nf, dim)),   # frame_features, flattened (bf16)
          full((dim, dim)),       # global_mat_weight (bf16)
          full((dim, dim)),       # local_mat_weight (bf16)
          full((nw, nw)),         # word_logit_weight
          full((nf, nf)),         # frame_logit_weight
          full((nf, nf)),         # frame_mat_weight
          full((nw, nw)),         # word_mat_weight
          full((nf, nf)),         # frame_mat_weight2
          full((nw, nw)),         # word_mat_weight2
          full((bs, bs * nf)),    # f-group indicator
          full((bs, bs * nw)),    # w-group indicator
          full((bs * bs, bs)),    # pair -> row selector
          full((bs * bs, bs)),    # pair -> col selector
      ],
      out_specs=pl.BlockSpec(memory_space=pltpu.MemorySpace.SMEM),
      scratch_shapes=[
          pltpu.VMEM((bs * bs, nw), jnp.float32),        # vw_s
          pltpu.VMEM((bs * bs, nf), jnp.float32),        # sf_s
          pltpu.VMEM((bs * bs * nw, nf), jnp.float32),   # f2_s
          pltpu.VMEM((bs * bs * nf, nw), jnp.float32),   # w2_s
          pltpu.VMEM((bs * nw, bs * nf), jnp.float32),   # pun_s
          pltpu.VMEM((bs * nf, bs * nw), jnp.float32),   # qun_s
          pltpu.VMEM((bs * bs, nw), jnp.float32),        # flx_s
          pltpu.VMEM((bs * bs, nf), jnp.float32),        # s2f_s
      ],
      compiler_params=pltpu.CompilerParams(
          dimension_semantics=("arbitrary",),
          vmem_limit_bytes=32 << 20),
  )(sent_bf, traj_bf, word_bf, frame_bf, wg, wloc,
    wwl, wfl, wfm, wwm, wfm2, wwm2, e_f_t, e_w_t, sel_hi, sel_lo)
  return loss[0]


# ---------- pure-JAX reference (transcription of the PyTorch forward) ----------
def contrastive_loss_reference(traj, frame, sent, word, params, flags):
  wg, wwl, wfl, wloc, wfm, wwm, wfm2, wwm2 = (params[k] for k in _WEIGHT_ORDER)
  mm = lambda a, b: jnp.matmul(a, b, precision=_HI)
  sm = jax.nn.softmax

  traj_sent_sim = mm(mm(sent, wg), traj.T)

  a = mm(word, traj.T)                                          # [bs_t, nw, bs_v]
  video_word_sim = jnp.sum(
      a * jnp.transpose(mm(jnp.transpose(sm(a / 0.01, axis=1), (0, 2, 1)), wwl),
                        (0, 2, 1)), axis=1)

  b = mm(sent, jnp.transpose(frame, (0, 2, 1)))                 # [bs_v, bs_s, nf]
  sentence_frame_sim = jnp.sum(b * mm(sm(b / 0.01, axis=-1), wfl), axis=-1).T

  bs_v, nf, dv = frame.shape
  bs_t, nw, dt = word.shape
  fine = mm(mm(word.reshape(-1, dt), wloc),
            frame.reshape(-1, dv).T).reshape(bs_t, nw, bs_v, nf)
  word_level = jnp.sum(
      jnp.transpose(mm(jnp.transpose(sm(fine / 0.01, axis=1), (0, 2, 3, 1)), wwm),
                    (0, 3, 1, 2)) * fine, axis=1)
  frame_level = jnp.sum(mm(sm(fine / 0.01, axis=-1), wfm) * fine, axis=-1)
  s2f = jnp.sum(mm(sm(word_level / 0.01, axis=-1), wfm2) * word_level, axis=-1)
  v2w = jnp.sum(
      jnp.transpose(mm(jnp.transpose(sm(frame_level / 0.01, axis=1), (0, 2, 1)), wwm2),
                    (0, 2, 1)) * frame_level, axis=1)
  frame_word_sim = 0.5 * (s2f + v2w)

  denom = (flags["traj_sent"] + flags["video_word"]
           + flags["sentence_frame"] + flags["frame_word"])
  sim = (traj_sent_sim + video_word_sim + sentence_frame_sim + frame_word_sim) / denom

  def cross_en(m):
    logpt = jax.nn.log_softmax(m, axis=-1)
    return jnp.mean(-jnp.diag(logpt))

  return 0.5 * (cross_en(sim) + cross_en(sim.T))


if __name__ == "__main__":
  # Small shapes: bs=4, embed_dim=768 (hardcoded in module), num_words=12
  # (max_instr_len), num_frames=10 (max_graph_len, cl_duet path).
  bs, dim, nw, nf = 4, 768, 12, 10
  flags = dict(traj_sent=1, video_word=1, sentence_frame=1, frame_word=1)

  key = jax.random.PRNGKey(0)
  k1, k2, k3, k4, k5 = jax.random.split(key, 5)
  traj = 0.05 * jax.random.normal(k1, (bs, dim), jnp.float32)
  frame = 0.05 * jax.random.normal(k2, (bs, nf, dim), jnp.float32)
  sent = 0.05 * jax.random.normal(k3, (bs, dim), jnp.float32)
  word = 0.05 * jax.random.normal(k4, (bs, nw, dim), jnp.float32)

  # Module __init__ uses identity matrices; add a small deterministic
  # perturbation so the mixing matmuls are actually exercised/verified.
  wk = jax.random.split(k5, 8)
  def eye_ish(k, n):
    return jnp.eye(n, dtype=jnp.float32) + 0.02 * jax.random.normal(k, (n, n), jnp.float32)

  params = {
      "global_mat": eye_ish(wk[0], dim),
      "word_logit": eye_ish(wk[1], nw),
      "frame_logit": eye_ish(wk[2], nf),
      "local_mat": eye_ish(wk[3], dim),
      "frame_mat": eye_ish(wk[4], nf),
      "word_mat": eye_ish(wk[5], nw),
      "frame_mat2": eye_ish(wk[6], nf),
      "word_mat2": eye_ish(wk[7], nw),
  }
  prepared = prepare_contrastive_params(params)   # bf16 big weights cached once

  loss = jax.block_until_ready(
      contrastive_loss_pallas(traj, frame, sent, word, prepared, flags))
  ref = jax.block_until_ready(
      contrastive_loss_reference(traj, frame, sent, word, params, flags))

  assert bool(jnp.isfinite(loss)), "non-finite loss"
  assert abs(float(loss) - float(ref)) < 1e-2 * max(1.0, abs(float(ref))), (
      f"mismatch: pallas={float(loss)} ref={float(ref)}")
  print("KERNEL_OK")
</pallas_src>

<mosaic_0001>
module attributes {stable_mosaic.version = 11 : i64} {
  func.func @_loss_kernel(%arg0: i32, %arg1: memref<4x768xbf16, #tpu.memory_space<vmem>>, %arg2: memref<4x768xbf16, #tpu.memory_space<vmem>>, %arg3: memref<48x768xbf16, #tpu.memory_space<vmem>>, %arg4: memref<40x768xbf16, #tpu.memory_space<vmem>>, %arg5: memref<768x768xbf16, #tpu.memory_space<vmem>>, %arg6: memref<768x768xbf16, #tpu.memory_space<vmem>>, %arg7: memref<12x12xf32, #tpu.memory_space<vmem>>, %arg8: memref<10x10xf32, #tpu.memory_space<vmem>>, %arg9: memref<10x10xf32, #tpu.memory_space<vmem>>, %arg10: memref<12x12xf32, #tpu.memory_space<vmem>>, %arg11: memref<10x10xf32, #tpu.memory_space<vmem>>, %arg12: memref<12x12xf32, #tpu.memory_space<vmem>>, %arg13: memref<4x40xf32, #tpu.memory_space<vmem>>, %arg14: memref<4x48xf32, #tpu.memory_space<vmem>>, %arg15: memref<16x4xf32, #tpu.memory_space<vmem>>, %arg16: memref<16x4xf32, #tpu.memory_space<vmem>>, %arg17: memref<1xf32, #tpu.memory_space<smem>>, %arg18: memref<16x12xf32, #tpu.memory_space<vmem>>, %arg19: memref<16x10xf32, #tpu.memory_space<vmem>>, %arg20: memref<192x10xf32, #tpu.memory_space<vmem>>, %arg21: memref<160x12xf32, #tpu.memory_space<vmem>>, %arg22: memref<48x40xf32, #tpu.memory_space<vmem>>, %arg23: memref<40x48xf32, #tpu.memory_space<vmem>>, %arg24: memref<16x12xf32, #tpu.memory_space<vmem>>, %arg25: memref<16x10xf32, #tpu.memory_space<vmem>>) attributes {dimension_semantics = [#tpu.dimension_semantics<arbitrary>], iteration_bounds = array<i64: 1>, scalar_prefetch = 0 : i64, scratch_operands = 8 : i64, tpu.core_type = #tpu.core_type<tc>, window_params = [{pipeline_mode = #tpu.pipeline_mode<synchronous>, transform_indices = @transform_0, window_bounds = array<i64: 4, 768>}, {pipeline_mode = #tpu.pipeline_mode<synchronous>, transform_indices = @transform_1, window_bounds = array<i64: 4, 768>}, {pipeline_mode = #tpu.pipeline_mode<synchronous>, transform_indices = @transform_2, window_bounds = array<i64: 48, 768>}, {pipeline_mode = #tpu.pipeline_mode<synchronous>, transform_indices = @transform_3, window_bounds = array<i64: 40, 768>}, {pipeline_mode = #tpu.pipeline_mode<synchronous>, transform_indices = @transform_4, window_bounds = array<i64: 768, 768>}, {pipeline_mode = #tpu.pipeline_mode<synchronous>, transform_indices = @transform_5, window_bounds = array<i64: 768, 768>}, {pipeline_mode = #tpu.pipeline_mode<synchronous>, transform_indices = @transform_6, window_bounds = array<i64: 12, 12>}, {pipeline_mode = #tpu.pipeline_mode<synchronous>, transform_indices = @transform_7, window_bounds = array<i64: 10, 10>}, {pipeline_mode = #tpu.pipeline_mode<synchronous>, transform_indices = @transform_8, window_bounds = array<i64: 10, 10>}, {pipeline_mode = #tpu.pipeline_mode<synchronous>, transform_indices = @transform_9, window_bounds = array<i64: 12, 12>}, {pipeline_mode = #tpu.pipeline_mode<synchronous>, transform_indices = @transform_10, window_bounds = array<i64: 10, 10>}, {pipeline_mode = #tpu.pipeline_mode<synchronous>, transform_indices = @transform_11, window_bounds = array<i64: 12, 12>}, {pipeline_mode = #tpu.pipeline_mode<synchronous>, transform_indices = @transform_12, window_bounds = array<i64: 4, 40>}, {pipeline_mode = #tpu.pipeline_mode<synchronous>, transform_indices = @transform_13, window_bounds = array<i64: 4, 48>}, {pipeline_mode = #tpu.pipeline_mode<synchronous>, transform_indices = @transform_14, window_bounds = array<i64: 16, 4>}, {pipeline_mode = #tpu.pipeline_mode<synchronous>, transform_indices = @transform_15, window_bounds = array<i64: 16, 4>}, {transform_indices = @transform_16, window_bounds = array<i64: 1>}]} {
    %c0 = arith.constant 0 : index
    %c0_0 = arith.constant 0 : index
    %0 = vector.load %arg1[%c0, %c0_0] : memref<4x768xbf16, #tpu.memory_space<vmem>>, vector<4x768xbf16>
    %c0_1 = arith.constant 0 : index
    %c0_2 = arith.constant 0 : index
    %1 = vector.load %arg2[%c0_1, %c0_2] : memref<4x768xbf16, #tpu.memory_space<vmem>>, vector<4x768xbf16>
    %c0_3 = arith.constant 0 : index
    %c0_4 = arith.constant 0 : index
    %2 = vector.load %arg3[%c0_3, %c0_4] : memref<48x768xbf16, #tpu.memory_space<vmem>>, vector<48x768xbf16>
    %c0_5 = arith.constant 0 : index
    %c0_6 = arith.constant 0 : index
    %3 = vector.load %arg4[%c0_5, %c0_6] : memref<40x768xbf16, #tpu.memory_space<vmem>>, vector<40x768xbf16>
    %c0_7 = arith.constant 0 : index
    %c0_8 = arith.constant 0 : index
    %4 = vector.load %arg5[%c0_7, %c0_8] : memref<768x768xbf16, #tpu.memory_space<vmem>>, vector<768x768xbf16>
    %cst = arith.constant dense<0.000000e+00> : vector<768x4xf32>
    %5 = tpu.matmul %4, %1, %cst {dimension_numbers = #tpu.dot_dimension_numbers<[1], [1], [0], [0], [0, 0, 1, 0], [], []>} : vector<768x768xbf16>, vector<4x768xbf16>, vector<768x4xf32> -> vector<768x4xf32>
    %c0_9 = arith.constant 0 : index
    %c0_10 = arith.constant 0 : index
    %6 = vector.load %arg6[%c0_9, %c0_10] : memref<768x768xbf16, #tpu.memory_space<vmem>>, vector<768x768xbf16>
    %cst_11 = arith.constant dense<0.000000e+00> : vector<768x40xf32>
    %7 = tpu.matmul %6, %3, %cst_11 {dimension_numbers = #tpu.dot_dimension_numbers<[1], [1], [0], [0], [0, 0, 1, 0], [], []>} : vector<768x768xbf16>, vector<40x768xbf16>, vector<768x40xf32> -> vector<768x40xf32>
    %8 = arith.truncf %5 : vector<768x4xf32> to vector<768x4xbf16>
    %cst_12 = arith.constant dense<0.000000e+00> : vector<4x4xf32>
    %9 = tpu.matmul %0, %8, %cst_12 {dimension_numbers = #tpu.dot_dimension_numbers<[1], [0], [0], [1], [0, 0, 1, 1], [], []>} : vector<4x768xbf16>, vector<768x4xbf16>, vector<4x4xf32> -> vector<4x4xf32>
    %cst_13 = arith.constant dense<0.000000e+00> : vector<4x48xf32>
    %10 = tpu.matmul %1, %2, %cst_13 {dimension_numbers = #tpu.dot_dimension_numbers<[1], [1], [0], [0], [0, 0, 1, 0], [], []>} : vector<4x768xbf16>, vector<48x768xbf16>, vector<4x48xf32> -> vector<4x48xf32>
    %cst_14 = arith.constant dense<0.000000e+00> : vector<4x40xf32>
    %11 = tpu.matmul %0, %3, %cst_14 {dimension_numbers = #tpu.dot_dimension_numbers<[1], [1], [0], [0], [0, 0, 1, 0], [], []>} : vector<4x768xbf16>, vector<40x768xbf16>, vector<4x40xf32> -> vector<4x40xf32>
    %12 = arith.truncf %7 : vector<768x40xf32> to vector<768x40xbf16>
    %cst_15 = arith.constant dense<0.000000e+00> : vector<48x40xf32>
    %13 = tpu.matmul %2, %12, %cst_15 {dimension_numbers = #tpu.dot_dimension_numbers<[1], [0], [0], [1], [0, 0, 1, 1], [], []>} : vector<48x768xbf16>, vector<768x40xbf16>, vector<48x40xf32> -> vector<48x40xf32>
    %14 = tpu.transpose %13, [1, 0] : vector<48x40xf32> -> vector<40x48xf32>
    %15 = vector.extract_strided_slice %10 {offsets = [0, 0], sizes = [4, 12], strides = [1, 1]} : vector<4x48xf32> to vector<4x12xf32>
    %c0_16 = arith.constant 0 : index
    %c0_17 = arith.constant 0 : index
    %16 = vector.load %arg18[%c0_16, %c0_17] : memref<16x12xf32, #tpu.memory_space<vmem>>, vector<4x12xf32>
    tpu.vector_store %arg18[%c0_16, %c0_17], %15 {strides = array<i32>} : memref<16x12xf32, #tpu.memory_space<vmem>>, vector<4x12xf32>,
    %17 = vector.extract_strided_slice %14 {offsets = [0, 0], sizes = [40, 12], strides = [1, 1]} : vector<40x48xf32> to vector<40x12xf32>
    %c0_18 = arith.constant 0 : index
    %c0_19 = arith.constant 0 : index
    %18 = vector.load %arg21[%c0_18, %c0_19] : memref<160x12xf32, #tpu.memory_space<vmem>>, vector<40x12xf32>
    tpu.vector_store %arg21[%c0_18, %c0_19], %17 {strides = array<i32>} : memref<160x12xf32, #tpu.memory_space<vmem>>, vector<40x12xf32>,
    %19 = vector.extract_strided_slice %10 {offsets = [0, 12], sizes = [4, 12], strides = [1, 1]} : vector<4x48xf32> to vector<4x12xf32>
    %c4 = arith.constant 4 : index
    %c0_20 = arith.constant 0 : index
    %20 = vector.load %arg18[%c4, %c0_20] : memref<16x12xf32, #tpu.memory_space<vmem>>, vector<4x12xf32>
    tpu.vector_store %arg18[%c4, %c0_20], %19 {strides = array<i32>} : memref<16x12xf32, #tpu.memory_space<vmem>>, vector<4x12xf32>,
    %21 = vector.extract_strided_slice %14 {offsets = [0, 12], sizes = [40, 12], strides = [1, 1]} : vector<40x48xf32> to vector<40x12xf32>
    %c40 = arith.constant 40 : index
    %c0_21 = arith.constant 0 : index
    %22 = vector.load %arg21[%c40, %c0_21] : memref<160x12xf32, #tpu.memory_space<vmem>>, vector<40x12xf32>
    tpu.vector_store %arg21[%c40, %c0_21], %21 {strides = array<i32>} : memref<160x12xf32, #tpu.memory_space<vmem>>, vector<40x12xf32>,
    %23 = vector.extract_strided_slice %10 {offsets = [0, 24], sizes = [4, 12], strides = [1, 1]} : vector<4x48xf32> to vector<4x12xf32>
    %c8 = arith.constant 8 : index
    %c0_22 = arith.constant 0 : index
    %24 = vector.load %arg18[%c8, %c0_22] : memref<16x12xf32, #tpu.memory_space<vmem>>, vector<4x12xf32>
    tpu.vector_store %arg18[%c8, %c0_22], %23 {strides = array<i32>} : memref<16x12xf32, #tpu.memory_space<vmem>>, vector<4x12xf32>,
    %25 = vector.extract_strided_slice %14 {offsets = [0, 24], sizes = [40, 12], strides = [1, 1]} : vector<40x48xf32> to vector<40x12xf32>
    %c80 = arith.constant 80 : index
    %c0_23 = arith.constant 0 : index
    %26 = vector.load %arg21[%c80, %c0_23] : memref<160x12xf32, #tpu.memory_space<vmem>>, vector<40x12xf32>
    tpu.vector_store %arg21[%c80, %c0_23], %25 {strides = array<i32>} : memref<160x12xf32, #tpu.memory_space<vmem>>, vector<40x12xf32>,
    %27 = vector.extract_strided_slice %10 {offsets = [0, 36], sizes = [4, 12], strides = [1, 1]} : vector<4x48xf32> to vector<4x12xf32>
    %c12 = arith.constant 12 : index
    %c0_24 = arith.constant 0 : index
    %28 = vector.load %arg18[%c12, %c0_24] : memref<16x12xf32, #tpu.memory_space<vmem>>, vector<4x12xf32>
    tpu.vector_store %arg18[%c12, %c0_24], %27 {strides = array<i32>} : memref<16x12xf32, #tpu.memory_space<vmem>>, vector<4x12xf32>,
    %29 = vector.extract_strided_slice %14 {offsets = [0, 36], sizes = [40, 12], strides = [1, 1]} : vector<40x48xf32> to vector<40x12xf32>
    %c120 = arith.constant 120 : index
    %c0_25 = arith.constant 0 : index
    %30 = vector.load %arg21[%c120, %c0_25] : memref<160x12xf32, #tpu.memory_space<vmem>>, vector<40x12xf32>
    tpu.vector_store %arg21[%c120, %c0_25], %29 {strides = array<i32>} : memref<160x12xf32, #tpu.memory_space<vmem>>, vector<40x12xf32>,
    %31 = vector.extract_strided_slice %11 {offsets = [0, 0], sizes = [4, 10], strides = [1, 1]} : vector<4x40xf32> to vector<4x10xf32>
    %c0_26 = arith.constant 0 : index
    %c0_27 = arith.constant 0 : index
    %32 = vector.load %arg19[%c0_26, %c0_27] : memref<16x10xf32, #tpu.memory_space<vmem>>, vector<4x10xf32>
    tpu.vector_store %arg19[%c0_26, %c0_27], %31 {strides = array<i32>} : memref<16x10xf32, #tpu.memory_space<vmem>>, vector<4x10xf32>,
    %33 = vector.extract_strided_slice %13 {offsets = [0, 0], sizes = [48, 10], strides = [1, 1]} : vector<48x40xf32> to vector<48x10xf32>
    %c0_28 = arith.constant 0 : index
    %c0_29 = arith.constant 0 : index
    %34 = vector.load %arg20[%c0_28, %c0_29] : memref<192x10xf32, #tpu.memory_space<vmem>>, vector<48x10xf32>
    tpu.vector_store %arg20[%c0_28, %c0_29], %33 {strides = array<i32>} : memref<192x10xf32, #tpu.memory_space<vmem>>, vector<48x10xf32>,
    %35 = vector.extract_strided_slice %11 {offsets = [0, 10], sizes = [4, 10], strides = [1, 1]} : vector<4x40xf32> to vector<4x10xf32>
    %c4_30 = arith.constant 4 : index
    %c0_31 = arith.constant 0 : index
    %36 = vector.load %arg19[%c4_30, %c0_31] : memref<16x10xf32, #tpu.memory_space<vmem>>, vector<4x10xf32>
    tpu.vector_store %arg19[%c4_30, %c0_31], %35 {strides = array<i32>} : memref<16x10xf32, #tpu.memory_space<vmem>>, vector<4x10xf32>,
    %37 = vector.extract_strided_slice %13 {offsets = [0, 10], sizes = [48, 10], strides = [1, 1]} : vector<48x40xf32> to vector<48x10xf32>
    %c48 = arith.constant 48 : index
    %c0_32 = arith.constant 0 : index
    %38 = vector.load %arg20[%c48, %c0_32] : memref<192x10xf32, #tpu.memory_space<vmem>>, vector<48x10xf32>
    tpu.vector_store %arg20[%c48, %c0_32], %37 {strides = array<i32>} : memref<192x10xf32, #tpu.memory_space<vmem>>, vector<48x10xf32>,
    %39 = vector.extract_strided_slice %11 {offsets = [0, 20], sizes = [4, 10], strides = [1, 1]} : vector<4x40xf32> to vector<4x10xf32>
    %c8_33 = arith.constant 8 : index
    %c0_34 = arith.constant 0 : index
    %40 = vector.load %arg19[%c8_33, %c0_34] : memref<16x10xf32, #tpu.memory_space<vmem>>, vector<4x10xf32>
    tpu.vector_store %arg19[%c8_33, %c0_34], %39 {strides = array<i32>} : memref<16x10xf32, #tpu.memory_space<vmem>>, vector<4x10xf32>,
    %41 = vector.extract_strided_slice %13 {offsets = [0, 20], sizes = [48, 10], strides = [1, 1]} : vector<48x40xf32> to vector<48x10xf32>
    %c96 = arith.constant 96 : index
    %c0_35 = arith.constant 0 : index
    %42 = vector.load %arg20[%c96, %c0_35] : memref<192x10xf32, #tpu.memory_space<vmem>>, vector<48x10xf32>
    tpu.vector_store %arg20[%c96, %c0_35], %41 {strides = array<i32>} : memref<192x10xf32, #tpu.memory_space<vmem>>, vector<48x10xf32>,
    %43 = vector.extract_strided_slice %11 {offsets = [0, 30], sizes = [4, 10], strides = [1, 1]} : vector<4x40xf32> to vector<4x10xf32>
    %c12_36 = arith.constant 12 : index
    %c0_37 = arith.constant 0 : index
    %44 = vector.load %arg19[%c12_36, %c0_37] : memref<16x10xf32, #tpu.memory_space<vmem>>, vector<4x10xf32>
    tpu.vector_store %arg19[%c12_36, %c0_37], %43 {strides = array<i32>} : memref<16x10xf32, #tpu.memory_space<vmem>>, vector<4x10xf32>,
    %45 = vector.extract_strided_slice %13 {offsets = [0, 30], sizes = [48, 10], strides = [1, 1]} : vector<48x40xf32> to vector<48x10xf32>
    %c144 = arith.constant 144 : index
    %c0_38 = arith.constant 0 : index
    %46 = vector.load %arg20[%c144, %c0_38] : memref<192x10xf32, #tpu.memory_space<vmem>>, vector<48x10xf32>
    tpu.vector_store %arg20[%c144, %c0_38], %45 {strides = array<i32>} : memref<192x10xf32, #tpu.memory_space<vmem>>, vector<48x10xf32>,
    %c0_39 = arith.constant 0 : index
    %c0_40 = arith.constant 0 : index
    %47 = vector.load %arg7[%c0_39, %c0_40] : memref<12x12xf32, #tpu.memory_space<vmem>>, vector<12x12xf32>
    %c0_41 = arith.constant 0 : index
    %c0_42 = arith.constant 0 : index
    %48 = vector.load %arg8[%c0_41, %c0_42] : memref<10x10xf32, #tpu.memory_space<vmem>>, vector<10x10xf32>
    %c0_43 = arith.constant 0 : index
    %c0_44 = arith.constant 0 : index
    %49 = vector.load %arg9[%c0_43, %c0_44] : memref<10x10xf32, #tpu.memory_space<vmem>>, vector<10x10xf32>
    %c0_45 = arith.constant 0 : index
    %c0_46 = arith.constant 0 : index
    %50 = vector.load %arg10[%c0_45, %c0_46] : memref<12x12xf32, #tpu.memory_space<vmem>>, vector<12x12xf32>
    %c0_47 = arith.constant 0 : index
    %c0_48 = arith.constant 0 : index
    %51 = vector.load %arg11[%c0_47, %c0_48] : memref<10x10xf32, #tpu.memory_space<vmem>>, vector<10x10xf32>
    %c0_49 = arith.constant 0 : index
    %c0_50 = arith.constant 0 : index
    %52 = vector.load %arg12[%c0_49, %c0_50] : memref<12x12xf32, #tpu.memory_space<vmem>>, vector<12x12xf32>
    %c0_51 = arith.constant 0 : index
    %c0_52 = arith.constant 0 : index
    %53 = vector.load %arg18[%c0_51, %c0_52] : memref<16x12xf32, #tpu.memory_space<vmem>>, vector<16x12xf32>
    %cst_53 = arith.constant 1.000000e+02 : f32
    %54 = vector.broadcast %cst_53 : f32 to vector<16x12xf32>
    %55 = arith.mulf %53, %54 : vector<16x12xf32>
    %cst_54 = arith.constant dense<0xFF800000> : vector<16xf32>
    %56 = vector.multi_reduction <maximumf>, %55, %cst_54 [1] : vector<16x12xf32> to vector<16xf32>
    %57 = vector.shape_cast %56 : vector<16xf32> to vector<16x1xf32>
    %58 = vector.broadcast %57 : vector<16x1xf32> to vector<16x12xf32>
    %59 = arith.subf %55, %58 : vector<16x12xf32>
    %60 = math.exp %59 : vector<16x12xf32>
    %cst_55 = arith.constant dense<0.000000e+00> : vector<16xf32>
    %61 = vector.multi_reduction <add>, %60, %cst_55 [1] : vector<16x12xf32> to vector<16xf32>
    %62 = vector.shape_cast %61 : vector<16xf32> to vector<16x1xf32>
    %63 = tpu.reciprocal %62 {approx = true} : vector<16x1xf32> -> vector<16x1xf32>
    %64 = vector.broadcast %63 : vector<16x1xf32> to vector<16x12xf32>
    %65 = arith.mulf %60, %64 : vector<16x12xf32>
    %cst_56 = arith.constant dense<0.000000e+00> : vector<16x12xf32>
    %66 = tpu.matmul %65, %47, %cst_56 {dimension_numbers = #tpu.dot_dimension_numbers<[1], [0], [0], [1], [0, 0, 1, 1], [], []>} : vector<16x12xf32>, vector<12x12xf32>, vector<16x12xf32> -> vector<16x12xf32>
    %67 = arith.mulf %53, %66 : vector<16x12xf32>
    %cst_57 = arith.constant dense<0.000000e+00> : vector<16xf32>
    %68 = vector.multi_reduction <add>, %67, %cst_57 [1] : vector<16x12xf32> to vector<16xf32>
    %69 = vector.shape_cast %68 : vector<16xf32> to vector<16x1xf32>
    %c0_58 = arith.constant 0 : index
    %c0_59 = arith.constant 0 : index
    %70 = vector.load %arg19[%c0_58, %c0_59] : memref<16x10xf32, #tpu.memory_space<vmem>>, vector<16x10xf32>
    %cst_60 = arith.constant 1.000000e+02 : f32
    %71 = vector.broadcast %cst_60 : f32 to vector<16x10xf32>
    %72 = arith.mulf %70, %71 : vector<16x10xf32>
    %cst_61 = arith.constant dense<0xFF800000> : vector<16xf32>
    %73 = vector.multi_reduction <maximumf>, %72, %cst_61 [1] : vector<16x10xf32> to vector<16xf32>
    %74 = vector.shape_cast %73 : vector<16xf32> to vector<16x1xf32>
    %75 = vector.broadcast %74 : vector<16x1xf32> to vector<16x10xf32>
    %76 = arith.subf %72, %75 : vector<16x10xf32>
    %77 = math.exp %76 : vector<16x10xf32>
    %cst_62 = arith.constant dense<0.000000e+00> : vector<16xf32>
    %78 = vector.multi_reduction <add>, %77, %cst_62 [1] : vector<16x10xf32> to vector<16xf32>
    %79 = vector.shape_cast %78 : vector<16xf32> to vector<16x1xf32>
    %80 = tpu.reciprocal %79 {approx = true} : vector<16x1xf32> -> vector<16x1xf32>
    %81 = vector.broadcast %80 : vector<16x1xf32> to vector<16x10xf32>
    %82 = arith.mulf %77, %81 : vector<16x10xf32>
    %cst_63 = arith.constant dense<0.000000e+00> : vector<16x10xf32>
    %83 = tpu.matmul %82, %48, %cst_63 {dimension_numbers = #tpu.dot_dimension_numbers<[1], [0], [0], [1], [0, 0, 1, 1], [], []>} : vector<16x10xf32>, vector<10x10xf32>, vector<16x10xf32> -> vector<16x10xf32>
    %84 = arith.mulf %70, %83 : vector<16x10xf32>
    %cst_64 = arith.constant dense<0.000000e+00> : vector<16xf32>
    %85 = vector.multi_reduction <add>, %84, %cst_64 [1] : vector<16x10xf32> to vector<16xf32>
    %86 = vector.shape_cast %85 : vector<16xf32> to vector<16x1xf32>
    %c0_65 = arith.constant 0 : index
    %c0_66 = arith.constant 0 : index
    %87 = vector.load %arg20[%c0_65, %c0_66] : memref<192x10xf32, #tpu.memory_space<vmem>>, vector<192x10xf32>
    %cst_67 = arith.constant 1.000000e+02 : f32
    %88 = vector.broadcast %cst_67 : f32 to vector<192x10xf32>
    %89 = arith.mulf %87, %88 : vector<192x10xf32>
    %cst_68 = arith.constant dense<0xFF800000> : vector<192xf32>
    %90 = vector.multi_reduction <maximumf>, %89, %cst_68 [1] : vector<192x10xf32> to vector<192xf32>
    %91 = vector.shape_cast %90 : vector<192xf32> to vector<192x1xf32>
    %92 = vector.broadcast %91 : vector<192x1xf32> to vector<192x10xf32>
    %93 = arith.subf %89, %92 : vector<192x10xf32>
    %94 = math.exp %93 : vector<192x10xf32>
    %cst_69 = arith.constant dense<0.000000e+00> : vector<192xf32>
    %95 = vector.multi_reduction <add>, %94, %cst_69 [1] : vector<192x10xf32> to vector<192xf32>
    %96 = vector.shape_cast %95 : vector<192xf32> to vector<192x1xf32>
    %97 = tpu.reciprocal %96 {approx = true} : vector<192x1xf32> -> vector<192x1xf32>
    %98 = vector.broadcast %97 : vector<192x1xf32> to vector<192x10xf32>
    %99 = arith.mulf %94, %98 : vector<192x10xf32>
    %cst_70 = arith.constant dense<0.000000e+00> : vector<192x10xf32>
    %100 = tpu.matmul %99, %49, %cst_70 {dimension_numbers = #tpu.dot_dimension_numbers<[1], [0], [0], [1], [0, 0, 1, 1], [], []>} : vector<192x10xf32>, vector<10x10xf32>, vector<192x10xf32> -> vector<192x10xf32>
    %101 = vector.extract_strided_slice %100 {offsets = [0, 0], sizes = [48, 10], strides = [1, 1]} : vector<192x10xf32> to vector<48x10xf32>
    %c0_71 = arith.constant 0 : index
    %c0_72 = arith.constant 0 : index
    %102 = vector.load %arg22[%c0_71, %c0_72] : memref<48x40xf32, #tpu.memory_space<vmem>>, vector<48x10xf32>
    tpu.vector_store %arg22[%c0_71, %c0_72], %101 {strides = array<i32>} : memref<48x40xf32, #tpu.memory_space<vmem>>, vector<48x10xf32>,
    %103 = vector.extract_strided_slice %100 {offsets = [48, 0], sizes = [48, 10], strides = [1, 1]} : vector<192x10xf32> to vector<48x10xf32>
    %c0_73 = arith.constant 0 : index
    %c10 = arith.constant 10 : index
    %104 = vector.load %arg22[%c0_73, %c10] : memref<48x40xf32, #tpu.memory_space<vmem>>, vector<48x10xf32>
    tpu.vector_store %arg22[%c0_73, %c10], %103 {strides = array<i32>} : memref<48x40xf32, #tpu.memory_space<vmem>>, vector<48x10xf32>,
    %105 = vector.extract_strided_slice %100 {offsets = [96, 0], sizes = [48, 10], strides = [1, 1]} : vector<192x10xf32> to vector<48x10xf32>
    %c0_74 = arith.constant 0 : index
    %c20 = arith.constant 20 : index
    %106 = vector.load %arg22[%c0_74, %c20] : memref<48x40xf32, #tpu.memory_space<vmem>>, vector<48x10xf32>
    tpu.vector_store %arg22[%c0_74, %c20], %105 {strides = array<i32>} : memref<48x40xf32, #tpu.memory_space<vmem>>, vector<48x10xf32>,
    %107 = vector.extract_strided_slice %100 {offsets = [144, 0], sizes = [48, 10], strides = [1, 1]} : vector<192x10xf32> to vector<48x10xf32>
    %c0_75 = arith.constant 0 : index
    %c30 = arith.constant 30 : index
    %108 = vector.load %arg22[%c0_75, %c30] : memref<48x40xf32, #tpu.memory_space<vmem>>, vector<48x10xf32>
    tpu.vector_store %arg22[%c0_75, %c30], %107 {strides = array<i32>} : memref<48x40xf32, #tpu.memory_space<vmem>>, vector<48x10xf32>,
    %c0_76 = arith.constant 0 : index
    %c0_77 = arith.constant 0 : index
    %109 = vector.load %arg22[%c0_76, %c0_77] : memref<48x40xf32, #tpu.memory_space<vmem>>, vector<48x40xf32>
    %110 = arith.mulf %13, %109 : vector<48x40xf32>
    %c0_78 = arith.constant 0 : index
    %c0_79 = arith.constant 0 : index
    %111 = vector.load %arg13[%c0_78, %c0_79] : memref<4x40xf32, #tpu.memory_space<vmem>>, vector<4x40xf32>
    %cst_80 = arith.constant dense<0.000000e+00> : vector<4x48xf32>
    %112 = tpu.matmul %111, %110, %cst_80 {dimension_numbers = #tpu.dot_dimension_numbers<[1], [1], [0], [0], [0, 0, 1, 0], [], []>} : vector<4x40xf32>, vector<48x40xf32>, vector<4x48xf32> -> vector<4x48xf32>
    %113 = vector.extract_strided_slice %112 {offsets = [0, 0], sizes = [4, 12], strides = [1, 1]} : vector<4x48xf32> to vector<4x12xf32>
    %c0_81 = arith.constant 0 : index
    %c0_82 = arith.constant 0 : index
    %114 = vector.load %arg24[%c0_81, %c0_82] : memref<16x12xf32, #tpu.memory_space<vmem>>, vector<4x12xf32>
    tpu.vector_store %arg24[%c0_81, %c0_82], %113 {strides = array<i32>} : memref<16x12xf32, #tpu.memory_space<vmem>>, vector<4x12xf32>,
    %115 = vector.extract_strided_slice %112 {offsets = [0, 12], sizes = [4, 12], strides = [1, 1]} : vector<4x48xf32> to vector<4x12xf32>
    %c4_83 = arith.constant 4 : index
    %c0_84 = arith.constant 0 : index
    %116 = vector.load %arg24[%c4_83, %c0_84] : memref<16x12xf32, #tpu.memory_space<vmem>>, vector<4x12xf32>
    tpu.vector_store %arg24[%c4_83, %c0_84], %115 {strides = array<i32>} : memref<16x12xf32, #tpu.memory_space<vmem>>, vector<4x12xf32>,
    %117 = vector.extract_strided_slice %112 {offsets = [0, 24], sizes = [4, 12], strides = [1, 1]} : vector<4x48xf32> to vector<4x12xf32>
    %c8_85 = arith.constant 8 : index
    %c0_86 = arith.constant 0 : index
    %118 = vector.load %arg24[%c8_85, %c0_86] : memref<16x12xf32, #tpu.memory_space<vmem>>, vector<4x12xf32>
    tpu.vector_store %arg24[%c8_85, %c0_86], %117 {strides = array<i32>} : memref<16x12xf32, #tpu.memory_space<vmem>>, vector<4x12xf32>,
    %119 = vector.extract_strided_slice %112 {offsets = [0, 36], sizes = [4, 12], strides = [1, 1]} : vector<4x48xf32> to vector<4x12xf32>
    %c12_87 = arith.constant 12 : index
    %c0_88 = arith.constant 0 : index
    %120 = vector.load %arg24[%c12_87, %c0_88] : memref<16x12xf32, #tpu.memory_space<vmem>>, vector<4x12xf32>
    tpu.vector_store %arg24[%c12_87, %c0_88], %119 {strides = array<i32>} : memref<16x12xf32, #tpu.memory_space<vmem>>, vector<4x12xf32>,
    %c0_89 = arith.constant 0 : index
    %c0_90 = arith.constant 0 : index
    %121 = vector.load %arg24[%c0_89, %c0_90] : memref<16x12xf32, #tpu.memory_space<vmem>>, vector<16x12xf32>
    %cst_91 = arith.constant 1.000000e+02 : f32
    %122 = vector.broadcast %cst_91 : f32 to vector<16x12xf32>
    %123 = arith.mulf %121, %122 : vector<16x12xf32>
    %cst_92 = arith.constant dense<0xFF800000> : vector<16xf32>
    %124 = vector.multi_reduction <maximumf>, %123, %cst_92 [1] : vector<16x12xf32> to vector<16xf32>
    %125 = vector.shape_cast %124 : vector<16xf32> to vector<16x1xf32>
    %126 = vector.broadcast %125 : vector<16x1xf32> to vector<16x12xf32>
    %127 = arith.subf %123, %126 : vector<16x12xf32>
    %128 = math.exp %127 : vector<16x12xf32>
    %cst_93 = arith.constant dense<0.000000e+00> : vector<16xf32>
    %129 = vector.multi_reduction <add>, %128, %cst_93 [1] : vector<16x12xf32> to vector<16xf32>
    %130 = vector.shape_cast %129 : vector<16xf32> to vector<16x1xf32>
    %131 = tpu.reciprocal %130 {approx = true} : vector<16x1xf32> -> vector<16x1xf32>
    %132 = vector.broadcast %131 : vector<16x1xf32> to vector<16x12xf32>
    %133 = arith.mulf %128, %132 : vector<16x12xf32>
    %cst_94 = arith.constant dense<0.000000e+00> : vector<16x12xf32>
    %134 = tpu.matmul %133, %52, %cst_94 {dimension_numbers = #tpu.dot_dimension_numbers<[1], [0], [0], [1], [0, 0, 1, 1], [], []>} : vector<16x12xf32>, vector<12x12xf32>, vector<16x12xf32> -> vector<16x12xf32>
    %135 = arith.mulf %121, %134 : vector<16x12xf32>
    %cst_95 = arith.constant dense<0.000000e+00> : vector<16xf32>
    %136 = vector.multi_reduction <add>, %135, %cst_95 [1] : vector<16x12xf32> to vector<16xf32>
    %137 = vector.shape_cast %136 : vector<16xf32> to vector<16x1xf32>
    %c0_96 = arith.constant 0 : index
    %c0_97 = arith.constant 0 : index
    %138 = vector.load %arg21[%c0_96, %c0_97] : memref<160x12xf32, #tpu.memory_space<vmem>>, vector<160x12xf32>
    %cst_98 = arith.constant 1.000000e+02 : f32
    %139 = vector.broadcast %cst_98 : f32 to vector<160x12xf32>
    %140 = arith.mulf %138, %139 : vector<160x12xf32>
    %cst_99 = arith.constant dense<0xFF800000> : vector<160xf32>
    %141 = vector.multi_reduction <maximumf>, %140, %cst_99 [1] : vector<160x12xf32> to vector<160xf32>
    %142 = vector.shape_cast %141 : vector<160xf32> to vector<160x1xf32>
    %143 = vector.broadcast %142 : vector<160x1xf32> to vector<160x12xf32>
    %144 = arith.subf %140, %143 : vector<160x12xf32>
    %145 = math.exp %144 : vector<160x12xf32>
    %cst_100 = arith.constant dense<0.000000e+00> : vector<160xf32>
    %146 = vector.multi_reduction <add>, %145, %cst_100 [1] : vector<160x12xf32> to vector<160xf32>
    %147 = vector.shape_cast %146 : vector<160xf32> to vector<160x1xf32>
    %148 = tpu.reciprocal %147 {approx = true} : vector<160x1xf32> -> vector<160x1xf32>
    %149 = vector.broadcast %148 : vector<160x1xf32> to vector<160x12xf32>
    %150 = arith.mulf %145, %149 : vector<160x12xf32>
    %cst_101 = arith.constant dense<0.000000e+00> : vector<160x12xf32>
    %151 = tpu.matmul %150, %50, %cst_101 {dimension_numbers = #tpu.dot_dimension_numbers<[1], [0], [0], [1], [0, 0, 1, 1], [], []>} : vector<160x12xf32>, vector<12x12xf32>, vector<160x12xf32> -> vector<160x12xf32>
    %152 = vector.extract_strided_slice %151 {offsets = [0, 0], sizes = [40, 12], strides = [1, 1]} : vector<160x12xf32> to vector<40x12xf32>
    %c0_102 = arith.constant 0 : index
    %c0_103 = arith.constant 0 : index
    %153 = vector.load %arg23[%c0_102, %c0_103] : memref<40x48xf32, #tpu.memory_space<vmem>>, vector<40x12xf32>
    tpu.vector_store %arg23[%c0_102, %c0_103], %152 {strides = array<i32>} : memref<40x48xf32, #tpu.memory_space<vmem>>, vector<40x12xf32>,
    %154 = vector.extract_strided_slice %151 {offsets = [40, 0], sizes = [40, 12], strides = [1, 1]} : vector<160x12xf32> to vector<40x12xf32>
    %c0_104 = arith.constant 0 : index
    %c12_105 = arith.constant 12 : index
    %155 = vector.load %arg23[%c0_104, %c12_105] : memref<40x48xf32, #tpu.memory_space<vmem>>, vector<40x12xf32>
    tpu.vector_store %arg23[%c0_104, %c12_105], %154 {strides = array<i32>} : memref<40x48xf32, #tpu.memory_space<vmem>>, vector<40x12xf32>,
    %156 = vector.extract_strided_slice %151 {offsets = [80, 0], sizes = [40, 12], strides = [1, 1]} : vector<160x12xf32> to vector<40x12xf32>
    %c0_106 = arith.constant 0 : index
    %c24 = arith.constant 24 : index
    %157 = vector.load %arg23[%c0_106, %c24] : memref<40x48xf32, #tpu.memory_space<vmem>>, vector<40x12xf32>
    tpu.vector_store %arg23[%c0_106, %c24], %156 {strides = array<i32>} : memref<40x48xf32, #tpu.memory_space<vmem>>, vector<40x12xf32>,
    %158 = vector.extract_strided_slice %151 {offsets = [120, 0], sizes = [40, 12], strides = [1, 1]} : vector<160x12xf32> to vector<40x12xf32>
    %c0_107 = arith.constant 0 : index
    %c36 = arith.constant 36 : index
    %159 = vector.load %arg23[%c0_107, %c36] : memref<40x48xf32, #tpu.memory_space<vmem>>, vector<40x12xf32>
    tpu.vector_store %arg23[%c0_107, %c36], %158 {strides = array<i32>} : memref<40x48xf32, #tpu.memory_space<vmem>>, vector<40x12xf32>,
    %c0_108 = arith.constant 0 : index
    %c0_109 = arith.constant 0 : index
    %160 = vector.load %arg23[%c0_108, %c0_109] : memref<40x48xf32, #tpu.memory_space<vmem>>, vector<40x48xf32>
    %161 = arith.mulf %14, %160 : vector<40x48xf32>
    %c0_110 = arith.constant 0 : index
    %c0_111 = arith.constant 0 : index
    %162 = vector.load %arg14[%c0_110, %c0_111] : memref<4x48xf32, #tpu.memory_space<vmem>>, vector<4x48xf32>
    %cst_112 = arith.constant dense<0.000000e+00> : vector<4x40xf32>
    %163 = tpu.matmul %162, %161, %cst_112 {dimension_numbers = #tpu.dot_dimension_numbers<[1], [1], [0], [0], [0, 0, 1, 0], [], []>} : vector<4x48xf32>, vector<40x48xf32>, vector<4x40xf32> -> vector<4x40xf32>
    %164 = vector.extract_strided_slice %163 {offsets = [0, 0], sizes = [4, 10], strides = [1, 1]} : vector<4x40xf32> to vector<4x10xf32>
    %c0_113 = arith.constant 0 : index
    %c0_114 = arith.constant 0 : index
    %165 = vector.load %arg25[%c0_113, %c0_114] : memref<16x10xf32, #tpu.memory_space<vmem>>, vector<4x10xf32>
    tpu.vector_store %arg25[%c0_113, %c0_114], %164 {strides = array<i32>} : memref<16x10xf32, #tpu.memory_space<vmem>>, vector<4x10xf32>,
    %166 = vector.extract_strided_slice %163 {offsets = [0, 10], sizes = [4, 10], strides = [1, 1]} : vector<4x40xf32> to vector<4x10xf32>
    %c4_115 = arith.constant 4 : index
    %c0_116 = arith.constant 0 : index
    %167 = vector.load %arg25[%c4_115, %c0_116] : memref<16x10xf32, #tpu.memory_space<vmem>>, vector<4x10xf32>
    tpu.vector_store %arg25[%c4_115, %c0_116], %166 {strides = array<i32>} : memref<16x10xf32, #tpu.memory_space<vmem>>, vector<4x10xf32>,
    %168 = vector.extract_strided_slice %163 {offsets = [0, 20], sizes = [4, 10], strides = [1, 1]} : vector<4x40xf32> to vector<4x10xf32>
    %c8_117 = arith.constant 8 : index
    %c0_118 = arith.constant 0 : index
    %169 = vector.load %arg25[%c8_117, %c0_118] : memref<16x10xf32, #tpu.memory_space<vmem>>, vector<4x10xf32>
    tpu.vector_store %arg25[%c8_117, %c0_118], %168 {strides = array<i32>} : memref<16x10xf32, #tpu.memory_space<vmem>>, vector<4x10xf32>,
    %170 = vector.extract_strided_slice %163 {offsets = [0, 30], sizes = [4, 10], strides = [1, 1]} : vector<4x40xf32> to vector<4x10xf32>
    %c12_119 = arith.constant 12 : index
    %c0_120 = arith.constant 0 : index
    %171 = vector.load %arg25[%c12_119, %c0_120] : memref<16x10xf32, #tpu.memory_space<vmem>>, vector<4x10xf32>
    tpu.vector_store %arg25[%c12_119, %c0_120], %170 {strides = array<i32>} : memref<16x10xf32, #tpu.memory_space<vmem>>, vector<4x10xf32>,
    %c0_121 = arith.constant 0 : index
    %c0_122 = arith.constant 0 : index
    %172 = vector.load %arg25[%c0_121, %c0_122] : memref<16x10xf32, #tpu.memory_space<vmem>>, vector<16x10xf32>
    %cst_123 = arith.constant 1.000000e+02 : f32
    %173 = vector.broadcast %cst_123 : f32 to vector<16x10xf32>
    %174 = arith.mulf %172, %173 : vector<16x10xf32>
    %cst_124 = arith.constant dense<0xFF800000> : vector<16xf32>
    %175 = vector.multi_reduction <maximumf>, %174, %cst_124 [1] : vector<16x10xf32> to vector<16xf32>
    %176 = vector.shape_cast %175 : vector<16xf32> to vector<16x1xf32>
    %177 = vector.broadcast %176 : vector<16x1xf32> to vector<16x10xf32>
    %178 = arith.subf %174, %177 : vector<16x10xf32>
    %179 = math.exp %178 : vector<16x10xf32>
    %cst_125 = arith.constant dense<0.000000e+00> : vector<16xf32>
    %180 = vector.multi_reduction <add>, %179, %cst_125 [1] : vector<16x10xf32> to vector<16xf32>
    %181 = vector.shape_cast %180 : vector<16xf32> to vector<16x1xf32>
    %182 = tpu.reciprocal %181 {approx = true} : vector<16x1xf32> -> vector<16x1xf32>
    %183 = vector.broadcast %182 : vector<16x1xf32> to vector<16x10xf32>
    %184 = arith.mulf %179, %183 : vector<16x10xf32>
    %cst_126 = arith.constant dense<0.000000e+00> : vector<16x10xf32>
    %185 = tpu.matmul %184, %51, %cst_126 {dimension_numbers = #tpu.dot_dimension_numbers<[1], [0], [0], [1], [0, 0, 1, 1], [], []>} : vector<16x10xf32>, vector<10x10xf32>, vector<16x10xf32> -> vector<16x10xf32>
    %186 = arith.mulf %172, %185 : vector<16x10xf32>
    %cst_127 = arith.constant dense<0.000000e+00> : vector<16xf32>
    %187 = vector.multi_reduction <add>, %186, %cst_127 [1] : vector<16x10xf32> to vector<16xf32>
    %188 = vector.shape_cast %187 : vector<16xf32> to vector<16x1xf32>
    %cst_128 = arith.constant 1.000000e+00 : f32
    %189 = vector.broadcast %cst_128 : f32 to vector<16x1xf32>
    %190 = arith.mulf %189, %69 : vector<16x1xf32>
    %cst_129 = arith.constant 5.000000e-01 : f32
    %191 = vector.broadcast %cst_129 : f32 to vector<16x1xf32>
    %192 = arith.mulf %191, %137 : vector<16x1xf32>
    %193 = arith.addf %190, %192 : vector<16x1xf32>
    %cst_130 = arith.constant 1.000000e+00 : f32
    %194 = vector.broadcast %cst_130 : f32 to vector<16x1xf32>
    %195 = arith.mulf %194, %86 : vector<16x1xf32>
    %cst_131 = arith.constant 5.000000e-01 : f32
    %196 = vector.broadcast %cst_131 : f32 to vector<16x1xf32>
    %197 = arith.mulf %196, %188 : vector<16x1xf32>
    %198 = arith.addf %195, %197 : vector<16x1xf32>
    %c0_132 = arith.constant 0 : index
    %c0_133 = arith.constant 0 : index
    %199 = vector.load %arg15[%c0_132, %c0_133] : memref<16x4xf32, #tpu.memory_space<vmem>>, vector<16x4xf32>
    %c0_134 = arith.constant 0 : index
    %c0_135 = arith.constant 0 : index
    %200 = vector.load %arg16[%c0_134, %c0_135] : memref<16x4xf32, #tpu.memory_space<vmem>>, vector<16x4xf32>
    %201 = vector.broadcast %193 : vector<16x1xf32> to vector<16x4xf32>
    %202 = arith.mulf %199, %201 : vector<16x4xf32>
    %cst_136 = arith.constant dense<0.000000e+00> : vector<4x4xf32>
    %203 = tpu.matmul %202, %200, %cst_136 {dimension_numbers = #tpu.dot_dimension_numbers<[0], [0], [1], [1], [0, 1, 1, 1], [], []>} : vector<16x4xf32>, vector<16x4xf32>, vector<4x4xf32> -> vector<4x4xf32>
    %204 = vector.broadcast %198 : vector<16x1xf32> to vector<16x4xf32>
    %205 = arith.mulf %200, %204 : vector<16x4xf32>
    %cst_137 = arith.constant dense<0.000000e+00> : vector<4x4xf32>
    %206 = tpu.matmul %205, %199, %cst_137 {dimension_numbers = #tpu.dot_dimension_numbers<[0], [0], [1], [1], [0, 1, 1, 1], [], []>} : vector<16x4xf32>, vector<16x4xf32>, vector<4x4xf32> -> vector<4x4xf32>
    %cst_138 = arith.constant 1.000000e+00 : f32
    %207 = vector.broadcast %cst_138 : f32 to vector<4x4xf32>
    %208 = arith.mulf %207, %9 : vector<4x4xf32>
    %209 = arith.addf %208, %203 : vector<4x4xf32>
    %210 = arith.addf %209, %206 : vector<4x4xf32>
    %cst_139 = arith.constant 2.500000e-01 : f32
    %211 = vector.broadcast %cst_139 : f32 to vector<4x4xf32>
    %212 = arith.mulf %210, %211 : vector<4x4xf32>
    %213 = tpu.iota {dimensions = array<i32: 0>} : vector<4x4xi32>
    %214 = tpu.iota {dimensions = array<i32: 1>} : vector<4x4xi32>
    %215 = arith.cmpi eq, %213, %214 : vector<4x4xi32>
    %216 = arith.extui %215 : vector<4x4xi1> to vector<4x4xi32>
    %217 = arith.sitofp %216 : vector<4x4xi32> to vector<4x4xf32>
    %218 = arith.mulf %212, %217 : vector<4x4xf32>
    %219 = vector.shape_cast %218 : vector<4x4xf32> to vector<1x4x4xf32>
    %cst_140 = arith.constant dense<0.000000e+00> : vector<1xf32>
    %220 = vector.multi_reduction <add>, %219, %cst_140 [1, 2] : vector<1x4x4xf32> to vector<1xf32>
    %221 = vector.shape_cast %220 : vector<1xf32> to vector<1x1x1xf32>
    %222 = vector.extract %221[0, 0, 0] : f32 from vector<1x1x1xf32>
    %cst_141 = arith.constant dense<0xFF800000> : vector<4xf32>
    %223 = vector.multi_reduction <maximumf>, %212, %cst_141 [1] : vector<4x4xf32> to vector<4xf32>
    %224 = vector.shape_cast %223 : vector<4xf32> to vector<4x1xf32>
    %225 = vector.broadcast %224 : vector<4x1xf32> to vector<4x4xf32>
    %226 = arith.subf %212, %225 : vector<4x4xf32>
    %227 = math.exp %226 : vector<4x4xf32>
    %cst_142 = arith.constant dense<0.000000e+00> : vector<4xf32>
    %228 = vector.multi_reduction <add>, %227, %cst_142 [1] : vector<4x4xf32> to vector<4xf32>
    %229 = vector.shape_cast %228 : vector<4xf32> to vector<4x1xf32>
    %230 = math.log %229 : vector<4x1xf32>
    %231 = arith.addf %230, %224 : vector<4x1xf32>
    %232 = vector.shape_cast %231 : vector<4x1xf32> to vector<1x4x1xf32>
    %cst_143 = arith.constant dense<0.000000e+00> : vector<1xf32>
    %233 = vector.multi_reduction <add>, %232, %cst_143 [1, 2] : vector<1x4x1xf32> to vector<1xf32>
    %234 = vector.shape_cast %233 : vector<1xf32> to vector<1x1x1xf32>
    %235 = vector.extract %234[0, 0, 0] : f32 from vector<1x1x1xf32>
    %cst_144 = arith.constant dense<0xFF800000> : vector<4xf32>
    %236 = vector.multi_reduction <maximumf>, %212, %cst_144 [0] : vector<4x4xf32> to vector<4xf32>
    %237 = vector.shape_cast %236 : vector<4xf32> to vector<1x4xf32>
    %238 = vector.broadcast %237 : vector<1x4xf32> to vector<4x4xf32>
    %239 = arith.subf %212, %238 : vector<4x4xf32>
    %240 = math.exp %239 : vector<4x4xf32>
    %cst_145 = arith.constant dense<0.000000e+00> : vector<4xf32>
    %241 = vector.multi_reduction <add>, %240, %cst_145 [0] : vector<4x4xf32> to vector<4xf32>
    %242 = vector.shape_cast %241 : vector<4xf32> to vector<1x4xf32>
    %243 = math.log %242 : vector<1x4xf32>
    %244 = arith.addf %243, %237 : vector<1x4xf32>
    %245 = vector.shape_cast %244 : vector<1x4xf32> to vector<1x1x4xf32>
    %cst_146 = arith.constant dense<0.000000e+00> : vector<1xf32>
    %246 = vector.multi_reduction <add>, %245, %cst_146 [1, 2] : vector<1x1x4xf32> to vector<1xf32>
    %247 = vector.shape_cast %246 : vector<1xf32> to vector<1x1x1xf32>
    %248 = vector.extract %247[0, 0, 0] : f32 from vector<1x1x1xf32>
    %249 = arith.subf %235, %222 : f32
    %250 = arith.subf %248, %222 : f32
    %251 = arith.addf %249, %250 : f32
    %cst_147 = arith.constant 5.000000e-01 : f32
    %252 = arith.mulf %cst_147, %251 : f32
    %cst_148 = arith.constant 4.000000e+00 : f32
    %253 = arith.divf %252, %cst_148 : f32
    %c0_149 = arith.constant 0 : index
    %254 = memref.load %arg17[%c0_149] : memref<1xf32, #tpu.memory_space<smem>>
    memref.store %253, %arg17[%c0_149] : memref<1xf32, #tpu.memory_space<smem>>
    return
  }
  func.func @transform_0(%arg0: i32) -> (i32, i32) {
    %c0_i32 = arith.constant 0 : i32
    %c0_i32_0 = arith.constant 0 : i32
    %c0_i32_1 = arith.constant 0 : i32
    return %c0_i32, %c0_i32_0 : i32, i32
  }
  func.func @transform_1(%arg0: i32) -> (i32, i32) {
    %c0_i32 = arith.constant 0 : i32
    %c0_i32_0 = arith.constant 0 : i32
    %c0_i32_1 = arith.constant 0 : i32
    return %c0_i32, %c0_i32_0 : i32, i32
  }
  func.func @transform_2(%arg0: i32) -> (i32, i32) {
    %c0_i32 = arith.constant 0 : i32
    %c0_i32_0 = arith.constant 0 : i32
    %c0_i32_1 = arith.constant 0 : i32
    return %c0_i32, %c0_i32_0 : i32, i32
  }
  func.func @transform_3(%arg0: i32) -> (i32, i32) {
    %c0_i32 = arith.constant 0 : i32
    %c0_i32_0 = arith.constant 0 : i32
    %c0_i32_1 = arith.constant 0 : i32
    return %c0_i32, %c0_i32_0 : i32, i32
  }
  func.func @transform_4(%arg0: i32) -> (i32, i32) {
    %c0_i32 = arith.constant 0 : i32
    %c0_i32_0 = arith.constant 0 : i32
    %c0_i32_1 = arith.constant 0 : i32
    return %c0_i32, %c0_i32_0 : i32, i32
  }
  func.func @transform_5(%arg0: i32) -> (i32, i32) {
    %c0_i32 = arith.constant 0 : i32
    %c0_i32_0 = arith.constant 0 : i32
    %c0_i32_1 = arith.constant 0 : i32
    return %c0_i32, %c0_i32_0 : i32, i32
  }
  func.func @transform_6(%arg0: i32) -> (i32, i32) {
    %c0_i32 = arith.constant 0 : i32
    %c0_i32_0 = arith.constant 0 : i32
    %c0_i32_1 = arith.constant 0 : i32
    return %c0_i32, %c0_i32_0 : i32, i32
  }
  func.func @transform_7(%arg0: i32) -> (i32, i32) {
    %c0_i32 = arith.constant 0 : i32
    %c0_i32_0 = arith.constant 0 : i32
    %c0_i32_1 = arith.constant 0 : i32
    return %c0_i32, %c0_i32_0 : i32, i32
  }
  func.func @transform_8(%arg0: i32) -> (i32, i32) {
    %c0_i32 = arith.constant 0 : i32
    %c0_i32_0 = arith.constant 0 : i32
    %c0_i32_1 = arith.constant 0 : i32
    return %c0_i32, %c0_i32_0 : i32, i32
  }
  func.func @transform_9(%arg0: i32) -> (i32, i32) {
    %c0_i32 = arith.constant 0 : i32
    %c0_i32_0 = arith.constant 0 : i32
    %c0_i32_1 = arith.constant 0 : i32
    return %c0_i32, %c0_i32_0 : i32, i32
  }
  func.func @transform_10(%arg0: i32) -> (i32, i32) {
    %c0_i32 = arith.constant 0 : i32
    %c0_i32_0 = arith.constant 0 : i32
    %c0_i32_1 = arith.constant 0 : i32
    return %c0_i32, %c0_i32_0 : i32, i32
  }
  func.func @transform_11(%arg0: i32) -> (i32, i32) {
    %c0_i32 = arith.constant 0 : i32
    %c0_i32_0 = arith.constant 0 : i32
    %c0_i32_1 = arith.constant 0 : i32
    return %c0_i32, %c0_i32_0 : i32, i32
  }
  func.func @transform_12(%arg0: i32) -> (i32, i32) {
    %c0_i32 = arith.constant 0 : i32
    %c0_i32_0 = arith.constant 0 : i32
    %c0_i32_1 = arith.constant 0 : i32
    return %c0_i32, %c0_i32_0 : i32, i32
  }
  func.func @transform_13(%arg0: i32) -> (i32, i32) {
    %c0_i32 = arith.constant 0 : i32
    %c0_i32_0 = arith.constant 0 : i32
    %c0_i32_1 = arith.constant 0 : i32
    return %c0_i32, %c0_i32_0 : i32, i32
  }
  func.func @transform_14(%arg0: i32) -> (i32, i32) {
    %c0_i32 = arith.constant 0 : i32
    %c0_i32_0 = arith.constant 0 : i32
    %c0_i32_1 = arith.constant 0 : i32
    return %c0_i32, %c0_i32_0 : i32, i32
  }
  func.func @transform_15(%arg0: i32) -> (i32, i32) {
    %c0_i32 = arith.constant 0 : i32
    %c0_i32_0 = arith.constant 0 : i32
    %c0_i32_1 = arith.constant 0 : i32
    return %c0_i32, %c0_i32_0 : i32, i32
  }
  func.func @transform_16(%arg0: i32) -> i32 {
    %c0_i32 = arith.constant 0 : i32
    %c0_i32_0 = arith.constant 0 : i32
    return %c0_i32 : i32
  }
}

</mosaic_0001>

<bundles_post_ra>
// kernel: tpu_custom_call.1
= control target key start
LH: loop header
LB: loop body
LE: loop exit
PB: predicated region body
PF: predicated region fallthrough
CT: control target
= control target key end

     0   :  { %s15186_s0 = inlined_call_operand.hbm [shape: bf16[4,768], index: 0, kind: input, shape index: {}]   ;;  %s15187_s1 = inlined_call_operand.hbm [shape: bf16[4,768], index: 1, kind: input, shape index: {}]   ;;  %s15188_s2 = inlined_call_operand.hbm [shape: bf16[48,768], index: 2, kind: input, shape index: {}]   ;;  %s15189_s3 = inlined_call_operand.hbm [shape: bf16[40,768], index: 3, kind: input, shape index: {}]   ;;  %s15190_s4 = inlined_call_operand.hbm [shape: bf16[768,768], index: 4, kind: input, shape index: {}]   ;;  %s15191_s5 = inlined_call_operand.hbm [shape: bf16[768,768], index: 5, kind: input, shape index: {}]   ;;  %s15192_s6 = inlined_call_operand.hbm [shape: f32[12,12], index: 6, kind: input, shape index: {}]   ;;  %s15193_s7 = inlined_call_operand.hbm [shape: f32[10,10], index: 7, kind: input, shape index: {}]   ;;  %s15194_s8 = inlined_call_operand.hbm [shape: f32[10,10], index: 8, kind: input, shape index: {}]   ;;  %s15195_s9 = inlined_call_operand.hbm [shape: f32[12,12], index: 9, kind: input, shape index: {}]   ;;  %s15196_s10 = inlined_call_operand.hbm [shape: f32[10,10], index: 10, kind: input, shape index: {}]   ;;  %s15197_s11 = inlined_call_operand.hbm [shape: f32[12,12], index: 11, kind: input, shape index: {}]   ;;  %s15198_s12 = inlined_call_operand.hbm [shape: f32[4,40], index: 12, kind: input, shape index: {}]   ;;  %s15199_s13 = inlined_call_operand.hbm [shape: f32[4,48], index: 13, kind: input, shape index: {}]   ;;  %s15200_s14 = inlined_call_operand.vmem [shape: f32[16,4], index: 14, kind: input, shape index: {}]   ;;  %s15201_s15 = inlined_call_operand.vmem [shape: f32[16,4], index: 15, kind: input, shape index: {}]   ;;  %s15202_s16 = inlined_call_operand.hbm [shape: f32[1], index: 16, kind: output, shape index: {}]  }
   0x1   :  { %15312 = sst [smem:[#allocation130_spill]] %s15186_s0 }
   0x2   :  { %21 = vsyncpa [#allocation11], 0 }
   0x3   :  { %22 = vsyncpa [#allocation14], 0 }
   0x4   :  { %23 = vsyncpa [#allocation17], 0 }
   0x5   :  { %24 = vsyncpa [#allocation20], 0 }
   0x6   :  { %25 = vsyncpa [#allocation23], 0 }
   0x7   :  { %26 = vsyncpa [#allocation26], 0 }
   0x8   :  { %27 = vsyncpa [#allocation29], 0 }
   0x9   :  { %28 = vsyncpa [#allocation32], 0 }
   0xa   :  { %29 = vsyncpa [#allocation12], 0  ;;  %s13074_s21 = smov [#allocation13]   ;;  %s12738_s25 = scalar_lea.hbm %s15187_s1, 192 }
   0xb   :  { %s46_s22 = sshll.u32 %s13074_s21, 4  ;;  %p12739_p0 = scmp.ne.s32.totalorder %s15187_s1, %s12738_s25  ;;  %s47_s22 = int_to_ptr.vmem [resolvable:$true] %s46_s22 }
   0xc   :  { %p12742_p1 = scmp.lt.u32.totalorder %s12738_s25, %s15187_s1 }
   0xe   :  { %p12744_p2 = pnand %p12742_p1, %p12739_p0 }
  0x10   :  { %12747 = shalt.err (!%p12744_p2)
}
  0x11   :  { %s12748_s30 = scalar_lea.vmem %s47_s22, 192  ;;  %p12753_p4 = scmp.lt.s32.totalorder %s47_s22, %s47_s22 }
  0x12   :  { %p12749_p3 = scmp.ne.s32.totalorder %s47_s22, %s12748_s30  ;;  %p12754_p5 = scmp.lt.s32.totalorder %s12748_s30, %s12748_s30 }
  0x14   :  { %p12755_p6 = por %p12754_p5, %p12753_p4 }
  0x16   :  { %p12756_p7 = pnand %p12755_p6, %p12749_p3 }
  0x18   :  { %12759 = shalt.err (!%p12756_p7)
}
  0x19   :  { %49 = dma.hbm_to_vmem [thread:$0]  %s15187_s1, 192, %s47_s22, [#allocation14]  }
  0x1a   :  { %s13075_s18 = smov [#allocation16]   ;;  %s13076_s20 = smov [#allocation19]  }
  0x1b   :  { %s67_s19 = sshll.u32 %s13075_s18, 4  ;;  %s91_s21 = sshll.u32 %s13076_s20, 4  ;;  %s68_s19 = int_to_ptr.vmem [resolvable:$true] %s67_s19  ;;  %s92_s21 = int_to_ptr.vmem [resolvable:$true] %s91_s21 }
  0x1c   :  { %s12760_s25 = scalar_lea.hbm %s15189_s3, 1920 }
  0x1d   :  { %p12761_p8 = scmp.ne.s32.totalorder %s15189_s3, %s12760_s25  ;;  %p12764_p9 = scmp.lt.u32.totalorder %s12760_s25, %s15189_s3 }
  0x1f   :  { %p12766_p10 = pnand %p12764_p9, %p12761_p8 }
  0x21   :  { %12769 = shalt.err (!%p12766_p10)
}
  0x22   :  { %s12770_s1 = scalar_lea.vmem %s68_s19, 1920  ;;  %p12775_p12 = scmp.lt.s32.totalorder %s68_s19, %s68_s19 }
  0x23   :  { %p12771_p11 = scmp.ne.s32.totalorder %s68_s19, %s12770_s1  ;;  %p12776_p13 = scmp.lt.s32.totalorder %s12770_s1, %s12770_s1 }
  0x25   :  { %p12777_p0 = por %p12776_p13, %p12775_p12 }
  0x27   :  { %p12778_p1 = pnand %p12777_p0, %p12771_p11 }
  0x29   :  { %12781 = shalt.err (!%p12778_p1)
}
  0x2a   :  { %s13077_s22 = smov 384   ;;  %s13078_s30 = smov 24  }
  0x2b   :  { %73 = dma.hbm_to_vmem [thread:$0]  %s15189_s3, 1920, %s68_s19, [#allocation17], %s13077_s22, %s13077_s22, %s13078_s30  }
  0x2c   :  { %s12782_s23 = scalar_lea.hbm %s15191_s5, 36864 }
  0x2d   :  { %p12783_p2 = scmp.ne.s32.totalorder %s15191_s5, %s12782_s23  ;;  %p12786_p3 = scmp.lt.u32.totalorder %s12782_s23, %s15191_s5 }
  0x2f   :  { %p12788_p4 = pnand %p12786_p3, %p12783_p2 }
  0x31   :  { %12791 = shalt.err (!%p12788_p4)
}
  0x32   :  { %s12792_s28 = scalar_lea.vmem %s92_s21, 36864  ;;  %p12797_p6 = scmp.lt.s32.totalorder %s92_s21, %s92_s21 }
  0x33   :  { %p12793_p5 = scmp.ne.s32.totalorder %s92_s21, %s12792_s28  ;;  %p12798_p7 = scmp.lt.s32.totalorder %s12792_s28, %s12792_s28 }
  0x35   :  { %p12799_p8 = por %p12798_p7, %p12797_p6 }
  0x37   :  { %p12800_p9 = pnand %p12799_p8, %p12793_p5 }
  0x39   :  { %12803 = shalt.err (!%p12800_p9)
}
  0x3a   :  { %97 = dma.hbm_to_vmem [thread:$0]  %s15191_s5, 36864, %s92_s21, [#allocation20], %s13077_s22, %s13077_s22, %s13078_s30  }
  0x3b   :  { %s13079_s29 = smov [#allocation22]   ;;  %s13080_s0 = smov [#allocation25]  }
  0x3c   :  { %s115_s1 = sshll.u32 %s13079_s29, 4  ;;  %s139_s17 = sshll.u32 %s13080_s0, 4  ;;  %s116_s1 = int_to_ptr.vmem [resolvable:$true] %s115_s1  ;;  %s140_s17 = int_to_ptr.vmem [resolvable:$true] %s139_s17 }
  0x3d   :  { %s12804_s23 = scalar_lea.hbm %s15193_s7, 256 }
  0x3e   :  { %p12805_p10 = scmp.ne.s32.totalorder %s15193_s7, %s12804_s23  ;;  %p12808_p11 = scmp.lt.u32.totalorder %s12804_s23, %s15193_s7 }
  0x40   :  { %p12810_p12 = pnand %p12808_p11, %p12805_p10 }
  0x42   :  { %12813 = shalt.err (!%p12810_p12)
}
  0x43   :  { %s12814_s5 = scalar_lea.vmem %s116_s1, 256  ;;  %p12819_p0 = scmp.lt.s32.totalorder %s116_s1, %s116_s1 }
  0x44   :  { %p12815_p13 = scmp.ne.s32.totalorder %s116_s1, %s12814_s5  ;;  %p12820_p1 = scmp.lt.s32.totalorder %s12814_s5, %s12814_s5 }
  0x46   :  { %p12821_p2 = por %p12820_p1, %p12819_p0 }
  0x48   :  { %p12822_p3 = pnand %p12821_p2, %p12815_p13 }
  0x4a   :  { %12825 = shalt.err (!%p12822_p3)
}
  0x4b   :  { %s13081_s21 = smov 128   ;;  %s13082_s28 = smov 8  }
  0x4c   :  { %121 = dma.hbm_to_vmem [thread:$0]  %s15193_s7, 256, %s116_s1, [#allocation23], %s13081_s21, %s13081_s21, %s13082_s28  }
  0x4d   :  { %s12826_s18 = scalar_lea.hbm %s15195_s9, 256 }
  0x4e   :  { %p12827_p4 = scmp.ne.s32.totalorder %s15195_s9, %s12826_s18  ;;  %p12830_p5 = scmp.lt.u32.totalorder %s12826_s18, %s15195_s9 }
  0x50   :  { %p12832_p6 = pnand %p12830_p5, %p12827_p4 }
  0x52   :  { %12835 = shalt.err (!%p12832_p6)
}
  0x53   :  { %s12836_s26 = scalar_lea.vmem %s140_s17, 256  ;;  %p12841_p8 = scmp.lt.s32.totalorder %s140_s17, %s140_s17 }
  0x54   :  { %p12837_p7 = scmp.ne.s32.totalorder %s140_s17, %s12836_s26  ;;  %p12842_p9 = scmp.lt.s32.totalorder %s12836_s26, %s12836_s26 }
  0x56   :  { %p12843_p10 = por %p12842_p9, %p12841_p8 }
  0x58   :  { %p12844_p11 = pnand %p12843_p10, %p12837_p7 }
  0x5a   :  { %12847 = shalt.err (!%p12844_p11)
}
  0x5b   :  { %145 = dma.hbm_to_vmem [thread:$0]  %s15195_s9, 256, %s140_s17, [#allocation26], %s13081_s21, %s13081_s21, %s13082_s28  }
  0x5c   :  { %s13083_s27 = smov [#allocation28]   ;;  %s13084_s3 = smov [#allocation10]  }
  0x5d   :  { %s163_s5 = sshll.u32 %s13083_s27, 4  ;;  %s36_s19 = sshll.u32 %s13084_s3, 4  ;;  %s164_s5 = int_to_ptr.vmem [resolvable:$true] %s163_s5  ;;  %s37_s19 = int_to_ptr.vmem [resolvable:$true] %s36_s19 }
  0x5e   :  { %s12848_s18 = scalar_lea.hbm %s15197_s11, 256 }
  0x5f   :  { %p12849_p12 = scmp.ne.s32.totalorder %s15197_s11, %s12848_s18  ;;  %p12852_p13 = scmp.lt.u32.totalorder %s12848_s18, %s15197_s11 }
  0x61   :  { %p12854_p0 = pnand %p12852_p13, %p12849_p12 }
  0x63   :  { %12857 = shalt.err (!%p12854_p0)
}
  0x64   :  { %s12858_s9 = scalar_lea.vmem %s164_s5, 256  ;;  %p12863_p2 = scmp.lt.s32.totalorder %s164_s5, %s164_s5 }
  0x65   :  { %p12859_p1 = scmp.ne.s32.totalorder %s164_s5, %s12858_s9  ;;  %p12864_p3 = scmp.lt.s32.totalorder %s12858_s9, %s12858_s9 }
  0x67   :  { %p12865_p4 = por %p12864_p3, %p12863_p2 }
  0x69   :  { %p12866_p5 = pnand %p12865_p4, %p12859_p1 }
  0x6b   :  { %12869 = shalt.err (!%p12866_p5)
}
  0x6c   :  { %169 = dma.hbm_to_vmem [thread:$0]  %s15197_s11, 256, %s164_s5, [#allocation29], %s13081_s21, %s13081_s21, %s13082_s28  }
  0x6d   :  { %s15313_s27 = sld [smem:[#allocation130_spill]] }
  0x73   :  { %s12870_s3 = scalar_lea.hbm %s15313_s27, 192 }
  0x74   :  { %p12871_p6 = scmp.ne.s32.totalorder %s15313_s27, %s12870_s3  ;;  %p12874_p7 = scmp.lt.u32.totalorder %s12870_s3, %s15313_s27 }
  0x76   :  { %p12876_p8 = pnand %p12874_p7, %p12871_p6 }
  0x78   :  { %12879 = shalt.err (!%p12876_p8)
}
  0x79   :  { %s12880_s23 = scalar_lea.vmem %s37_s19, 192  ;;  %p12885_p10 = scmp.lt.s32.totalorder %s37_s19, %s37_s19 }
  0x7a   :  { %p12881_p9 = scmp.ne.s32.totalorder %s37_s19, %s12880_s23  ;;  %p12886_p11 = scmp.lt.s32.totalorder %s12880_s23, %s12880_s23 }
  0x7c   :  { %p12887_p12 = por %p12886_p11, %p12885_p10 }
  0x7e   :  { %p12888_p13 = pnand %p12887_p12, %p12881_p9 }
  0x80   :  { %12891 = shalt.err (!%p12888_p13)
}
  0x81   :  { %39 = dma.hbm_to_vmem [thread:$0]  %s15313_s27, 192, %s37_s19, [#allocation11]  }
  0x82   :  { %s13085_s24 = smov [#allocation15]   ;;  %s13086_s9 = smov [#allocation18]  }
  0x83   :  { %s55_s25 = sshll.u32 %s13085_s24, 4  ;;  %s79_s17 = sshll.u32 %s13086_s9, 4  ;;  %s56_s25 = int_to_ptr.vmem [resolvable:$true] %s55_s25  ;;  %s80_s17 = int_to_ptr.vmem [resolvable:$true] %s79_s17 }
  0x84   :  { %s12892_s1 = scalar_lea.hbm %s15188_s2, 2304 }
  0x85   :  { %p12893_p0 = scmp.ne.s32.totalorder %s15188_s2, %s12892_s1  ;;  %p12896_p1 = scmp.lt.u32.totalorder %s12892_s1, %s15188_s2 }
  0x87   :  { %p12898_p2 = pnand %p12896_p1, %p12893_p0 }
  0x89   :  { %12901 = shalt.err (!%p12898_p2)
}
  0x8a   :  { %s12902_s19 = scalar_lea.vmem %s56_s25, 2304  ;;  %p12907_p4 = scmp.lt.s32.totalorder %s56_s25, %s56_s25 }
  0x8b   :  { %p12903_p3 = scmp.ne.s32.totalorder %s56_s25, %s12902_s19  ;;  %p12908_p5 = scmp.lt.s32.totalorder %s12902_s19, %s12902_s19 }
  0x8d   :  { %p12909_p6 = por %p12908_p5, %p12907_p4 }
  0x8f   :  { %p12910_p7 = pnand %p12909_p6, %p12903_p3 }
  0x91   :  { %12913 = shalt.err (!%p12910_p7)
}
  0x92   :  { %61 = dma.hbm_to_vmem [thread:$0]  %s15188_s2, 2304, %s56_s25, [#allocation14], %s13077_s22, %s13077_s22, %s13078_s30  }
  0x93   :  { %s12914_s5 = scalar_lea.hbm %s15190_s4, 36864 }
  0x94   :  { %p12915_p8 = scmp.ne.s32.totalorder %s15190_s4, %s12914_s5  ;;  %p12918_p9 = scmp.lt.u32.totalorder %s12914_s5, %s15190_s4 }
  0x96   :  { %p12920_p10 = pnand %p12918_p9, %p12915_p8 }
  0x98   :  { %12923 = shalt.err (!%p12920_p10)
}
  0x99   :  { %s12924_s1 = scalar_lea.vmem %s80_s17, 36864  ;;  %p12929_p12 = scmp.lt.s32.totalorder %s80_s17, %s80_s17 }
  0x9a   :  { %p12925_p11 = scmp.ne.s32.totalorder %s80_s17, %s12924_s1  ;;  %p12930_p13 = scmp.lt.s32.totalorder %s12924_s1, %s12924_s1 }
  0x9c   :  { %p12931_p0 = por %p12930_p13, %p12929_p12 }
  0x9e   :  { %p12932_p1 = pnand %p12931_p0, %p12925_p11 }
  0xa0   :  { %12935 = shalt.err (!%p12932_p1)
}
  0xa1   :  { %85 = dma.hbm_to_vmem [thread:$0]  %s15190_s4, 36864, %s80_s17, [#allocation17], %s13077_s22, %s13077_s22, %s13078_s30  }
  0xa2   :  { %s13087_s3 = smov [#allocation21]   ;;  %s13088_s0 = smov [#allocation24]  }
  0xa3   :  { %s103_s29 = sshll.u32 %s13087_s3, 4  ;;  %s127_s18 = sshll.u32 %s13088_s0, 4  ;;  %s104_s29 = int_to_ptr.vmem [resolvable:$true] %s103_s29  ;;  %s128_s18 = int_to_ptr.vmem [resolvable:$true] %s127_s18 }
  0xa4   :  { %s12936_s20 = scalar_lea.hbm %s15192_s6, 256 }
  0xa5   :  { %p12937_p2 = scmp.ne.s32.totalorder %s15192_s6, %s12936_s20  ;;  %p12940_p3 = scmp.lt.u32.totalorder %s12936_s20, %s15192_s6 }
  0xa7   :  { %p12942_p4 = pnand %p12940_p3, %p12937_p2 }
  0xa9   :  { %12945 = shalt.err (!%p12942_p4)
}
  0xaa   :  { %s12946_s4 = scalar_lea.vmem %s104_s29, 256  ;;  %p12951_p6 = scmp.lt.s32.totalorder %s104_s29, %s104_s29 }
  0xab   :  { %p12947_p5 = scmp.ne.s32.totalorder %s104_s29, %s12946_s4  ;;  %p12952_p7 = scmp.lt.s32.totalorder %s12946_s4, %s12946_s4 }
  0xad   :  { %p12953_p8 = por %p12952_p7, %p12951_p6 }
  0xaf   :  { %p12954_p9 = pnand %p12953_p8, %p12947_p5 }
  0xb1   :  { %12957 = shalt.err (!%p12954_p9)
}
  0xb2   :  { %109 = dma.hbm_to_vmem [thread:$0]  %s15192_s6, 256, %s104_s29, [#allocation20], %s13081_s21, %s13081_s21, %s13082_s28  }
  0xb3   :  { %s12958_s7 = scalar_lea.hbm %s15194_s8, 256 }
  0xb4   :  { %p12959_p10 = scmp.ne.s32.totalorder %s15194_s8, %s12958_s7  ;;  %p12962_p11 = scmp.lt.u32.totalorder %s12958_s7, %s15194_s8 }
  0xb6   :  { %p12964_p12 = pnand %p12962_p11, %p12959_p10 }
  0xb8   :  { %12967 = shalt.err (!%p12964_p12)
}
  0xb9   :  { %s12968_s0 = scalar_lea.vmem %s128_s18, 256  ;;  %p12973_p0 = scmp.lt.s32.totalorder %s128_s18, %s128_s18 }
  0xba   :  { %p12969_p13 = scmp.ne.s32.totalorder %s128_s18, %s12968_s0  ;;  %p12974_p1 = scmp.lt.s32.totalorder %s12968_s0, %s12968_s0 }
  0xbc   :  { %p12975_p2 = por %p12974_p1, %p12973_p0 }
  0xbe   :  { %p12976_p3 = pnand %p12975_p2, %p12969_p13 }
  0xc0   :  { %12979 = shalt.err (!%p12976_p3)
}
  0xc1   :  { %133 = dma.hbm_to_vmem [thread:$0]  %s15194_s8, 256, %s128_s18, [#allocation23], %s13081_s21, %s13081_s21, %s13082_s28  }
  0xc2   :  { %s13089_s19 = smov [#allocation27]   ;;  %s13090_s20 = smov [#allocation30]  }
  0xc3   :  { %s151_s27 = sshll.u32 %s13089_s19, 4  ;;  %s176_s23 = sshll.u32 %s13090_s20, 4  ;;  %s152_s27 = int_to_ptr.vmem [resolvable:$true] %s151_s27  ;;  %s177_s23 = int_to_ptr.vmem [resolvable:$true] %s176_s23 }
  0xc4   :  { %s12980_s24 = scalar_lea.hbm %s15196_s10, 256 }
  0xc5   :  { %p12981_p4 = scmp.ne.s32.totalorder %s15196_s10, %s12980_s24  ;;  %p12984_p5 = scmp.lt.u32.totalorder %s12980_s24, %s15196_s10 }
  0xc7   :  { %p12986_p6 = pnand %p12984_p5, %p12981_p4 }
  0xc9   :  { %12989 = shalt.err (!%p12986_p6)
}
  0xca   :  { %s12990_s8 = scalar_lea.vmem %s152_s27, 256  ;;  %p12995_p8 = scmp.lt.s32.totalorder %s152_s27, %s152_s27 }
  0xcb   :  { %p12991_p7 = scmp.ne.s32.totalorder %s152_s27, %s12990_s8  ;;  %p12996_p9 = scmp.lt.s32.totalorder %s12990_s8, %s12990_s8 }
  0xcd   :  { %p12997_p10 = por %p12996_p9, %p12995_p8 }
  0xcf   :  { %p12998_p11 = pnand %p12997_p10, %p12991_p7 }
  0xd1   :  { %13001 = shalt.err (!%p12998_p11)
}
  0xd2   :  { %157 = dma.hbm_to_vmem [thread:$0]  %s15196_s10, 256, %s152_s27, [#allocation26], %s13081_s21, %s13081_s21, %s13082_s28  }
  0xd3   :  { %s13002_s2 = scalar_lea.hbm %s15198_s12, 64 }
  0xd4   :  { %p13003_p12 = scmp.ne.s32.totalorder %s15198_s12, %s13002_s2  ;;  %p13006_p13 = scmp.lt.u32.totalorder %s13002_s2, %s15198_s12 }
  0xd6   :  { %p13008_p0 = pnand %p13006_p13, %p13003_p12 }
  0xd8   :  { %13011 = shalt.err (!%p13008_p0)
}
  0xd9   :  { %s13012_s29 = scalar_lea.vmem %s177_s23, 64  ;;  %p13017_p2 = scmp.lt.s32.totalorder %s177_s23, %s177_s23 }
  0xda   :  { %p13013_p1 = scmp.ne.s32.totalorder %s177_s23, %s13012_s29  ;;  %p13018_p3 = scmp.lt.s32.totalorder %s13012_s29, %s13012_s29 }
  0xdc   :  { %p13019_p4 = por %p13018_p3, %p13017_p2 }
  0xde   :  { %p13020_p5 = pnand %p13019_p4, %p13013_p1 }
  0xe0   :  { %13023 = shalt.err (!%p13020_p5)
}
  0xe1   :  { %179 = dma.hbm_to_vmem [thread:$0]  %s15198_s12, 64, %s177_s23, [#allocation29]  }
  0xe2   :  { %s13091_s28 = smov [#allocation31]   ;;  %s13024_s11 = scalar_lea.hbm %s15199_s13, 64 }
  0xe3   :  { %s186_s19 = sshll.u32 %s13091_s28, 4  ;;  %p13025_p6 = scmp.ne.s32.totalorder %s15199_s13, %s13024_s11  ;;  %s187_s19 = int_to_ptr.vmem [resolvable:$true] %s186_s19 }
  0xe4   :  { %p13028_p7 = scmp.lt.u32.totalorder %s13024_s11, %s15199_s13 }
  0xe6   :  { %p13030_p8 = pnand %p13028_p7, %p13025_p6 }
  0xe8   :  { %13033 = shalt.err (!%p13030_p8)
}
  0xe9   :  { %s13034_s17 = scalar_lea.vmem %s187_s19, 64  ;;  %p13039_p10 = scmp.lt.s32.totalorder %s187_s19, %s187_s19 }
  0xea   :  { %p13035_p9 = scmp.ne.s32.totalorder %s187_s19, %s13034_s17  ;;  %p13040_p11 = scmp.lt.s32.totalorder %s13034_s17, %s13034_s17 }
  0xec   :  { %p13041_p12 = por %p13040_p11, %p13039_p10 }
  0xee   :  { %p13042_p13 = pnand %p13041_p12, %p13035_p9 }
  0xf0   :  { %13045 = shalt.err (!%p13042_p13)
}
  0xf1   :  { %189 = dma.hbm_to_vmem [thread:$0]  %s15199_s13, 64, %s187_s19, [#allocation32]  }
  0xf2   :  { %13056 = dma.done.wait [#allocation11], 192  }
  0xf3   :  { %13057 = vsyncadd [#allocation11], 4294967104 }
  0xf4   :  { %13058 = dma.done.wait [#allocation14], 2496  }
  0xf5   :  { %13059 = vsyncadd [#allocation14], 4294964800 }
  0xf6   :  { %13060 = dma.done.wait [#allocation17], 38784  }
  0xf7   :  { %13061 = vsyncadd [#allocation17], 4294928512 }
  0xf8   :  { %13062 = dma.done.wait [#allocation20], 37120  }
  0xf9   :  { %13063 = vsyncadd [#allocation20], 4294930176 }
  0xfa   :  { %13064 = dma.done.wait [#allocation23], 512  }
  0xfb   :  { %13065 = vsyncadd [#allocation23], 4294966784 }
  0xfc   :  { %13066 = dma.done.wait [#allocation26], 512  }
  0xfd   :  { %13067 = vsyncadd [#allocation26], 4294966784 }
  0xfe   :  { %13068 = dma.done.wait [#allocation29], 320  }
  0xff   :  { %13069 = vsyncadd [#allocation29], 4294966976 }
 0x100   :  { %13070 = dma.done.wait [#allocation32], 64  }
 0x101   :  { %13071 = vsyncadd [#allocation32], 4294967232  ;;  %v15204_v0 = vlaneseq  ;;  %v13092_v1 = vmov 1983009808   ;;  %v11581_v6 = vld [vmem:[#allocation16 + $0x4] ss:$24 sps:$4 sm:$0xff]  }
 0x102   :  { %v2006_v2 = vunpack.c.l.s4 %v13092_v1  ;;  %v11583_v7 = vld [vmem:[#allocation16] ss:$24 sps:$4 sm:$0xff]   ;;  %v239_v8 = vld [vmem:[#allocation13] sm:$0xff]  ;;  %5095 = vmatprep.subr.bf16.mxu1 %v11581_v6  ;;  %v11585_v10 = vld [vmem:[#allocation16 + $0x34] ss:$24 sps:$4 sm:$0xff]   ;;  %vm7008_vm0 = vcmask 93184  }
 0x103   :  { %v13393_v3 = vshrl.u32 %v15204_v0, 7  ;;  %5096 = vmatpush1.bf16.xpose.msra.mxu1 %v11583_v7  ;;  %v11589_v11 = vld [vmem:[#allocation18 + $0x4] ss:$24 sps:$4 sm:$0xff]   ;;  %v271_v13 = vld [vmem:[#allocation16 + $0x60] sm:$0xff]  ;;  %v11590_v14 = vld [vmem:[#allocation16 + $0x30] ss:$24 sps:$4 sm:$0xff]   ;;  %v2004_v19 = vcombine.high %v239_v8, %v239_v8 }
 0x104   :  { %v2007_v4 = vunpack.c.0.s8 %v2006_v2  ;;  %5097 = vmatprep.subr.bf16.mxu1 %v11585_v10  ;;  %2067 = vmatprep.mubr.bf16.mxu0 %v11589_v11  ;;  %v11598_v15 = vld [vmem:[#allocation19 + $0x4] ss:$24 sps:$4 sm:$0xff]   ;;  %v13407_v16 = vcombine.high %v271_v13, %v271_v13  ;;  %v11587_v17 = vld [vmem:[#allocation18] ss:$24 sps:$4 sm:$0xff]   ;;  %v11592_v18 = vld [vmem:[#allocation18 + $0x34] ss:$24 sps:$4 sm:$0xff]   ;;  %v13410_v20 = vcombine.low %v271_v13, %v271_v13 }
 0x105   :  { %15314 = vst [vmem:[#allocation43_spill] sm:$0xff] %v13393_v3  ;;  %5127 = vmatprep.mubr.bf16.mxu1 %v11598_v15  ;;  %v11616_v21 = vld [vmem:[#allocation16 + $0xc] ss:$24 sps:$4 sm:$0xff]   ;;  %v11595_v22 = vld [vmem:[#allocation18 + $0x30] ss:$24 sps:$4 sm:$0xff]   ;;  %s13093_s13 = smov 116  }
 0x106   :  { %v13396_v5 = vsub.s32 %v2007_v4, %v13393_v3  ;;  %v11599_v24 = vld [vmem:[#allocation18 + $0x64] ss:$24 sps:$4 sm:$0xff]   ;;  %v11596_v26 = vld [vmem:[#allocation19] ss:$24 sps:$4 sm:$0xff]   ;;  %v11602_v27 = vld [vmem:[#allocation19 + $0x34] ss:$24 sps:$4 sm:$0xff]  }
 0x107   :  { %v11614_v28 = vld [vmem:[#allocation16 + $0x8] ss:$24 sps:$4 sm:$0xff]   ;;  %v11601_v29 = vld [vmem:[#allocation18 + $0x60] ss:$24 sps:$4 sm:$0xff]   ;;  %v11605_v30 = vld [vmem:[#allocation18 + $0x94] ss:$24 sps:$4 sm:$0xff]  }
 0x108   :  { %v13399_v9 = vrot.slane %v239_v8, %v13396_v5  ;;  %v13413_v23 = vrot.slane %v2004_v19, %v13396_v5  ;;  %v11604_v31 = vld [vmem:[#allocation19 + $0x30] ss:$24 sps:$4 sm:$0xff]   ;;  %v11608_v32 = vld [vmem:[#allocation19 + $0x64] ss:$24 sps:$4 sm:$0xff]   ;;  %v11610_v35 = vld [vmem:[#allocation19 + $0x60] ss:$24 sps:$4 sm:$0xff]  }
 0x109   :  { %v11607_v33 = vld [vmem:[#allocation18 + $0x90] ss:$24 sps:$4 sm:$0xff]   ;;  %v11611_v34 = vld [vmem:[#allocation18 + $0xc4] ss:$24 sps:$4 sm:$0xff]   ;;  %v11617_v36 = vld [vmem:[#allocation19 + $0x94] ss:$24 sps:$4 sm:$0xff]  }
 0x10a   :  { %v13403_v12 = vcombine.high %v13399_v9, %v13399_v9  ;;  %v13418_v25 = vcombine.high %v13413_v23, %v13413_v23  ;;  %v11613_v37 = vld [vmem:[#allocation18 + $0xc0] ss:$24 sps:$4 sm:$0xff]   ;;  %v11620_v38 = vld [vmem:[#allocation18 + $0xf4] ss:$24 sps:$4 sm:$0xff]   ;;  %v11619_v39 = vld [vmem:[#allocation19 + $0x90] ss:$24 sps:$4 sm:$0xff]  }
 0x10b   :  { %5098 = vmatpush1.bf16.xpose.msra.mxu1 %v11590_v14  ;;  %v11623_v40 = vld [vmem:[#allocation19 + $0xc4] ss:$24 sps:$4 sm:$0xff]   ;;  %v11622_v41 = vld [vmem:[#allocation18 + $0xf0] ss:$24 sps:$4 sm:$0xff]   ;;  %v11625_v43 = vld [vmem:[#allocation19 + $0xc0] ss:$24 sps:$4 sm:$0xff]  }
 0x10c   :  { %2035 = vmatprep.subr.bf16.mxu0 %v13403_v12  ;;  %5099 = vmatprep.subr.bf16.mxu1 %v13407_v16  ;;  %v11626_v42 = vld [vmem:[#allocation18 + $0x124] ss:$24 sps:$4 sm:$0xff]   ;;  %v11629_v44 = vld [vmem:[#allocation19 + $0xf4] ss:$24 sps:$4 sm:$0xff]   ;;  %v11628_v45 = vld [vmem:[#allocation18 + $0x120] ss:$24 sps:$4 sm:$0xff]  }
 0x10d   :  { %2036 = vmatpush1.bf16.xpose.msra.mxu0 %v13399_v9  ;;  %v11632_v46 = vld [vmem:[#allocation18 + $0x154] ss:$24 sps:$4 sm:$0xff]   ;;  %v11713_v47 = vld [vmem:[#allocation16 + $0x38] ss:$24 sps:$4 sm:$0xff]   ;;  %v11715_v48 = vld [vmem:[#allocation16 + $0x3c] ss:$24 sps:$4 sm:$0xff]  }
 0x10e   :  { %2452 = vmatprep.subr.bf16.mxu0 %v13418_v25  ;;  %v11631_v49 = vld [vmem:[#allocation19 + $0xf0] ss:$24 sps:$4 sm:$0xff]   ;;  %v11635_v50 = vld [vmem:[#allocation19 + $0x124] ss:$24 sps:$4 sm:$0xff]   ;;  %v11637_v53 = vld [vmem:[#allocation19 + $0x120] ss:$24 sps:$4 sm:$0xff]  }
 0x10f   :  { %v11634_v51 = vld [vmem:[#allocation18 + $0x150] ss:$24 sps:$4 sm:$0xff]   ;;  %v11638_v52 = vld [vmem:[#allocation18 + $0x184] ss:$24 sps:$4 sm:$0xff]   ;;  %v11641_v54 = vld [vmem:[#allocation19 + $0x154] ss:$24 sps:$4 sm:$0xff]  }
 0x110   :  { %v11640_v55 = vld [vmem:[#allocation18 + $0x180] ss:$24 sps:$4 sm:$0xff]   ;;  %v11644_v56 = vld [vmem:[#allocation18 + $0x1b4] ss:$24 sps:$4 sm:$0xff]   ;;  %v11643_v57 = vld [vmem:[#allocation19 + $0x150] ss:$24 sps:$4 sm:$0xff]  }
 0x111   :  { %v11647_v58 = vld [vmem:[#allocation19 + $0x184] ss:$24 sps:$4 sm:$0xff]   ;;  %v11646_v59 = vld [vmem:[#allocation18 + $0x1b0] ss:$24 sps:$4 sm:$0xff]   ;;  %v11649_v61 = vld [vmem:[#allocation19 + $0x180] ss:$24 sps:$4 sm:$0xff]  }
 0x112   :  { %v11650_v60 = vld [vmem:[#allocation18 + $0x1e4] ss:$24 sps:$4 sm:$0xff]   ;;  %v11653_v62 = vld [vmem:[#allocation19 + $0x1b4] ss:$24 sps:$4 sm:$0xff]   ;;  %v11652_v63 = vld [vmem:[#allocation18 + $0x1e0] ss:$24 sps:$4 sm:$0xff]  }
 0x113   :  { %5100 = vmatpush1.bf16.xpose.msra.mxu1 %v13410_v20  ;;  %v11656_v1 = vld [vmem:[#allocation18 + $0x214] ss:$24 sps:$4 sm:$0xff]   ;;  %v11655_v2 = vld [vmem:[#allocation19 + $0x1b0] ss:$24 sps:$4 sm:$0xff]   ;;  %v11659_v4 = vld [vmem:[#allocation19 + $0x1e4] ss:$24 sps:$4 sm:$0xff]  }
 0x114   :  { %2068 = vmatmul.mubr.bf16.vlgmr.msra.gmra.mrb[0].mxu0 %v11587_v17  ;;  %5512 = vmatprep.subr.bf16.mxu1 %v11616_v21  ;;  %v11658_v6 = vld [vmem:[#allocation18 + $0x210] ss:$24 sps:$4 sm:$0xff]   ;;  %v11662_v7 = vld [vmem:[#allocation18 + $0x244] ss:$24 sps:$4 sm:$0xff]   ;;  %v11661_v8 = vld [vmem:[#allocation19 + $0x1e0] ss:$24 sps:$4 sm:$0xff]  }
 0x115   :  { %2075 = vmatprep.mubr.bf16.mxu0 %v11592_v18  ;;  %2453 = vmatpush1.bf16.xpose.msra.mxu0 %v13413_v23  ;;  %v11665_v10 = vld [vmem:[#allocation19 + $0x214] ss:$24 sps:$4 sm:$0xff]   ;;  %v11664_v11 = vld [vmem:[#allocation18 + $0x240] ss:$24 sps:$4 sm:$0xff]   ;;  %v11667_v14 = vld [vmem:[#allocation19 + $0x210] ss:$24 sps:$4 sm:$0xff]  }
 0x116   :  { %v11668_v13 = vld [vmem:[#allocation18 + $0x274] ss:$24 sps:$4 sm:$0xff]   ;;  %v11671_v15 = vld [vmem:[#allocation19 + $0x244] ss:$24 sps:$4 sm:$0xff]   ;;  %v11670_v17 = vld [vmem:[#allocation18 + $0x270] ss:$24 sps:$4 sm:$0xff]  }
 0x117   :  { %v11674_v18 = vld [vmem:[#allocation18 + $0x2a4] ss:$24 sps:$4 sm:$0xff]   ;;  %v11673_v19 = vld [vmem:[#allocation19 + $0x240] ss:$24 sps:$4 sm:$0xff]   ;;  %v11677_v21 = vld [vmem:[#allocation19 + $0x274] ss:$24 sps:$4 sm:$0xff]  }
 0x118   :  { %v12394_v0 = vld [vmem:[#allocation19 + $0x640] ss:$24 sps:$4 sm:$0xff]   ;;  %s13094_s9 = smov 92   ;;  %s13095_s8 = smov 104   ;;  %vm7094_vm1 = vcmask 76800   ;;  %vm7096_vm2 = vcmask 80896  }
 0x119   :  { %s13096_s18 = smov 118   ;;  %s13097_s26 = smov 108   ;;  %vm7010_vm3 = vcmask 97280   ;;  %vm7238_vm4 = vcmask 1043456   ;;  %vm13099_vm5 = vmmov 1   ;;  %vm7357_vm7 = vcmask 1041408  }
 0x11a   :  { %5128 = vmatmul.mubr.bf16.vlgmr.msra.gmra.mrb[0].mxu1 %v11596_v26  ;;  %v11679_v26 = vld [vmem:[#allocation19 + $0x270] ss:$24 sps:$4 sm:$0xff]   ;;  %s13098_s7 = smov 98   ;;  %vm14313_vm6 = vmpackc.low %vm7238_vm4, %vm13099_vm5  ;;  %s13100_s1 = smov 10   ;;  %vm13104_vm9 = vmmov 0   ;;  %vm8046_vm10 = vcmask 162896  }
 0x11b   :  { %5135 = vmatprep.mubr.bf16.mxu1 %v11602_v27  ;;  %5513 = vmatpush1.bf16.xpose.msra.mxu1 %v11614_v28  ;;  %v11683_v27 = vld [vmem:[#allocation19 + $0x2a4] ss:$24 sps:$4 sm:$0xff]   ;;  %v11682_v28 = vld [vmem:[#allocation18 + $0x2d0] ss:$24 sps:$4 sm:$0xff]   ;;  %vm14387_vm8 = vmpackc.low %vm7357_vm7, %vm13099_vm5  ;;  %s13101_s2 = smov 20   ;;  %s13102_s25 = smov 30  }
 0x11c   :  { %2076 = vmatmul.mubr.bf16.gmra.mrb[4].mxu0 %v11595_v22  ;;  %5514 = vmatprep.subr.bf16.mxu1 %v11715_v48  ;;  %v11676_v22 = vld [vmem:[#allocation18 + $0x2a0] ss:$24 sps:$4 sm:$0xff]   ;;  %vm8077_vm11 = vcmask 244896   ;;  %vm8108_vm12 = vcmask 326896   ;;  %vm8128_vm13 = vcmask 326656   ;;  %s13106_s3 = smov 12  }
 0x11d   :  { %2083 = vmatprep.mubr.bf16.mxu0 %v11599_v24  ;;  %v11680_v24 = vld [vmem:[#allocation18 + $0x2d4] ss:$24 sps:$4 sm:$0xff]   ;;  %v11712_v48 = vld [vmem:[#allocation18 + $0x3c0] ss:$24 sps:$4 sm:$0xff]   ;;  %vm14670_vm14 = vmpackc.low %vm8128_vm13, %vm8128_vm13  ;;  %s13107_s0 = smov 36   ;;  %vm8865_vm15 = vcmask 195680  }
 0x11e   :  { %vm8917_vm4 = vcmask 392480   ;;  %vm8934_vm5 = vcmask 392192   ;;  %vm9565_vm7 = vcmask 24576   ;;  %s13046_s23 = scalar_lea.hbm %s15202_s16, 16 }
 0x11f   :  { %p13047_p0 = scmp.ne.s32.totalorder %s15202_s16, %s13046_s23  ;;  %p13050_p1 = scmp.lt.u32.totalorder %s13046_s23, %s15202_s16 }
 0x121   :  { %p13052_p2 = pnand %p13050_p1, %p13047_p0 }
 0x122   :  { %5136 = vmatmul.mubr.bf16.gmra.mrb[4].mxu1 %v11604_v31  ;;  %v11689_v31 = vld [vmem:[#allocation19 + $0x2d4] ss:$24 sps:$4 sm:$0xff]  }
 0x123   :  { %5143 = vmatprep.mubr.bf16.mxu1 %v11608_v32  ;;  %5515 = vmatpush1.bf16.xpose.msra.mxu1 %v11713_v47  ;;  %v11688_v32 = vld [vmem:[#allocation18 + $0x300] ss:$24 sps:$4 sm:$0xff]   ;;  %v11716_v47 = vld [vmem:[#allocation19 + $0x394] ss:$24 sps:$4 sm:$0xff]  }
 0x124   :  { %2084 = vmatmul.mubr.bf16.gmra.mrb[8].mxu0 %v11601_v29  ;;  %v11686_v29 = vld [vmem:[#allocation18 + $0x304] ss:$24 sps:$4 sm:$0xff]  }
 0x125   :  { %2091 = vmatprep.mubr.bf16.mxu0 %v11605_v30  ;;  %v11685_v30 = vld [vmem:[#allocation19 + $0x2a0] ss:$24 sps:$4 sm:$0xff]  }
 0x12a   :  { %5144 = vmatmul.mubr.bf16.gmra.mrb[8].mxu1 %v11610_v35  ;;  %v11695_v35 = vld [vmem:[#allocation19 + $0x304] ss:$24 sps:$4 sm:$0xff]  }
 0x12b   :  { %5151 = vmatprep.mubr.bf16.mxu1 %v11617_v36  ;;  %v11694_v36 = vld [vmem:[#allocation18 + $0x330] ss:$24 sps:$4 sm:$0xff]  }
 0x12c   :  { %2092 = vmatmul.mubr.bf16.gmra.mrb[12].mxu0 %v11607_v33  ;;  %v11692_v33 = vld [vmem:[#allocation18 + $0x334] ss:$24 sps:$4 sm:$0xff]  }
 0x12d   :  { %2099 = vmatprep.mubr.bf16.mxu0 %v11611_v34  ;;  %v11691_v34 = vld [vmem:[#allocation19 + $0x2d0] ss:$24 sps:$4 sm:$0xff]  }
 0x132   :  { %5152 = vmatmul.mubr.bf16.gmra.mrb[12].mxu1 %v11619_v39  ;;  %v11701_v39 = vld [vmem:[#allocation19 + $0x334] ss:$24 sps:$4 sm:$0xff]  }
 0x133   :  { %5159 = vmatprep.mubr.bf16.mxu1 %v11623_v40  ;;  %v11700_v40 = vld [vmem:[#allocation18 + $0x360] ss:$24 sps:$4 sm:$0xff]  }
 0x134   :  { %2100 = vmatmul.mubr.bf16.gmra.mrb[16].mxu0 %v11613_v37  ;;  %v11698_v37 = vld [vmem:[#allocation18 + $0x364] ss:$24 sps:$4 sm:$0xff]  }
 0x135   :  { %2107 = vmatprep.mubr.bf16.mxu0 %v11620_v38  ;;  %v11697_v38 = vld [vmem:[#allocation19 + $0x300] ss:$24 sps:$4 sm:$0xff]  }
 0x13a   :  { %5160 = vmatmul.mubr.bf16.gmra.mrb[16].mxu1 %v11625_v43  ;;  %v11707_v43 = vld [vmem:[#allocation19 + $0x364] ss:$24 sps:$4 sm:$0xff]  }
 0x13b   :  { %5167 = vmatprep.mubr.bf16.mxu1 %v11629_v44  ;;  %v11706_v44 = vld [vmem:[#allocation18 + $0x390] ss:$24 sps:$4 sm:$0xff]  }
 0x13c   :  { %2108 = vmatmul.mubr.bf16.gmra.mrb[20].mxu0 %v11622_v41  ;;  %v11704_v41 = vld [vmem:[#allocation18 + $0x394] ss:$24 sps:$4 sm:$0xff]  }
 0x13d   :  { %2115 = vmatprep.mubr.bf16.mxu0 %v11626_v42  ;;  %v11703_v42 = vld [vmem:[#allocation19 + $0x330] ss:$24 sps:$4 sm:$0xff]  }
 0x142   :  { %5168 = vmatmul.mubr.bf16.gmra.mrb[20].mxu1 %v11631_v49  ;;  %v11719_v49 = vld [vmem:[#allocation18 + $0x3f4] ss:$24 sps:$4 sm:$0xff]  }
 0x143   :  { %5175 = vmatprep.mubr.bf16.mxu1 %v11635_v50  ;;  %v11718_v50 = vld [vmem:[#allocation19 + $0x390] ss:$24 sps:$4 sm:$0xff]  }
 0x144   :  { %2116 = vmatmul.mubr.bf16.gmra.mrb[24].mxu0 %v11628_v45  ;;  %v11710_v45 = vld [vmem:[#allocation18 + $0x3c4] ss:$24 sps:$4 sm:$0xff]  }
 0x145   :  { %2123 = vmatprep.mubr.bf16.mxu0 %v11632_v46  ;;  %v11709_v46 = vld [vmem:[#allocation19 + $0x360] ss:$24 sps:$4 sm:$0xff]  }
 0x14a   :  { %5176 = vmatmul.mubr.bf16.gmra.mrb[24].mxu1 %v11637_v53 }
 0x14b   :  { %5183 = vmatprep.mubr.bf16.mxu1 %v11641_v54 }
 0x14c   :  { %2124 = vmatmul.mubr.bf16.gmra.mrb[28].mxu0 %v11634_v51  ;;  %v11722_v51 = vld [vmem:[#allocation19 + $0x3c4] ss:$24 sps:$4 sm:$0xff]  }
 0x14d   :  { %2131 = vmatprep.mubr.bf16.mxu0 %v11638_v52  ;;  %v272_v52 = vld [vmem:[#allocation16 + $0x68] sm:$0xff] }
 0x14e   :  { %v13422_v53 = vcombine.low %v272_v52, %v272_v52  ;;  %v13424_v54 = vcombine.high %v272_v52, %v272_v52  ;;  %v11799_v52 = vld [vmem:[#allocation18 + $0x660] ss:$24 sps:$4 sm:$0xff]  }
 0x150   :  { %5516 = vmatprep.subr.bf16.mxu1 %v13424_v54 }
 0x151   :  { %5517 = vmatpush1.bf16.xpose.msra.mxu1 %v13422_v53 }
 0x152   :  { %5184 = vmatmul.mubr.bf16.gmra.mrb[28].mxu1 %v11643_v57  ;;  %v11724_v57 = vld [vmem:[#allocation19 + $0x3c0] ss:$24 sps:$4 sm:$0xff]  }
 0x153   :  { %5191 = vmatprep.mubr.bf16.mxu1 %v11647_v58  ;;  %v11728_v58 = vld [vmem:[#allocation19 + $0x3f4] ss:$24 sps:$4 sm:$0xff]  }
 0x154   :  { %2132 = vmatmul.mubr.bf16.gmra.mrb[32].mxu0 %v11640_v55  ;;  %v11721_v55 = vld [vmem:[#allocation18 + $0x3f0] ss:$24 sps:$4 sm:$0xff]  }
 0x155   :  { %2139 = vmatprep.mubr.bf16.mxu0 %v11644_v56  ;;  %v11725_v56 = vld [vmem:[#allocation18 + $0x424] ss:$24 sps:$4 sm:$0xff]  }
 0x15a   :  { %5192 = vmatmul.mubr.bf16.gmra.mrb[32].mxu1 %v11649_v61  ;;  %v11730_v61 = vld [vmem:[#allocation19 + $0x3f0] ss:$24 sps:$4 sm:$0xff]  }
 0x15b   :  { %5199 = vmatprep.mubr.bf16.mxu1 %v11653_v62  ;;  %v11734_v62 = vld [vmem:[#allocation19 + $0x424] ss:$24 sps:$4 sm:$0xff]  }
 0x15c   :  { %2140 = vmatmul.mubr.bf16.gmra.mrb[36].mxu0 %v11646_v59  ;;  %v11727_v59 = vld [vmem:[#allocation18 + $0x420] ss:$24 sps:$4 sm:$0xff]  }
 0x15d   :  { %2147 = vmatprep.mubr.bf16.mxu0 %v11650_v60  ;;  %v11731_v60 = vld [vmem:[#allocation18 + $0x454] ss:$24 sps:$4 sm:$0xff]  }
 0x162   :  { %5200 = vmatmul.mubr.bf16.gmra.mrb[36].mxu1 %v11655_v2  ;;  %v11736_v2 = vld [vmem:[#allocation19 + $0x420] ss:$24 sps:$4 sm:$0xff]  }
 0x163   :  { %5207 = vmatprep.mubr.bf16.mxu1 %v11659_v4  ;;  %v11740_v4 = vld [vmem:[#allocation19 + $0x454] ss:$24 sps:$4 sm:$0xff]  }
 0x164   :  { %2148 = vmatmul.mubr.bf16.gmra.mrb[40].mxu0 %v11652_v63  ;;  %v11733_v63 = vld [vmem:[#allocation18 + $0x450] ss:$24 sps:$4 sm:$0xff]  }
 0x165   :  { %2155 = vmatprep.mubr.bf16.mxu0 %v11656_v1  ;;  %v11737_v1 = vld [vmem:[#allocation18 + $0x484] ss:$24 sps:$4 sm:$0xff]  }
 0x16a   :  { %5208 = vmatmul.mubr.bf16.gmra.mrb[40].mxu1 %v11661_v8  ;;  %v11742_v8 = vld [vmem:[#allocation19 + $0x450] ss:$24 sps:$4 sm:$0xff]  }
 0x16b   :  { %5215 = vmatprep.mubr.bf16.mxu1 %v11665_v10  ;;  %v11746_v10 = vld [vmem:[#allocation19 + $0x484] ss:$24 sps:$4 sm:$0xff]  }
 0x16c   :  { %2156 = vmatmul.mubr.bf16.gmra.mrb[44].mxu0 %v11658_v6  ;;  %v11739_v6 = vld [vmem:[#allocation18 + $0x480] ss:$24 sps:$4 sm:$0xff]  }
 0x16d   :  { %2163 = vmatprep.mubr.bf16.mxu0 %v11662_v7  ;;  %v11743_v7 = vld [vmem:[#allocation18 + $0x4b4] ss:$24 sps:$4 sm:$0xff]  }
 0x172   :  { %5216 = vmatmul.mubr.bf16.gmra.mrb[44].mxu1 %v11667_v14  ;;  %v11748_v14 = vld [vmem:[#allocation19 + $0x480] ss:$24 sps:$4 sm:$0xff]  }
 0x173   :  { %5223 = vmatprep.mubr.bf16.mxu1 %v11671_v15  ;;  %v11752_v15 = vld [vmem:[#allocation19 + $0x4b4] ss:$24 sps:$4 sm:$0xff]  }
 0x174   :  { %2164 = vmatmul.mubr.bf16.gmra.mrb[48].mxu0 %v11664_v11  ;;  %v11745_v11 = vld [vmem:[#allocation18 + $0x4b0] ss:$24 sps:$4 sm:$0xff]  }
 0x175   :  { %2171 = vmatprep.mubr.bf16.mxu0 %v11668_v13  ;;  %v11749_v13 = vld [vmem:[#allocation18 + $0x4e4] ss:$24 sps:$4 sm:$0xff]  }
 0x17a   :  { %5224 = vmatmul.mubr.bf16.gmra.mrb[48].mxu1 %v11673_v19  ;;  %v11754_v19 = vld [vmem:[#allocation19 + $0x4b0] ss:$24 sps:$4 sm:$0xff]  }
 0x17b   :  { %5231 = vmatprep.mubr.bf16.mxu1 %v11677_v21  ;;  %v11758_v21 = vld [vmem:[#allocation19 + $0x4e4] ss:$24 sps:$4 sm:$0xff]  }
 0x17c   :  { %2172 = vmatmul.mubr.bf16.gmra.mrb[52].mxu0 %v11670_v17  ;;  %v11751_v17 = vld [vmem:[#allocation18 + $0x4e0] ss:$24 sps:$4 sm:$0xff]  }
 0x17d   :  { %2179 = vmatprep.mubr.bf16.mxu0 %v11674_v18  ;;  %v11755_v18 = vld [vmem:[#allocation18 + $0x514] ss:$24 sps:$4 sm:$0xff]  }
 0x182   :  { %5232 = vmatmul.mubr.bf16.gmra.mrb[52].mxu1 %v11679_v26  ;;  %v11760_v26 = vld [vmem:[#allocation19 + $0x4e0] ss:$24 sps:$4 sm:$0xff]  }
 0x183   :  { %5239 = vmatprep.mubr.bf16.mxu1 %v11683_v27  ;;  %v11764_v27 = vld [vmem:[#allocation19 + $0x514] ss:$24 sps:$4 sm:$0xff]  }
 0x184   :  { %2180 = vmatmul.mubr.bf16.gmra.mrb[56].mxu0 %v11676_v22  ;;  %v11757_v22 = vld [vmem:[#allocation18 + $0x510] ss:$24 sps:$4 sm:$0xff]  }
 0x185   :  { %2187 = vmatprep.mubr.bf16.mxu0 %v11680_v24  ;;  %v11761_v24 = vld [vmem:[#allocation18 + $0x544] ss:$24 sps:$4 sm:$0xff]  }
 0x18a   :  { %5240 = vmatmul.mubr.bf16.gmra.mrb[56].mxu1 %v11685_v30  ;;  %v11766_v30 = vld [vmem:[#allocation19 + $0x510] ss:$24 sps:$4 sm:$0xff]  }
 0x18b   :  { %5247 = vmatprep.mubr.bf16.mxu1 %v11689_v31  ;;  %v11770_v31 = vld [vmem:[#allocation19 + $0x544] ss:$24 sps:$4 sm:$0xff]  }
 0x18c   :  { %2188 = vmatmul.mubr.bf16.gmra.mrb[60].mxu0 %v11682_v28  ;;  %v11763_v28 = vld [vmem:[#allocation18 + $0x540] ss:$24 sps:$4 sm:$0xff]  }
 0x18d   :  { %2195 = vmatprep.mubr.bf16.mxu0 %v11686_v29  ;;  %v11767_v29 = vld [vmem:[#allocation18 + $0x574] ss:$24 sps:$4 sm:$0xff]  }
 0x192   :  { %5248 = vmatmul.mubr.bf16.gmra.mrb[60].mxu1 %v11691_v34  ;;  %v11772_v34 = vld [vmem:[#allocation19 + $0x540] ss:$24 sps:$4 sm:$0xff]  }
 0x193   :  { %5255 = vmatprep.mubr.bf16.mxu1 %v11695_v35  ;;  %v11776_v35 = vld [vmem:[#allocation19 + $0x574] ss:$24 sps:$4 sm:$0xff]  }
 0x194   :  { %2196 = vmatmul.mubr.bf16.gmra.mrb[64].mxu0 %v11688_v32  ;;  %v11769_v32 = vld [vmem:[#allocation18 + $0x570] ss:$24 sps:$4 sm:$0xff]  }
 0x195   :  { %2203 = vmatprep.mubr.bf16.mxu0 %v11692_v33  ;;  %v11773_v33 = vld [vmem:[#allocation18 + $0x5a4] ss:$24 sps:$4 sm:$0xff]  }
 0x19a   :  { %5256 = vmatmul.mubr.bf16.gmra.mrb[64].mxu1 %v11697_v38  ;;  %v11778_v38 = vld [vmem:[#allocation19 + $0x570] ss:$24 sps:$4 sm:$0xff]  }
 0x19b   :  { %5263 = vmatprep.mubr.bf16.mxu1 %v11701_v39  ;;  %v11782_v39 = vld [vmem:[#allocation19 + $0x5a4] ss:$24 sps:$4 sm:$0xff]  }
 0x19c   :  { %2204 = vmatmul.mubr.bf16.gmra.mrb[68].mxu0 %v11694_v36  ;;  %v11775_v36 = vld [vmem:[#allocation18 + $0x5a0] ss:$24 sps:$4 sm:$0xff]  }
 0x19d   :  { %2211 = vmatprep.mubr.bf16.mxu0 %v11698_v37  ;;  %v11779_v37 = vld [vmem:[#allocation18 + $0x5d4] ss:$24 sps:$4 sm:$0xff]  }
 0x1a2   :  { %5264 = vmatmul.mubr.bf16.gmra.mrb[68].mxu1 %v11703_v42  ;;  %v11784_v42 = vld [vmem:[#allocation19 + $0x5a0] ss:$24 sps:$4 sm:$0xff]  }
 0x1a3   :  { %5271 = vmatprep.mubr.bf16.mxu1 %v11707_v43  ;;  %v11788_v43 = vld [vmem:[#allocation19 + $0x5d4] ss:$24 sps:$4 sm:$0xff]  }
 0x1a4   :  { %2212 = vmatmul.mubr.bf16.gmra.mrb[72].mxu0 %v11700_v40  ;;  %v11781_v40 = vld [vmem:[#allocation18 + $0x5d0] ss:$24 sps:$4 sm:$0xff]  }
 0x1a5   :  { %2219 = vmatprep.mubr.bf16.mxu0 %v11704_v41  ;;  %v11785_v41 = vld [vmem:[#allocation18 + $0x604] ss:$24 sps:$4 sm:$0xff]  }
 0x1aa   :  { %5272 = vmatmul.mubr.bf16.gmra.mrb[72].mxu1 %v11709_v46  ;;  %v11790_v46 = vld [vmem:[#allocation19 + $0x5d0] ss:$24 sps:$4 sm:$0xff]  }
 0x1ab   :  { %5279 = vmatprep.mubr.bf16.mxu1 %v11716_v47  ;;  %v11794_v47 = vld [vmem:[#allocation19 + $0x604] ss:$24 sps:$4 sm:$0xff]  }
 0x1ac   :  { %2220 = vmatmul.mubr.bf16.gmra.mrb[76].mxu0 %v11706_v44  ;;  %v11787_v44 = vld [vmem:[#allocation18 + $0x600] ss:$24 sps:$4 sm:$0xff]  }
 0x1ad   :  { %2227 = vmatprep.mubr.bf16.mxu0 %v11710_v45  ;;  %v11791_v45 = vld [vmem:[#allocation18 + $0x634] ss:$24 sps:$4 sm:$0xff]  }
 0x1b2   :  { %5280 = vmatmul.mubr.bf16.gmra.mrb[76].mxu1 %v11718_v50  ;;  %v11796_v50 = vld [vmem:[#allocation19 + $0x600] ss:$24 sps:$4 sm:$0xff]  }
 0x1b3   :  { %5287 = vmatprep.mubr.bf16.mxu1 %v11722_v51  ;;  %v11800_v51 = vld [vmem:[#allocation19 + $0x634] ss:$24 sps:$4 sm:$0xff]  }
 0x1b4   :  { %2228 = vmatmul.mubr.bf16.gmra.mrb[80].mxu0 %v11712_v48  ;;  %v11793_v48 = vld [vmem:[#allocation18 + $0x630] ss:$24 sps:$4 sm:$0xff]  }
 0x1b5   :  { %2235 = vmatprep.mubr.bf16.mxu0 %v11719_v49  ;;  %v11797_v49 = vld [vmem:[#allocation18 + $0x664] ss:$24 sps:$4 sm:$0xff]  }
 0x1ba   :  { %5288 = vmatmul.mubr.bf16.gmra.mrb[80].mxu1 %v11724_v57  ;;  %v11806_v57 = vld [vmem:[#allocation19 + $0x664] ss:$24 sps:$4 sm:$0xff]  }
 0x1bb   :  { %5295 = vmatprep.mubr.bf16.mxu1 %v11728_v58  ;;  %v11805_v58 = vld [vmem:[#allocation18 + $0x690] ss:$24 sps:$4 sm:$0xff]  }
 0x1bc   :  { %2236 = vmatmul.mubr.bf16.gmra.mrb[84].mxu0 %v11721_v55  ;;  %v11803_v55 = vld [vmem:[#allocation18 + $0x694] ss:$24 sps:$4 sm:$0xff]  }
 0x1bd   :  { %2243 = vmatprep.mubr.bf16.mxu0 %v11725_v56  ;;  %v11802_v56 = vld [vmem:[#allocation19 + $0x630] ss:$24 sps:$4 sm:$0xff]  }
 0x1c2   :  { %5296 = vmatmul.mubr.bf16.gmra.mrb[84].mxu1 %v11730_v61  ;;  %v11814_v61 = vld [vmem:[#allocation19 + $0x694] ss:$24 sps:$4 sm:$0xff]  }
 0x1c3   :  { %5303 = vmatprep.mubr.bf16.mxu1 %v11734_v62  ;;  %v11811_v62 = vld [vmem:[#allocation18 + $0x6c0] ss:$24 sps:$4 sm:$0xff]  }
 0x1c4   :  { %2244 = vmatmul.mubr.bf16.gmra.mrb[88].mxu0 %v11727_v59  ;;  %v11809_v59 = vld [vmem:[#allocation18 + $0x6c4] ss:$24 sps:$4 sm:$0xff]  }
 0x1c5   :  { %2251 = vmatprep.mubr.bf16.mxu0 %v11731_v60  ;;  %v11808_v60 = vld [vmem:[#allocation19 + $0x660] ss:$24 sps:$4 sm:$0xff]  }
 0x1ca   :  { %5304 = vmatmul.mubr.bf16.gmra.mrb[88].mxu1 %v11736_v2  ;;  %v11912_v2 = vld [vmem:[#allocation16 + $0x14] ss:$24 sps:$4 sm:$0xff]  }
 0x1cb   :  { %5311 = vmatprep.mubr.bf16.mxu1 %v11740_v4  ;;  %v11820_v4 = vld [vmem:[#allocation19 + $0x6c4] ss:$24 sps:$4 sm:$0xff]   ;;  %5929 = vmatprep.subr.bf16.mxu1 %v11912_v2 }
 0x1cc   :  { %2252 = vmatmul.mubr.bf16.gmra.mrb[92].mxu0 %v11733_v63  ;;  %v11817_v63 = vld [vmem:[#allocation18 + $0x6f4] ss:$24 sps:$4 sm:$0xff]  }
 0x1cd   :  { %2259 = vmatprep.mubr.bf16.mxu0 %v11737_v1  ;;  %v11816_v1 = vld [vmem:[#allocation19 + $0x690] ss:$24 sps:$4 sm:$0xff]  }
 0x1d2   :  { %5312 = vmatmul.mubr.bf16.gmra.mrb[92].mxu1 %v11742_v8  ;;  %v11822_v8 = vld [vmem:[#allocation19 + $0x6c0] ss:$24 sps:$4 sm:$0xff]  }
 0x1d3   :  { %5319 = vmatprep.mubr.bf16.mxu1 %v11746_v10  ;;  %v11826_v10 = vld [vmem:[#allocation19 + $0x6f4] ss:$24 sps:$4 sm:$0xff]  }
 0x1d4   :  { %2260 = vmatmul.mubr.bf16.gmra.mrb[96].mxu0 %v11739_v6  ;;  %v11819_v6 = vld [vmem:[#allocation18 + $0x6f0] ss:$24 sps:$4 sm:$0xff]  }
 0x1d5   :  { %2267 = vmatprep.mubr.bf16.mxu0 %v11743_v7  ;;  %v11823_v7 = vld [vmem:[#allocation18 + $0x724] ss:$24 sps:$4 sm:$0xff]  }
 0x1da   :  { %5320 = vmatmul.mubr.bf16.gmra.mrb[96].mxu1 %v11748_v14  ;;  %v11828_v14 = vld [vmem:[#allocation19 + $0x6f0] ss:$24 sps:$4 sm:$0xff]  }
 0x1db   :  { %5327 = vmatprep.mubr.bf16.mxu1 %v11752_v15  ;;  %v11832_v15 = vld [vmem:[#allocation19 + $0x724] ss:$24 sps:$4 sm:$0xff]  }
 0x1dc   :  { %2268 = vmatmul.mubr.bf16.gmra.mrb[100].mxu0 %v11745_v11  ;;  %v11825_v11 = vld [vmem:[#allocation18 + $0x720] ss:$24 sps:$4 sm:$0xff]  }
 0x1dd   :  { %2275 = vmatprep.mubr.bf16.mxu0 %v11749_v13  ;;  %v11829_v13 = vld [vmem:[#allocation18 + $0x754] ss:$24 sps:$4 sm:$0xff]  }
 0x1e2   :  { %5328 = vmatmul.mubr.bf16.gmra.mrb[100].mxu1 %v11754_v19  ;;  %v11834_v19 = vld [vmem:[#allocation19 + $0x720] ss:$24 sps:$4 sm:$0xff]  }
 0x1e3   :  { %5335 = vmatprep.mubr.bf16.mxu1 %v11758_v21  ;;  %v11838_v21 = vld [vmem:[#allocation19 + $0x754] ss:$24 sps:$4 sm:$0xff]  }
 0x1e4   :  { %2276 = vmatmul.mubr.bf16.gmra.mrb[104].mxu0 %v11751_v17  ;;  %v11831_v17 = vld [vmem:[#allocation18 + $0x750] ss:$24 sps:$4 sm:$0xff]  }
 0x1e5   :  { %2283 = vmatprep.mubr.bf16.mxu0 %v11755_v18  ;;  %v11835_v18 = vld [vmem:[#allocation18 + $0x784] ss:$24 sps:$4 sm:$0xff]  }
 0x1ea   :  { %5336 = vmatmul.mubr.bf16.gmra.mrb[104].mxu1 %v11760_v26  ;;  %v11840_v26 = vld [vmem:[#allocation19 + $0x750] ss:$24 sps:$4 sm:$0xff]  }
 0x1eb   :  { %5343 = vmatprep.mubr.bf16.mxu1 %v11764_v27  ;;  %v11844_v27 = vld [vmem:[#allocation19 + $0x784] ss:$24 sps:$4 sm:$0xff]  }
 0x1ec   :  { %2284 = vmatmul.mubr.bf16.gmra.mrb[108].mxu0 %v11757_v22  ;;  %v11837_v22 = vld [vmem:[#allocation18 + $0x780] ss:$24 sps:$4 sm:$0xff]  }
 0x1ed   :  { %2291 = vmatprep.mubr.bf16.mxu0 %v11761_v24  ;;  %v11841_v24 = vld [vmem:[#allocation18 + $0x7b4] ss:$24 sps:$4 sm:$0xff]  }
 0x1f2   :  { %5344 = vmatmul.mubr.bf16.gmra.mrb[108].mxu1 %v11766_v30  ;;  %v11846_v30 = vld [vmem:[#allocation19 + $0x780] ss:$24 sps:$4 sm:$0xff]  }
 0x1f3   :  { %5351 = vmatprep.mubr.bf16.mxu1 %v11770_v31  ;;  %v11850_v31 = vld [vmem:[#allocation19 + $0x7b4] ss:$24 sps:$4 sm:$0xff]  }
 0x1f4   :  { %2292 = vmatmul.mubr.bf16.gmra.mrb[112].mxu0 %v11763_v28  ;;  %v11843_v28 = vld [vmem:[#allocation18 + $0x7b0] ss:$24 sps:$4 sm:$0xff]  }
 0x1f5   :  { %2299 = vmatprep.mubr.bf16.mxu0 %v11767_v29  ;;  %v11847_v29 = vld [vmem:[#allocation18 + $0x7e4] ss:$24 sps:$4 sm:$0xff]  }
 0x1fa   :  { %5352 = vmatmul.mubr.bf16.gmra.mrb[112].mxu1 %v11772_v34  ;;  %v11852_v34 = vld [vmem:[#allocation19 + $0x7b0] ss:$24 sps:$4 sm:$0xff]  }
 0x1fb   :  { %5359 = vmatprep.mubr.bf16.mxu1 %v11776_v35  ;;  %v11856_v35 = vld [vmem:[#allocation19 + $0x7e4] ss:$24 sps:$4 sm:$0xff]  }
 0x1fc   :  { %2300 = vmatmul.mubr.bf16.gmra.mrb[116].mxu0 %v11769_v32  ;;  %v11849_v32 = vld [vmem:[#allocation18 + $0x7e0] ss:$24 sps:$4 sm:$0xff]  }
 0x1fd   :  { %2307 = vmatprep.mubr.bf16.mxu0 %v11773_v33  ;;  %v11853_v33 = vld [vmem:[#allocation18 + $0x814] ss:$24 sps:$4 sm:$0xff]  }
 0x202   :  { %5360 = vmatmul.mubr.bf16.gmra.mrb[116].mxu1 %v11778_v38  ;;  %v11858_v38 = vld [vmem:[#allocation19 + $0x7e0] ss:$24 sps:$4 sm:$0xff]  }
 0x203   :  { %5367 = vmatprep.mubr.bf16.mxu1 %v11782_v39  ;;  %v11862_v39 = vld [vmem:[#allocation19 + $0x814] ss:$24 sps:$4 sm:$0xff]  }
 0x204   :  { %2308 = vmatmul.mubr.bf16.gmra.mrb[120].mxu0 %v11775_v36  ;;  %v11855_v36 = vld [vmem:[#allocation18 + $0x810] ss:$24 sps:$4 sm:$0xff]  }
 0x205   :  { %2315 = vmatprep.mubr.bf16.mxu0 %v11779_v37  ;;  %v11859_v37 = vld [vmem:[#allocation18 + $0x844] ss:$24 sps:$4 sm:$0xff]  }
 0x20a   :  { %5368 = vmatmul.mubr.bf16.gmra.mrb[120].mxu1 %v11784_v42  ;;  %v11864_v42 = vld [vmem:[#allocation19 + $0x810] ss:$24 sps:$4 sm:$0xff]  }
 0x20b   :  { %5375 = vmatprep.mubr.bf16.mxu1 %v11788_v43  ;;  %v11868_v43 = vld [vmem:[#allocation19 + $0x844] ss:$24 sps:$4 sm:$0xff]  }
 0x20c   :  { %2316 = vmatmul.mubr.bf16.gmra.mrb[124].mxu0 %v11781_v40  ;;  %v11861_v40 = vld [vmem:[#allocation18 + $0x840] ss:$24 sps:$4 sm:$0xff]  }
 0x20d   :  { %2323 = vmatprep.mubr.bf16.mxu0 %v11785_v41  ;;  %v11865_v41 = vld [vmem:[#allocation18 + $0x874] ss:$24 sps:$4 sm:$0xff]  }
 0x212   :  { %5376 = vmatmul.mubr.bf16.gmra.mrb[124].mxu1 %v11790_v46  ;;  %v11870_v46 = vld [vmem:[#allocation19 + $0x840] ss:$24 sps:$4 sm:$0xff]  }
 0x213   :  { %5383 = vmatprep.mubr.bf16.mxu1 %v11794_v47  ;;  %v11874_v47 = vld [vmem:[#allocation19 + $0x874] ss:$24 sps:$4 sm:$0xff]  }
 0x214   :  { %2324 = vmatmul.mubr.bf16.gmra.mrb[128].mxu0 %v11787_v44  ;;  %v11867_v44 = vld [vmem:[#allocation18 + $0x870] ss:$24 sps:$4 sm:$0xff]  }
 0x215   :  { %2331 = vmatprep.mubr.bf16.mxu0 %v11791_v45  ;;  %v11871_v45 = vld [vmem:[#allocation18 + $0x8a4] ss:$24 sps:$4 sm:$0xff]  }
 0x21a   :  { %5384 = vmatmul.mubr.bf16.gmra.mrb[128].mxu1 %v11796_v50  ;;  %v11876_v50 = vld [vmem:[#allocation19 + $0x870] ss:$24 sps:$4 sm:$0xff]  }
 0x21b   :  { %5391 = vmatprep.mubr.bf16.mxu1 %v11800_v51  ;;  %v11880_v51 = vld [vmem:[#allocation19 + $0x8a4] ss:$24 sps:$4 sm:$0xff]  }
 0x21c   :  { %2332 = vmatmul.mubr.bf16.gmra.mrb[132].mxu0 %v11793_v48  ;;  %v11873_v48 = vld [vmem:[#allocation18 + $0x8a0] ss:$24 sps:$4 sm:$0xff]  }
 0x21d   :  { %2339 = vmatprep.mubr.bf16.mxu0 %v11797_v49  ;;  %v11877_v49 = vld [vmem:[#allocation18 + $0x8d4] ss:$24 sps:$4 sm:$0xff]  }
 0x222   :  { %5392 = vmatmul.mubr.bf16.gmra.mrb[132].mxu1 %v11802_v56  ;;  %v11882_v56 = vld [vmem:[#allocation19 + $0x8a0] ss:$24 sps:$4 sm:$0xff]  }
 0x223   :  { %5399 = vmatprep.mubr.bf16.mxu1 %v11806_v57  ;;  %v11886_v57 = vld [vmem:[#allocation19 + $0x8d4] ss:$24 sps:$4 sm:$0xff]  }
 0x224   :  { %2340 = vmatmul.mubr.bf16.gmra.mrb[136].mxu0 %v11799_v52  ;;  %v11879_v52 = vld [vmem:[#allocation18 + $0x8d0] ss:$24 sps:$4 sm:$0xff]  }
 0x225   :  { %2347 = vmatprep.mubr.bf16.mxu0 %v11803_v55  ;;  %v11885_v55 = vld [vmem:[#allocation18 + $0xc] ss:$24 sps:$4 sm:$0xff]  }
 0x22a   :  { %5400 = vmatmul.mubr.bf16.gmra.mrb[136].mxu1 %v11808_v60  ;;  %v11888_v60 = vld [vmem:[#allocation19 + $0x8d0] ss:$24 sps:$4 sm:$0xff]  }
 0x22b   :  { %5407 = vmatprep.mubr.bf16.mxu1 %v11814_v61  ;;  %v11894_v61 = vld [vmem:[#allocation19 + $0xc] ss:$24 sps:$4 sm:$0xff]  }
 0x22c   :  { %2348 = vmatmul.mubr.bf16.gmra.mrb[140].mxu0 %v11805_v58  ;;  %v11883_v58 = vld [vmem:[#allocation18 + $0x8] ss:$24 sps:$4 sm:$0xff]  }
 0x22d   :  { %2355 = vmatprep.mubr.bf16.mxu0 %v11809_v59  ;;  %v11889_v59 = vld [vmem:[#allocation18 + $0x3c] ss:$24 sps:$4 sm:$0xff]  }
 0x232   :  { %5408 = vmatmul.mubr.bf16.gmra.mrb[140].mxu1 %v11816_v1  ;;  %v11895_v1 = vld [vmem:[#allocation18 + $0x6c] ss:$24 sps:$4 sm:$0xff]  }
 0x233   :  { %5415 = vmatprep.mubr.bf16.mxu1 %v11820_v4  ;;  %v11892_v4 = vld [vmem:[#allocation19 + $0x8] ss:$24 sps:$4 sm:$0xff]  }
 0x234   :  { %2356 = vmatmul.mubr.bf16.gmra.mrb[144].mxu0 %v11811_v62  ;;  %v11891_v62 = vld [vmem:[#allocation18 + $0x38] ss:$24 sps:$4 sm:$0xff]  }
 0x235   :  { %2363 = vmatprep.mubr.bf16.mxu0 %v11817_v63  ;;  %v9894_v63 = vld.sshfl [vmem:[#allocation13 + $0x8] sm:$0x33 pattern:$0x76325410] }
 0x236   :  { %v13428_v2 = vcombine.high %v9894_v63, %v9894_v63 }
 0x238   :  { %2869 = vmatprep.subr.bf16.mxu0 %v13428_v2 }
 0x23a   :  { %5416 = vmatmul.mubr.bf16.gmra.mrb[144].mxu1 %v11822_v8  ;;  %v11897_v8 = vld [vmem:[#allocation18 + $0x68] ss:$24 sps:$4 sm:$0xff]  }
 0x23b   :  { %5423 = vmatprep.mubr.bf16.mxu1 %v11826_v10  ;;  %v11901_v10 = vld [vmem:[#allocation18 + $0x9c] ss:$24 sps:$4 sm:$0xff]  }
 0x23c   :  { %2364 = vmatmul.mubr.bf16.gmra.mrb[148].mxu0 %v11819_v6  ;;  %v11898_v6 = vld [vmem:[#allocation19 + $0x3c] ss:$24 sps:$4 sm:$0xff]  }
 0x23d   :  { %2371 = vmatprep.mubr.bf16.mxu0 %v11823_v7  ;;  %v11910_v7 = vld [vmem:[#allocation16 + $0x10] ss:$24 sps:$4 sm:$0xff]  }
 0x242   :  { %5424 = vmatmul.mubr.bf16.gmra.mrb[148].mxu1 %v11828_v14  ;;  %v11903_v14 = vld [vmem:[#allocation18 + $0x98] ss:$24 sps:$4 sm:$0xff]  }
 0x243   :  { %5431 = vmatprep.mubr.bf16.mxu1 %v11832_v15  ;;  %v11907_v15 = vld [vmem:[#allocation18 + $0xcc] ss:$24 sps:$4 sm:$0xff]  }
 0x244   :  { %2372 = vmatmul.mubr.bf16.gmra.mrb[152].mxu0 %v11825_v11  ;;  %v11900_v11 = vld [vmem:[#allocation19 + $0x38] ss:$24 sps:$4 sm:$0xff]  }
 0x245   :  { %2379 = vmatprep.mubr.bf16.mxu0 %v11829_v13  ;;  %v11904_v13 = vld [vmem:[#allocation19 + $0x6c] ss:$24 sps:$4 sm:$0xff]  }
 0x24a   :  { %5432 = vmatmul.mubr.bf16.gmra.mrb[152].mxu1 %v11834_v19  ;;  %v11909_v19 = vld [vmem:[#allocation18 + $0xc8] ss:$24 sps:$4 sm:$0xff]  }
 0x24b   :  { %5439 = vmatprep.mubr.bf16.mxu1 %v11838_v21  ;;  %v11916_v21 = vld [vmem:[#allocation18 + $0xfc] ss:$24 sps:$4 sm:$0xff]  }
 0x24c   :  { %2380 = vmatmul.mubr.bf16.gmra.mrb[156].mxu0 %v11831_v17  ;;  %v11906_v17 = vld [vmem:[#allocation19 + $0x68] ss:$24 sps:$4 sm:$0xff]  }
 0x24d   :  { %2387 = vmatprep.mubr.bf16.mxu0 %v11835_v18  ;;  %v11913_v18 = vld [vmem:[#allocation19 + $0x9c] ss:$24 sps:$4 sm:$0xff]  }
 0x252   :  { %5440 = vmatmul.mubr.bf16.gmra.mrb[156].mxu1 %v11840_v26  ;;  %v12011_v26 = vld [vmem:[#allocation16 + $0x44] ss:$24 sps:$4 sm:$0xff]  }
 0x253   :  { %5447 = vmatprep.mubr.bf16.mxu1 %v11844_v27  ;;  %v11919_v27 = vld [vmem:[#allocation19 + $0xcc] ss:$24 sps:$4 sm:$0xff]  }
 0x254   :  { %2388 = vmatmul.mubr.bf16.gmra.mrb[160].mxu0 %v11837_v22  ;;  %v11915_v22 = vld [vmem:[#allocation19 + $0x98] ss:$24 sps:$4 sm:$0xff]  }
 0x255   :  { %2395 = vmatprep.mubr.bf16.mxu0 %v11841_v24  ;;  %v12009_v24 = vld [vmem:[#allocation16 + $0x40] ss:$24 sps:$4 sm:$0xff]  }
 0x25a   :  { %5448 = vmatmul.mubr.bf16.gmra.mrb[160].mxu1 %v11846_v30  ;;  %v11921_v30 = vld [vmem:[#allocation19 + $0xc8] ss:$24 sps:$4 sm:$0xff]  }
 0x25b   :  { %5455 = vmatprep.mubr.bf16.mxu1 %v11850_v31  ;;  %v11925_v31 = vld [vmem:[#allocation19 + $0xfc] ss:$24 sps:$4 sm:$0xff]  }
 0x25c   :  { %2396 = vmatmul.mubr.bf16.gmra.mrb[164].mxu0 %v11843_v28  ;;  %v11918_v28 = vld [vmem:[#allocation18 + $0xf8] ss:$24 sps:$4 sm:$0xff]  }
 0x25d   :  { %2403 = vmatprep.mubr.bf16.mxu0 %v11847_v29  ;;  %v11922_v29 = vld [vmem:[#allocation18 + $0x12c] ss:$24 sps:$4 sm:$0xff]  }
 0x262   :  { %5456 = vmatmul.mubr.bf16.gmra.mrb[164].mxu1 %v11852_v34  ;;  %v11927_v34 = vld [vmem:[#allocation19 + $0xf8] ss:$24 sps:$4 sm:$0xff]  }
 0x263   :  { %5463 = vmatprep.mubr.bf16.mxu1 %v11856_v35  ;;  %v11931_v35 = vld [vmem:[#allocation19 + $0x12c] ss:$24 sps:$4 sm:$0xff]  }
 0x264   :  { %2404 = vmatmul.mubr.bf16.gmra.mrb[168].mxu0 %v11849_v32  ;;  %v11924_v32 = vld [vmem:[#allocation18 + $0x128] ss:$24 sps:$4 sm:$0xff]  }
 0x265   :  { %2411 = vmatprep.mubr.bf16.mxu0 %v11853_v33  ;;  %v11928_v33 = vld [vmem:[#allocation18 + $0x15c] ss:$24 sps:$4 sm:$0xff]  }
 0x26a   :  { %5464 = vmatmul.mubr.bf16.gmra.mrb[168].mxu1 %v11858_v38  ;;  %v11933_v38 = vld [vmem:[#allocation19 + $0x128] ss:$24 sps:$4 sm:$0xff]  }
 0x26b   :  { %5471 = vmatprep.mubr.bf16.mxu1 %v11862_v39  ;;  %v11937_v39 = vld [vmem:[#allocation19 + $0x15c] ss:$24 sps:$4 sm:$0xff]  }
 0x26c   :  { %2412 = vmatmul.mubr.bf16.gmra.mrb[172].mxu0 %v11855_v36  ;;  %v11930_v36 = vld [vmem:[#allocation18 + $0x158] ss:$24 sps:$4 sm:$0xff]  }
 0x26d   :  { %2419 = vmatprep.mubr.bf16.mxu0 %v11859_v37  ;;  %v11934_v37 = vld [vmem:[#allocation18 + $0x18c] ss:$24 sps:$4 sm:$0xff]  }
 0x272   :  { %5472 = vmatmul.mubr.bf16.gmra.mrb[172].mxu1 %v11864_v42  ;;  %v11939_v42 = vld [vmem:[#allocation19 + $0x158] ss:$24 sps:$4 sm:$0xff]  }
 0x273   :  { %5479 = vmatprep.mubr.bf16.mxu1 %v11868_v43  ;;  %v11943_v43 = vld [vmem:[#allocation19 + $0x18c] ss:$24 sps:$4 sm:$0xff]  }
 0x274   :  { %2420 = vmatmul.mubr.bf16.gmra.mrb[176].mxu0 %v11861_v40  ;;  %v11936_v40 = vld [vmem:[#allocation18 + $0x188] ss:$24 sps:$4 sm:$0xff]  }
 0x275   :  { %2427 = vmatprep.mubr.bf16.mxu0 %v11865_v41  ;;  %v11940_v41 = vld [vmem:[#allocation18 + $0x1bc] ss:$24 sps:$4 sm:$0xff]  }
 0x27a   :  { %5480 = vmatmul.mubr.bf16.gmra.mrb[176].mxu1 %v11870_v46  ;;  %v11945_v46 = vld [vmem:[#allocation19 + $0x188] ss:$24 sps:$4 sm:$0xff]  }
 0x27b   :  { %5487 = vmatprep.mubr.bf16.mxu1 %v11874_v47  ;;  %v11949_v47 = vld [vmem:[#allocation19 + $0x1bc] ss:$24 sps:$4 sm:$0xff]  }
 0x27c   :  { %2428 = vmatmul.mubr.bf16.gmra.mrb[180].mxu0 %v11867_v44  ;;  %v11942_v44 = vld [vmem:[#allocation18 + $0x1b8] ss:$24 sps:$4 sm:$0xff]  }
 0x27d   :  { %2435 = vmatprep.mubr.bf16.mxu0 %v11871_v45  ;;  %v11946_v45 = vld [vmem:[#allocation18 + $0x1ec] ss:$24 sps:$4 sm:$0xff]  }
 0x282   :  { %5488 = vmatmul.mubr.bf16.gmra.mrb[180].mxu1 %v11876_v50  ;;  %v11951_v50 = vld [vmem:[#allocation19 + $0x1b8] ss:$24 sps:$4 sm:$0xff]  }
 0x283   :  { %5495 = vmatprep.mubr.bf16.mxu1 %v11880_v51  ;;  %v11955_v51 = vld [vmem:[#allocation19 + $0x1ec] ss:$24 sps:$4 sm:$0xff]  }
 0x284   :  { %2436 = vmatmul.mubr.bf16.gmra.mrb[184].mxu0 %v11873_v48  ;;  %v11948_v48 = vld [vmem:[#allocation18 + $0x1e8] ss:$24 sps:$4 sm:$0xff]  }
 0x285   :  { %2443 = vmatprep.mubr.bf16.mxu0 %v11877_v49  ;;  %v11952_v49 = vld [vmem:[#allocation18 + $0x21c] ss:$24 sps:$4 sm:$0xff]  }
 0x28a   :  { %5496 = vmatmul.mubr.bf16.gmra.mrb[184].mxu1 %v11882_v56  ;;  %v11957_v56 = vld [vmem:[#allocation19 + $0x1e8] ss:$24 sps:$4 sm:$0xff]  }
 0x28b   :  { %5503 = vmatprep.mubr.bf16.mxu1 %v11886_v57  ;;  %v11961_v57 = vld [vmem:[#allocation19 + $0x21c] ss:$24 sps:$4 sm:$0xff]  }
 0x28c   :  { %2444 = vmatmul.mubr.bf16.gmra.mrb[188].mxu0 %v11879_v52  ;;  %v11954_v52 = vld [vmem:[#allocation18 + $0x218] ss:$24 sps:$4 sm:$0xff]  }
 0x28d   :  { %2484 = vmatprep.mubr.bf16.mxu0 %v11885_v55  ;;  %v11958_v55 = vld [vmem:[#allocation18 + $0x24c] ss:$24 sps:$4 sm:$0xff]  }
 0x292   :  { %5504 = vmatmul.mubr.bf16.gmra.mrb[188].mxu1 %v11888_v60  ;;  %v11963_v60 = vld [vmem:[#allocation19 + $0x218] ss:$24 sps:$4 sm:$0xff]  }
 0x293   :  { %5544 = vmatprep.mubr.bf16.mxu1 %v11894_v61  ;;  %v11967_v61 = vld [vmem:[#allocation19 + $0x24c] ss:$24 sps:$4 sm:$0xff]  }
 0x294   :  { %2485 = vmatmul.mubr.bf16.vlgmr.msra.gmra.mrb[0].mxu0 %v11883_v58  ;;  %v11960_v58 = vld [vmem:[#allocation18 + $0x248] ss:$24 sps:$4 sm:$0xff]  }
 0x295   :  { %2492 = vmatprep.mubr.bf16.mxu0 %v11889_v59  ;;  %2870 = vmatpush1.bf16.xpose.msra.mxu0 %v9894_v63  ;;  %v11964_v59 = vld [vmem:[#allocation18 + $0x27c] ss:$24 sps:$4 sm:$0xff]   ;;  %v11970_v63 = vld [vmem:[#allocation18 + $0x2ac] ss:$24 sps:$4 sm:$0xff]  }
 0x29a   :  { %5545 = vmatmul.mubr.bf16.vlgmr.msra.gmra.mrb[0].mxu1 %v11892_v4  ;;  %v11973_v4 = vld [vmem:[#allocation19 + $0x27c] ss:$24 sps:$4 sm:$0xff]  }
 0x29b   :  { %5552 = vmatprep.mubr.bf16.mxu1 %v11898_v6  ;;  %5930 = vmatpush1.bf16.xpose.msra.mxu1 %v11910_v7  ;;  %v11972_v6 = vld [vmem:[#allocation18 + $0x2a8] ss:$24 sps:$4 sm:$0xff]   ;;  %v11976_v7 = vld [vmem:[#allocation18 + $0x2dc] ss:$24 sps:$4 sm:$0xff]  }
 0x29c   :  { %2493 = vmatmul.mubr.bf16.gmra.mrb[4].mxu0 %v11891_v62  ;;  %5931 = vmatprep.subr.bf16.mxu1 %v12011_v26  ;;  %v11966_v62 = vld [vmem:[#allocation18 + $0x278] ss:$24 sps:$4 sm:$0xff]   ;;  %v11993_v26 = vld [vmem:[#allocation19 + $0x308] ss:$24 sps:$4 sm:$0xff]  }
 0x29d   :  { %2500 = vmatprep.mubr.bf16.mxu0 %v11895_v1  ;;  %v11969_v1 = vld [vmem:[#allocation19 + $0x248] ss:$24 sps:$4 sm:$0xff]  }
 0x2a2   :  { %5553 = vmatmul.mubr.bf16.gmra.mrb[4].mxu1 %v11900_v11  ;;  %v11978_v11 = vld [vmem:[#allocation18 + $0x2d8] ss:$24 sps:$4 sm:$0xff]  }
 0x2a3   :  { %5560 = vmatprep.mubr.bf16.mxu1 %v11904_v13  ;;  %5932 = vmatpush1.bf16.xpose.msra.mxu1 %v12009_v24  ;;  %v11982_v13 = vld [vmem:[#allocation18 + $0x30c] ss:$24 sps:$4 sm:$0xff]  }
 0x2a4   :  { %2501 = vmatmul.mubr.bf16.gmra.mrb[8].mxu0 %v11897_v8  ;;  %v11975_v8 = vld [vmem:[#allocation19 + $0x278] ss:$24 sps:$4 sm:$0xff]   ;;  %v11994_v24 = vld [vmem:[#allocation18 + $0x36c] ss:$24 sps:$4 sm:$0xff]  }
 0x2a5   :  { %2508 = vmatprep.mubr.bf16.mxu0 %v11901_v10  ;;  %v11979_v10 = vld [vmem:[#allocation19 + $0x2ac] ss:$24 sps:$4 sm:$0xff]  }
 0x2aa   :  { %5561 = vmatmul.mubr.bf16.gmra.mrb[8].mxu1 %v11906_v17  ;;  %v11984_v17 = vld [vmem:[#allocation18 + $0x308] ss:$24 sps:$4 sm:$0xff]  }
 0x2ab   :  { %5568 = vmatprep.mubr.bf16.mxu1 %v11913_v18  ;;  %v11988_v18 = vld [vmem:[#allocation18 + $0x33c] ss:$24 sps:$4 sm:$0xff]  }
 0x2ac   :  { %2509 = vmatmul.mubr.bf16.gmra.mrb[12].mxu0 %v11903_v14  ;;  %v11981_v14 = vld [vmem:[#allocation19 + $0x2a8] ss:$24 sps:$4 sm:$0xff]  }
 0x2ad   :  { %2516 = vmatprep.mubr.bf16.mxu0 %v11907_v15  ;;  %v11985_v15 = vld [vmem:[#allocation19 + $0x2dc] ss:$24 sps:$4 sm:$0xff]  }
 0x2b2   :  { %5569 = vmatmul.mubr.bf16.gmra.mrb[12].mxu1 %v11915_v22  ;;  %v11990_v22 = vld [vmem:[#allocation18 + $0x338] ss:$24 sps:$4 sm:$0xff]  }
 0x2b3   :  { %5576 = vmatprep.mubr.bf16.mxu1 %v11919_v27  ;;  %v11997_v27 = vld [vmem:[#allocation19 + $0x33c] ss:$24 sps:$4 sm:$0xff]  }
 0x2b4   :  { %2517 = vmatmul.mubr.bf16.gmra.mrb[16].mxu0 %v11909_v19  ;;  %v11987_v19 = vld [vmem:[#allocation19 + $0x2d8] ss:$24 sps:$4 sm:$0xff]  }
 0x2b5   :  { %2524 = vmatprep.mubr.bf16.mxu0 %v11916_v21  ;;  %v11991_v21 = vld [vmem:[#allocation19 + $0x30c] ss:$24 sps:$4 sm:$0xff]  }
 0x2ba   :  { %5577 = vmatmul.mubr.bf16.gmra.mrb[16].mxu1 %v11921_v30  ;;  %v11999_v30 = vld [vmem:[#allocation19 + $0x338] ss:$24 sps:$4 sm:$0xff]  }
 0x2bb   :  { %5584 = vmatprep.mubr.bf16.mxu1 %v11925_v31  ;;  %v12003_v31 = vld [vmem:[#allocation19 + $0x36c] ss:$24 sps:$4 sm:$0xff]  }
 0x2bc   :  { %2525 = vmatmul.mubr.bf16.gmra.mrb[20].mxu0 %v11918_v28  ;;  %v11996_v28 = vld [vmem:[#allocation18 + $0x368] ss:$24 sps:$4 sm:$0xff]  }
 0x2bd   :  { %2532 = vmatprep.mubr.bf16.mxu0 %v11922_v29  ;;  %v12000_v29 = vld [vmem:[#allocation18 + $0x39c] ss:$24 sps:$4 sm:$0xff]  }
 0x2c2   :  { %5585 = vmatmul.mubr.bf16.gmra.mrb[20].mxu1 %v11927_v34  ;;  %v12005_v34 = vld [vmem:[#allocation19 + $0x368] ss:$24 sps:$4 sm:$0xff]  }
 0x2c3   :  { %5592 = vmatprep.mubr.bf16.mxu1 %v11931_v35  ;;  %v12012_v35 = vld [vmem:[#allocation19 + $0x39c] ss:$24 sps:$4 sm:$0xff]  }
 0x2c4   :  { %2533 = vmatmul.mubr.bf16.gmra.mrb[24].mxu0 %v11924_v32  ;;  %v12002_v32 = vld [vmem:[#allocation18 + $0x398] ss:$24 sps:$4 sm:$0xff]  }
 0x2c5   :  { %2540 = vmatprep.mubr.bf16.mxu0 %v11928_v33  ;;  %v12006_v33 = vld [vmem:[#allocation18 + $0x3cc] ss:$24 sps:$4 sm:$0xff]  }
 0x2ca   :  { %5593 = vmatmul.mubr.bf16.gmra.mrb[24].mxu1 %v11933_v38  ;;  %v12014_v38 = vld [vmem:[#allocation19 + $0x398] ss:$24 sps:$4 sm:$0xff]  }
 0x2cb   :  { %5600 = vmatprep.mubr.bf16.mxu1 %v11937_v39  ;;  %v273_v39 = vld [vmem:[#allocation16 + $0x70] sm:$0xff] }
 0x2cc   :  { %2541 = vmatmul.mubr.bf16.gmra.mrb[28].mxu0 %v11930_v36  ;;  %v12008_v36 = vld [vmem:[#allocation18 + $0x3c8] ss:$24 sps:$4 sm:$0xff]  }
 0x2cd   :  { %2548 = vmatprep.mubr.bf16.mxu0 %v11934_v37  ;;  %v12015_v37 = vld [vmem:[#allocation18 + $0x3fc] ss:$24 sps:$4 sm:$0xff]  }
 0x2d2   :  { %5601 = vmatmul.mubr.bf16.gmra.mrb[28].mxu1 %v11939_v42  ;;  %v13433_v42 = vcombine.high %v273_v39, %v273_v39 }
 0x2d3   :  { %5608 = vmatprep.mubr.bf16.mxu1 %v11943_v43  ;;  %v12017_v43 = vld [vmem:[#allocation18 + $0x3f8] ss:$24 sps:$4 sm:$0xff]  }
 0x2d4   :  { %2549 = vmatmul.mubr.bf16.gmra.mrb[32].mxu0 %v11936_v40  ;;  %v12018_v40 = vld [vmem:[#allocation19 + $0x3cc] ss:$24 sps:$4 sm:$0xff]   ;;  %5933 = vmatprep.subr.bf16.mxu1 %v13433_v42 }
 0x2d5   :  { %2556 = vmatprep.mubr.bf16.mxu0 %v11940_v41  ;;  %v13431_v41 = vcombine.low %v273_v39, %v273_v39  ;;  %v12090_v39 = vld [vmem:[#allocation19 + $0x60c] ss:$24 sps:$4 sm:$0xff]  }
 0x2d7   :  { %5934 = vmatpush1.bf16.xpose.msra.mxu1 %v13431_v41 }
 0x2da   :  { %5609 = vmatmul.mubr.bf16.gmra.mrb[32].mxu1 %v11945_v46  ;;  %v12020_v46 = vld [vmem:[#allocation19 + $0x3c8] ss:$24 sps:$4 sm:$0xff]  }
 0x2db   :  { %5616 = vmatprep.mubr.bf16.mxu1 %v11949_v47  ;;  %v12024_v47 = vld [vmem:[#allocation19 + $0x3fc] ss:$24 sps:$4 sm:$0xff]  }
 0x2dc   :  { %2557 = vmatmul.mubr.bf16.gmra.mrb[36].mxu0 %v11942_v44  ;;  %v12021_v44 = vld [vmem:[#allocation18 + $0x42c] ss:$24 sps:$4 sm:$0xff]  }
 0x2dd   :  { %2564 = vmatprep.mubr.bf16.mxu0 %v11946_v45  ;;  %v12714_v45 = vld [vmem:[#allocation16 + $0x4] ss:$24 sps:$4 sm:$0xff]  }
 0x2de   :  { %6637 = vmatprep.subr.bf16.mxu1 %v12714_v45  ;;  %v12096_v45 = vld [vmem:[#allocation19 + $0x63c] ss:$24 sps:$4 sm:$0xff]  }
 0x2e2   :  { %5617 = vmatmul.mubr.bf16.gmra.mrb[36].mxu1 %v11951_v50  ;;  %v12026_v50 = vld [vmem:[#allocation19 + $0x3f8] ss:$24 sps:$4 sm:$0xff]  }
 0x2e3   :  { %5624 = vmatprep.mubr.bf16.mxu1 %v11955_v51  ;;  %v12030_v51 = vld [vmem:[#allocation19 + $0x42c] ss:$24 sps:$4 sm:$0xff]  }
 0x2e4   :  { %2565 = vmatmul.mubr.bf16.gmra.mrb[40].mxu0 %v11948_v48  ;;  %v12023_v48 = vld [vmem:[#allocation18 + $0x428] ss:$24 sps:$4 sm:$0xff]  }
 0x2e5   :  { %2572 = vmatprep.mubr.bf16.mxu0 %v11952_v49  ;;  %v12027_v49 = vld [vmem:[#allocation18 + $0x45c] ss:$24 sps:$4 sm:$0xff]  }
 0x2ea   :  { %5625 = vmatmul.mubr.bf16.gmra.mrb[40].mxu1 %v11957_v56  ;;  %v12032_v56 = vld [vmem:[#allocation19 + $0x428] ss:$24 sps:$4 sm:$0xff]  }
 0x2eb   :  { %5632 = vmatprep.mubr.bf16.mxu1 %v11961_v57  ;;  %v12036_v57 = vld [vmem:[#allocation19 + $0x45c] ss:$24 sps:$4 sm:$0xff]  }
 0x2ec   :  { %2573 = vmatmul.mubr.bf16.gmra.mrb[44].mxu0 %v11954_v52  ;;  %v12029_v52 = vld [vmem:[#allocation18 + $0x458] ss:$24 sps:$4 sm:$0xff]  }
 0x2ed   :  { %2580 = vmatprep.mubr.bf16.mxu0 %v11958_v55  ;;  %v12033_v55 = vld [vmem:[#allocation18 + $0x48c] ss:$24 sps:$4 sm:$0xff]  }
 0x2f2   :  { %5633 = vmatmul.mubr.bf16.gmra.mrb[44].mxu1 %v11963_v60  ;;  %v12038_v60 = vld [vmem:[#allocation19 + $0x458] ss:$24 sps:$4 sm:$0xff]  }
 0x2f3   :  { %5640 = vmatprep.mubr.bf16.mxu1 %v11967_v61  ;;  %v12042_v61 = vld [vmem:[#allocation19 + $0x48c] ss:$24 sps:$4 sm:$0xff]  }
 0x2f4   :  { %2581 = vmatmul.mubr.bf16.gmra.mrb[48].mxu0 %v11960_v58  ;;  %v12035_v58 = vld [vmem:[#allocation18 + $0x488] ss:$24 sps:$4 sm:$0xff]  }
 0x2f5   :  { %2588 = vmatprep.mubr.bf16.mxu0 %v11964_v59  ;;  %v12039_v59 = vld [vmem:[#allocation18 + $0x4bc] ss:$24 sps:$4 sm:$0xff]  }
 0x2fa   :  { %5641 = vmatmul.mubr.bf16.gmra.mrb[48].mxu1 %v11969_v1  ;;  %v12044_v1 = vld [vmem:[#allocation19 + $0x488] ss:$24 sps:$4 sm:$0xff]  }
 0x2fb   :  { %5648 = vmatprep.mubr.bf16.mxu1 %v11973_v4  ;;  %v12048_v4 = vld [vmem:[#allocation19 + $0x4bc] ss:$24 sps:$4 sm:$0xff]  }
 0x2fc   :  { %2589 = vmatmul.mubr.bf16.gmra.mrb[52].mxu0 %v11966_v62  ;;  %v12041_v62 = vld [vmem:[#allocation18 + $0x4b8] ss:$24 sps:$4 sm:$0xff]  }
 0x2fd   :  { %2596 = vmatprep.mubr.bf16.mxu0 %v11970_v63  ;;  %v12045_v63 = vld [vmem:[#allocation18 + $0x4ec] ss:$24 sps:$4 sm:$0xff]  }
 0x302   :  { %5649 = vmatmul.mubr.bf16.gmra.mrb[52].mxu1 %v11975_v8  ;;  %v12050_v8 = vld [vmem:[#allocation19 + $0x4b8] ss:$24 sps:$4 sm:$0xff]  }
 0x303   :  { %5656 = vmatprep.mubr.bf16.mxu1 %v11979_v10  ;;  %v12054_v10 = vld [vmem:[#allocation19 + $0x4ec] ss:$24 sps:$4 sm:$0xff]  }
 0x304   :  { %2597 = vmatmul.mubr.bf16.gmra.mrb[56].mxu0 %v11972_v6  ;;  %v12047_v6 = vld [vmem:[#allocation18 + $0x4e8] ss:$24 sps:$4 sm:$0xff]  }
 0x305   :  { %2604 = vmatprep.mubr.bf16.mxu0 %v11976_v7  ;;  %v12051_v7 = vld [vmem:[#allocation18 + $0x51c] ss:$24 sps:$4 sm:$0xff]  }
 0x30a   :  { %5657 = vmatmul.mubr.bf16.gmra.mrb[56].mxu1 %v11981_v14  ;;  %v12056_v14 = vld [vmem:[#allocation19 + $0x4e8] ss:$24 sps:$4 sm:$0xff]  }
 0x30b   :  { %5664 = vmatprep.mubr.bf16.mxu1 %v11985_v15  ;;  %v12060_v15 = vld [vmem:[#allocation19 + $0x51c] ss:$24 sps:$4 sm:$0xff]  }
 0x30c   :  { %2605 = vmatmul.mubr.bf16.gmra.mrb[60].mxu0 %v11978_v11  ;;  %v12053_v11 = vld [vmem:[#allocation18 + $0x518] ss:$24 sps:$4 sm:$0xff]  }
 0x30d   :  { %2612 = vmatprep.mubr.bf16.mxu0 %v11982_v13  ;;  %v12057_v13 = vld [vmem:[#allocation18 + $0x54c] ss:$24 sps:$4 sm:$0xff]  }
 0x312   :  { %5665 = vmatmul.mubr.bf16.gmra.mrb[60].mxu1 %v11987_v19  ;;  %v12062_v19 = vld [vmem:[#allocation19 + $0x518] ss:$24 sps:$4 sm:$0xff]  }
 0x313   :  { %5672 = vmatprep.mubr.bf16.mxu1 %v11991_v21  ;;  %v12066_v21 = vld [vmem:[#allocation19 + $0x54c] ss:$24 sps:$4 sm:$0xff]  }
 0x314   :  { %2613 = vmatmul.mubr.bf16.gmra.mrb[64].mxu0 %v11984_v17  ;;  %v12059_v17 = vld [vmem:[#allocation18 + $0x548] ss:$24 sps:$4 sm:$0xff]  }
 0x315   :  { %2620 = vmatprep.mubr.bf16.mxu0 %v11988_v18  ;;  %v12063_v18 = vld [vmem:[#allocation18 + $0x57c] ss:$24 sps:$4 sm:$0xff]  }
 0x31a   :  { %5673 = vmatmul.mubr.bf16.gmra.mrb[64].mxu1 %v11993_v26  ;;  %v12068_v26 = vld [vmem:[#allocation19 + $0x548] ss:$24 sps:$4 sm:$0xff]  }
 0x31b   :  { %5680 = vmatprep.mubr.bf16.mxu1 %v11997_v27  ;;  %v12072_v27 = vld [vmem:[#allocation19 + $0x57c] ss:$24 sps:$4 sm:$0xff]  }
 0x31c   :  { %2621 = vmatmul.mubr.bf16.gmra.mrb[68].mxu0 %v11990_v22  ;;  %v12065_v22 = vld [vmem:[#allocation18 + $0x578] ss:$24 sps:$4 sm:$0xff]  }
 0x31d   :  { %2628 = vmatprep.mubr.bf16.mxu0 %v11994_v24  ;;  %v12069_v24 = vld [vmem:[#allocation18 + $0x5ac] ss:$24 sps:$4 sm:$0xff]  }
 0x322   :  { %5681 = vmatmul.mubr.bf16.gmra.mrb[68].mxu1 %v11999_v30  ;;  %v12074_v30 = vld [vmem:[#allocation19 + $0x578] ss:$24 sps:$4 sm:$0xff]  }
 0x323   :  { %5688 = vmatprep.mubr.bf16.mxu1 %v12003_v31  ;;  %v12078_v31 = vld [vmem:[#allocation19 + $0x5ac] ss:$24 sps:$4 sm:$0xff]  }
 0x324   :  { %2629 = vmatmul.mubr.bf16.gmra.mrb[72].mxu0 %v11996_v28  ;;  %v12071_v28 = vld [vmem:[#allocation18 + $0x5a8] ss:$24 sps:$4 sm:$0xff]  }
 0x325   :  { %2636 = vmatprep.mubr.bf16.mxu0 %v12000_v29  ;;  %v12075_v29 = vld [vmem:[#allocation18 + $0x5dc] ss:$24 sps:$4 sm:$0xff]  }
 0x32a   :  { %5689 = vmatmul.mubr.bf16.gmra.mrb[72].mxu1 %v12005_v34  ;;  %v12080_v34 = vld [vmem:[#allocation19 + $0x5a8] ss:$24 sps:$4 sm:$0xff]  }
 0x32b   :  { %5696 = vmatprep.mubr.bf16.mxu1 %v12012_v35  ;;  %v12084_v35 = vld [vmem:[#allocation19 + $0x5dc] ss:$24 sps:$4 sm:$0xff]  }
 0x32c   :  { %2637 = vmatmul.mubr.bf16.gmra.mrb[76].mxu0 %v12002_v32  ;;  %v12077_v32 = vld [vmem:[#allocation18 + $0x5d8] ss:$24 sps:$4 sm:$0xff]  }
 0x32d   :  { %2644 = vmatprep.mubr.bf16.mxu0 %v12006_v33  ;;  %v12081_v33 = vld [vmem:[#allocation18 + $0x60c] ss:$24 sps:$4 sm:$0xff]  }
 0x332   :  { %5697 = vmatmul.mubr.bf16.gmra.mrb[76].mxu1 %v12014_v38  ;;  %v12086_v38 = vld [vmem:[#allocation19 + $0x5d8] ss:$24 sps:$4 sm:$0xff]  }
 0x333   :  { %5704 = vmatprep.mubr.bf16.mxu1 %v12018_v40  ;;  %v12089_v40 = vld [vmem:[#allocation18 + $0x638] ss:$24 sps:$4 sm:$0xff]  }
 0x334   :  { %2645 = vmatmul.mubr.bf16.gmra.mrb[80].mxu0 %v12008_v36  ;;  %v12083_v36 = vld [vmem:[#allocation18 + $0x608] ss:$24 sps:$4 sm:$0xff]  }
 0x335   :  { %2652 = vmatprep.mubr.bf16.mxu0 %v12015_v37  ;;  %v12087_v37 = vld [vmem:[#allocation18 + $0x63c] ss:$24 sps:$4 sm:$0xff]  }
 0x33a   :  { %5705 = vmatmul.mubr.bf16.gmra.mrb[80].mxu1 %v12020_v46  ;;  %v12095_v46 = vld [vmem:[#allocation18 + $0x668] ss:$24 sps:$4 sm:$0xff]  }
 0x33b   :  { %5712 = vmatprep.mubr.bf16.mxu1 %v12024_v47  ;;  %v12099_v47 = vld [vmem:[#allocation18 + $0x69c] ss:$24 sps:$4 sm:$0xff]  }
 0x33c   :  { %2653 = vmatmul.mubr.bf16.gmra.mrb[84].mxu0 %v12017_v43  ;;  %v12093_v43 = vld [vmem:[#allocation18 + $0x66c] ss:$24 sps:$4 sm:$0xff]  }
 0x33d   :  { %2660 = vmatprep.mubr.bf16.mxu0 %v12021_v44  ;;  %v12092_v44 = vld [vmem:[#allocation19 + $0x608] ss:$24 sps:$4 sm:$0xff]  }
 0x342   :  { %5713 = vmatmul.mubr.bf16.gmra.mrb[84].mxu1 %v12026_v50  ;;  %v12101_v50 = vld [vmem:[#allocation18 + $0x698] ss:$24 sps:$4 sm:$0xff]  }
 0x343   :  { %5720 = vmatprep.mubr.bf16.mxu1 %v12030_v51  ;;  %v12105_v51 = vld [vmem:[#allocation18 + $0x6cc] ss:$24 sps:$4 sm:$0xff]  }
 0x344   :  { %2661 = vmatmul.mubr.bf16.gmra.mrb[88].mxu0 %v12023_v48  ;;  %v12098_v48 = vld [vmem:[#allocation19 + $0x638] ss:$24 sps:$4 sm:$0xff]  }
 0x345   :  { %2668 = vmatprep.mubr.bf16.mxu0 %v12027_v49  ;;  %v12102_v49 = vld [vmem:[#allocation19 + $0x66c] ss:$24 sps:$4 sm:$0xff]  }
 0x34a   :  { %5721 = vmatmul.mubr.bf16.gmra.mrb[88].mxu1 %v12032_v56  ;;  %v12107_v56 = vld [vmem:[#allocation18 + $0x6c8] ss:$24 sps:$4 sm:$0xff]  }
 0x34b   :  { %5728 = vmatprep.mubr.bf16.mxu1 %v12036_v57  ;;  %v12113_v57 = vld [vmem:[#allocation18 + $0x6fc] ss:$24 sps:$4 sm:$0xff]  }
 0x34c   :  { %2669 = vmatmul.mubr.bf16.gmra.mrb[92].mxu0 %v12029_v52  ;;  %v12104_v52 = vld [vmem:[#allocation19 + $0x668] ss:$24 sps:$4 sm:$0xff]  }
 0x34d   :  { %2676 = vmatprep.mubr.bf16.mxu0 %v12033_v55  ;;  %v12110_v55 = vld [vmem:[#allocation19 + $0x69c] ss:$24 sps:$4 sm:$0xff]  }
 0x352   :  { %5729 = vmatmul.mubr.bf16.gmra.mrb[92].mxu1 %v12038_v60  ;;  %v12115_v60 = vld [vmem:[#allocation18 + $0x6f8] ss:$24 sps:$4 sm:$0xff]  }
 0x353   :  { %5736 = vmatprep.mubr.bf16.mxu1 %v12042_v61  ;;  %v12119_v61 = vld [vmem:[#allocation18 + $0x72c] ss:$24 sps:$4 sm:$0xff]  }
 0x354   :  { %2677 = vmatmul.mubr.bf16.gmra.mrb[96].mxu0 %v12035_v58  ;;  %v12112_v58 = vld [vmem:[#allocation19 + $0x698] ss:$24 sps:$4 sm:$0xff]  }
 0x355   :  { %2684 = vmatprep.mubr.bf16.mxu0 %v12039_v59  ;;  %v12116_v59 = vld [vmem:[#allocation19 + $0x6cc] ss:$24 sps:$4 sm:$0xff]  }
 0x35a   :  { %5737 = vmatmul.mubr.bf16.gmra.mrb[96].mxu1 %v12044_v1  ;;  %v12121_v1 = vld [vmem:[#allocation18 + $0x728] ss:$24 sps:$4 sm:$0xff]  }
 0x35b   :  { %5744 = vmatprep.mubr.bf16.mxu1 %v12048_v4  ;;  %v12125_v4 = vld [vmem:[#allocation18 + $0x75c] ss:$24 sps:$4 sm:$0xff]  }
 0x35c   :  { %2685 = vmatmul.mubr.bf16.gmra.mrb[100].mxu0 %v12041_v62  ;;  %v12118_v62 = vld [vmem:[#allocation19 + $0x6c8] ss:$24 sps:$4 sm:$0xff]  }
 0x35d   :  { %2692 = vmatprep.mubr.bf16.mxu0 %v12045_v63  ;;  %v12122_v63 = vld [vmem:[#allocation19 + $0x6fc] ss:$24 sps:$4 sm:$0xff]  }
 0x362   :  { %5745 = vmatmul.mubr.bf16.gmra.mrb[100].mxu1 %v12050_v8  ;;  %v12127_v8 = vld [vmem:[#allocation18 + $0x758] ss:$24 sps:$4 sm:$0xff]  }
 0x363   :  { %5752 = vmatprep.mubr.bf16.mxu1 %v12054_v10  ;;  %v12131_v10 = vld [vmem:[#allocation18 + $0x78c] ss:$24 sps:$4 sm:$0xff]  }
 0x364   :  { %2693 = vmatmul.mubr.bf16.gmra.mrb[104].mxu0 %v12047_v6  ;;  %v12124_v6 = vld [vmem:[#allocation19 + $0x6f8] ss:$24 sps:$4 sm:$0xff]  }
 0x365   :  { %2700 = vmatprep.mubr.bf16.mxu0 %v12051_v7  ;;  %v12128_v7 = vld [vmem:[#allocation19 + $0x72c] ss:$24 sps:$4 sm:$0xff]  }
 0x36a   :  { %5753 = vmatmul.mubr.bf16.gmra.mrb[104].mxu1 %v12056_v14  ;;  %v12133_v14 = vld [vmem:[#allocation18 + $0x788] ss:$24 sps:$4 sm:$0xff]  }
 0x36b   :  { %5760 = vmatprep.mubr.bf16.mxu1 %v12060_v15  ;;  %v12137_v15 = vld [vmem:[#allocation18 + $0x7bc] ss:$24 sps:$4 sm:$0xff]  }
 0x36c   :  { %2701 = vmatmul.mubr.bf16.gmra.mrb[108].mxu0 %v12053_v11  ;;  %v12130_v11 = vld [vmem:[#allocation19 + $0x728] ss:$24 sps:$4 sm:$0xff]  }
 0x36d   :  { %2708 = vmatprep.mubr.bf16.mxu0 %v12057_v13  ;;  %v12134_v13 = vld [vmem:[#allocation19 + $0x75c] ss:$24 sps:$4 sm:$0xff]  }
 0x372   :  { %5761 = vmatmul.mubr.bf16.gmra.mrb[108].mxu1 %v12062_v19  ;;  %v12139_v19 = vld [vmem:[#allocation18 + $0x7b8] ss:$24 sps:$4 sm:$0xff]  }
 0x373   :  { %5768 = vmatprep.mubr.bf16.mxu1 %v12066_v21  ;;  %v12143_v21 = vld [vmem:[#allocation18 + $0x7ec] ss:$24 sps:$4 sm:$0xff]  }
 0x374   :  { %2709 = vmatmul.mubr.bf16.gmra.mrb[112].mxu0 %v12059_v17  ;;  %v12136_v17 = vld [vmem:[#allocation19 + $0x758] ss:$24 sps:$4 sm:$0xff]  }
 0x375   :  { %2716 = vmatprep.mubr.bf16.mxu0 %v12063_v18  ;;  %v12140_v18 = vld [vmem:[#allocation19 + $0x78c] ss:$24 sps:$4 sm:$0xff]  }
 0x37a   :  { %5769 = vmatmul.mubr.bf16.gmra.mrb[112].mxu1 %v12068_v26  ;;  %v12145_v26 = vld [vmem:[#allocation18 + $0x7e8] ss:$24 sps:$4 sm:$0xff]  }
 0x37b   :  { %5776 = vmatprep.mubr.bf16.mxu1 %v12072_v27  ;;  %v12149_v27 = vld [vmem:[#allocation18 + $0x81c] ss:$24 sps:$4 sm:$0xff]  }
 0x37c   :  { %2717 = vmatmul.mubr.bf16.gmra.mrb[116].mxu0 %v12065_v22  ;;  %v12142_v22 = vld [vmem:[#allocation19 + $0x788] ss:$24 sps:$4 sm:$0xff]  }
 0x37d   :  { %2724 = vmatprep.mubr.bf16.mxu0 %v12069_v24  ;;  %v12146_v24 = vld [vmem:[#allocation19 + $0x7bc] ss:$24 sps:$4 sm:$0xff]  }
 0x382   :  { %5777 = vmatmul.mubr.bf16.gmra.mrb[116].mxu1 %v12074_v30  ;;  %v12151_v30 = vld [vmem:[#allocation18 + $0x818] ss:$24 sps:$4 sm:$0xff]  }
 0x383   :  { %5784 = vmatprep.mubr.bf16.mxu1 %v12078_v31  ;;  %v12155_v31 = vld [vmem:[#allocation18 + $0x84c] ss:$24 sps:$4 sm:$0xff]  }
 0x384   :  { %2725 = vmatmul.mubr.bf16.gmra.mrb[120].mxu0 %v12071_v28  ;;  %v12148_v28 = vld [vmem:[#allocation19 + $0x7b8] ss:$24 sps:$4 sm:$0xff]  }
 0x385   :  { %2732 = vmatprep.mubr.bf16.mxu0 %v12075_v29  ;;  %v12152_v29 = vld [vmem:[#allocation19 + $0x7ec] ss:$24 sps:$4 sm:$0xff]  }
 0x38a   :  { %5785 = vmatmul.mubr.bf16.gmra.mrb[120].mxu1 %v12080_v34  ;;  %v12157_v34 = vld [vmem:[#allocation18 + $0x848] ss:$24 sps:$4 sm:$0xff]  }
 0x38b   :  { %5792 = vmatprep.mubr.bf16.mxu1 %v12084_v35  ;;  %v12161_v35 = vld [vmem:[#allocation18 + $0x87c] ss:$24 sps:$4 sm:$0xff]  }
 0x38c   :  { %2733 = vmatmul.mubr.bf16.gmra.mrb[124].mxu0 %v12077_v32  ;;  %v12154_v32 = vld [vmem:[#allocation19 + $0x7e8] ss:$24 sps:$4 sm:$0xff]  }
 0x38d   :  { %2740 = vmatprep.mubr.bf16.mxu0 %v12081_v33  ;;  %v12158_v33 = vld [vmem:[#allocation19 + $0x81c] ss:$24 sps:$4 sm:$0xff]  }
 0x392   :  { %5793 = vmatmul.mubr.bf16.gmra.mrb[124].mxu1 %v12086_v38  ;;  %v12163_v38 = vld [vmem:[#allocation18 + $0x878] ss:$24 sps:$4 sm:$0xff]  }
 0x393   :  { %5800 = vmatprep.mubr.bf16.mxu1 %v12090_v39  ;;  %v12167_v39 = vld [vmem:[#allocation18 + $0x8ac] ss:$24 sps:$4 sm:$0xff]  }
 0x394   :  { %2741 = vmatmul.mubr.bf16.gmra.mrb[128].mxu0 %v12083_v36  ;;  %v12160_v36 = vld [vmem:[#allocation19 + $0x818] ss:$24 sps:$4 sm:$0xff]  }
 0x395   :  { %2748 = vmatprep.mubr.bf16.mxu0 %v12087_v37  ;;  %v12164_v37 = vld [vmem:[#allocation19 + $0x84c] ss:$24 sps:$4 sm:$0xff]  }
 0x39a   :  { %5801 = vmatmul.mubr.bf16.gmra.mrb[128].mxu1 %v12092_v44  ;;  %v12169_v44 = vld [vmem:[#allocation18 + $0x8a8] ss:$24 sps:$4 sm:$0xff]  }
 0x39b   :  { %5808 = vmatprep.mubr.bf16.mxu1 %v12096_v45  ;;  %v12173_v45 = vld [vmem:[#allocation18 + $0x8dc] ss:$24 sps:$4 sm:$0xff]  }
 0x39c   :  { %2749 = vmatmul.mubr.bf16.gmra.mrb[132].mxu0 %v12089_v40  ;;  %v12166_v40 = vld [vmem:[#allocation19 + $0x848] ss:$24 sps:$4 sm:$0xff]  }
 0x39d   :  { %2756 = vmatprep.mubr.bf16.mxu0 %v12093_v43  ;;  %v12170_v43 = vld [vmem:[#allocation19 + $0x87c] ss:$24 sps:$4 sm:$0xff]  }
 0x3a2   :  { %5809 = vmatmul.mubr.bf16.gmra.mrb[132].mxu1 %v12098_v48  ;;  %v12175_v48 = vld [vmem:[#allocation18 + $0x8d8] ss:$24 sps:$4 sm:$0xff]  }
 0x3a3   :  { %5816 = vmatprep.mubr.bf16.mxu1 %v12102_v49  ;;  %v12181_v49 = vld [vmem:[#allocation18 + $0x14] ss:$24 sps:$4 sm:$0xff]  }
 0x3a4   :  { %2757 = vmatmul.mubr.bf16.gmra.mrb[136].mxu0 %v12095_v46  ;;  %v12172_v46 = vld [vmem:[#allocation19 + $0x878] ss:$24 sps:$4 sm:$0xff]  }
 0x3a5   :  { %2764 = vmatprep.mubr.bf16.mxu0 %v12099_v47  ;;  %v12176_v47 = vld [vmem:[#allocation19 + $0x8ac] ss:$24 sps:$4 sm:$0xff]  }
 0x3aa   :  { %5817 = vmatmul.mubr.bf16.gmra.mrb[136].mxu1 %v12104_v52  ;;  %v12179_v52 = vld [vmem:[#allocation18 + $0x10] ss:$24 sps:$4 sm:$0xff]  }
 0x3ab   :  { %5824 = vmatprep.mubr.bf16.mxu1 %v12110_v55  ;;  %v12185_v55 = vld [vmem:[#allocation18 + $0x44] ss:$24 sps:$4 sm:$0xff]  }
 0x3ac   :  { %2765 = vmatmul.mubr.bf16.gmra.mrb[140].mxu0 %v12101_v50  ;;  %v12178_v50 = vld [vmem:[#allocation19 + $0x8a8] ss:$24 sps:$4 sm:$0xff]  }
 0x3ad   :  { %2772 = vmatprep.mubr.bf16.mxu0 %v12105_v51  ;;  %v12182_v51 = vld [vmem:[#allocation19 + $0x8dc] ss:$24 sps:$4 sm:$0xff]  }
 0x3b2   :  { %5825 = vmatmul.mubr.bf16.gmra.mrb[140].mxu1 %v12112_v58  ;;  %v12187_v58 = vld [vmem:[#allocation18 + $0x40] ss:$24 sps:$4 sm:$0xff]  }
 0x3b3   :  { %5832 = vmatprep.mubr.bf16.mxu1 %v12116_v59  ;;  %v12283_v59 = vld [vmem:[#allocation15] ss:$24 sps:$4 sm:$0xff]  }
 0x3b4   :  { %2773 = vmatmul.mubr.bf16.gmra.mrb[144].mxu0 %v12107_v56  ;;  %v12184_v56 = vld [vmem:[#allocation19 + $0x8d8] ss:$24 sps:$4 sm:$0xff]  }
 0x3b5   :  { %2780 = vmatprep.mubr.bf16.mxu0 %v12113_v57  ;;  %v12190_v57 = vld [vmem:[#allocation19 + $0x14] ss:$24 sps:$4 sm:$0xff]  }
 0x3ba   :  { %5833 = vmatmul.mubr.bf16.gmra.mrb[144].mxu1 %v12118_v62  ;;  %v12188_v62 = vld [vmem:[#allocation19 + $0x10] ss:$24 sps:$4 sm:$0xff]  }
 0x3bb   :  { %5840 = vmatprep.mubr.bf16.mxu1 %v12122_v63  ;;  %v12194_v63 = vld [vmem:[#allocation19 + $0x44] ss:$24 sps:$4 sm:$0xff]  }
 0x3bc   :  { %2781 = vmatmul.mubr.bf16.gmra.mrb[148].mxu0 %v12115_v60  ;;  %v12285_v60 = vld [vmem:[#allocation15 + $0x4] ss:$24 sps:$4 sm:$0xff]  }
 0x3bd   :  { %2788 = vmatprep.mubr.bf16.mxu0 %v12119_v61  ;;  %v12191_v61 = vld [vmem:[#allocation18 + $0x74] ss:$24 sps:$4 sm:$0xff]   ;;  %6484 = vmatprep.subr.bf16.mxu0 %v12285_v60  ;;  %v12259_v60 = vld [vmem:[#allocation18 + $0x280] ss:$24 sps:$4 sm:$0xff]  }
 0x3c2   :  { %5841 = vmatmul.mubr.bf16.gmra.mrb[148].mxu1 %v12124_v6  ;;  %v12715_v6 = vld [vmem:[#allocation16] ss:$24 sps:$4 sm:$0xff]  }
 0x3c3   :  { %5848 = vmatprep.mubr.bf16.mxu1 %v12128_v7  ;;  %v12716_v7 = vld [vmem:[#allocation16 + $0x34] ss:$24 sps:$4 sm:$0xff]  }
 0x3c4   :  { %2789 = vmatmul.mubr.bf16.gmra.mrb[152].mxu0 %v12121_v1  ;;  %v12193_v1 = vld [vmem:[#allocation18 + $0x70] ss:$24 sps:$4 sm:$0xff]  }
 0x3c5   :  { %2796 = vmatprep.mubr.bf16.mxu0 %v12125_v4  ;;  %v12197_v4 = vld [vmem:[#allocation18 + $0xa4] ss:$24 sps:$4 sm:$0xff]  }
 0x3ca   :  { %5849 = vmatmul.mubr.bf16.gmra.mrb[152].mxu1 %v12130_v11  ;;  %v12199_v11 = vld [vmem:[#allocation18 + $0xa0] ss:$24 sps:$4 sm:$0xff]  }
 0x3cb   :  { %5856 = vmatprep.mubr.bf16.mxu1 %v12134_v13  ;;  %v12203_v13 = vld [vmem:[#allocation18 + $0xd4] ss:$24 sps:$4 sm:$0xff]  }
 0x3cc   :  { %2797 = vmatmul.mubr.bf16.gmra.mrb[156].mxu0 %v12127_v8  ;;  %v12196_v8 = vld [vmem:[#allocation19 + $0x40] ss:$24 sps:$4 sm:$0xff]  }
 0x3cd   :  { %2804 = vmatprep.mubr.bf16.mxu0 %v12131_v10  ;;  %v12200_v10 = vld [vmem:[#allocation19 + $0x74] ss:$24 sps:$4 sm:$0xff]  }
 0x3d2   :  { %5857 = vmatmul.mubr.bf16.gmra.mrb[156].mxu1 %v12136_v17  ;;  %v12206_v17 = vld [vmem:[#allocation19 + $0xa4] ss:$24 sps:$4 sm:$0xff]  }
 0x3d3   :  { %5864 = vmatprep.mubr.bf16.mxu1 %v12140_v18  ;;  %v12205_v18 = vld [vmem:[#allocation18 + $0xd0] ss:$24 sps:$4 sm:$0xff]  }
 0x3d4   :  { %2805 = vmatmul.mubr.bf16.gmra.mrb[160].mxu0 %v12133_v14  ;;  %v12717_v14 = vld [vmem:[#allocation16 + $0x30] ss:$24 sps:$4 sm:$0xff]  }
 0x3d5   :  { %2812 = vmatprep.mubr.bf16.mxu0 %v12137_v15  ;;  %v12202_v15 = vld [vmem:[#allocation19 + $0x70] ss:$24 sps:$4 sm:$0xff]  }
 0x3da   :  { %5865 = vmatmul.mubr.bf16.gmra.mrb[160].mxu1 %v12142_v22  ;;  %v12208_v22 = vld [vmem:[#allocation19 + $0xa0] ss:$24 sps:$4 sm:$0xff]  }
 0x3db   :  { %5872 = vmatprep.mubr.bf16.mxu1 %v12146_v24  ;;  %v12212_v24 = vld [vmem:[#allocation19 + $0xd4] ss:$24 sps:$4 sm:$0xff]  }
 0x3dc   :  { %2813 = vmatmul.mubr.bf16.gmra.mrb[164].mxu0 %v12139_v19  ;;  %v12209_v19 = vld [vmem:[#allocation18 + $0x104] ss:$24 sps:$4 sm:$0xff]  }
 0x3dd   :  { %2820 = vmatprep.mubr.bf16.mxu0 %v12143_v21  ;;  %v12718_v21 = vld [vmem:[#allocation16 + $0xc] ss:$24 sps:$4 sm:$0xff]  }
 0x3e2   :  { %5873 = vmatmul.mubr.bf16.gmra.mrb[164].mxu1 %v12148_v28  ;;  %v12218_v28 = vld [vmem:[#allocation19 + $0x104] ss:$24 sps:$4 sm:$0xff]  }
 0x3e3   :  { %5880 = vmatprep.mubr.bf16.mxu1 %v12152_v29  ;;  %v12217_v29 = vld [vmem:[#allocation18 + $0x130] ss:$24 sps:$4 sm:$0xff]  }
 0x3e4   :  { %2821 = vmatmul.mubr.bf16.gmra.mrb[168].mxu0 %v12145_v26  ;;  %v12211_v26 = vld [vmem:[#allocation18 + $0x100] ss:$24 sps:$4 sm:$0xff]  }
 0x3e5   :  { %2828 = vmatprep.mubr.bf16.mxu0 %v12149_v27  ;;  %v12214_v27 = vld [vmem:[#allocation19 + $0xd0] ss:$24 sps:$4 sm:$0xff]  }
 0x3ea   :  { %5881 = vmatmul.mubr.bf16.gmra.mrb[168].mxu1 %v12154_v32  ;;  %v12223_v32 = vld [vmem:[#allocation18 + $0x160] ss:$24 sps:$4 sm:$0xff]  }
 0x3eb   :  { %5888 = vmatprep.mubr.bf16.mxu1 %v12158_v33  ;;  %v12227_v33 = vld [vmem:[#allocation18 + $0x194] ss:$24 sps:$4 sm:$0xff]  }
 0x3ec   :  { %2829 = vmatmul.mubr.bf16.gmra.mrb[172].mxu0 %v12151_v30  ;;  %v12221_v30 = vld [vmem:[#allocation18 + $0x164] ss:$24 sps:$4 sm:$0xff]  }
 0x3ed   :  { %2836 = vmatprep.mubr.bf16.mxu0 %v12155_v31  ;;  %v12224_v31 = vld [vmem:[#allocation19 + $0x134] ss:$24 sps:$4 sm:$0xff]  }
 0x3f2   :  { %5889 = vmatmul.mubr.bf16.gmra.mrb[172].mxu1 %v12160_v36  ;;  %v12229_v36 = vld [vmem:[#allocation18 + $0x190] ss:$24 sps:$4 sm:$0xff]  }
 0x3f3   :  { %5896 = vmatprep.mubr.bf16.mxu1 %v12164_v37  ;;  %v12233_v37 = vld [vmem:[#allocation18 + $0x1c4] ss:$24 sps:$4 sm:$0xff]  }
 0x3f4   :  { %2837 = vmatmul.mubr.bf16.gmra.mrb[176].mxu0 %v12157_v34  ;;  %v12226_v34 = vld [vmem:[#allocation19 + $0x130] ss:$24 sps:$4 sm:$0xff]  }
 0x3f5   :  { %2844 = vmatprep.mubr.bf16.mxu0 %v12161_v35  ;;  %v12230_v35 = vld [vmem:[#allocation19 + $0x164] ss:$24 sps:$4 sm:$0xff]  }
 0x3fa   :  { %5897 = vmatmul.mubr.bf16.gmra.mrb[176].mxu1 %v12166_v40  ;;  %v12235_v40 = vld [vmem:[#allocation18 + $0x1c0] ss:$24 sps:$4 sm:$0xff]  }
 0x3fb   :  { %5904 = vmatprep.mubr.bf16.mxu1 %v12170_v43  ;;  %v12239_v43 = vld [vmem:[#allocation18 + $0x1f4] ss:$24 sps:$4 sm:$0xff]  }
 0x3fc   :  { %2845 = vmatmul.mubr.bf16.gmra.mrb[180].mxu0 %v12163_v38  ;;  %v12232_v38 = vld [vmem:[#allocation19 + $0x160] ss:$24 sps:$4 sm:$0xff]  }
 0x3fd   :  { %2852 = vmatprep.mubr.bf16.mxu0 %v12167_v39  ;;  %v12236_v39 = vld [vmem:[#allocation19 + $0x194] ss:$24 sps:$4 sm:$0xff]  }
 0x402   :  { %5905 = vmatmul.mubr.bf16.gmra.mrb[180].mxu1 %v12172_v46  ;;  %v12241_v46 = vld [vmem:[#allocation18 + $0x1f0] ss:$24 sps:$4 sm:$0xff]  }
 0x403   :  { %5912 = vmatprep.mubr.bf16.mxu1 %v12176_v47  ;;  %v12245_v47 = vld [vmem:[#allocation18 + $0x224] ss:$24 sps:$4 sm:$0xff]  }
 0x404   :  { %2853 = vmatmul.mubr.bf16.gmra.mrb[184].mxu0 %v12169_v44  ;;  %v12238_v44 = vld [vmem:[#allocation19 + $0x190] ss:$24 sps:$4 sm:$0xff]  }
 0x405   :  { %2860 = vmatprep.mubr.bf16.mxu0 %v12173_v45  ;;  %v12242_v45 = vld [vmem:[#allocation19 + $0x1c4] ss:$24 sps:$4 sm:$0xff]  }
 0x40a   :  { %5913 = vmatmul.mubr.bf16.gmra.mrb[184].mxu1 %v12178_v50  ;;  %v12247_v50 = vld [vmem:[#allocation18 + $0x220] ss:$24 sps:$4 sm:$0xff]  }
 0x40b   :  { %5920 = vmatprep.mubr.bf16.mxu1 %v12182_v51  ;;  %v12251_v51 = vld [vmem:[#allocation18 + $0x254] ss:$24 sps:$4 sm:$0xff]  }
 0x40c   :  { %2861 = vmatmul.mubr.bf16.gmra.mrb[188].mxu0 %v12175_v48  ;;  %v12244_v48 = vld [vmem:[#allocation19 + $0x1c0] ss:$24 sps:$4 sm:$0xff]  }
 0x40d   :  { %2901 = vmatprep.mubr.bf16.mxu0 %v12181_v49  ;;  %v12248_v49 = vld [vmem:[#allocation19 + $0x1f4] ss:$24 sps:$4 sm:$0xff]  }
 0x412   :  { %5921 = vmatmul.mubr.bf16.gmra.mrb[188].mxu1 %v12184_v56  ;;  %v12253_v56 = vld [vmem:[#allocation18 + $0x250] ss:$24 sps:$4 sm:$0xff]  }
 0x413   :  { %5961 = vmatprep.mubr.bf16.mxu1 %v12190_v57  ;;  %v12257_v57 = vld [vmem:[#allocation18 + $0x284] ss:$24 sps:$4 sm:$0xff]  }
 0x414   :  { %2902 = vmatmul.mubr.bf16.vlgmr.msra.gmra.mrb[0].mxu0 %v12179_v52  ;;  %v12250_v52 = vld [vmem:[#allocation19 + $0x1f0] ss:$24 sps:$4 sm:$0xff]  }
 0x415   :  { %2909 = vmatprep.mubr.bf16.mxu0 %v12185_v55  ;;  %6485 = vmatpush1.bf16.xpose.msra.mxu0 %v12283_v59  ;;  %v12254_v55 = vld [vmem:[#allocation19 + $0x224] ss:$24 sps:$4 sm:$0xff]   ;;  %v12260_v59 = vld [vmem:[#allocation19 + $0x254] ss:$24 sps:$4 sm:$0xff]  }
 0x41a   :  { %5962 = vmatmul.mubr.bf16.vlgmr.msra.gmra.mrb[0].mxu1 %v12188_v62  ;;  %v12262_v62 = vld [vmem:[#allocation19 + $0x250] ss:$24 sps:$4 sm:$0xff]  }
 0x41b   :  { %5969 = vmatprep.mubr.bf16.mxu1 %v12194_v63  ;;  %6638 = vmatpush1.bf16.xpose.msra.mxu1 %v12715_v6  ;;  %v12266_v63 = vld [vmem:[#allocation19 + $0x284] ss:$24 sps:$4 sm:$0xff]   ;;  %v12268_v6 = vld [vmem:[#allocation19 + $0x280] ss:$24 sps:$4 sm:$0xff]  }
 0x41c   :  { %2910 = vmatmul.mubr.bf16.gmra.mrb[4].mxu0 %v12187_v58  ;;  %6639 = vmatprep.subr.bf16.mxu1 %v12716_v7  ;;  %v12256_v58 = vld [vmem:[#allocation19 + $0x220] ss:$24 sps:$4 sm:$0xff]   ;;  %v12272_v7 = vld [vmem:[#allocation19 + $0x2b4] ss:$24 sps:$4 sm:$0xff]  }
 0x41d   :  { %2917 = vmatprep.mubr.bf16.mxu0 %v12191_v61  ;;  %v12263_v61 = vld [vmem:[#allocation18 + $0x2b4] ss:$24 sps:$4 sm:$0xff]  }
 0x422   :  { %5970 = vmatmul.mubr.bf16.gmra.mrb[4].mxu1 %v12196_v8  ;;  %v12271_v8 = vld [vmem:[#allocation18 + $0x2e0] ss:$24 sps:$4 sm:$0xff]  }
 0x423   :  { %5977 = vmatprep.mubr.bf16.mxu1 %v12200_v10  ;;  %6640 = vmatpush1.bf16.xpose.msra.mxu1 %v12717_v14  ;;  %v12275_v10 = vld [vmem:[#allocation18 + $0x314] ss:$24 sps:$4 sm:$0xff]   ;;  %v12277_v14 = vld [vmem:[#allocation18 + $0x310] ss:$24 sps:$4 sm:$0xff]  }
 0x424   :  { %2918 = vmatmul.mubr.bf16.gmra.mrb[8].mxu0 %v12193_v1  ;;  %6641 = vmatprep.subr.bf16.mxu1 %v13407_v16  ;;  %v12215_v16 = vld [vmem:[#allocation18 + $0x134] ss:$24 sps:$4 sm:$0xff]   ;;  %v12265_v1 = vld [vmem:[#allocation18 + $0x2b0] ss:$24 sps:$4 sm:$0xff]  }
 0x425   :  { %2925 = vmatprep.mubr.bf16.mxu0 %v12197_v4  ;;  %v12269_v4 = vld [vmem:[#allocation18 + $0x2e4] ss:$24 sps:$4 sm:$0xff]  }
 0x42a   :  { %5978 = vmatmul.mubr.bf16.gmra.mrb[8].mxu1 %v12202_v15  ;;  %v12281_v15 = vld [vmem:[#allocation18 + $0x344] ss:$24 sps:$4 sm:$0xff]  }
 0x42b   :  { %5985 = vmatprep.mubr.bf16.mxu1 %v12206_v17  ;;  %6642 = vmatpush1.bf16.xpose.msra.mxu1 %v13410_v20  ;;  %v12220_v20 = vld [vmem:[#allocation19 + $0x100] ss:$24 sps:$4 sm:$0xff]  }
 0x42c   :  { %2926 = vmatmul.mubr.bf16.gmra.mrb[12].mxu0 %v12199_v11  ;;  %6677 = vmatprep.subr.bf16.mxu1 %v12718_v21  ;;  %v12274_v11 = vld [vmem:[#allocation19 + $0x2b0] ss:$24 sps:$4 sm:$0xff]   ;;  %v12280_v17 = vld [vmem:[#allocation19 + $0x2e0] ss:$24 sps:$4 sm:$0xff]   ;;  %v12290_v21 = vld [vmem:[#allocation18 + $0x374] ss:$24 sps:$4 sm:$0xff]  }
 0x42d   :  { %2933 = vmatprep.mubr.bf16.mxu0 %v12203_v13  ;;  %v12278_v13 = vld [vmem:[#allocation19 + $0x2e4] ss:$24 sps:$4 sm:$0xff]  }
 0x432   :  { %5986 = vmatmul.mubr.bf16.gmra.mrb[12].mxu1 %v12208_v22  ;;  %v12382_v22 = vld [vmem:[#allocation15 + $0x30] ss:$24 sps:$4 sm:$0xff]  }
 0x433   :  { %5993 = vmatprep.mubr.bf16.mxu1 %v12212_v24  ;;  %v12384_v24 = vld [vmem:[#allocation15 + $0x34] ss:$24 sps:$4 sm:$0xff]  }
 0x434   :  { %2934 = vmatmul.mubr.bf16.gmra.mrb[16].mxu0 %v12205_v18  ;;  %v12287_v18 = vld [vmem:[#allocation19 + $0x314] ss:$24 sps:$4 sm:$0xff]   ;;  %6486 = vmatprep.subr.bf16.mxu0 %v12384_v24  ;;  %v12356_v24 = vld [vmem:[#allocation18 + $0x584] ss:$24 sps:$4 sm:$0xff]  }
 0x435   :  { %2941 = vmatprep.mubr.bf16.mxu0 %v12209_v19  ;;  %v12286_v19 = vld [vmem:[#allocation18 + $0x340] ss:$24 sps:$4 sm:$0xff]   ;;  %6487 = vmatpush1.bf16.xpose.msra.mxu0 %v12382_v22 }
 0x43a   :  { %5994 = vmatmul.mubr.bf16.gmra.mrb[16].mxu1 %v12214_v27  ;;  %v12292_v27 = vld [vmem:[#allocation18 + $0x370] ss:$24 sps:$4 sm:$0xff]  }
 0x43b   :  { %6001 = vmatprep.mubr.bf16.mxu1 %v12218_v28  ;;  %v12296_v28 = vld [vmem:[#allocation18 + $0x3a4] ss:$24 sps:$4 sm:$0xff]  }
 0x43c   :  { %2942 = vmatmul.mubr.bf16.gmra.mrb[20].mxu0 %v12211_v26  ;;  %v12289_v26 = vld [vmem:[#allocation19 + $0x310] ss:$24 sps:$4 sm:$0xff]  }
 0x43d   :  { %2949 = vmatprep.mubr.bf16.mxu0 %v12215_v16  ;;  %v12293_v16 = vld [vmem:[#allocation19 + $0x344] ss:$24 sps:$4 sm:$0xff]  }
 0x442   :  { %6002 = vmatmul.mubr.bf16.gmra.mrb[20].mxu1 %v12220_v20  ;;  %v12298_v20 = vld [vmem:[#allocation18 + $0x3a0] ss:$24 sps:$4 sm:$0xff]  }
 0x443   :  { %6009 = vmatprep.mubr.bf16.mxu1 %v12224_v31  ;;  %v12302_v31 = vld [vmem:[#allocation18 + $0x3d4] ss:$24 sps:$4 sm:$0xff]  }
 0x444   :  { %2950 = vmatmul.mubr.bf16.gmra.mrb[24].mxu0 %v12217_v29  ;;  %v12295_v29 = vld [vmem:[#allocation19 + $0x340] ss:$24 sps:$4 sm:$0xff]  }
 0x445   :  { %2957 = vmatprep.mubr.bf16.mxu0 %v12221_v30  ;;  %v12299_v30 = vld [vmem:[#allocation19 + $0x374] ss:$24 sps:$4 sm:$0xff]  }
 0x44a   :  { %6010 = vmatmul.mubr.bf16.gmra.mrb[24].mxu1 %v12226_v34  ;;  %v12304_v34 = vld [vmem:[#allocation18 + $0x3d0] ss:$24 sps:$4 sm:$0xff]  }
 0x44b   :  { %6017 = vmatprep.mubr.bf16.mxu1 %v12230_v35  ;;  %v12308_v35 = vld [vmem:[#allocation18 + $0x404] ss:$24 sps:$4 sm:$0xff]  }
 0x44c   :  { %2958 = vmatmul.mubr.bf16.gmra.mrb[28].mxu0 %v12223_v32  ;;  %v12301_v32 = vld [vmem:[#allocation19 + $0x370] ss:$24 sps:$4 sm:$0xff]  }
 0x44d   :  { %2965 = vmatprep.mubr.bf16.mxu0 %v12227_v33  ;;  %v12305_v33 = vld [vmem:[#allocation19 + $0x3a4] ss:$24 sps:$4 sm:$0xff]  }
 0x452   :  { %6018 = vmatmul.mubr.bf16.gmra.mrb[28].mxu1 %v12232_v38  ;;  %v12310_v38 = vld [vmem:[#allocation18 + $0x400] ss:$24 sps:$4 sm:$0xff]  }
 0x453   :  { %6025 = vmatprep.mubr.bf16.mxu1 %v12236_v39  ;;  %v12314_v39 = vld [vmem:[#allocation18 + $0x434] ss:$24 sps:$4 sm:$0xff]  }
 0x454   :  { %2966 = vmatmul.mubr.bf16.gmra.mrb[32].mxu0 %v12229_v36  ;;  %v12307_v36 = vld [vmem:[#allocation19 + $0x3a0] ss:$24 sps:$4 sm:$0xff]  }
 0x455   :  { %2973 = vmatprep.mubr.bf16.mxu0 %v12233_v37  ;;  %v12311_v37 = vld [vmem:[#allocation19 + $0x3d4] ss:$24 sps:$4 sm:$0xff]  }
 0x45a   :  { %6026 = vmatmul.mubr.bf16.gmra.mrb[32].mxu1 %v12238_v44  ;;  %v12316_v44 = vld [vmem:[#allocation18 + $0x430] ss:$24 sps:$4 sm:$0xff]  }
 0x45b   :  { %6033 = vmatprep.mubr.bf16.mxu1 %v12242_v45  ;;  %v12320_v45 = vld [vmem:[#allocation18 + $0x464] ss:$24 sps:$4 sm:$0xff]  }
 0x45c   :  { %2974 = vmatmul.mubr.bf16.gmra.mrb[36].mxu0 %v12235_v40  ;;  %v12313_v40 = vld [vmem:[#allocation19 + $0x3d0] ss:$24 sps:$4 sm:$0xff]  }
 0x45d   :  { %2981 = vmatprep.mubr.bf16.mxu0 %v12239_v43  ;;  %v12317_v43 = vld [vmem:[#allocation19 + $0x404] ss:$24 sps:$4 sm:$0xff]  }
 0x462   :  { %6034 = vmatmul.mubr.bf16.gmra.mrb[36].mxu1 %v12244_v48  ;;  %v12322_v48 = vld [vmem:[#allocation18 + $0x460] ss:$24 sps:$4 sm:$0xff]  }
 0x463   :  { %6041 = vmatprep.mubr.bf16.mxu1 %v12248_v49  ;;  %v12326_v49 = vld [vmem:[#allocation18 + $0x494] ss:$24 sps:$4 sm:$0xff]  }
 0x464   :  { %2982 = vmatmul.mubr.bf16.gmra.mrb[40].mxu0 %v12241_v46  ;;  %v12319_v46 = vld [vmem:[#allocation19 + $0x400] ss:$24 sps:$4 sm:$0xff]  }
 0x465   :  { %2989 = vmatprep.mubr.bf16.mxu0 %v12245_v47  ;;  %v12323_v47 = vld [vmem:[#allocation19 + $0x434] ss:$24 sps:$4 sm:$0xff]  }
 0x46a   :  { %6042 = vmatmul.mubr.bf16.gmra.mrb[40].mxu1 %v12250_v52  ;;  %v12328_v52 = vld [vmem:[#allocation18 + $0x490] ss:$24 sps:$4 sm:$0xff]  }
 0x46b   :  { %6049 = vmatprep.mubr.bf16.mxu1 %v12254_v55  ;;  %v12332_v55 = vld [vmem:[#allocation18 + $0x4c4] ss:$24 sps:$4 sm:$0xff]  }
 0x46c   :  { %2990 = vmatmul.mubr.bf16.gmra.mrb[44].mxu0 %v12247_v50  ;;  %v12325_v50 = vld [vmem:[#allocation19 + $0x430] ss:$24 sps:$4 sm:$0xff]  }
 0x46d   :  { %2997 = vmatprep.mubr.bf16.mxu0 %v12251_v51  ;;  %v12329_v51 = vld [vmem:[#allocation19 + $0x464] ss:$24 sps:$4 sm:$0xff]  }
 0x472   :  { %6050 = vmatmul.mubr.bf16.gmra.mrb[44].mxu1 %v12256_v58  ;;  %v12334_v58 = vld [vmem:[#allocation18 + $0x4c0] ss:$24 sps:$4 sm:$0xff]  }
 0x473   :  { %6057 = vmatprep.mubr.bf16.mxu1 %v12260_v59  ;;  %v12338_v59 = vld [vmem:[#allocation18 + $0x4f4] ss:$24 sps:$4 sm:$0xff]  }
 0x474   :  { %2998 = vmatmul.mubr.bf16.gmra.mrb[48].mxu0 %v12253_v56  ;;  %v12331_v56 = vld [vmem:[#allocation19 + $0x460] ss:$24 sps:$4 sm:$0xff]  }
 0x475   :  { %3005 = vmatprep.mubr.bf16.mxu0 %v12257_v57  ;;  %v12335_v57 = vld [vmem:[#allocation19 + $0x494] ss:$24 sps:$4 sm:$0xff]  }
 0x47a   :  { %6058 = vmatmul.mubr.bf16.gmra.mrb[48].mxu1 %v12262_v62  ;;  %v12340_v62 = vld [vmem:[#allocation18 + $0x4f0] ss:$24 sps:$4 sm:$0xff]  }
 0x47b   :  { %6065 = vmatprep.mubr.bf16.mxu1 %v12266_v63  ;;  %v12344_v63 = vld [vmem:[#allocation18 + $0x524] ss:$24 sps:$4 sm:$0xff]  }
 0x47c   :  { %3006 = vmatmul.mubr.bf16.gmra.mrb[52].mxu0 %v12259_v60  ;;  %v12337_v60 = vld [vmem:[#allocation19 + $0x490] ss:$24 sps:$4 sm:$0xff]  }
 0x47d   :  { %3013 = vmatprep.mubr.bf16.mxu0 %v12263_v61  ;;  %v12341_v61 = vld [vmem:[#allocation19 + $0x4c4] ss:$24 sps:$4 sm:$0xff]  }
 0x482   :  { %6066 = vmatmul.mubr.bf16.gmra.mrb[52].mxu1 %v12268_v6 }
 0x483   :  { %6073 = vmatprep.mubr.bf16.mxu1 %v12272_v7 }
 0x484   :  { %3014 = vmatmul.mubr.bf16.gmra.mrb[56].mxu0 %v12265_v1  ;;  %v12343_v1 = vld [vmem:[#allocation19 + $0x4c0] ss:$24 sps:$4 sm:$0xff]  }
 0x485   :  { %3021 = vmatprep.mubr.bf16.mxu0 %v12269_v4  ;;  %v12347_v4 = vld [vmem:[#allocation19 + $0x4f4] ss:$24 sps:$4 sm:$0xff]  }
 0x48a   :  { %6074 = vmatmul.mubr.bf16.gmra.mrb[56].mxu1 %v12274_v11  ;;  %v12350_v11 = vld [vmem:[#allocation18 + $0x554] ss:$24 sps:$4 sm:$0xff]  }
 0x48b   :  { %6081 = vmatprep.mubr.bf16.mxu1 %v12278_v13 }
 0x48c   :  { %3022 = vmatmul.mubr.bf16.gmra.mrb[60].mxu0 %v12271_v8  ;;  %v12346_v8 = vld [vmem:[#allocation18 + $0x520] ss:$24 sps:$4 sm:$0xff]  }
 0x48d   :  { %3029 = vmatprep.mubr.bf16.mxu0 %v12275_v10 }
 0x492   :  { %6082 = vmatmul.mubr.bf16.gmra.mrb[60].mxu1 %v12280_v17  ;;  %v12353_v17 = vld [vmem:[#allocation19 + $0x524] ss:$24 sps:$4 sm:$0xff]  }
 0x493   :  { %6089 = vmatprep.mubr.bf16.mxu1 %v12287_v18 }
 0x494   :  { %3030 = vmatmul.mubr.bf16.gmra.mrb[64].mxu0 %v12277_v14 }
 0x495   :  { %3037 = vmatprep.mubr.bf16.mxu0 %v12281_v15  ;;  %v12349_v15 = vld [vmem:[#allocation19 + $0x4f0] ss:$24 sps:$4 sm:$0xff]  }
 0x49a   :  { %6090 = vmatmul.mubr.bf16.gmra.mrb[64].mxu1 %v12289_v26 }
 0x49b   :  { %6097 = vmatprep.mubr.bf16.mxu1 %v12293_v16 }
 0x49c   :  { %3038 = vmatmul.mubr.bf16.gmra.mrb[68].mxu0 %v12286_v19 }
 0x49d   :  { %3045 = vmatprep.mubr.bf16.mxu0 %v12290_v21  ;;  %v12352_v21 = vld [vmem:[#allocation18 + $0x550] ss:$24 sps:$4 sm:$0xff]  }
 0x4a2   :  { %6098 = vmatmul.mubr.bf16.gmra.mrb[68].mxu1 %v12295_v29  ;;  %v12355_v29 = vld [vmem:[#allocation19 + $0x520] ss:$24 sps:$4 sm:$0xff]  }
 0x4a3   :  { %6105 = vmatprep.mubr.bf16.mxu1 %v12299_v30 }
 0x4a4   :  { %3046 = vmatmul.mubr.bf16.gmra.mrb[72].mxu0 %v12292_v27 }
 0x4a5   :  { %3053 = vmatprep.mubr.bf16.mxu0 %v12296_v28 }
 0x4aa   :  { %6106 = vmatmul.mubr.bf16.gmra.mrb[72].mxu1 %v12301_v32 }
 0x4ab   :  { %6113 = vmatprep.mubr.bf16.mxu1 %v12305_v33 }
 0x4ac   :  { %3054 = vmatmul.mubr.bf16.gmra.mrb[76].mxu0 %v12298_v20  ;;  %v12359_v20 = vld [vmem:[#allocation19 + $0x554] ss:$24 sps:$4 sm:$0xff]  }
 0x4ad   :  { %3061 = vmatprep.mubr.bf16.mxu0 %v12302_v31  ;;  %v12412_v31 = vld [vmem:[#allocation19 + $0x6d0] ss:$24 sps:$4 sm:$0xff]  }
 0x4b2   :  { %6114 = vmatmul.mubr.bf16.gmra.mrb[76].mxu1 %v12307_v36 }
 0x4b3   :  { %6121 = vmatprep.mubr.bf16.mxu1 %v12311_v37  ;;  %v12362_v37 = vld [vmem:[#allocation18 + $0x5b4] ss:$24 sps:$4 sm:$0xff]  }
 0x4b4   :  { %3062 = vmatmul.mubr.bf16.gmra.mrb[80].mxu0 %v12304_v34 }
 0x4b5   :  { %3069 = vmatprep.mubr.bf16.mxu0 %v12308_v35  ;;  %v12358_v35 = vld [vmem:[#allocation18 + $0x580] ss:$24 sps:$4 sm:$0xff]  }
 0x4ba   :  { %6122 = vmatmul.mubr.bf16.gmra.mrb[80].mxu1 %v12313_v40 }
 0x4bb   :  { %6129 = vmatprep.mubr.bf16.mxu1 %v12317_v43 }
 0x4bc   :  { %3070 = vmatmul.mubr.bf16.gmra.mrb[84].mxu0 %v12310_v38  ;;  %v12400_v38 = vld [vmem:[#allocation19 + $0x670] ss:$24 sps:$4 sm:$0xff]  }
 0x4bd   :  { %3077 = vmatprep.mubr.bf16.mxu0 %v12314_v39 }
 0x4c2   :  { %6130 = vmatmul.mubr.bf16.gmra.mrb[84].mxu1 %v12319_v46  ;;  %v12365_v46 = vld [vmem:[#allocation19 + $0x584] ss:$24 sps:$4 sm:$0xff]  }
 0x4c3   :  { %6137 = vmatprep.mubr.bf16.mxu1 %v12323_v47 }
 0x4c4   :  { %3078 = vmatmul.mubr.bf16.gmra.mrb[88].mxu0 %v12316_v44  ;;  %v12361_v44 = vld [vmem:[#allocation19 + $0x550] ss:$24 sps:$4 sm:$0xff]  }
 0x4c5   :  { %3085 = vmatprep.mubr.bf16.mxu0 %v12320_v45 }
 0x4ca   :  { %6138 = vmatmul.mubr.bf16.gmra.mrb[88].mxu1 %v12325_v50 }
 0x4cb   :  { %6145 = vmatprep.mubr.bf16.mxu1 %v12329_v51  ;;  %v12364_v51 = vld [vmem:[#allocation18 + $0x5b0] ss:$24 sps:$4 sm:$0xff]  }
 0x4cc   :  { %3086 = vmatmul.mubr.bf16.gmra.mrb[92].mxu0 %v12322_v48 }
 0x4cd   :  { %3093 = vmatprep.mubr.bf16.mxu0 %v12326_v49 }
 0x4d2   :  { %6146 = vmatmul.mubr.bf16.gmra.mrb[92].mxu1 %v12331_v56 }
 0x4d3   :  { %6153 = vmatprep.mubr.bf16.mxu1 %v12335_v57 }
 0x4d4   :  { %3094 = vmatmul.mubr.bf16.gmra.mrb[96].mxu0 %v12328_v52 }
 0x4d5   :  { %3101 = vmatprep.mubr.bf16.mxu0 %v12332_v55  ;;  %v12368_v55 = vld [vmem:[#allocation18 + $0x5e4] ss:$24 sps:$4 sm:$0xff]  }
 0x4da   :  { %6154 = vmatmul.mubr.bf16.gmra.mrb[96].mxu1 %v12337_v60  ;;  %v12367_v60 = vld [vmem:[#allocation19 + $0x580] ss:$24 sps:$4 sm:$0xff]  }
 0x4db   :  { %6161 = vmatprep.mubr.bf16.mxu1 %v12341_v61 }
 0x4dc   :  { %3102 = vmatmul.mubr.bf16.gmra.mrb[100].mxu0 %v12334_v58 }
 0x4dd   :  { %3109 = vmatprep.mubr.bf16.mxu0 %v12338_v59 }
 0x4e2   :  { %6162 = vmatmul.mubr.bf16.gmra.mrb[100].mxu1 %v12343_v1 }
 0x4e3   :  { %6169 = vmatprep.mubr.bf16.mxu1 %v12347_v4 }
 0x4e4   :  { %3110 = vmatmul.mubr.bf16.gmra.mrb[104].mxu0 %v12340_v62  ;;  %v12371_v62 = vld [vmem:[#allocation19 + $0x5b4] ss:$24 sps:$4 sm:$0xff]  }
 0x4e5   :  { %3117 = vmatprep.mubr.bf16.mxu0 %v12344_v63  ;;  %v12409_v63 = vld [vmem:[#allocation18 + $0x700] ss:$24 sps:$4 sm:$0xff]  }
 0x4e7   :  { %v13439_v6 = vpop.f32.mrb[0].mxu0 }
 0x4e8   :  { %15315 = vst [vmem:[#allocation44_spill] sm:$0xff] %v13439_v6  ;;  %v2905_v7 = vpop.f32.mrb[1].mxu0  ;;  %v12463_v6 = vld [vmem:[#allocation18 + $0x8b0] ss:$24 sps:$4 sm:$0xff]  }
 0x4e9   :  { %v13441_v10 = vpop.f32.mrb[2].mxu0 }
 0x4ea   :  { %15316 = vst [vmem:[#allocation45_spill] sm:$0xff] %v13441_v10  ;;  %v2908_v14 = vpop.f32.mrb[3].mxu0  ;;  %6170 = vmatmul.mubr.bf16.gmra.mrb[104].mxu1 %v12349_v15  ;;  %v12471_v15 = vld [vmem:[#allocation15 + $0x64] ss:$24 sps:$4 sm:$0xff]  }
 0x4eb   :  { %6177 = vmatprep.mubr.bf16.mxu1 %v12353_v17  ;;  %v12374_v14 = vld [vmem:[#allocation18 + $0x614] ss:$24 sps:$4 sm:$0xff]   ;;  %6488 = vmatprep.subr.bf16.mxu0 %v12471_v15  ;;  %v12397_v17 = vld [vmem:[#allocation18 + $0x6a0] ss:$24 sps:$4 sm:$0xff]  }
 0x4ec   :  { %3118 = vmatmul.mubr.bf16.gmra.mrb[108].mxu0 %v12346_v8  ;;  %v12370_v8 = vld [vmem:[#allocation18 + $0x5e0] ss:$24 sps:$4 sm:$0xff]  }
 0x4ed   :  { %3125 = vmatprep.mubr.bf16.mxu0 %v12350_v11  ;;  %v13451_v27 = vpop.f32.mrb[0].mxu1 }
 0x4ee   :  { %v5965_v28 = vpop.f32.mrb[1].mxu1 }
 0x4ef   :  { %v13445_v18 = vpop.f32.mrb[4].mxu0  ;;  %v13453_v30 = vpop.f32.mrb[2].mxu1  ;;  %v12373_v28 = vld [vmem:[#allocation19 + $0x5b0] ss:$24 sps:$4 sm:$0xff]  }
 0x4f0   :  { %15317 = vst [vmem:[#allocation46_spill] sm:$0xff] %v13445_v18  ;;  %v2913_v19 = vpop.f32.mrb[5].mxu0  ;;  %v5968_v32 = vpop.f32.mrb[3].mxu1  ;;  %v12451_v18 = vld [vmem:[#allocation18 + $0x850] ss:$24 sps:$4 sm:$0xff]  }
 0x4f1   :  { %v13447_v22 = vpop.f32.mrb[6].mxu0 }
 0x4f2   :  { %15318 = vst [vmem:[#allocation47_spill] sm:$0xff] %v13447_v22  ;;  %v2916_v16 = vpop.f32.mrb[7].mxu0  ;;  %6178 = vmatmul.mubr.bf16.gmra.mrb[108].mxu1 %v12355_v29 }
 0x4f3   :  { %6185 = vmatprep.mubr.bf16.mxu1 %v12359_v20  ;;  %v12377_v20 = vld [vmem:[#allocation19 + $0x5e4] ss:$24 sps:$4 sm:$0xff]  }
 0x4f4   :  { %3126 = vmatmul.mubr.bf16.gmra.mrb[112].mxu0 %v12352_v21  ;;  %v12469_v21 = vld [vmem:[#allocation15 + $0x60] ss:$24 sps:$4 sm:$0xff]  }
 0x4f5   :  { %3133 = vmatprep.mubr.bf16.mxu0 %v12356_v24  ;;  %v13463_v40 = vpop.f32.mrb[4].mxu1  ;;  %6489 = vmatpush1.bf16.xpose.msra.mxu0 %v12469_v21 }
 0x4f6   :  { %v5973_v43 = vpop.f32.mrb[5].mxu1 }
 0x4f7   :  { %v13457_v33 = vpop.f32.mrb[8].mxu0  ;;  %v13465_v45 = vpop.f32.mrb[6].mxu1 }
 0x4f8   :  { %15319 = vst [vmem:[#allocation48_spill] sm:$0xff] %v13457_v33  ;;  %v2921_v34 = vpop.f32.mrb[9].mxu0  ;;  %v5976_v48 = vpop.f32.mrb[7].mxu1  ;;  %v12439_v33 = vld [vmem:[#allocation18 + $0x7f0] ss:$24 sps:$4 sm:$0xff]  }
 0x4f9   :  { %v13459_v36 = vpop.f32.mrb[10].mxu0 }
 0x4fa   :  { %15320 = vst [vmem:[#allocation49_spill] sm:$0xff] %v13459_v36  ;;  %v2924_v39 = vpop.f32.mrb[11].mxu0  ;;  %6186 = vmatmul.mubr.bf16.gmra.mrb[112].mxu1 %v12361_v44  ;;  %v12380_v44 = vld [vmem:[#allocation18 + $0x644] ss:$24 sps:$4 sm:$0xff]  }
 0x4fb   :  { %6193 = vmatprep.mubr.bf16.mxu1 %v12365_v46  ;;  %v12376_v39 = vld [vmem:[#allocation18 + $0x610] ss:$24 sps:$4 sm:$0xff]   ;;  %v13497_v46 = vld [vmem:[#allocation15 + $0xc] ss:$24 sps:$4 sm:$0xff]  }
 0x4fc   :  { %3134 = vmatmul.mubr.bf16.gmra.mrb[116].mxu0 %v12358_v35  ;;  %6524 = vmatprep.subr.bf16.mxu0 %v13497_v46 }
 0x4fd   :  { %3141 = vmatprep.mubr.bf16.mxu0 %v12362_v37  ;;  %v13475_v58 = vpop.f32.mrb[8].mxu1 }
 0x4fe   :  { %v5981_v59 = vpop.f32.mrb[9].mxu1 }
 0x4ff   :  { %v13469_v49 = vpop.f32.mrb[12].mxu0  ;;  %v13477_v61 = vpop.f32.mrb[10].mxu1 }
 0x500   :  { %15321 = vst [vmem:[#allocation50_spill] sm:$0xff] %v13469_v49  ;;  %v2929_v50 = vpop.f32.mrb[13].mxu0  ;;  %v5984_v1 = vpop.f32.mrb[11].mxu1  ;;  %v12427_v49 = vld [vmem:[#allocation18 + $0x790] ss:$24 sps:$4 sm:$0xff]  }
 0x501   :  { %v13471_v52 = vpop.f32.mrb[14].mxu0 }
 0x502   :  { %15322 = vst [vmem:[#allocation51_spill] sm:$0xff] %v13471_v52  ;;  %v2932_v57 = vpop.f32.mrb[15].mxu0  ;;  %6194 = vmatmul.mubr.bf16.gmra.mrb[116].mxu1 %v12367_v60  ;;  %v12386_v60 = vld [vmem:[#allocation19 + $0x614] ss:$24 sps:$4 sm:$0xff]  }
 0x503   :  { %6201 = vmatprep.mubr.bf16.mxu1 %v12371_v62  ;;  %v12379_v57 = vld [vmem:[#allocation19 + $0x5e0] ss:$24 sps:$4 sm:$0xff]  }
 0x504   :  { %3142 = vmatmul.mubr.bf16.gmra.mrb[120].mxu0 %v12364_v51  ;;  %v12406_v62 = vld [vmem:[#allocation19 + $0x6a0] ss:$24 sps:$4 sm:$0xff]  }
 0x505   :  { %3149 = vmatprep.mubr.bf16.mxu0 %v12368_v55  ;;  %v13487_v24 = vpop.f32.mrb[12].mxu1 }
 0x506   :  { %v5989_v16 = vpop.f32.mrb[13].mxu1 }
 0x507   :  { %v13481_v4 = vpop.f32.mrb[16].mxu0  ;;  %v13489_v29 = vpop.f32.mrb[14].mxu1 }
 0x508   :  { %15323 = vst [vmem:[#allocation52_spill] sm:$0xff] %v13481_v4  ;;  %v2937_v7 = vpop.f32.mrb[17].mxu0  ;;  %v5992_v34 = vpop.f32.mrb[15].mxu1  ;;  %v12424_v4 = vld [vmem:[#allocation19 + $0x730] ss:$24 sps:$4 sm:$0xff]  }
 0x509   :  { %v13483_v11 = vpop.f32.mrb[18].mxu0  ;;  %v12388_v34 = vld [vmem:[#allocation19 + $0x610] ss:$24 sps:$4 sm:$0xff]  }
 0x50a   :  { %15324 = vst [vmem:[#allocation53_spill] sm:$0xff] %v13483_v11  ;;  %v2940_v19 = vpop.f32.mrb[19].mxu0  ;;  %6202 = vmatmul.mubr.bf16.gmra.mrb[120].mxu1 %v12373_v28 }
 0x50b   :  { %6209 = vmatprep.mubr.bf16.mxu1 %v12377_v20  ;;  %v12389_v19 = vld [vmem:[#allocation18 + $0x674] ss:$24 sps:$4 sm:$0xff]  }
 0x50c   :  { %3150 = vmatmul.mubr.bf16.gmra.mrb[124].mxu0 %v12370_v8 }
 0x50d   :  { %3157 = vmatprep.mubr.bf16.mxu0 %v12374_v14  ;;  %v13501_v51 = vpop.f32.mrb[16].mxu1  ;;  %v12385_v14 = vld [vmem:[#allocation18 + $0x640] ss:$24 sps:$4 sm:$0xff]  }
 0x50e   :  { %v5997_v55 = vpop.f32.mrb[17].mxu1 }
 0x50f   :  { %v13493_v35 = vpop.f32.mrb[20].mxu0  ;;  %v13504_v59 = vpop.f32.mrb[18].mxu1 }
 0x510   :  { %15325 = vst [vmem:[#allocation54_spill] sm:$0xff] %v13493_v35  ;;  %v2945_v37 = vpop.f32.mrb[21].mxu0  ;;  %v6000_v1 = vpop.f32.mrb[19].mxu1  ;;  %v12421_v35 = vld [vmem:[#allocation18 + $0x760] ss:$24 sps:$4 sm:$0xff]  }
 0x511   :  { %v13495_v43 = vpop.f32.mrb[22].mxu0 }
 0x512   :  { %15326 = vst [vmem:[#allocation55_spill] sm:$0xff] %v13495_v43  ;;  %v2948_v50 = vpop.f32.mrb[23].mxu0  ;;  %6210 = vmatmul.mubr.bf16.gmra.mrb[124].mxu1 %v12379_v57 }
 0x513   :  { %6217 = vmatprep.mubr.bf16.mxu1 %v12386_v60  ;;  %v12391_v60 = vld [vmem:[#allocation18 + $0x670] ss:$24 sps:$4 sm:$0xff]  }
 0x514   :  { %3158 = vmatmul.mubr.bf16.gmra.mrb[128].mxu0 %v12376_v39  ;;  %v12392_v39 = vld [vmem:[#allocation19 + $0x644] ss:$24 sps:$4 sm:$0xff]  }
 0x515   :  { %3165 = vmatprep.mubr.bf16.mxu0 %v12380_v44  ;;  %v13514_v28 = vpop.f32.mrb[20].mxu1 }
 0x516   :  { %v6005_v20 = vpop.f32.mrb[21].mxu1 }
 0x517   :  { %v13508_v7 = vpop.f32.mrb[24].mxu0  ;;  %v13516_v37 = vpop.f32.mrb[22].mxu1 }
 0x518   :  { %15327 = vst [vmem:[#allocation56_spill] sm:$0xff] %v13508_v7  ;;  %v2953_v8 = vpop.f32.mrb[25].mxu0  ;;  %v6008_v50 = vpop.f32.mrb[23].mxu1  ;;  %v12418_v7 = vld [vmem:[#allocation19 + $0x700] ss:$24 sps:$4 sm:$0xff]  }
 0x519   :  { %v13510_v15 = vpop.f32.mrb[26].mxu0  ;;  %v12395_v8 = vld [vmem:[#allocation18 + $0x6a4] ss:$24 sps:$4 sm:$0xff]   ;;  %v12398_v50 = vld [vmem:[#allocation19 + $0x674] ss:$24 sps:$4 sm:$0xff]  }
 0x51a   :  { %15328 = vst [vmem:[#allocation57_spill] sm:$0xff] %v13510_v15  ;;  %v2956_v16 = vpop.f32.mrb[27].mxu0  ;;  %6218 = vmatmul.mubr.bf16.gmra.mrb[128].mxu1 %v12388_v34  ;;  %v12403_v34 = vld [vmem:[#allocation18 + $0x6d0] ss:$24 sps:$4 sm:$0xff]  }
 0x51b   :  { %6225 = vmatprep.mubr.bf16.mxu1 %v12392_v39 }
 0x51c   :  { %3166 = vmatmul.mubr.bf16.gmra.mrb[132].mxu0 %v12385_v14 }
 0x51d   :  { %3173 = vmatprep.mubr.bf16.mxu0 %v12389_v19  ;;  %v13526_v20 = vpop.f32.mrb[24].mxu1 }
 0x51e   :  { %v6013_v19 = vpop.f32.mrb[25].mxu1 }
 0x51f   :  { %v13520_v55 = vpop.f32.mrb[28].mxu0  ;;  %v13528_v21 = vpop.f32.mrb[26].mxu1 }
 0x520   :  { %15329 = vst [vmem:[#allocation58_spill] sm:$0xff] %v13520_v55  ;;  %v2961_v57 = vpop.f32.mrb[29].mxu0  ;;  %v12415_v55 = vld [vmem:[#allocation18 + $0x730] ss:$24 sps:$4 sm:$0xff]  }
 0x521   :  { %v13522_v1 = vpop.f32.mrb[30].mxu0  ;;  %v6016_v57 = vpop.f32.mrb[27].mxu1 }
 0x522   :  { %15330 = vst [vmem:[#allocation59_spill] sm:$0xff] %v13522_v1  ;;  %v2964_v16 = vpop.f32.mrb[31].mxu0  ;;  %6226 = vmatmul.mubr.bf16.gmra.mrb[132].mxu1 %v12394_v0  ;;  %v12404_v57 = vld [vmem:[#allocation19 + $0x6a4] ss:$24 sps:$4 sm:$0xff]  }
 0x523   :  { %6233 = vmatprep.mubr.bf16.mxu1 %v12398_v50  ;;  %v12401_v16 = vld [vmem:[#allocation18 + $0x6d4] ss:$24 sps:$4 sm:$0xff]  }
 0x524   :  { %3174 = vmatmul.mubr.bf16.gmra.mrb[136].mxu0 %v12391_v60 }
 0x525   :  { %3181 = vmatprep.mubr.bf16.mxu0 %v12395_v8  ;;  %v13538_v56 = vpop.f32.mrb[28].mxu1 }
 0x526   :  { %v6021_v8 = vpop.f32.mrb[29].mxu1 }
 0x527   :  { %v13532_v48 = vpop.f32.mrb[32].mxu0  ;;  %v13540_v26 = vpop.f32.mrb[30].mxu1 }
 0x528   :  { %15331 = vst [vmem:[#allocation60_spill] sm:$0xff] %v13532_v48  ;;  %v2969_v39 = vpop.f32.mrb[33].mxu0  ;;  %v12472_v48 = vld [vmem:[#allocation18 + $0x8e0] ss:$24 sps:$4 sm:$0xff]  }
 0x529   :  { %v13534_v14 = vpop.f32.mrb[34].mxu0  ;;  %v6024_v39 = vpop.f32.mrb[31].mxu1 }
 0x52a   :  { %15332 = vst [vmem:[#allocation61_spill] sm:$0xff] %v13534_v14  ;;  %v2972_v19 = vpop.f32.mrb[35].mxu0  ;;  %6234 = vmatmul.mubr.bf16.gmra.mrb[136].mxu1 %v12400_v38  ;;  %v12410_v39 = vld [vmem:[#allocation19 + $0x6d4] ss:$24 sps:$4 sm:$0xff]  }
 0x52b   :  { %6241 = vmatprep.mubr.bf16.mxu1 %v12404_v57  ;;  %v12407_v19 = vld [vmem:[#allocation18 + $0x704] ss:$24 sps:$4 sm:$0xff]  }
 0x52c   :  { %3182 = vmatmul.mubr.bf16.gmra.mrb[140].mxu0 %v12397_v17 }
 0x52d   :  { %3189 = vmatprep.mubr.bf16.mxu0 %v12401_v16  ;;  %v13550_v44 = vpop.f32.mrb[32].mxu1 }
 0x52e   :  { %v6029_v16 = vpop.f32.mrb[33].mxu1 }
 0x52f   :  { %v13544_v13 = vpop.f32.mrb[36].mxu0  ;;  %v13552_v0 = vpop.f32.mrb[34].mxu1 }
 0x530   :  { %15333 = vst [vmem:[#allocation62_spill] sm:$0xff] %v13544_v13  ;;  %v2977_v50 = vpop.f32.mrb[37].mxu0  ;;  %v12457_v13 = vld [vmem:[#allocation18 + $0x880] ss:$24 sps:$4 sm:$0xff]  }
 0x531   :  { %v13546_v60 = vpop.f32.mrb[38].mxu0  ;;  %v6032_v50 = vpop.f32.mrb[35].mxu1 }
 0x532   :  { %15334 = vst [vmem:[#allocation63_spill] sm:$0xff] %v13546_v60  ;;  %v2980_v8 = vpop.f32.mrb[39].mxu0  ;;  %6242 = vmatmul.mubr.bf16.gmra.mrb[140].mxu1 %v12406_v62  ;;  %v12416_v50 = vld [vmem:[#allocation19 + $0x704] ss:$24 sps:$4 sm:$0xff]  }
 0x533   :  { %6249 = vmatprep.mubr.bf16.mxu1 %v12410_v39  ;;  %v12413_v8 = vld [vmem:[#allocation18 + $0x734] ss:$24 sps:$4 sm:$0xff]  }
 0x534   :  { %3190 = vmatmul.mubr.bf16.gmra.mrb[144].mxu0 %v12403_v34 }
 0x535   :  { %3197 = vmatprep.mubr.bf16.mxu0 %v12407_v19  ;;  %v13562_v47 = vpop.f32.mrb[36].mxu1 }
 0x536   :  { %v6037_v19 = vpop.f32.mrb[37].mxu1 }
 0x537   :  { %v13556_v32 = vpop.f32.mrb[40].mxu0  ;;  %v13564_v38 = vpop.f32.mrb[38].mxu1 }
 0x538   :  { %15335 = vst [vmem:[#allocation64_spill] sm:$0xff] %v13556_v32  ;;  %v2985_v57 = vpop.f32.mrb[41].mxu0  ;;  %v12445_v32 = vld [vmem:[#allocation18 + $0x820] ss:$24 sps:$4 sm:$0xff]  }
 0x539   :  { %v13558_v17 = vpop.f32.mrb[42].mxu0  ;;  %v6040_v57 = vpop.f32.mrb[39].mxu1 }
 0x53a   :  { %15336 = vst [vmem:[#allocation65_spill] sm:$0xff] %v13558_v17  ;;  %v2988_v16 = vpop.f32.mrb[43].mxu0  ;;  %6250 = vmatmul.mubr.bf16.gmra.mrb[144].mxu1 %v12412_v31  ;;  %v12422_v57 = vld [vmem:[#allocation19 + $0x734] ss:$24 sps:$4 sm:$0xff]  }
 0x53b   :  { %6257 = vmatprep.mubr.bf16.mxu1 %v12416_v50  ;;  %v12419_v16 = vld [vmem:[#allocation18 + $0x764] ss:$24 sps:$4 sm:$0xff]  }
 0x53c   :  { %3198 = vmatmul.mubr.bf16.gmra.mrb[148].mxu0 %v12409_v63 }
 0x53d   :  { %3205 = vmatprep.mubr.bf16.mxu0 %v12413_v8  ;;  %v13574_v1 = vpop.f32.mrb[40].mxu1 }
 0x53e   :  { %v6045_v8 = vpop.f32.mrb[41].mxu1 }
 0x53f   :  { %v13568_v3 = vpop.f32.mrb[44].mxu0  ;;  %v13576_v62 = vpop.f32.mrb[42].mxu1 }
 0x540   :  { %15337 = vst [vmem:[#allocation66_spill] sm:$0xff] %v13568_v3  ;;  %v2993_v39 = vpop.f32.mrb[45].mxu0  ;;  %v12433_v3 = vld [vmem:[#allocation18 + $0x7c0] ss:$24 sps:$4 sm:$0xff]  }
 0x541   :  { %v13570_v34 = vpop.f32.mrb[46].mxu0  ;;  %v6048_v39 = vpop.f32.mrb[43].mxu1 }
 0x542   :  { %15338 = vst [vmem:[#allocation67_spill] sm:$0xff] %v13570_v34  ;;  %v2996_v19 = vpop.f32.mrb[47].mxu0  ;;  %6258 = vmatmul.mubr.bf16.gmra.mrb[148].mxu1 %v12418_v7  ;;  %v12428_v39 = vld [vmem:[#allocation19 + $0x764] ss:$24 sps:$4 sm:$0xff]  }
 0x543   :  { %6265 = vmatprep.mubr.bf16.mxu1 %v12422_v57  ;;  %v12425_v19 = vld [vmem:[#allocation18 + $0x794] ss:$24 sps:$4 sm:$0xff]  }
 0x544   :  { %3206 = vmatmul.mubr.bf16.gmra.mrb[152].mxu0 %v12415_v55 }
 0x545   :  { %3213 = vmatprep.mubr.bf16.mxu0 %v12419_v16  ;;  %v13586_v43 = vpop.f32.mrb[44].mxu1 }
 0x546   :  { %v6053_v16 = vpop.f32.mrb[45].mxu1 }
 0x547   :  { %v13580_v15 = vpop.f32.mrb[48].mxu0  ;;  %v13588_v31 = vpop.f32.mrb[46].mxu1 }
 0x548   :  { %15339 = vst [vmem:[#allocation68_spill] sm:$0xff] %v13580_v15  ;;  %v3001_v50 = vpop.f32.mrb[49].mxu0 }
 0x549   :  { %v13582_v63 = vpop.f32.mrb[50].mxu0  ;;  %v6056_v50 = vpop.f32.mrb[47].mxu1 }
 0x54a   :  { %15340 = vst [vmem:[#allocation69_spill] sm:$0xff] %v13582_v63  ;;  %v3004_v8 = vpop.f32.mrb[51].mxu0  ;;  %6266 = vmatmul.mubr.bf16.gmra.mrb[152].mxu1 %v12424_v4  ;;  %v12430_v63 = vld [vmem:[#allocation19 + $0x760] ss:$24 sps:$4 sm:$0xff]   ;;  %v12434_v50 = vld [vmem:[#allocation19 + $0x794] ss:$24 sps:$4 sm:$0xff]  }
 0x54b   :  { %6273 = vmatprep.mubr.bf16.mxu1 %v12428_v39  ;;  %v12431_v8 = vld [vmem:[#allocation18 + $0x7c4] ss:$24 sps:$4 sm:$0xff]  }
 0x54c   :  { %3214 = vmatmul.mubr.bf16.gmra.mrb[156].mxu0 %v12421_v35 }
 0x54d   :  { %3221 = vmatprep.mubr.bf16.mxu0 %v12425_v19  ;;  %v13598_v15 = vpop.f32.mrb[48].mxu1 }
 0x54e   :  { %v6061_v19 = vpop.f32.mrb[49].mxu1 }
 0x54f   :  { %v13592_v11 = vpop.f32.mrb[52].mxu0  ;;  %v13600_v7 = vpop.f32.mrb[50].mxu1 }
 0x550   :  { %15341 = vst [vmem:[#allocation70_spill] sm:$0xff] %v13592_v11  ;;  %v3009_v57 = vpop.f32.mrb[53].mxu0 }
 0x551   :  { %v13594_v55 = vpop.f32.mrb[54].mxu0  ;;  %v6064_v57 = vpop.f32.mrb[51].mxu1 }
 0x552   :  { %15342 = vst [vmem:[#allocation71_spill] sm:$0xff] %v13594_v55  ;;  %v3012_v16 = vpop.f32.mrb[55].mxu0  ;;  %6274 = vmatmul.mubr.bf16.gmra.mrb[156].mxu1 %v12430_v63  ;;  %v12436_v55 = vld [vmem:[#allocation19 + $0x790] ss:$24 sps:$4 sm:$0xff]   ;;  %v12440_v57 = vld [vmem:[#allocation19 + $0x7c4] ss:$24 sps:$4 sm:$0xff]  }
 0x553   :  { %6281 = vmatprep.mubr.bf16.mxu1 %v12434_v50  ;;  %v12437_v16 = vld [vmem:[#allocation18 + $0x7f4] ss:$24 sps:$4 sm:$0xff]  }
 0x554   :  { %3222 = vmatmul.mubr.bf16.gmra.mrb[160].mxu0 %v12427_v49 }
 0x555   :  { %3229 = vmatprep.mubr.bf16.mxu0 %v12431_v8  ;;  %v13610_v11 = vpop.f32.mrb[52].mxu1 }
 0x556   :  { %v6069_v8 = vpop.f32.mrb[53].mxu1 }
 0x557   :  { %v13604_v52 = vpop.f32.mrb[56].mxu0  ;;  %v13612_v4 = vpop.f32.mrb[54].mxu1 }
 0x558   :  { %15343 = vst [vmem:[#allocation72_spill] sm:$0xff] %v13604_v52  ;;  %v3017_v39 = vpop.f32.mrb[57].mxu0 }
 0x559   :  { %v13606_v35 = vpop.f32.mrb[58].mxu0  ;;  %v6072_v39 = vpop.f32.mrb[55].mxu1 }
 0x55a   :  { %15344 = vst [vmem:[#allocation73_spill] sm:$0xff] %v13606_v35  ;;  %v3020_v19 = vpop.f32.mrb[59].mxu0  ;;  %6282 = vmatmul.mubr.bf16.gmra.mrb[160].mxu1 %v12436_v55  ;;  %v12442_v35 = vld [vmem:[#allocation19 + $0x7c0] ss:$24 sps:$4 sm:$0xff]   ;;  %v12446_v39 = vld [vmem:[#allocation19 + $0x7f4] ss:$24 sps:$4 sm:$0xff]  }
 0x55b   :  { %6289 = vmatprep.mubr.bf16.mxu1 %v12440_v57  ;;  %v12443_v19 = vld [vmem:[#allocation18 + $0x824] ss:$24 sps:$4 sm:$0xff]  }
 0x55c   :  { %3230 = vmatmul.mubr.bf16.gmra.mrb[164].mxu0 %v12433_v3 }
 0x55d   :  { %3237 = vmatprep.mubr.bf16.mxu0 %v12437_v16  ;;  %v13622_v52 = vpop.f32.mrb[56].mxu1 }
 0x55e   :  { %v6077_v16 = vpop.f32.mrb[57].mxu1 }
 0x55f   :  { %v13616_v34 = vpop.f32.mrb[60].mxu0  ;;  %v13624_v63 = vpop.f32.mrb[58].mxu1 }
 0x560   :  { %15345 = vst [vmem:[#allocation74_spill] sm:$0xff] %v13616_v34  ;;  %v3025_v50 = vpop.f32.mrb[61].mxu0 }
 0x561   :  { %v13618_v49 = vpop.f32.mrb[62].mxu0  ;;  %v6080_v50 = vpop.f32.mrb[59].mxu1 }
 0x562   :  { %15346 = vst [vmem:[#allocation75_spill] sm:$0xff] %v13618_v49  ;;  %v3028_v8 = vpop.f32.mrb[63].mxu0  ;;  %6290 = vmatmul.mubr.bf16.gmra.mrb[164].mxu1 %v12442_v35  ;;  %v12448_v49 = vld [vmem:[#allocation19 + $0x7f0] ss:$24 sps:$4 sm:$0xff]   ;;  %v12452_v50 = vld [vmem:[#allocation19 + $0x824] ss:$24 sps:$4 sm:$0xff]  }
 0x563   :  { %6297 = vmatprep.mubr.bf16.mxu1 %v12446_v39  ;;  %v12449_v8 = vld [vmem:[#allocation18 + $0x854] ss:$24 sps:$4 sm:$0xff]  }
 0x564   :  { %3238 = vmatmul.mubr.bf16.gmra.mrb[168].mxu0 %v12439_v33 }
 0x565   :  { %3245 = vmatprep.mubr.bf16.mxu0 %v12443_v19  ;;  %v13634_v34 = vpop.f32.mrb[60].mxu1 }
 0x566   :  { %v6085_v19 = vpop.f32.mrb[61].mxu1 }
 0x567   :  { %v13628_v36 = vpop.f32.mrb[64].mxu0  ;;  %v13636_v55 = vpop.f32.mrb[62].mxu1 }
 0x568   :  { %15347 = vst [vmem:[#allocation76_spill] sm:$0xff] %v13628_v36  ;;  %v3033_v57 = vpop.f32.mrb[65].mxu0 }
 0x569   :  { %v13630_v3 = vpop.f32.mrb[66].mxu0  ;;  %v6088_v57 = vpop.f32.mrb[63].mxu1 }
 0x56a   :  { %15348 = vst [vmem:[#allocation77_spill] sm:$0xff] %v13630_v3  ;;  %v3036_v16 = vpop.f32.mrb[67].mxu0  ;;  %6298 = vmatmul.mubr.bf16.gmra.mrb[168].mxu1 %v12448_v49  ;;  %v12454_v3 = vld [vmem:[#allocation19 + $0x820] ss:$24 sps:$4 sm:$0xff]   ;;  %v12458_v57 = vld [vmem:[#allocation19 + $0x854] ss:$24 sps:$4 sm:$0xff]  }
 0x56b   :  { %6305 = vmatprep.mubr.bf16.mxu1 %v12452_v50  ;;  %v12455_v16 = vld [vmem:[#allocation18 + $0x884] ss:$24 sps:$4 sm:$0xff]  }
 0x56c   :  { %3246 = vmatmul.mubr.bf16.gmra.mrb[172].mxu0 %v12445_v32 }
 0x56d   :  { %3253 = vmatprep.mubr.bf16.mxu0 %v12449_v8  ;;  %v13646_v36 = vpop.f32.mrb[64].mxu1 }
 0x56e   :  { %v6093_v8 = vpop.f32.mrb[65].mxu1 }
 0x56f   :  { %v13640_v17 = vpop.f32.mrb[68].mxu0  ;;  %v13648_v35 = vpop.f32.mrb[66].mxu1 }
 0x570   :  { %15349 = vst [vmem:[#allocation78_spill] sm:$0xff] %v13640_v17  ;;  %v3041_v39 = vpop.f32.mrb[69].mxu0 }
 0x571   :  { %v13642_v33 = vpop.f32.mrb[70].mxu0  ;;  %v6096_v39 = vpop.f32.mrb[67].mxu1 }
 0x572   :  { %15350 = vst [vmem:[#allocation79_spill] sm:$0xff] %v13642_v33  ;;  %v3044_v19 = vpop.f32.mrb[71].mxu0  ;;  %6306 = vmatmul.mubr.bf16.gmra.mrb[172].mxu1 %v12454_v3  ;;  %v12460_v33 = vld [vmem:[#allocation19 + $0x850] ss:$24 sps:$4 sm:$0xff]   ;;  %v12464_v39 = vld [vmem:[#allocation19 + $0x884] ss:$24 sps:$4 sm:$0xff]  }
 0x573   :  { %6313 = vmatprep.mubr.bf16.mxu1 %v12458_v57  ;;  %v12461_v19 = vld [vmem:[#allocation18 + $0x8b4] ss:$24 sps:$4 sm:$0xff]  }
 0x574   :  { %3254 = vmatmul.mubr.bf16.gmra.mrb[176].mxu0 %v12451_v18 }
 0x575   :  { %3261 = vmatprep.mubr.bf16.mxu0 %v12455_v16  ;;  %v13658_v17 = vpop.f32.mrb[68].mxu1 }
 0x576   :  { %v6101_v16 = vpop.f32.mrb[69].mxu1 }
 0x577   :  { %v13652_v22 = vpop.f32.mrb[72].mxu0  ;;  %v13660_v49 = vpop.f32.mrb[70].mxu1 }
 0x578   :  { %15351 = vst [vmem:[#allocation80_spill] sm:$0xff] %v13652_v22  ;;  %v3049_v50 = vpop.f32.mrb[73].mxu0 }
 0x579   :  { %v13654_v32 = vpop.f32.mrb[74].mxu0  ;;  %v6104_v50 = vpop.f32.mrb[71].mxu1 }
 0x57a   :  { %15352 = vst [vmem:[#allocation81_spill] sm:$0xff] %v13654_v32  ;;  %v3052_v8 = vpop.f32.mrb[75].mxu0  ;;  %6314 = vmatmul.mubr.bf16.gmra.mrb[176].mxu1 %v12460_v33  ;;  %v12466_v32 = vld [vmem:[#allocation19 + $0x880] ss:$24 sps:$4 sm:$0xff]   ;;  %v12473_v50 = vld [vmem:[#allocation19 + $0x8b4] ss:$24 sps:$4 sm:$0xff]  }
 0x57b   :  { %6321 = vmatprep.mubr.bf16.mxu1 %v12464_v39  ;;  %v12467_v8 = vld [vmem:[#allocation18 + $0x8e4] ss:$24 sps:$4 sm:$0xff]  }
 0x57c   :  { %3262 = vmatmul.mubr.bf16.gmra.mrb[180].mxu0 %v12457_v13  ;;  %v237_v33 = vld [vmem:[#allocation10] sm:$0xff] }
 0x57d   :  { %3269 = vmatprep.mubr.bf16.mxu0 %v12461_v19  ;;  %v13670_v22 = vpop.f32.mrb[72].mxu1 }
 0x57e   :  { %v6109_v19 = vpop.f32.mrb[73].mxu1 }
 0x57f   :  { %v13664_v60 = vpop.f32.mrb[76].mxu0  ;;  %v13672_v3 = vpop.f32.mrb[74].mxu1 }
 0x580   :  { %15353 = vst [vmem:[#allocation82_spill] sm:$0xff] %v13664_v60  ;;  %v3057_v57 = vpop.f32.mrb[77].mxu0  ;;  %v12475_v60 = vld [vmem:[#allocation19 + $0x8b0] ss:$24 sps:$4 sm:$0xff]  }
 0x581   :  { %v13666_v18 = vpop.f32.mrb[78].mxu0  ;;  %v6112_v57 = vpop.f32.mrb[75].mxu1 }
 0x582   :  { %15354 = vst [vmem:[#allocation83_spill] sm:$0xff] %v13666_v18  ;;  %v3060_v16 = vpop.f32.mrb[79].mxu0  ;;  %6322 = vmatmul.mubr.bf16.gmra.mrb[180].mxu1 %v12466_v32  ;;  %v12479_v57 = vld [vmem:[#allocation19 + $0x8e4] ss:$24 sps:$4 sm:$0xff]  }
 0x583   :  { %6329 = vmatprep.mubr.bf16.mxu1 %v12473_v50 }
 0x584   :  { %3270 = vmatmul.mubr.bf16.gmra.mrb[184].mxu0 %v12463_v6  ;;  %v13693_v6 = vld [vmem:[#allocation15 + $0x8] ss:$24 sps:$4 sm:$0xff]  }
 0x585   :  { %3277 = vmatprep.mubr.bf16.mxu0 %v12467_v8  ;;  %v13682_v19 = vpop.f32.mrb[76].mxu1  ;;  %15359 = vst [vmem:[#allocation88_spill] sm:$0xff] %v13693_v6 }
 0x586   :  { %v6117_v8 = vpop.f32.mrb[77].mxu1 }
 0x587   :  { %v13676_v10 = vpop.f32.mrb[80].mxu0  ;;  %v13684_v18 = vpop.f32.mrb[78].mxu1 }
 0x588   :  { %15355 = vst [vmem:[#allocation84_spill] sm:$0xff] %v13676_v10  ;;  %v3065_v39 = vpop.f32.mrb[81].mxu0  ;;  %v13700_v10 = vld [vmem:[#allocation15 + $0x3c] ss:$24 sps:$4 sm:$0xff]  }
 0x589   :  { %v13678_v13 = vpop.f32.mrb[82].mxu0  ;;  %v6120_v39 = vpop.f32.mrb[79].mxu1  ;;  %15361 = vst [vmem:[#allocation90_spill] sm:$0xff] %v13700_v10 }
 0x58a   :  { %15356 = vst [vmem:[#allocation85_spill] sm:$0xff] %v13678_v13  ;;  %v3068_v16 = vpop.f32.mrb[83].mxu0  ;;  %6330 = vmatmul.mubr.bf16.gmra.mrb[184].mxu1 %v12475_v60  ;;  %v12481_v60 = vld [vmem:[#allocation19 + $0x8e0] ss:$24 sps:$4 sm:$0xff]   ;;  %v13720_v13 = vld [vmem:[#allocation15 + $0x38] ss:$24 sps:$4 sm:$0xff]  }
 0x58b   :  { %6337 = vmatprep.mubr.bf16.mxu1 %v12479_v57  ;;  %15365 = vst [vmem:[#allocation94_spill] sm:$0xff] %v13720_v13 }
 0x58c   :  { %3278 = vmatmul.mubr.bf16.gmra.mrb[188].mxu0 %v12472_v48  ;;  %v13696_v48 = vrot.slane %v237_v33, %v13396_v5 }
 0x58d   :  { %6516 = vmatprep.mubr.bf16.mxu0 %v13403_v12  ;;  %v13702_v39 = vpop.f32.mrb[80].mxu1  ;;  %v6606_v12 = vcombine.high %v237_v33, %v237_v33 }
 0x58e   :  { %15360 = vst [vmem:[#allocation89_spill] sm:$0xff] %v13696_v48  ;;  %v13710_v57 = vcombine.high %v13696_v48, %v13696_v48 }
 0x58f   :  { %v13689_v50 = vpop.f32.mrb[84].mxu0 }
 0x590   :  { %15357 = vst [vmem:[#allocation86_spill] sm:$0xff] %v13689_v50  ;;  %v3073_v14 = vpop.f32.mrb[85].mxu0  ;;  %15362 = vst [vmem:[#allocation91_spill] sm:$0xff] %v13710_v57 }
 0x591   :  { %v13691_v16 = vpop.f32.mrb[86].mxu0  ;;  %v6125_v14 = vpop.f32.mrb[81].mxu1 }
 0x592   :  { %15358 = vst [vmem:[#allocation87_spill] sm:$0xff] %v13691_v16  ;;  %v3076_v8 = vpop.f32.mrb[87].mxu0  ;;  %v13706_v32 = vpop.f32.mrb[82].mxu1  ;;  %6338 = vmatmul.mubr.bf16.gmra.mrb[188].mxu1 %v12481_v60 }
 0x593   :  { %v6128_v50 = vpop.f32.mrb[83].mxu1  ;;  %6669 = vmatprep.mubr.bf16.mxu1 %v13710_v57 }
 0x594   :  { %6517 = vmatmul.mubr.bf16.vlgmr.msra.gmra.mrb[192].mxu0 %v13399_v9  ;;  %v13728_v50 = vld [vmem:[#allocation15 + $0x6c] ss:$24 sps:$4 sm:$0xff]  }
 0x595   :  { %6525 = vmatpush1.bf16.xpose.msra.mxu0 %v13693_v6  ;;  %6556 = vmatprep.mubr.bf16.mxu0 %v13418_v25  ;;  %v13724_v6 = vrot.slane %v6606_v12, %v13396_v5  ;;  %15367 = vst [vmem:[#allocation96_spill] sm:$0xff] %v13728_v50  ;;  %v13730_v8 = vpop.f32.mrb[84].mxu1 }
 0x596   :  { %6526 = vmatprep.subr.bf16.mxu0 %v13700_v10  ;;  %15368 = vst [vmem:[#allocation97_spill] sm:$0xff] %v13730_v8  ;;  %v6133_v10 = vpop.f32.mrb[85].mxu1 }
 0x597   :  { %v13716_v9 = vpop.f32.mrb[88].mxu0  ;;  %15366 = vst [vmem:[#allocation95_spill] sm:$0xff] %v13724_v6  ;;  %v13733_v60 = vpop.f32.mrb[86].mxu1 }
 0x598   :  { %15363 = vst [vmem:[#allocation92_spill] sm:$0xff] %v13716_v9  ;;  %v3081_v14 = vpop.f32.mrb[89].mxu0  ;;  %v6136_v12 = vpop.f32.mrb[87].mxu1  ;;  %v12719_v9 = vld [vmem:[#allocation16 + $0x8] ss:$24 sps:$4 sm:$0xff]  }
 0x599   :  { %v13718_v16 = vpop.f32.mrb[90].mxu0  ;;  %v13737_v14 = vcombine.high %v13724_v6, %v13724_v6  ;;  %v12720_v12 = vld [vmem:[#allocation16 + $0x3c] ss:$24 sps:$4 sm:$0xff]  }
 0x59a   :  { %15364 = vst [vmem:[#allocation93_spill] sm:$0xff] %v13718_v16  ;;  %v3084_v33 = vpop.f32.mrb[91].mxu0  ;;  %6670 = vmatmul.mubr.bf16.vlgmr.msra.gmra.mrb[192].mxu1 %v13696_v48  ;;  %v13747_v16 = vld [vmem:[#allocation15 + $0x68] ss:$24 sps:$4 sm:$0xff]  }
 0x59b   :  { %15369 = vst [vmem:[#allocation98_spill] sm:$0xff] %v13737_v14  ;;  %6678 = vmatpush1.bf16.xpose.msra.mxu1 %v12719_v9  ;;  %15372 = vst [vmem:[#allocation101_spill] sm:$0xff] %v13747_v16  ;;  %6709 = vmatprep.mubr.bf16.mxu1 %v13737_v14 }
 0x59c   :  { %6679 = vmatprep.subr.bf16.mxu1 %v12720_v12  ;;  %v12721_v12 = vld [vmem:[#allocation16 + $0x38] ss:$24 sps:$4 sm:$0xff]  }
 0x59d   :  { %6527 = vmatpush1.bf16.xpose.msra.mxu0 %v13720_v13  ;;  %v13754_v13 = vpop.f32.mrb[88].mxu1 }
 0x59e   :  { %6528 = vmatprep.subr.bf16.mxu0 %v13728_v50  ;;  %v13752_v50 = vld [vmem:[#allocation15 + $0x14] ss:$24 sps:$4 sm:$0xff]   ;;  %15374 = vst [vmem:[#allocation103_spill] sm:$0xff] %v13754_v13 }
 0x59f   :  { %v13742_v33 = vpop.f32.mrb[92].mxu0  ;;  %15373 = vst [vmem:[#allocation102_spill] sm:$0xff] %v13752_v50 }
 0x5a0   :  { %15370 = vst [vmem:[#allocation99_spill] sm:$0xff] %v13742_v33  ;;  %v3089_v25 = vpop.f32.mrb[93].mxu0  ;;  %v13766_v33 = vld [vmem:[#allocation15 + $0x10] ss:$24 sps:$4 sm:$0xff]  }
 0x5a1   :  { %v13745_v10 = vpop.f32.mrb[94].mxu0  ;;  %v6141_v25 = vpop.f32.mrb[89].mxu1  ;;  %15377 = vst [vmem:[#allocation106_spill] sm:$0xff] %v13766_v33 }
 0x5a2   :  { %15371 = vst [vmem:[#allocation100_spill] sm:$0xff] %v13745_v10  ;;  %v3092_v5 = vpop.f32.mrb[95].mxu0  ;;  %v13757_v48 = vpop.f32.mrb[90].mxu1 }
 0x5a3   :  { %v6144_v8 = vpop.f32.mrb[91].mxu1  ;;  %6680 = vmatpush1.bf16.xpose.msra.mxu1 %v12721_v12 }
 0x5a4   :  { %6681 = vmatprep.subr.bf16.mxu1 %v13424_v54 }
 0x5a5   :  { %6529 = vmatpush1.bf16.xpose.msra.mxu0 %v13747_v16  ;;  %v13771_v16 = vld [vmem:[#allocation15 + $0x44] ss:$24 sps:$4 sm:$0xff]   ;;  %v13773_v8 = vpop.f32.mrb[92].mxu1 }
 0x5a6   :  { %6564 = vmatprep.subr.bf16.mxu0 %v13752_v50  ;;  %15378 = vst [vmem:[#allocation107_spill] sm:$0xff] %v13771_v16  ;;  %15379 = vst [vmem:[#allocation108_spill] sm:$0xff] %v13773_v8  ;;  %v6149_v9 = vpop.f32.mrb[93].mxu1 }
 0x5a7   :  { %v13762_v14 = vpop.f32.mrb[96].mxu0  ;;  %v13790_v9 = vld [vmem:[#allocation15 + $0x74] ss:$24 sps:$4 sm:$0xff]  }
 0x5a8   :  { %15375 = vst [vmem:[#allocation104_spill] sm:$0xff] %v13762_v14  ;;  %v3097_v5 = vpop.f32.mrb[97].mxu0  ;;  %15384 = vst [vmem:[#allocation113_spill] sm:$0xff] %v13790_v9 }
 0x5a9   :  { %v13764_v57 = vpop.f32.mrb[98].mxu0  ;;  %v13777_v5 = vpop.f32.mrb[94].mxu1 }
 0x5aa   :  { %15376 = vst [vmem:[#allocation105_spill] sm:$0xff] %v13764_v57  ;;  %v3100_v10 = vpop.f32.mrb[99].mxu0  ;;  %15380 = vst [vmem:[#allocation109_spill] sm:$0xff] %v13777_v5  ;;  %v6152_v25 = vpop.f32.mrb[95].mxu1 }
 0x5ab   :  { %6682 = vmatpush1.bf16.xpose.msra.mxu1 %v13422_v53  ;;  %v13794_v25 = vld.sshfl [vmem:[#allocation10 + $0x8] sm:$0x33 pattern:$0x76325410] }
 0x5ac   :  { %6557 = vmatmul.mubr.bf16.vlgmr.msra.gmra.mrb[192].mxu0 %v13413_v23  ;;  %v13788_v23 = vld [vmem:[#allocation15 + $0x40] ss:$24 sps:$4 sm:$0xff]   ;;  %v13799_v53 = vcombine.high %v13794_v25, %v13794_v25 }
 0x5ad   :  { %6565 = vmatpush1.bf16.xpose.msra.mxu0 %v13766_v33  ;;  %6596 = vmatprep.mubr.bf16.mxu0 %v13428_v2  ;;  %15383 = vst [vmem:[#allocation112_spill] sm:$0xff] %v13788_v23  ;;  %v12722_v33 = vld [vmem:[#allocation16 + $0x14] ss:$24 sps:$4 sm:$0xff]   ;;  %v6155_v12 = vpop.f32.mrb[96].mxu1  ;;  %v12723_v2 = vld [vmem:[#allocation16 + $0x10] ss:$24 sps:$4 sm:$0xff]  }
 0x5ae   :  { %6566 = vmatprep.subr.bf16.mxu0 %v13771_v16  ;;  %6717 = vmatprep.subr.bf16.mxu1 %v12722_v33  ;;  %v6157_v16 = vpop.f32.mrb[97].mxu1  ;;  %15385 = vst [vmem:[#allocation114_spill] sm:$0xff] %v13799_v53 }
 0x5af   :  { %v13783_v54 = vpop.f32.mrb[100].mxu0  ;;  %v13807_v16 = vld [vmem:[#allocation15 + $0x70] ss:$24 sps:$4 sm:$0xff]  }
 0x5b0   :  { %15381 = vst [vmem:[#allocation110_spill] sm:$0xff] %v13783_v54  ;;  %v3105_v10 = vpop.f32.mrb[101].mxu0  ;;  %v12725_v54 = vld [vmem:[#allocation16 + $0x40] ss:$24 sps:$4 sm:$0xff]  }
 0x5b1   :  { %v13785_v14 = vpop.f32.mrb[102].mxu0  ;;  %v6158_v10 = vpop.f32.mrb[98].mxu1 }
 0x5b2   :  { %15382 = vst [vmem:[#allocation111_spill] sm:$0xff] %v13785_v14  ;;  %v3108_v57 = vpop.f32.mrb[103].mxu0  ;;  %v6781_v50 = vpack.c.bf16 %v6158_v10, %v6155_v12  ;;  %v6160_v8 = vpop.f32.mrb[99].mxu1  ;;  %6710 = vmatmul.mubr.bf16.vlgmr.msra.gmra.mrb[192].mxu1 %v13724_v6  ;;  %v15388_v6 = vpack.c.bf16 %v13552_v0, %v13550_v44  ;;  %v15391_v0 = vpack.c.bf16 %v13453_v30, %v13451_v27 }
 0x5b3   :  { %6718 = vmatpush1.bf16.xpose.msra.mxu1 %v12723_v2  ;;  %6749 = vmatprep.mubr.bf16.mxu1 %v13799_v53  ;;  %v12724_v8 = vld [vmem:[#allocation16 + $0x44] ss:$24 sps:$4 sm:$0xff]   ;;  %v15396_v30 = vpack.c.bf16 %v13576_v62, %v13574_v1  ;;  %v15400_v1 = vpack.c.bf16 %v13489_v29, %v13487_v24  ;;  %v15404_v29 = vpack.c.bf16 %v13504_v59, %v13501_v51 }
 0x5b4   :  { %6719 = vmatprep.subr.bf16.mxu1 %v12724_v8  ;;  %v15410_v59 = vpack.c.bf16 %v13672_v3, %v13670_v22  ;;  %v15414_v3 = vpack.c.bf16 %v13636_v55, %v13634_v34 }
 0x5b5   :  { %6567 = vmatpush1.bf16.xpose.msra.mxu0 %v13788_v23  ;;  %v6163_v10 = vpop.f32.mrb[100].mxu1 }
 0x5b6   :  { %6568 = vmatprep.subr.bf16.mxu0 %v13790_v9  ;;  %v6165_v14 = vpop.f32.mrb[101].mxu1 }
 0x5b7   :  { %v13802_v5 = vpop.f32.mrb[104].mxu0 }
 0x5b8   :  { %15386 = vst [vmem:[#allocation115_spill] sm:$0xff] %v13802_v5  ;;  %v3113_v57 = vpop.f32.mrb[105].mxu0  ;;  %v12726_v5 = vld.sshfl [vmem:[#allocation13 + $0x8] sm:$0x33 pattern:$0x76325410] }
 0x5b9   :  { %v13805_v33 = vpop.f32.mrb[106].mxu0  ;;  %v6166_v57 = vpop.f32.mrb[102].mxu1 }
 0x5ba   :  { %15387 = vst [vmem:[#allocation116_spill] sm:$0xff] %v13805_v33  ;;  %v3116_v12 = vpop.f32.mrb[107].mxu0  ;;  %v6782_v2 = vpack.c.bf16 %v6166_v57, %v6163_v10  ;;  %v6168_v9 = vpop.f32.mrb[103].mxu1 }
 0x5bb   :  { %6720 = vmatpush1.bf16.xpose.msra.mxu1 %v12725_v54  ;;  %v12727_v9 = vld [vmem:[#allocation15 + $0x4] ss:$24 sps:$4 sm:$0xff]   ;;  %v15392_v54 = vpack.c.bf16 %v13564_v38, %v13562_v47 }
 0x5bc   :  { %6721 = vmatprep.subr.bf16.mxu1 %v13433_v42 }
 0x5bd   :  { %6569 = vmatpush1.bf16.xpose.msra.mxu0 %v13807_v16  ;;  %v6171_v8 = vpop.f32.mrb[104].mxu1 }
 0x5be   :  { %10294 = vmatprep.subr.bf16.mxu0 %v15388_v6  ;;  %v6173_v44 = vpop.f32.mrb[105].mxu1 }
 0x5bf   :  { %v13816_v23 = vpop.f32.mrb[108].mxu0  ;;  %v6174_v6 = vpop.f32.mrb[106].mxu1  ;;  %v15397_v44 = vpack.c.bf16 %v13477_v61, %v13475_v58  ;;  %v15402_v58 = vpack.c.bf16 %v13648_v35, %v13646_v36  ;;  %v15405_v36 = vpack.c.bf16 %v13660_v49, %v13658_v17  ;;  %v15411_v17 = vpack.c.bf16 %v13624_v63, %v13622_v52 }
 0x5c0   :  { %15389 = vst [vmem:[#allocation117_spill] sm:$0xff] %v13816_v23  ;;  %v3121_v53 = vpop.f32.mrb[109].mxu0  ;;  %v6176_v10 = vpop.f32.mrb[107].mxu1 }
 0x5c1   :  { %v13818_v13 = vpop.f32.mrb[110].mxu0  ;;  %v6783_v53 = vpack.c.bf16 %v6174_v6, %v6171_v8 }
 0x5c2   :  { %15390 = vst [vmem:[#allocation118_spill] sm:$0xff] %v13818_v13  ;;  %v3124_v14 = vpop.f32.mrb[111].mxu0 }
 0x5c3   :  { %6722 = vmatpush1.bf16.xpose.msra.mxu1 %v13431_v41 }
 0x5c4   :  { %6597 = vmatmul.mubr.bf16.vlgmr.msra.gmra.mrb[192].mxu0 %v12726_v5  ;;  %v15394_v5 = vpack.c.bf16 %v13465_v45, %v13463_v40  ;;  %10328 = vmatprep.subr.bf16.mxu1 %v6781_v50  ;;  %v15398_v45 = vpack.c.bf16 %v13588_v31, %v13586_v43  ;;  %v15403_v43 = vpack.c.bf16 %v13600_v7, %v13598_v15 }
 0x5c5   :  { %10295 = vmatpush3.bf16.msra.mxu0 %v15391_v0  ;;  %6837 = vmatprep.mubr.bf16.mxu0 %v12727_v9  ;;  %v6179_v38 = vpop.f32.mrb[108].mxu1 }
 0x5c6   :  { %10296 = vmatprep.subr.bf16.mxu0 %v15392_v54  ;;  %v6181_v8 = vpop.f32.mrb[109].mxu1  ;;  %v15408_v54 = vpack.c.bf16 %v13516_v37, %v13514_v28  ;;  %v15412_v28 = vpack.c.bf16 %v13528_v21, %v13526_v20  ;;  %v15413_v37 = vpack.c.bf16 %v13684_v18, %v13682_v19  ;;  %v15418_v20 = vpack.c.bf16 %v13706_v32, %v13702_v39 }
 0x5c7   :  { %v13829_v57 = vpop.f32.mrb[112].mxu0  ;;  %v6182_v40 = vpop.f32.mrb[110].mxu1 }
 0x5c8   :  { %15393 = vst [vmem:[#allocation119_spill] sm:$0xff] %v13829_v57  ;;  %v3129_v42 = vpop.f32.mrb[113].mxu0  ;;  %v6784_v41 = vpack.c.bf16 %v6182_v40, %v6179_v38  ;;  %v6184_v0 = vpop.f32.mrb[111].mxu1 }
 0x5c9   :  { %10297 = vmatpush3.bf16.msra.mxu0 %v15394_v5  ;;  %v13834_v14 = vpop.f32.mrb[114].mxu0  ;;  %v15416_v5 = vpack.c.bf16 %v13540_v26, %v13538_v56  ;;  %v12729_v56 = vld [vmem:[#allocation15 + $0x34] ss:$24 sps:$4 sm:$0xff]  }
 0x5ca   :  { %15395 = vst [vmem:[#allocation120_spill] sm:$0xff] %v13834_v14  ;;  %10298 = vmatprep.subr.bf16.mxu0 %v15396_v30  ;;  %v3132_v47 = vpop.f32.mrb[115].mxu0  ;;  %6750 = vmatmul.mubr.bf16.vlgmr.msra.gmra.mrb[192].mxu1 %v13794_v25  ;;  %v15406_v25 = vpack.c.bf16 %v13612_v4, %v13610_v11  ;;  %v12728_v30 = vld [vmem:[#allocation15] ss:$24 sps:$4 sm:$0xff]  }
 0x5cb   :  { %10329 = vmatpush3.bf16.msra.mxu1 %v15402_v58  ;;  %6894 = vmatprep.mubr.bf16.mxu1 %v13497_v46  ;;  %v15419_v47 = vld [vmem:[#allocation97_spill] sm:$0xff]  ;;  %v12730_v58 = vld [vmem:[#allocation15 + $0x30] ss:$24 sps:$4 sm:$0xff]  }
 0x5cc   :  { %10330 = vmatprep.subr.bf16.mxu1 %v6782_v2  ;;  %v15420_v38 = vpack.c.bf16 %v13733_v60, %v15419_v47 }
 0x5cd   :  { %10299 = vmatpush3.bf16.msra.mxu0 %v15397_v44  ;;  %v6187_v50 = vpop.f32.mrb[112].mxu1 }
 0x5ce   :  { %10300 = vmatprep.subr.bf16.mxu0 %v15398_v45  ;;  %v6189_v24 = vpop.f32.mrb[113].mxu1  ;;  %v15421_v45 = vld [vmem:[#allocation103_spill] sm:$0xff] }
 0x5cf   :  { %v13848_v6 = vpop.f32.mrb[116].mxu0  ;;  %10331 = vmatpush3.bf16.msra.mxu1 %v15405_v36  ;;  %v6190_v35 = vpop.f32.mrb[114].mxu1 }
 0x5d0   :  { %15399 = vst [vmem:[#allocation121_spill] sm:$0xff] %v13848_v6  ;;  %v3137_v9 = vpop.f32.mrb[117].mxu0  ;;  %v6785_v15 = vpack.c.bf16 %v6190_v35, %v6187_v50  ;;  %10332 = vmatprep.subr.bf16.mxu1 %v6783_v53  ;;  %v6192_v7 = vpop.f32.mrb[115].mxu1 }
 0x5d1   :  { %10301 = vmatpush3.bf16.msra.mxu0 %v15400_v1  ;;  %v13854_v62 = vpop.f32.mrb[118].mxu0 }
 0x5d2   :  { %15401 = vst [vmem:[#allocation122_spill] sm:$0xff] %v13854_v62  ;;  %10302 = vmatprep.subr.bf16.mxu0 %v15403_v43  ;;  %v3140_v31 = vpop.f32.mrb[119].mxu0 }
 0x5d3   :  { %10333 = vmatpush3.bf16.msra.mxu1 %v15410_v59  ;;  %v12731_v31 = vld [vmem:[#allocation15 + $0x64] ss:$24 sps:$4 sm:$0xff]  }
 0x5d4   :  { %10334 = vmatprep.subr.bf16.mxu1 %v6784_v41  ;;  %v15422_v41 = vpack.c.bf16 %v13757_v48, %v15421_v45  ;;  %v15423_v48 = vld [vmem:[#allocation109_spill] sm:$0xff] }
 0x5d5   :  { %10303 = vmatpush3.bf16.msra.mxu0 %v15404_v29  ;;  %v6195_v49 = vpop.f32.mrb[116].mxu1 }
 0x5d6   :  { %10304 = vmatprep.subr.bf16.mxu0 %v15406_v25  ;;  %v6197_v53 = vpop.f32.mrb[117].mxu1  ;;  %v15424_v25 = vld [vmem:[#allocation108_spill] sm:$0xff] }
 0x5d7   :  { %v13874_v2 = vpop.f32.mrb[120].mxu0  ;;  %10335 = vmatpush3.bf16.msra.mxu1 %v15413_v37  ;;  %v6198_v22 = vpop.f32.mrb[118].mxu1  ;;  %v15427_v53 = vld [vmem:[#allocation90_spill] sm:$0xff] }
 0x5d8   :  { %15407 = vst [vmem:[#allocation123_spill] sm:$0xff] %v13874_v2  ;;  %v3145_v46 = vpop.f32.mrb[121].mxu0  ;;  %v6786_v10 = vpack.c.bf16 %v6198_v22, %v6195_v49  ;;  %10336 = vmatprep.subr.bf16.mxu1 %v6785_v15  ;;  %v6200_v52 = vpop.f32.mrb[119].mxu1  ;;  %v15425_v15 = vpack.c.bf16 %v15423_v48, %v15424_v25 }
 0x5d9   :  { %10305 = vmatpush3.bf16.msra.mxu0 %v15408_v54  ;;  %v13879_v51 = vpop.f32.mrb[122].mxu0 }
 0x5da   :  { %15409 = vst [vmem:[#allocation124_spill] sm:$0xff] %v13879_v51  ;;  %10306 = vmatprep.subr.bf16.mxu0 %v15411_v17  ;;  %v3148_v4 = vpop.f32.mrb[123].mxu0  ;;  %v15426_v17 = vld [vmem:[#allocation88_spill] sm:$0xff] }
 0x5db   :  { %10337 = vmatpush3.bf16.msra.mxu1 %v15418_v20  ;;  %v12732_v4 = vld [vmem:[#allocation15 + $0x60] ss:$24 sps:$4 sm:$0xff]  }
 0x5dc   :  { %10338 = vmatprep.subr.bf16.mxu1 %v6786_v10 }
 0x5dd   :  { %10307 = vmatpush3.bf16.msra.mxu0 %v15412_v28  ;;  %v6203_v18 = vpop.f32.mrb[120].mxu1  ;;  %v15428_v28 = vld [vmem:[#allocation102_spill] sm:$0xff] }
 0x5de   :  { %10308 = vmatprep.subr.bf16.mxu0 %v15414_v3  ;;  %v6205_v19 = vpop.f32.mrb[121].mxu1 }
 0x5df   :  { %v13898_v63 = vpop.f32.mrb[124].mxu0  ;;  %10339 = vmatpush3.bf16.msra.mxu1 %v15420_v38  ;;  %v6206_v26 = vpop.f32.mrb[122].mxu1 }
 0x5e0   :  { %15415 = vst [vmem:[#allocation125_spill] sm:$0xff] %v13898_v63  ;;  %v3153_v42 = vpop.f32.mrb[125].mxu0  ;;  %v6787_v8 = vpack.c.bf16 %v6206_v26, %v6203_v18  ;;  %v6208_v44 = vpop.f32.mrb[123].mxu1  ;;  %v15429_v18 = vld [vmem:[#allocation94_spill] sm:$0xff] }
 0x5e1   :  { %10309 = vmatpush3.bf16.msra.mxu0 %v15416_v5  ;;  %v13903_v21 = vpop.f32.mrb[126].mxu0 }
 0x5e2   :  { %15417 = vst [vmem:[#allocation126_spill] sm:$0xff] %v13903_v21  ;;  %v3156_v55 = vpop.f32.mrb[127].mxu0  ;;  %10340 = vmatprep.subr.bf16.mxu1 %v6787_v8 }
 0x5e3   :  { %10341 = vmatpush3.bf16.msra.mxu1 %v15422_v41 }
 0x5e4   :  { %6838 = vmatmul.mubr.bf16.vlgmr.msra.gmra.mrb[196].mxu0 %v12728_v30  ;;  %v15430_v30 = vld [vmem:[#allocation96_spill] sm:$0xff] }
 0x5e5   :  { %6845 = vmatprep.mubr.bf16.mxu0 %v12729_v56  ;;  %v6211_v9 = vpop.f32.mrb[124].mxu1 }
 0x5e6   :  { %v6213_v1 = vpop.f32.mrb[125].mxu1 }
 0x5e7   :  { %v13913_v32 = vpop.f32.mrb[128].mxu0  ;;  %v6214_v43 = vpop.f32.mrb[126].mxu1 }
 0x5e8   :  { %v3161_v39 = vpop.f32.mrb[129].mxu0  ;;  %v6788_v50 = vpack.c.bf16 %v6214_v43, %v6211_v9  ;;  %v6216_v24 = vpop.f32.mrb[127].mxu1 }
 0x5e9   :  { %v13915_v40 = vpop.f32.mrb[130].mxu0 }
 0x5ea   :  { %v3164_v60 = vpop.f32.mrb[131].mxu0  ;;  %10342 = vmatprep.subr.bf16.mxu1 %v6788_v50 }
 0x5eb   :  { %10343 = vmatpush3.bf16.msra.mxu1 %v15425_v15  ;;  %v15431_v60 = vld [vmem:[#allocation101_spill] sm:$0xff] }
 0x5ec   :  { %6846 = vmatmul.mubr.bf16.gmra.mrb[200].mxu0 %v12730_v58 }
 0x5ed   :  { %6853 = vmatprep.mubr.bf16.mxu0 %v12731_v31  ;;  %v13931_v54 = vpop.f32.mrb[128].mxu1 }
 0x5ee   :  { %v6221_v59 = vpop.f32.mrb[129].mxu1  ;;  %6895 = vmatmul.mubr.bf16.vlgmr.msra.gmra.mrb[196].mxu1 %v15426_v17 }
 0x5ef   :  { %v13922_v29 = vpop.f32.mrb[132].mxu0  ;;  %v13934_v49 = vpop.f32.mrb[130].mxu1  ;;  %6902 = vmatprep.mubr.bf16.mxu1 %v15427_v53 }
 0x5f0   :  { %v3169_v36 = vpop.f32.mrb[133].mxu0  ;;  %v6789_v37 = vpack.c.bf16 %v13934_v49, %v13931_v54  ;;  %v6224_v22 = vpop.f32.mrb[131].mxu1 }
 0x5f1   :  { %v13924_v35 = vpop.f32.mrb[134].mxu0 }
 0x5f2   :  { %v3172_v46 = vpop.f32.mrb[135].mxu0 }
 0x5f4   :  { %6854 = vmatmul.mubr.bf16.gmra.mrb[204].mxu0 %v12732_v4 }
 0x5f5   :  { %6951 = vmatprep.mubr.bf16.mxu0 %v15428_v28  ;;  %v13946_v20 = vpop.f32.mrb[132].mxu1 }
 0x5f6   :  { %v6229_v55 = vpop.f32.mrb[133].mxu1  ;;  %6903 = vmatmul.mubr.bf16.gmra.mrb[200].mxu1 %v15429_v18 }
 0x5f7   :  { %v13940_v3 = vpop.f32.mrb[136].mxu0  ;;  %v13949_v19 = vpop.f32.mrb[134].mxu1  ;;  %6910 = vmatprep.mubr.bf16.mxu1 %v15430_v30 }
 0x5f8   :  { %v3177_v10 = vpop.f32.mrb[137].mxu0  ;;  %v6790_v47 = vpack.c.bf16 %v13949_v19, %v13946_v20  ;;  %v6232_v38 = vpop.f32.mrb[135].mxu1 }
 0x5f9   :  { %v13942_v52 = vpop.f32.mrb[138].mxu0 }
 0x5fa   :  { %v3180_v5 = vpop.f32.mrb[139].mxu0 }
 0x5fd   :  { %v13960_v45 = vpop.f32.mrb[136].mxu1 }
 0x5fe   :  { %v6237_v41 = vpop.f32.mrb[137].mxu1  ;;  %6911 = vmatmul.mubr.bf16.gmra.mrb[204].mxu1 %v15431_v60 }
 0x5ff   :  { %v13954_v26 = vpop.f32.mrb[140].mxu0  ;;  %v13963_v9 = vpop.f32.mrb[138].mxu1 }
 0x600   :  { %v3185_v56 = vpop.f32.mrb[141].mxu0  ;;  %v6791_v1 = vpack.c.bf16 %v13963_v9, %v13960_v45  ;;  %v6240_v58 = vpop.f32.mrb[139].mxu1 }
 0x601   :  { %v13956_v8 = vpop.f32.mrb[142].mxu0 }
 0x602   :  { %v3188_v39 = vpop.f32.mrb[143].mxu0 }
 0x605   :  { %v13973_v48 = vpop.f32.mrb[140].mxu1 }
 0x606   :  { %v6245_v25 = vpop.f32.mrb[141].mxu1 }
 0x607   :  { %v13967_v43 = vpop.f32.mrb[144].mxu0  ;;  %v13975_v15 = vpop.f32.mrb[142].mxu1 }
 0x608   :  { %v3193_v31 = vpop.f32.mrb[145].mxu0  ;;  %v6248_v59 = vpop.f32.mrb[143].mxu1 }
 0x609   :  { %v13969_v50 = vpop.f32.mrb[146].mxu0 }
 0x60a   :  { %v3196_v36 = vpop.f32.mrb[147].mxu0 }
 0x60d   :  { %v13985_v10 = vpop.f32.mrb[144].mxu1 }
 0x60e   :  { %v6253_v5 = vpop.f32.mrb[145].mxu1 }
 0x60f   :  { %v13979_v17 = vpop.f32.mrb[148].mxu0  ;;  %v13987_v55 = vpop.f32.mrb[146].mxu1 }
 0x610   :  { %15432 = vst [vmem:[#allocation97_spill] sm:$0xff] %v13979_v17  ;;  %v3201_v4 = vpop.f32.mrb[149].mxu0  ;;  %v6256_v30 = vpop.f32.mrb[147].mxu1 }
 0x611   :  { %v13981_v53 = vpop.f32.mrb[150].mxu0 }
 0x612   :  { %15433 = vst [vmem:[#allocation103_spill] sm:$0xff] %v13981_v53  ;;  %v3204_v22 = vpop.f32.mrb[151].mxu0 }
 0x615   :  { %v13997_v58 = vpop.f32.mrb[148].mxu1 }
 0x616   :  { %v6261_v31 = vpop.f32.mrb[149].mxu1 }
 0x617   :  { %v13991_v38 = vpop.f32.mrb[152].mxu0  ;;  %v13999_v36 = vpop.f32.mrb[150].mxu1 }
 0x618   :  { %15434 = vst [vmem:[#allocation109_spill] sm:$0xff] %v13991_v38  ;;  %v3209_v56 = vpop.f32.mrb[153].mxu0  ;;  %v6264_v59 = vpop.f32.mrb[151].mxu1 }
 0x619   :  { %v13993_v39 = vpop.f32.mrb[154].mxu0 }
 0x61a   :  { %15435 = vst [vmem:[#allocation108_spill] sm:$0xff] %v13993_v39  ;;  %v3212_v60 = vpop.f32.mrb[155].mxu0 }
 0x61d   :  { %v14009_v34 = vpop.f32.mrb[152].mxu1 }
 0x61e   :  { %v6269_v60 = vpop.f32.mrb[153].mxu1 }
 0x61f   :  { %v14003_v4 = vpop.f32.mrb[156].mxu0  ;;  %v14011_v11 = vpop.f32.mrb[154].mxu1 }
 0x620   :  { %15436 = vst [vmem:[#allocation88_spill] sm:$0xff] %v14003_v4  ;;  %v3217_v22 = vpop.f32.mrb[157].mxu0  ;;  %v6272_v61 = vpop.f32.mrb[155].mxu1 }
 0x621   :  { %v14005_v5 = vpop.f32.mrb[158].mxu0 }
 0x622   :  { %15437 = vst [vmem:[#allocation90_spill] sm:$0xff] %v14005_v5  ;;  %v3220_v56 = vpop.f32.mrb[159].mxu0 }
 0x625   :  { %v14021_v30 = vpop.f32.mrb[156].mxu1 }
 0x626   :  { %v6277_v56 = vpop.f32.mrb[157].mxu1 }
 0x627   :  { %v14015_v27 = vpop.f32.mrb[160].mxu0  ;;  %v14023_v28 = vpop.f32.mrb[158].mxu1 }
 0x628   :  { %v3225_v59 = vpop.f32.mrb[161].mxu0  ;;  %v6280_v24 = vpop.f32.mrb[159].mxu1 }
 0x629   :  { %v14017_v12 = vpop.f32.mrb[162].mxu0 }
 0x62a   :  { %v3228_v41 = vpop.f32.mrb[163].mxu0 }
 0x62d   :  { %v6283_v0 = vpop.f32.mrb[160].mxu1 }
 0x62e   :  { %v6285_v41 = vpop.f32.mrb[161].mxu1 }
 0x62f   :  { %v14027_v44 = vpop.f32.mrb[164].mxu0  ;;  %v6286_v22 = vpop.f32.mrb[162].mxu1 }
 0x630   :  { %v3233_v61 = vpop.f32.mrb[165].mxu0  ;;  %v6797_v31 = vpack.c.bf16 %v6286_v22, %v6283_v0  ;;  %v6288_v56 = vpop.f32.mrb[163].mxu1 }
 0x631   :  { %v14029_v42 = vpop.f32.mrb[166].mxu0 }
 0x632   :  { %v3236_v7 = vpop.f32.mrb[167].mxu0  ;;  %10362 = vmatprep.subr.bf16.mxu0 %v6797_v31 }
 0x633   :  { %10363 = vmatpush3.bf16.msra.mxu0 %v6789_v37 }
 0x635   :  { %v6291_v7 = vpop.f32.mrb[164].mxu1 }
 0x636   :  { %v6293_v59 = vpop.f32.mrb[165].mxu1 }
 0x637   :  { %v14033_v25 = vpop.f32.mrb[168].mxu0  ;;  %v6294_v41 = vpop.f32.mrb[166].mxu1 }
 0x638   :  { %v3241_v18 = vpop.f32.mrb[169].mxu0  ;;  %v6798_v46 = vpack.c.bf16 %v6294_v41, %v6291_v7  ;;  %v6296_v0 = vpop.f32.mrb[167].mxu1 }
 0x639   :  { %v14035_v60 = vpop.f32.mrb[170].mxu0 }
 0x63a   :  { %v3244_v61 = vpop.f32.mrb[171].mxu0  ;;  %10364 = vmatprep.subr.bf16.mxu0 %v6798_v46 }
 0x63b   :  { %10365 = vmatpush3.bf16.msra.mxu0 %v6790_v47 }
 0x63d   :  { %v6299_v37 = vpop.f32.mrb[168].mxu1 }
 0x63e   :  { %v6301_v31 = vpop.f32.mrb[169].mxu1 }
 0x63f   :  { %v14042_v22 = vpop.f32.mrb[172].mxu0  ;;  %v6302_v59 = vpop.f32.mrb[170].mxu1 }
 0x640   :  { %v3249_v56 = vpop.f32.mrb[173].mxu0  ;;  %v6799_v61 = vpack.c.bf16 %v6302_v59, %v6299_v37  ;;  %v6304_v7 = vpop.f32.mrb[171].mxu1 }
 0x641   :  { %v14044_v18 = vpop.f32.mrb[174].mxu0 }
 0x642   :  { %v3252_v49 = vpop.f32.mrb[175].mxu0  ;;  %10366 = vmatprep.subr.bf16.mxu0 %v6799_v61 }
 0x643   :  { %10367 = vmatpush3.bf16.msra.mxu0 %v6791_v1 }
 0x645   :  { %v6307_v47 = vpop.f32.mrb[172].mxu1 }
 0x646   :  { %v6309_v56 = vpop.f32.mrb[173].mxu1 }
 0x647   :  { %v14051_v41 = vpop.f32.mrb[176].mxu0  ;;  %v6310_v49 = vpop.f32.mrb[174].mxu1 }
 0x648   :  { %v3257_v0 = vpop.f32.mrb[177].mxu0  ;;  %v6800_v31 = vpack.c.bf16 %v6310_v49, %v6307_v47  ;;  %v6312_v37 = vpop.f32.mrb[175].mxu1 }
 0x649   :  { %v14053_v46 = vpop.f32.mrb[178].mxu0  ;;  %v15439_v0 = vpack.c.bf16 %v13975_v15, %v13973_v48 }
 0x64a   :  { %v3260_v19 = vpop.f32.mrb[179].mxu0  ;;  %10368 = vmatprep.subr.bf16.mxu0 %v6800_v31 }
 0x64b   :  { %10369 = vmatpush3.bf16.msra.mxu0 %v15439_v0 }
 0x64d   :  { %v6315_v1 = vpop.f32.mrb[176].mxu1 }
 0x64e   :  { %v6317_v19 = vpop.f32.mrb[177].mxu1 }
 0x64f   :  { %v14060_v59 = vpop.f32.mrb[180].mxu0  ;;  %v6318_v56 = vpop.f32.mrb[178].mxu1 }
 0x650   :  { %15438 = vst [vmem:[#allocation102_spill] sm:$0xff] %v14060_v59  ;;  %v3265_v7 = vpop.f32.mrb[181].mxu0  ;;  %v6801_v20 = vpack.c.bf16 %v6318_v56, %v6315_v1  ;;  %v6320_v47 = vpop.f32.mrb[179].mxu1 }
 0x651   :  { %v14062_v61 = vpop.f32.mrb[182].mxu0  ;;  %v15442_v7 = vpack.c.bf16 %v13987_v55, %v13985_v10 }
 0x652   :  { %v3268_v9 = vpop.f32.mrb[183].mxu0  ;;  %10370 = vmatprep.subr.bf16.mxu0 %v6801_v20 }
 0x653   :  { %10371 = vmatpush3.bf16.msra.mxu0 %v15442_v7 }
 0x655   :  { %v6323_v0 = vpop.f32.mrb[180].mxu1 }
 0x656   :  { %v6325_v9 = vpop.f32.mrb[181].mxu1 }
 0x657   :  { %v14069_v49 = vpop.f32.mrb[184].mxu0  ;;  %v6326_v19 = vpop.f32.mrb[182].mxu1 }
 0x658   :  { %15440 = vst [vmem:[#allocation94_spill] sm:$0xff] %v14069_v49  ;;  %v3273_v37 = vpop.f32.mrb[185].mxu0  ;;  %v6802_v45 = vpack.c.bf16 %v6326_v19, %v6323_v0  ;;  %v6328_v1 = vpop.f32.mrb[183].mxu1  ;;  %v15446_v19 = vpack.c.bf16 %v14011_v11, %v14009_v34 }
 0x659   :  { %v14071_v31 = vpop.f32.mrb[186].mxu0  ;;  %v15445_v37 = vpack.c.bf16 %v13999_v36, %v13997_v58  ;;  %v15447_v36 = vpack.c.bf16 %v14023_v28, %v14021_v30 }
 0x65a   :  { %15441 = vst [vmem:[#allocation96_spill] sm:$0xff] %v14071_v31  ;;  %v3276_v15 = vpop.f32.mrb[187].mxu0  ;;  %10372 = vmatprep.subr.bf16.mxu0 %v6802_v45 }
 0x65b   :  { %10373 = vmatpush3.bf16.msra.mxu0 %v15445_v37  ;;  %v15448_v37 = vld [vmem:[#allocation106_spill] sm:$0xff] }
 0x65d   :  { %v6331_v7 = vpop.f32.mrb[184].mxu1 }
 0x65e   :  { %v6333_v15 = vpop.f32.mrb[185].mxu1 }
 0x65f   :  { %v14078_v56 = vpop.f32.mrb[188].mxu0  ;;  %v6334_v9 = vpop.f32.mrb[186].mxu1 }
 0x660   :  { %15443 = vst [vmem:[#allocation101_spill] sm:$0xff] %v14078_v56  ;;  %v3281_v47 = vpop.f32.mrb[189].mxu0  ;;  %v6803_v48 = vpack.c.bf16 %v6334_v9, %v6331_v7  ;;  %v6336_v0 = vpop.f32.mrb[187].mxu1  ;;  %v15450_v7 = vld [vmem:[#allocation112_spill] sm:$0xff] }
 0x661   :  { %v14080_v20 = vpop.f32.mrb[190].mxu0 }
 0x662   :  { %15444 = vst [vmem:[#allocation127_spill] sm:$0xff] %v14080_v20  ;;  %v3284_v55 = vpop.f32.mrb[191].mxu0  ;;  %10374 = vmatprep.subr.bf16.mxu0 %v6803_v48  ;;  %v15451_v48 = vld [vmem:[#allocation113_spill] sm:$0xff] }
 0x663   :  { %10375 = vmatpush3.bf16.msra.mxu0 %v15446_v19  ;;  %v15449_v55 = vld [vmem:[#allocation107_spill] sm:$0xff] }
 0x665   :  { %v6339_v45 = vpop.f32.mrb[188].mxu1 }
 0x666   :  { %v6341_v1 = vpop.f32.mrb[189].mxu1 }
 0x667   :  { %v6342_v47 = vpop.f32.mrb[190].mxu1 }
 0x668   :  { %v6804_v54 = vpack.c.bf16 %v6342_v47, %v6339_v45  ;;  %v6344_v58 = vpop.f32.mrb[191].mxu1 }
 0x66a   :  { %10376 = vmatprep.subr.bf16.mxu0 %v6804_v54 }
 0x66b   :  { %10377 = vmatpush3.bf16.msra.mxu0 %v15447_v36 }
 0x66e   :  { %6952 = vmatmul.mubr.bf16.vlgmr.msra.gmra.mrb[208].mxu0 %v15448_v37 }
 0x66f   :  { %6959 = vmatprep.mubr.bf16.mxu0 %v15449_v55 }
 0x676   :  { %6960 = vmatmul.mubr.bf16.gmra.mrb[212].mxu0 %v15450_v7 }
 0x677   :  { %6967 = vmatprep.mubr.bf16.mxu0 %v15451_v48 }
 0x67e   :  { %6968 = vmatmul.mubr.bf16.gmra.mrb[216].mxu0 %v13807_v16 }
 0x697   :  { %v6598_v11 = vpop.f32.mrb[192].mxu0 }
 0x698   :  { %7009 = vst.msk [vmem:[#allocation2] sm:$0xf] %vm7008_vm0, %v6598_v11  ;;  %7017 = vrot.lane.b32.xlu0 %v6598_v11, %s13093_s13  ;;  %7070 = vrot.lane.b32.xlu1 %v6598_v11, %s13094_s9  ;;  %v6600_v34 = vpop.f32.mrb[193].mxu0 }
 0x699   :  { %v6601_v28 = vpop.f32.mrb[194].mxu0 }
 0x69a   :  { %v6602_v30 = vpop.f32.mrb[195].mxu0 }
 0x69c   :  { %7046 = vrot.lane.b32.xlu0 %v6598_v11, %s13095_s8 }
 0x69d   :  { %v6751_v54 = vpop.f32.mrb[192].mxu1 }
 0x69e   :  { %7095 = vst.msk [vmem:[#allocation3] sm:$0xf] %vm7094_vm1, %v6751_v54  ;;  %7104 = vrot.lane.b32.xlu1 %v6751_v54, %s13096_s18  ;;  %v6753_v16 = vpop.f32.mrb[193].mxu1 }
 0x69f   :  { %v6754_v15 = vpop.f32.mrb[194].mxu1 }
 0x6a0   :  { %7138 = vrot.lane.b32.xlu0 %v6751_v54, %s13097_s26  ;;  %v6755_v9 = vpop.f32.mrb[195].mxu1 }
 0x6a2   :  { %7166 = vrot.lane.b32.xlu1 %v6751_v54, %s13098_s7 }
 0x6b7   :  { %v10310_v0 = vpop.f32.mrb[196].mxu0 }
 0x6b8   :  { %v10311_v19 = vpop.f32.mrb[197].mxu0 }
 0x6b9   :  { %v10312_v45 = vadd.f32 %v10311_v19, %v10310_v0  ;;  %v10313_v1 = vpop.f32.mrb[198].mxu0 }
 0x6ba   :  { %v10314_v47 = vpop.f32.mrb[199].mxu0 }
 0x6bb   :  { %v10315_v58 = vadd.f32 %v10314_v47, %v10313_v1 }
 0x6bf   :  { %v10316_v36 = vpop.f32.mrb[200].mxu0 }
 0x6c0   :  { %v10317_v37 = vpop.f32.mrb[201].mxu0 }
 0x6c1   :  { %v10318_v55 = vadd.f32 %v10317_v37, %v10316_v36  ;;  %v10319_v7 = vpop.f32.mrb[202].mxu0  ;;  %v10344_v34 = vpop.f32.mrb[196].mxu1 }
 0x6c2   :  { %v10320_v48 = vpop.f32.mrb[203].mxu0  ;;  %v10345_v30 = vpop.f32.mrb[197].mxu1 }
 0x6c3   :  { %v10321_v11 = vadd.f32 %v10320_v48, %v10319_v7  ;;  %v10346_v15 = vadd.f32 %v10345_v30, %v10344_v34  ;;  %v10347_v9 = vpop.f32.mrb[198].mxu1 }
 0x6c4   :  { %v10348_v24 = vpop.f32.mrb[199].mxu1 }
 0x6c5   :  { %v6897_v0 = vadd.f32 %v10346_v15, %v10312_v45  ;;  %v10349_v19 = vadd.f32 %v10348_v24, %v10347_v9 }
 0x6c7   :  { %v10322_v28 = vpop.f32.mrb[204].mxu0  ;;  %v6900_v1 = vadd.f32 %v10349_v19, %v10315_v58 }
 0x6c8   :  { %v10323_v16 = vpop.f32.mrb[205].mxu0 }
 0x6c9   :  { %v10324_v10 = vadd.f32 %v10323_v16, %v10322_v28  ;;  %v10325_v54 = vpop.f32.mrb[206].mxu0  ;;  %v10350_v47 = vpop.f32.mrb[200].mxu1 }
 0x6ca   :  { %v10326_v63 = vpop.f32.mrb[207].mxu0  ;;  %v10351_v2 = vpop.f32.mrb[201].mxu1 }
 0x6cb   :  { %v10327_v21 = vadd.f32 %v10326_v63, %v10325_v54  ;;  %v10352_v36 = vadd.f32 %v10351_v2, %v10350_v47  ;;  %v10353_v37 = vpop.f32.mrb[202].mxu1 }
 0x6cc   :  { %v10354_v51 = vpop.f32.mrb[203].mxu1 }
 0x6cd   :  { %v6905_v7 = vadd.f32 %v10352_v36, %v10318_v55  ;;  %v10355_v48 = vadd.f32 %v10354_v51, %v10353_v37 }
 0x6cf   :  { %v6908_v6 = vadd.f32 %v10355_v48, %v10321_v11 }
 0x6d1   :  { %v10356_v62 = vpop.f32.mrb[204].mxu1 }
 0x6d2   :  { %v10357_v57 = vpop.f32.mrb[205].mxu1 }
 0x6d3   :  { %v10358_v34 = vadd.f32 %v10357_v57, %v10356_v62  ;;  %v10359_v30 = vpop.f32.mrb[206].mxu1 }
 0x6d4   :  { %v10360_v28 = vpop.f32.mrb[207].mxu1 }
 0x6d5   :  { %v6913_v16 = vadd.f32 %v10358_v34, %v10324_v10  ;;  %v10361_v14 = vadd.f32 %v10360_v28, %v10359_v30 }
 0x6d7   :  { %v6916_v23 = vadd.f32 %v10361_v14, %v10327_v21 }
 0x70a   :  { %v7018_v45 = vpop.permute.xlu0 %7017  ;;  %v7071_v24 = vpop.permute.xlu1 %7070 }
 0x70b   :  { %7020 = vst.msk [vmem:[#allocation2 + $0x4] sm:$0xf] %vm7008_vm0, %v7018_v45  ;;  %7073 = vst.msk [vmem:[#allocation2 + $0xc] sm:$0xf] %vm7008_vm0, %v7071_v24 }
 0x70e   :  { %v7047_v2 = vpop.permute.xlu0 %7046 }
 0x70f   :  { %7049 = vst.msk [vmem:[#allocation2 + $0x8] sm:$0xf] %vm7008_vm0, %v7047_v2 }
 0x710   :  { %v7105_v63 = vpop.permute.xlu1 %7104 }
 0x711   :  { %7107 = vst.msk [vmem:[#allocation3 + $0x4] sm:$0xf] %vm7094_vm1, %v7105_v63 }
 0x712   :  { %v7139_v51 = vpop.permute.xlu0 %7138 }
 0x713   :  { %7141 = vst.msk [vmem:[#allocation3 + $0x8] sm:$0xf] %vm7094_vm1, %v7139_v51 }
 0x714   :  { %v7167_v57 = vpop.permute.xlu1 %7166 }
 0x715   :  { %7169 = vst.msk [vmem:[#allocation3 + $0xc] sm:$0xf] %vm7094_vm1, %v7167_v57 }
 0x716   :  { %v7207_v63 = vld [vmem:[#allocation2 + $0x8] sm:$0xff] }
 0x717   :  { %v14172_v51 = vmul.f32 100.0, %v7207_v63 }
 0x719   :  { %v7213_v57 = vsel %vm7010_vm3, %v14172_v51, -inf }
 0x741   :  { %v10378_v62 = vpop.f32.mrb[208].mxu0 }
 0x742   :  { %v10379_v14 = vpop.f32.mrb[209].mxu0 }
 0x743   :  { %v10380_v21 = vadd.f32 %v10379_v14, %v10378_v62  ;;  %v10381_v10 = vpop.f32.mrb[210].mxu0  ;;  %v7325_v62 = vld [vmem:[#allocation3] sm:$0xff] }
 0x744   :  { %v10382_v58 = vpop.f32.mrb[211].mxu0  ;;  %v14180_v14 = vmul.f32 100.0, %v7325_v62 }
 0x745   :  { %v14112_v55 = vadd.f32 %v10380_v21, %v6897_v0  ;;  %v10383_v11 = vadd.f32 %v10382_v58, %v10381_v10  ;;  %v7326_v21 = vld [vmem:[#allocation3 + $0x8] sm:$0xff] }
 0x746   :  { %v7329_v10 = vsel %vm7096_vm2, %v14180_v14, -inf  ;;  %v14184_v58 = vmul.f32 100.0, %v7326_v21 }
 0x747   :  { %15452 = vst [vmem:[#allocation106_spill] sm:$0xff] %v14112_v55  ;;  %7097 = vst.msk [vmem:[#allocation4] sm:$0xff] %vm7096_vm2, %v14112_v55  ;;  %v14116_v15 = vadd.f32 %v10383_v11, %v6900_v1  ;;  %7114 = vrot.lane.b32.xlu0 %v14112_v55, %s13096_s18 }
 0x749   :  { %15453 = vst [vmem:[#allocation107_spill] sm:$0xff] %v14116_v15  ;;  %7098 = vst.msk [vmem:[#allocation4 + $0x8] sm:$0xff] %vm7096_vm2, %v14116_v15  ;;  %v10384_v9 = vpop.f32.mrb[212].mxu0  ;;  %7116 = vrot.lane.b32.xlu1 %v14116_v15, %s13096_s18 }
 0x74a   :  { %v10385_v54 = vpop.f32.mrb[213].mxu0 }
 0x74b   :  { %v10386_v0 = vadd.f32 %v10385_v54, %v10384_v9  ;;  %v10387_v19 = vpop.f32.mrb[214].mxu0  ;;  %7142 = vrot.lane.b32.xlu0 %v14112_v55, %s13097_s26 }
 0x74c   :  { %v10388_v47 = vpop.f32.mrb[215].mxu0 }
 0x74d   :  { %v14126_v36 = vadd.f32 %v10386_v0, %v6905_v7  ;;  %v10389_v1 = vadd.f32 %v10388_v47, %v10387_v19  ;;  %7144 = vrot.lane.b32.xlu1 %v14116_v15, %s13097_s26  ;;  %v7332_v19 = vsel %vm7096_vm2, %v14184_v58, -inf }
 0x74e   :  { %v7444_v11 = vld [vmem:[#allocation4] sm:$0xff] }
 0x74f   :  { %15454 = vst [vmem:[#allocation112_spill] sm:$0xff] %v14126_v36  ;;  %7099 = vst.msk [vmem:[#allocation4 + $0x10] sm:$0xff] %vm7096_vm2, %v14126_v36  ;;  %v14132_v37 = vadd.f32 %v10389_v1, %v6908_v6  ;;  %7170 = vrot.lane.b32.xlu0 %v14112_v55, %s13098_s7  ;;  %v14186_v0 = vmul.f32 100.0, %v7444_v11 }
 0x750   :  { %v7445_v9 = vld [vmem:[#allocation4 + $0x8] sm:$0xff] }
 0x751   :  { %15455 = vst [vmem:[#allocation113_spill] sm:$0xff] %v14132_v37  ;;  %7100 = vst.msk [vmem:[#allocation4 + $0x18] sm:$0xff] %vm7096_vm2, %v14132_v37  ;;  %v10390_v48 = vpop.f32.mrb[216].mxu0  ;;  %7172 = vrot.lane.b32.xlu1 %v14116_v15, %s13098_s7  ;;  %v14191_v47 = vmul.f32 100.0, %v7445_v9 }
 0x752   :  { %v10391_v7 = vpop.f32.mrb[217].mxu0 }
 0x753   :  { %v10392_v34 = vadd.f32 %v10391_v7, %v10390_v48  ;;  %v10393_v30 = vpop.f32.mrb[218].mxu0  ;;  %7118 = vrot.lane.b32.xlu0 %v14126_v36, %s13096_s18 }
 0x754   :  { %v10394_v28 = vpop.f32.mrb[219].mxu0 }
 0x755   :  { %v14142_v45 = vadd.f32 %v10392_v34, %v6913_v16  ;;  %v10395_v6 = vadd.f32 %v10394_v28, %v10393_v30  ;;  %7120 = vrot.lane.b32.xlu1 %v14132_v37, %s13096_s18  ;;  %v7492_v30 = vsel %vm7096_vm2, %v14186_v0, -inf }
 0x756   :  { %v7446_v1 = vld [vmem:[#allocation4 + $0x10] sm:$0xff] }
 0x757   :  { %15456 = vst [vmem:[#allocation128_spill] sm:$0xff] %v14142_v45  ;;  %7101 = vst.msk [vmem:[#allocation4 + $0x20] sm:$0xff] %vm7096_vm2, %v14142_v45  ;;  %v14148_v24 = vadd.f32 %v10395_v6, %v6916_v23  ;;  %7146 = vrot.lane.b32.xlu0 %v14126_v36, %s13097_s26  ;;  %v7206_v23 = vld [vmem:[#allocation2] sm:$0xff]  ;;  %v14196_v28 = vmul.f32 100.0, %v7446_v1  ;;  %v7495_v6 = vsel %vm7096_vm2, %v14191_v47, -inf }
 0x758   :  { %v14168_v16 = vmul.f32 100.0, %v7206_v23  ;;  %v7447_v7 = vld [vmem:[#allocation4 + $0x18] sm:$0xff] }
 0x759   :  { %15457 = vst [vmem:[#allocation129_spill] sm:$0xff] %v14148_v24  ;;  %7102 = vst.msk [vmem:[#allocation4 + $0x28] sm:$0xff] %vm7096_vm2, %v14148_v24  ;;  %7148 = vrot.lane.b32.xlu1 %v14132_v37, %s13097_s26  ;;  %v14201_v23 = vmul.f32 100.0, %v7447_v7  ;;  %v7498_v21 = vsel %vm7096_vm2, %v14196_v28, -inf }
 0x75a   :  { %v7210_v2 = vsel %vm7010_vm3, %v14168_v16, -inf }
 0x75b   :  { %7174 = vrot.lane.b32.xlu0 %v14126_v36, %s13098_s7  ;;  %v7501_v11 = vsel %vm7096_vm2, %v14201_v23, -inf }
 0x75d   :  { %7176 = vrot.lane.b32.xlu1 %v14132_v37, %s13098_s7 }
 0x75f   :  { %7122 = vrot.lane.b32.xlu0 %v14142_v45, %s13096_s18 }
 0x761   :  { %7124 = vrot.lane.b32.xlu1 %v14148_v24, %s13096_s18 }
 0x763   :  { %7150 = vrot.lane.b32.xlu0 %v14142_v45, %s13097_s26 }
 0x765   :  { %7152 = vrot.lane.b32.xlu1 %v14148_v24, %s13097_s26 }
 0x782   :  { %7211 = vmax.xlane.f32.xlu0 %v7210_v2  ;;  %v7448_v2 = vld [vmem:[#allocation4 + $0x20] sm:$0xff] }
 0x789   :  { %7214 = vmax.xlane.f32.xlu1 %v7213_v57  ;;  %v7449_v57 = vld [vmem:[#allocation4 + $0x28] sm:$0xff] }
 0x78a   :  { %v14211_v9 = vmul.f32 100.0, %v7449_v57 }
 0x798   :  { %7178 = vrot.lane.b32.xlu0 %v14142_v45, %s13098_s7 }
 0x79a   :  { %7180 = vrot.lane.b32.xlu1 %v14148_v24, %s13098_s7 }
 0x7b7   :  { %7330 = vmax.xlane.f32.xlu0 %v7329_v10  ;;  %v14206_v10 = vmul.f32 100.0, %v7448_v2 }
 0x7b9   :  { %v7115_v54 = vpop.permute.xlu0 %7114  ;;  %v7504_v7 = vsel %vm7096_vm2, %v14206_v10, -inf }
 0x7ba   :  { %7132 = vst.msk [vmem:[#allocation4 + $0x30] sm:$0xff] %vm7096_vm2, %v7115_v54 }
 0x7bb   :  { %v7117_v48 = vpop.permute.xlu1 %7116  ;;  %7333 = vmax.xlane.f32.xlu0 %v7332_v19 }
 0x7bc   :  { %7133 = vst.msk [vmem:[#allocation4 + $0x38] sm:$0xff] %vm7096_vm2, %v7117_v48 }
 0x7bd   :  { %v7143_v34 = vpop.permute.xlu0 %7142 }
 0x7be   :  { %7160 = vst.msk [vmem:[#allocation4 + $0x60] sm:$0xff] %vm7096_vm2, %v7143_v34  ;;  %7493 = vmax.xlane.f32.xlu1 %v7492_v30  ;;  %v7507_v30 = vsel %vm7096_vm2, %v14211_v9, -inf }
 0x7bf   :  { %v7145_v63 = vpop.permute.xlu1 %7144  ;;  %7496 = vmax.xlane.f32.xlu0 %v7495_v6 }
 0x7c0   :  { %7161 = vst.msk [vmem:[#allocation4 + $0x68] sm:$0xff] %vm7096_vm2, %v7145_v63 }
 0x7c1   :  { %v7171_v62 = vpop.permute.xlu0 %7170  ;;  %v7450_v54 = vld [vmem:[#allocation4 + $0x30] sm:$0xff] }
 0x7c2   :  { %7188 = vst.msk [vmem:[#allocation4 + $0x90] sm:$0xff] %vm7096_vm2, %v7171_v62  ;;  %7499 = vmax.xlane.f32.xlu1 %v7498_v21  ;;  %v14216_v34 = vmul.f32 100.0, %v7450_v54 }
 0x7c3   :  { %v7173_v19 = vpop.permute.xlu1 %7172  ;;  %7502 = vmax.xlane.f32.xlu0 %v7501_v11  ;;  %v7451_v1 = vld [vmem:[#allocation4 + $0x38] sm:$0xff] }
 0x7c4   :  { %7189 = vst.msk [vmem:[#allocation4 + $0x98] sm:$0xff] %vm7096_vm2, %v7173_v19  ;;  %v14221_v6 = vmul.f32 100.0, %v7451_v1  ;;  %v7510_v57 = vsel %vm7096_vm2, %v14216_v34, -inf }
 0x7c5   :  { %v7119_v48 = vpop.permute.xlu0 %7118 }
 0x7c6   :  { %7134 = vst.msk [vmem:[#allocation4 + $0x40] sm:$0xff] %vm7096_vm2, %v7119_v48  ;;  %7505 = vmax.xlane.f32.xlu1 %v7504_v7  ;;  %v7513_v62 = vsel %vm7096_vm2, %v14221_v6, -inf }
 0x7c7   :  { %v7121_v2 = vpop.permute.xlu1 %7120  ;;  %7508 = vmax.xlane.f32.xlu0 %v7507_v30 }
 0x7c8   :  { %7135 = vst.msk [vmem:[#allocation4 + $0x48] sm:$0xff] %vm7096_vm2, %v7121_v2 }
 0x7c9   :  { %v7147_v63 = vpop.permute.xlu0 %7146 }
 0x7ca   :  { %7162 = vst.msk [vmem:[#allocation4 + $0x70] sm:$0xff] %vm7096_vm2, %v7147_v63  ;;  %7511 = vmax.xlane.f32.xlu1 %v7510_v57 }
 0x7cb   :  { %v7149_v21 = vpop.permute.xlu1 %7148  ;;  %7514 = vmax.xlane.f32.xlu0 %v7513_v62 }
 0x7cc   :  { %7163 = vst.msk [vmem:[#allocation4 + $0x78] sm:$0xff] %vm7096_vm2, %v7149_v21 }
 0x7cd   :  { %v7175_v11 = vpop.permute.xlu0 %7174  ;;  %v7452_v54 = vld [vmem:[#allocation4 + $0x40] sm:$0xff] }
 0x7ce   :  { %7190 = vst.msk [vmem:[#allocation4 + $0xa0] sm:$0xff] %vm7096_vm2, %v7175_v11  ;;  %v14231_v19 = vmul.f32 100.0, %v7452_v54  ;;  %v7456_v54 = vld [vmem:[#allocation4 + $0x60] sm:$0xff] }
 0x7cf   :  { %v7177_v1 = vpop.permute.xlu1 %7176  ;;  %v7453_v48 = vld [vmem:[#allocation4 + $0x48] sm:$0xff] }
 0x7d0   :  { %7191 = vst.msk [vmem:[#allocation4 + $0xa8] sm:$0xff] %vm7096_vm2, %v7177_v1  ;;  %v7516_v7 = vsel %vm7096_vm2, %v14231_v19, -inf  ;;  %v14236_v30 = vmul.f32 100.0, %v7453_v48 }
 0x7d1   :  { %v7123_v2 = vpop.permute.xlu0 %7122  ;;  %7517 = vmax.xlane.f32.xlu1 %v7516_v7  ;;  %v7457_v7 = vld [vmem:[#allocation4 + $0x68] sm:$0xff] }
 0x7d2   :  { %7136 = vst.msk [vmem:[#allocation4 + $0x50] sm:$0xff] %vm7096_vm2, %v7123_v2  ;;  %v7519_v63 = vsel %vm7096_vm2, %v14236_v30, -inf  ;;  %v14254_v33 = vmul.f32 100.0, %v7457_v7 }
 0x7d3   :  { %v7125_v57 = vpop.permute.xlu1 %7124  ;;  %7520 = vmax.xlane.f32.xlu0 %v7519_v63  ;;  %v14250_v63 = vmul.f32 100.0, %v7456_v54 }
 0x7d4   :  { %7137 = vst.msk [vmem:[#allocation4 + $0x58] sm:$0xff] %vm7096_vm2, %v7125_v57  ;;  %v7458_v57 = vld [vmem:[#allocation4 + $0x70] sm:$0xff]  ;;  %v7531_v54 = vsel %vm7096_vm2, %v14254_v33, -inf }
 0x7d5   :  { %v7151_v62 = vpop.permute.xlu0 %7150  ;;  %v14258_v24 = vmul.f32 100.0, %v7458_v57 }
 0x7d6   :  { %7164 = vst.msk [vmem:[#allocation4 + $0x80] sm:$0xff] %vm7096_vm2, %v7151_v62 }
 0x7d7   :  { %v7153_v21 = vpop.permute.xlu1 %7152  ;;  %v7534_v7 = vsel %vm7096_vm2, %v14258_v24, -inf }
 0x7d8   :  { %7165 = vst.msk [vmem:[#allocation4 + $0x88] sm:$0xff] %vm7096_vm2, %v7153_v21  ;;  %v7459_v21 = vld [vmem:[#allocation4 + $0x78] sm:$0xff] }
 0x7d9   :  { %v7454_v11 = vld [vmem:[#allocation4 + $0x50] sm:$0xff] }
 0x7da   :  { %v14244_v1 = vmul.f32 100.0, %v7454_v11  ;;  %v7528_v11 = vsel %vm7096_vm2, %v14250_v63, -inf }
 0x7db   :  { %v7455_v48 = vld [vmem:[#allocation4 + $0x58] sm:$0xff] }
 0x7dc   :  { %v7522_v2 = vsel %vm7096_vm2, %v14244_v1, -inf  ;;  %v14248_v13 = vmul.f32 100.0, %v7455_v48  ;;  %v14262_v48 = vmul.f32 100.0, %v7459_v21 }
 0x7dd   :  { %7523 = vmax.xlane.f32.xlu1 %v7522_v2  ;;  %v7460_v45 = vld [vmem:[#allocation4 + $0x80] sm:$0xff] }
 0x7de   :  { %v7525_v62 = vsel %vm7096_vm2, %v14248_v13, -inf  ;;  %v14266_v37 = vmul.f32 100.0, %v7460_v45  ;;  %v7537_v57 = vsel %vm7096_vm2, %v14262_v48, -inf }
 0x7df   :  { %7526 = vmax.xlane.f32.xlu0 %v7525_v62  ;;  %v7461_v2 = vld [vmem:[#allocation4 + $0x88] sm:$0xff]  ;;  %v7462_v62 = vld [vmem:[#allocation4 + $0x90] sm:$0xff] }
 0x7e0   :  { %v14270_v36 = vmul.f32 100.0, %v7461_v2  ;;  %v7540_v21 = vsel %vm7096_vm2, %v14266_v37, -inf  ;;  %v14274_v15 = vmul.f32 100.0, %v7462_v62 }
 0x7e1   :  { %7529 = vmax.xlane.f32.xlu1 %v7528_v11  ;;  %v7463_v11 = vld [vmem:[#allocation4 + $0x98] sm:$0xff] }
 0x7e2   :  { %v7543_v45 = vsel %vm7096_vm2, %v14270_v36, -inf  ;;  %v14278_v55 = vmul.f32 100.0, %v7463_v11  ;;  %v7546_v2 = vsel %vm7096_vm2, %v14274_v15, -inf }
 0x7e3   :  { %7532 = vmax.xlane.f32.xlu0 %v7531_v54  ;;  %v7464_v54 = vld [vmem:[#allocation4 + $0xa0] sm:$0xff] }
 0x7e4   :  { %v14282_v4 = vmul.f32 100.0, %v7464_v54 }
 0x7e5   :  { %7535 = vmax.xlane.f32.xlu1 %v7534_v7  ;;  %v7465_v7 = vld [vmem:[#allocation4 + $0xa8] sm:$0xff] }
 0x7e6   :  { %v14286_v62 = vmul.f32 100.0, %v7465_v7 }
 0x7e7   :  { %7538 = vmax.xlane.f32.xlu0 %v7537_v57  ;;  %v7549_v57 = vsel %vm7096_vm2, %v14278_v55, -inf }
 0x7e8   :  { %v7555_v11 = vsel %vm7096_vm2, %v14286_v62, -inf }
 0x7e9   :  { %7541 = vmax.xlane.f32.xlu1 %v7540_v21  ;;  %v7552_v21 = vsel %vm7096_vm2, %v14282_v4, -inf }
 0x7eb   :  { %7544 = vmax.xlane.f32.xlu0 %v7543_v45 }
 0x7ed   :  { %7547 = vmax.xlane.f32.xlu1 %v7546_v2 }
 0x7ef   :  { %7550 = vmax.xlane.f32.xlu0 %v7549_v57 }
 0x7f1   :  { %7553 = vmax.xlane.f32.xlu1 %v7552_v21 }
 0x7f3   :  { %7556 = vmax.xlane.f32.xlu0 %v7555_v11 }
 0x80f   :  { %v7212_v45 = vpop.xlane.xlu0 %7211 }
 0x810   :  { %v7216_v5 = vsub.f32 %v14168_v16, %v7212_v45 }
 0x812   :  { %v7218_v54 = vmul.f32 1.442695, %v7216_v5 }
 0x813   :  { %v7179_v56 = vpop.permute.xlu0 %7178 }
 0x814   :  { %7192 = vst.msk [vmem:[#allocation4 + $0xb0] sm:$0xff] %vm7096_vm2, %v7179_v56  ;;  %12498 = vpow2.f32 %v7218_v54 }
 0x816   :  { %v7215_v2 = vpop.xlane.xlu1 %7214 }
 0x817   :  { %v7217_v7 = vsub.f32 %v14172_v51, %v7215_v2  ;;  %v7194_v2 = vld [vmem:[#allocation21] sm:$0xff] }
 0x819   :  { %v7220_v57 = vmul.f32 1.442695, %v7217_v7  ;;  %v7195_v7 = vld [vmem:[#allocation21 + $0x8] sm:$0xf] }
 0x81a   :  { %v7181_v20 = vpop.permute.xlu1 %7180 }
 0x81b   :  { %7193 = vst.msk [vmem:[#allocation4 + $0xb8] sm:$0xff] %vm7096_vm2, %v7181_v20  ;;  %v7466_v21 = vld [vmem:[#allocation4 + $0xb0] sm:$0xff]  ;;  %12500 = vpow2.f32 %v7220_v57  ;;  %v10689_v57 = vpack.c.bf16 %v7195_v7, %v7194_v2 }
 0x81c   :  { %v14296_v38 = vmul.f32 100.0, %v7466_v21 }
 0x81d   :  { %10691 = vmatprep.subr.msk.bf16.mxu1 %vm14313_vm6, %v10689_v57 }
 0x81e   :  { %v7558_v11 = vsel %vm7096_vm2, %v14296_v38, -inf  ;;  %v14300_v16 = vpop.eup %12498  ;;  %10694 = vmatpush3.bf16.msk.msra.mxu1 %vm14313_vm6, %v10689_v57 }
 0x81f   :  { %7559 = vmax.xlane.f32.xlu1 %v7558_v11  ;;  %v7222_v5 = vsel %vm7010_vm3, %v14300_v16, 0.0 }
 0x822   :  { %v7467_v56 = vld [vmem:[#allocation4 + $0xb8] sm:$0xff] }
 0x823   :  { %7223 = vadd.xlane.f32.xlu1 %v7222_v5  ;;  %v14304_v51 = vmul.f32 100.0, %v7467_v56 }
 0x825   :  { %v7561_v20 = vsel %vm7096_vm2, %v14304_v51, -inf  ;;  %v14308_v45 = vpop.eup %12500 }
 0x826   :  { %7562 = vmax.xlane.f32.xlu0 %v7561_v20  ;;  %v7225_v54 = vsel %vm7010_vm3, %v14308_v45, 0.0 }
 0x82a   :  { %7226 = vadd.xlane.f32.xlu0 %v7225_v54 }
 0x844   :  { %v7331_v11 = vpop.xlane.xlu0 %7330 }
 0x845   :  { %v7335_v5 = vsub.f32 %v14180_v14, %v7331_v11 }
 0x847   :  { %v7337_v56 = vmul.f32 1.442695, %v7335_v5 }
 0x848   :  { %v7334_v20 = vpop.xlane.xlu0 %7333 }
 0x849   :  { %12502 = vpow2.f32 %v7337_v56  ;;  %v7336_v54 = vsub.f32 %v14184_v58, %v7334_v20 }
 0x84b   :  { %v7339_v2 = vmul.f32 1.442695, %v7336_v54  ;;  %v7494_v7 = vpop.xlane.xlu1 %7493 }
 0x84c   :  { %v7564_v39 = vsub.f32 %v14186_v0, %v7494_v7  ;;  %v7497_v49 = vpop.xlane.xlu0 %7496 }
 0x84d   :  { %12504 = vpow2.f32 %v7339_v2  ;;  %v7565_v31 = vsub.f32 %v14191_v47, %v7497_v49 }
 0x84e   :  { %v7588_v17 = vmul.f32 1.442695, %v7564_v39 }
 0x84f   :  { %v7590_v53 = vmul.f32 1.442695, %v7565_v31  ;;  %v7500_v59 = vpop.xlane.xlu1 %7499 }
 0x850   :  { %12506 = vpow2.f32 %v7588_v17  ;;  %v7566_v57 = vsub.f32 %v14196_v28, %v7500_v59  ;;  %v7503_v14 = vpop.xlane.xlu0 %7502 }
 0x851   :  { %12508 = vpow2.f32 %v7590_v53  ;;  %v7567_v11 = vsub.f32 %v14201_v23, %v7503_v14 }
 0x852   :  { %v7592_v5 = vmul.f32 1.442695, %v7566_v57 }
 0x853   :  { %v14327_v58 = vpop.eup %12502  ;;  %v7594_v56 = vmul.f32 1.442695, %v7567_v11  ;;  %v7506_v20 = vpop.xlane.xlu1 %7505 }
 0x854   :  { %12510 = vpow2.f32 %v7592_v5  ;;  %v7568_v0 = vsub.f32 %v14206_v10, %v7506_v20  ;;  %v7509_v54 = vpop.xlane.xlu0 %7508  ;;  %v7341_v39 = vsel %vm7096_vm2, %v14327_v58, 0.0 }
 0x855   :  { %12512 = vpow2.f32 %v7594_v56  ;;  %v7569_v17 = vsub.f32 %v14211_v9, %v7509_v54  ;;  %7342 = vadd.xlane.f32.xlu1 %v7341_v39 }
 0x856   :  { %v7596_v59 = vmul.f32 1.442695, %v7568_v0 }
 0x857   :  { %v14333_v53 = vpop.eup %12504  ;;  %v7598_v49 = vmul.f32 1.442695, %v7569_v17  ;;  %v7512_v31 = vpop.xlane.xlu1 %7511 }
 0x858   :  { %12514 = vpow2.f32 %v7596_v59  ;;  %v7570_v47 = vsub.f32 %v14216_v34, %v7512_v31  ;;  %v7515_v28 = vpop.xlane.xlu0 %7514  ;;  %v7344_v23 = vsel %vm7096_vm2, %v14333_v53, 0.0 }
 0x859   :  { %12516 = vpow2.f32 %v7598_v49  ;;  %v7571_v10 = vsub.f32 %v14221_v6, %v7515_v28  ;;  %7345 = vadd.xlane.f32.xlu0 %v7344_v23 }
 0x85a   :  { %v14339_v2 = vpop.eup %12506  ;;  %v7600_v9 = vmul.f32 1.442695, %v7570_v47 }
 0x85b   :  { %v14341_v7 = vpop.eup %12508  ;;  %v7602_v57 = vmul.f32 1.442695, %v7571_v10  ;;  %v7636_v14 = vsel %vm7096_vm2, %v14339_v2, 0.0 }
 0x85c   :  { %12518 = vpow2.f32 %v7600_v9  ;;  %7637 = vadd.xlane.f32.xlu1 %v7636_v14  ;;  %v7639_v34 = vsel %vm7096_vm2, %v14341_v7, 0.0 }
 0x85d   :  { %12520 = vpow2.f32 %v7602_v57  ;;  %7640 = vadd.xlane.f32.xlu0 %v7639_v34 }
 0x85e   :  { %v14347_v11 = vpop.eup %12510  ;;  %v7518_v6 = vpop.xlane.xlu1 %7517 }
 0x85f   :  { %v14349_v5 = vpop.eup %12512  ;;  %v7572_v56 = vsub.f32 %v14231_v19, %v7518_v6  ;;  %v7642_v20 = vsel %vm7096_vm2, %v14347_v11, 0.0 }
 0x860   :  { %v7521_v0 = vpop.xlane.xlu0 %7520  ;;  %7643 = vadd.xlane.f32.xlu1 %v7642_v20  ;;  %v7645_v54 = vsel %vm7096_vm2, %v14349_v5, 0.0 }
 0x861   :  { %v7604_v39 = vmul.f32 1.442695, %v7572_v56  ;;  %v7573_v17 = vsub.f32 %v14236_v30, %v7521_v0  ;;  %7646 = vadd.xlane.f32.xlu0 %v7645_v54  ;;  %v7196_v54 = vld [vmem:[#allocation22] sm:$0xff] }
 0x862   :  { %v14357_v59 = vpop.eup %12514 }
 0x863   :  { %v14359_v49 = vpop.eup %12516  ;;  %12522 = vpow2.f32 %v7604_v39  ;;  %v7606_v31 = vmul.f32 1.442695, %v7573_v17  ;;  %v7648_v19 = vsel %vm7096_vm2, %v14357_v59, 0.0  ;;  %v7197_v39 = vld [vmem:[#allocation22 + $0x8] sm:$0x3] }
 0x864   :  { %7649 = vadd.xlane.f32.xlu1 %v7648_v19  ;;  %v7651_v47 = vsel %vm7096_vm2, %v14359_v49, 0.0 }
 0x865   :  { %12524 = vpow2.f32 %v7606_v31  ;;  %7652 = vadd.xlane.f32.xlu0 %v7651_v47 }
 0x866   :  { %v14365_v28 = vpop.eup %12518 }
 0x867   :  { %v14367_v23 = vpop.eup %12520  ;;  %v7654_v30 = vsel %vm7096_vm2, %v14365_v28, 0.0 }
 0x868   :  { %7655 = vadd.xlane.f32.xlu1 %v7654_v30  ;;  %v7657_v10 = vsel %vm7096_vm2, %v14367_v23, 0.0  ;;  %v14384_v30 = vpack.c.bf16 %v7197_v39, %v7196_v54 }
 0x869   :  { %7658 = vadd.xlane.f32.xlu0 %v7657_v10 }
 0x86a   :  { %v7524_v9 = vpop.xlane.xlu1 %7523  ;;  %10697 = vmatprep.subr.msk.bf16.mxu1 %vm14387_vm8, %v14384_v30 }
 0x86b   :  { %v7574_v57 = vsub.f32 %v14244_v1, %v7524_v9 }
 0x86c   :  { %v7527_v14 = vpop.xlane.xlu0 %7526 }
 0x86d   :  { %v14374_v34 = vpop.eup %12522  ;;  %v7608_v6 = vmul.f32 1.442695, %v7574_v57  ;;  %v7575_v56 = vsub.f32 %v14248_v13, %v7527_v14 }
 0x86e   :  { %v7530_v20 = vpop.xlane.xlu1 %7529  ;;  %v7660_v0 = vsel %vm7096_vm2, %v14374_v34, 0.0 }
 0x86f   :  { %v14379_v17 = vpop.eup %12524  ;;  %12526 = vpow2.f32 %v7608_v6  ;;  %v7610_v31 = vmul.f32 1.442695, %v7575_v56  ;;  %v7576_v19 = vsub.f32 %v14250_v63, %v7530_v20  ;;  %7661 = vadd.xlane.f32.xlu1 %v7660_v0 }
 0x870   :  { %v7533_v1 = vpop.xlane.xlu0 %7532  ;;  %v7663_v47 = vsel %vm7096_vm2, %v14379_v17, 0.0 }
 0x871   :  { %12528 = vpow2.f32 %v7610_v31  ;;  %v7612_v10 = vmul.f32 1.442695, %v7576_v19  ;;  %v7577_v9 = vsub.f32 %v14254_v33, %v7533_v1  ;;  %7664 = vadd.xlane.f32.xlu0 %v7663_v47 }
 0x872   :  { %v7536_v57 = vpop.xlane.xlu1 %7535 }
 0x873   :  { %12530 = vpow2.f32 %v7612_v10  ;;  %v7614_v63 = vmul.f32 1.442695, %v7577_v9  ;;  %v7578_v14 = vsub.f32 %v14258_v24, %v7536_v57 }
 0x874   :  { %v7539_v6 = vpop.xlane.xlu0 %7538 }
 0x875   :  { %12532 = vpow2.f32 %v7614_v63  ;;  %v7616_v56 = vmul.f32 1.442695, %v7578_v14  ;;  %v7579_v20 = vsub.f32 %v14262_v48, %v7539_v6 }
 0x876   :  { %v7542_v0 = vpop.xlane.xlu1 %7541 }
 0x877   :  { %12534 = vpow2.f32 %v7616_v56  ;;  %v7618_v54 = vmul.f32 1.442695, %v7579_v20  ;;  %v7580_v33 = vsub.f32 %v14266_v37, %v7542_v0 }
 0x878   :  { %v7545_v39 = vpop.xlane.xlu0 %7544 }
 0x879   :  { %v14398_v31 = vpop.eup %12526  ;;  %12536 = vpow2.f32 %v7618_v54  ;;  %v7620_v19 = vmul.f32 1.442695, %v7580_v33  ;;  %v7581_v1 = vsub.f32 %v14270_v36, %v7545_v39 }
 0x87a   :  { %v7548_v47 = vpop.xlane.xlu1 %7547  ;;  %v7666_v24 = vsel %vm7096_vm2, %v14398_v31, 0.0 }
 0x87b   :  { %v14403_v10 = vpop.eup %12528  ;;  %12538 = vpow2.f32 %v7620_v19  ;;  %v7622_v48 = vmul.f32 1.442695, %v7581_v1  ;;  %v7582_v9 = vsub.f32 %v14274_v15, %v7548_v47  ;;  %7667 = vadd.xlane.f32.xlu1 %v7666_v24 }
 0x87c   :  { %v7551_v57 = vpop.xlane.xlu0 %7550  ;;  %v7669_v37 = vsel %vm7096_vm2, %v14403_v10, 0.0 }
 0x87d   :  { %v14408_v63 = vpop.eup %12530  ;;  %12540 = vpow2.f32 %v7622_v48  ;;  %v7624_v14 = vmul.f32 1.442695, %v7582_v9  ;;  %v7583_v36 = vsub.f32 %v14278_v55, %v7551_v57  ;;  %7670 = vadd.xlane.f32.xlu0 %v7669_v37 }
 0x87e   :  { %v7554_v6 = vpop.xlane.xlu1 %7553  ;;  %v7672_v56 = vsel %vm7096_vm2, %v14408_v63, 0.0 }
 0x87f   :  { %v14413_v20 = vpop.eup %12532  ;;  %12542 = vpow2.f32 %v7624_v14  ;;  %v7626_v15 = vmul.f32 1.442695, %v7583_v36  ;;  %v7584_v0 = vsub.f32 %v14282_v4, %v7554_v6  ;;  %7673 = vadd.xlane.f32.xlu1 %v7672_v56 }
 0x880   :  { %v7557_v54 = vpop.xlane.xlu0 %7556  ;;  %v7675_v33 = vsel %vm7096_vm2, %v14413_v20, 0.0 }
 0x881   :  { %v14418_v39 = vpop.eup %12534  ;;  %12544 = vpow2.f32 %v7626_v15  ;;  %v7628_v55 = vmul.f32 1.442695, %v7584_v0  ;;  %v7585_v19 = vsub.f32 %v14286_v62, %v7557_v54  ;;  %7676 = vadd.xlane.f32.xlu0 %v7675_v33 }
 0x882   :  { %v7678_v1 = vsel %vm7096_vm2, %v14418_v39, 0.0 }
 0x883   :  { %v14423_v47 = vpop.eup %12536  ;;  %12546 = vpow2.f32 %v7628_v55  ;;  %v7630_v24 = vmul.f32 1.442695, %v7585_v19  ;;  %7679 = vadd.xlane.f32.xlu1 %v7678_v1 }
 0x884   :  { %v7681_v4 = vsel %vm7096_vm2, %v14423_v47, 0.0 }
 0x885   :  { %v14427_v48 = vpop.eup %12538  ;;  %12548 = vpow2.f32 %v7630_v24  ;;  %7682 = vadd.xlane.f32.xlu0 %v7681_v4 }
 0x886   :  { %v7684_v9 = vsel %vm7096_vm2, %v14427_v48, 0.0 }
 0x887   :  { %v14431_v62 = vpop.eup %12540  ;;  %7685 = vadd.xlane.f32.xlu1 %v7684_v9 }
 0x888   :  { %v7687_v57 = vsel %vm7096_vm2, %v14431_v62, 0.0 }
 0x889   :  { %v14435_v37 = vpop.eup %12542  ;;  %7688 = vadd.xlane.f32.xlu0 %v7687_v57 }
 0x88a   :  { %v7690_v14 = vsel %vm7096_vm2, %v14435_v37, 0.0 }
 0x88b   :  { %v14439_v36 = vpop.eup %12544  ;;  %7691 = vadd.xlane.f32.xlu1 %v7690_v14 }
 0x88c   :  { %v7693_v6 = vsel %vm7096_vm2, %v14439_v36, 0.0 }
 0x88d   :  { %v14443_v56 = vpop.eup %12546  ;;  %7694 = vadd.xlane.f32.xlu0 %v7693_v6 }
 0x88e   :  { %v7696_v15 = vsel %vm7096_vm2, %v14443_v56, 0.0 }
 0x88f   :  { %v14447_v0 = vpop.eup %12548  ;;  %7697 = vadd.xlane.f32.xlu1 %v7696_v15 }
 0x890   :  { %v7699_v54 = vsel %vm7096_vm2, %v14447_v0, 0.0 }
 0x891   :  { %7700 = vadd.xlane.f32.xlu0 %v7699_v54  ;;  %v7198_v54 = vld [vmem:[#allocation24] sm:$0xff] }
 0x8ac   :  { %v7560_v33 = vpop.xlane.xlu1 %7559 }
 0x8ad   :  { %v7586_v55 = vsub.f32 %v14296_v38, %v7560_v33  ;;  %v7199_v33 = vld [vmem:[#allocation24 + $0x8] sm:$0x3] }
 0x8af   :  { %v7632_v19 = vmul.f32 1.442695, %v7586_v55 }
 0x8b0   :  { %v7224_v1 = vpop.xlane.xlu1 %7223 }
 0x8b1   :  { %12550 = vpow2.f32 %v7632_v19 }
 0x8b2   :  { %12552 = vrcp.f32 %v7224_v1 }
 0x8b3   :  { %v7563_v24 = vpop.xlane.xlu0 %7562 }
 0x8b4   :  { %v7587_v4 = vsub.f32 %v14304_v51, %v7563_v24  ;;  %v10701_v24 = vpack.c.bf16 %v7199_v33, %v7198_v54 }
 0x8b6   :  { %v7634_v9 = vmul.f32 1.442695, %v7587_v4 }
 0x8b7   :  { %v7227_v57 = vpop.xlane.xlu0 %7226 }
 0x8b8   :  { %12554 = vpow2.f32 %v7634_v9 }
 0x8b9   :  { %12556 = vrcp.f32 %v7227_v57 }
 0x8bb   :  { %v14453_v14 = vpop.eup %12550 }
 0x8bc   :  { %v12553_v6 = vpop.eup %12552  ;;  %v7702_v15 = vsel %vm7096_vm2, %v14453_v14, 0.0 }
 0x8bd   :  { %7703 = vadd.xlane.f32.xlu1 %v7702_v15  ;;  %v7230_v38 = vmul.f32 %v12553_v6, %v14300_v16 }
 0x8bf   :  { %10549 = vmatprep.mubr.msk.f32.mxu1 %vm7010_vm3, %v7230_v38 }
 0x8c2   :  { %v14459_v55 = vpop.eup %12554 }
 0x8c3   :  { %v12557_v51 = vpop.eup %12556  ;;  %v7705_v19 = vsel %vm7096_vm2, %v14459_v55, 0.0 }
 0x8c4   :  { %v7231_v1 = vmul.f32 %v12557_v51, %v14308_v45  ;;  %7706 = vadd.xlane.f32.xlu0 %v7705_v19 }
 0x8c6   :  { %10550 = vmatmul.mubr.msk.f32.vlgmr.msra.gmra.mrb[208].mxu1 %vm7010_vm3, %v7231_v1 }
 0x8c7   :  { %10700 = vmatpush3.bf16.msk.msra.mxu1 %vm14387_vm8, %v14384_v30 }
 0x8c8   :  { %10703 = vmatprep.subr.msk.bf16.mxu1 %vm14387_vm8, %v10701_v24 }
 0x8e2   :  { %v7343_v16 = vpop.xlane.xlu1 %7342 }
 0x8e3   :  { %12558 = vrcp.f32 %v7343_v16 }
 0x8e6   :  { %v7346_v4 = vpop.xlane.xlu0 %7345 }
 0x8e7   :  { %12560 = vrcp.f32 %v7346_v4  ;;  %v15462_v4 = vld [vmem:[#allocation61_spill] sm:$0xff] }
 0x8e9   :  { %v7638_v9 = vpop.xlane.xlu1 %7637 }
 0x8ea   :  { %12562 = vrcp.f32 %v7638_v9  ;;  %v7641_v57 = vpop.xlane.xlu0 %7640  ;;  %v15463_v9 = vld [vmem:[#allocation60_spill] sm:$0xff] }
 0x8eb   :  { %12564 = vrcp.f32 %v7641_v57  ;;  %v15464_v57 = vpack.c.bf16 %v15462_v4, %v15463_v9  ;;  %v15472_v4 = vld [vmem:[#allocation46_spill] sm:$0xff] }
 0x8ed   :  { %v12559_v45 = vpop.eup %12558  ;;  %v7644_v6 = vpop.xlane.xlu1 %7643 }
 0x8ee   :  { %12566 = vrcp.f32 %v7644_v6  ;;  %v7647_v15 = vpop.xlane.xlu0 %7646  ;;  %v7349_v38 = vmul.f32 %v12559_v45, %v14327_v58 }
 0x8ef   :  { %12568 = vrcp.f32 %v7647_v15 }
 0x8f0   :  { %10556 = vmatprep.mubr.msk.f32.mxu1 %vm7096_vm2, %v7349_v38  ;;  %v15465_v38 = vld [vmem:[#allocation45_spill] sm:$0xff] }
 0x8f1   :  { %v12561_v30 = vpop.eup %12560  ;;  %v7650_v54 = vpop.xlane.xlu1 %7649 }
 0x8f2   :  { %12570 = vrcp.f32 %v7650_v54  ;;  %v7653_v33 = vpop.xlane.xlu0 %7652  ;;  %v7350_v51 = vmul.f32 %v12561_v30, %v14333_v53  ;;  %v15468_v54 = vld [vmem:[#allocation63_spill] sm:$0xff] }
 0x8f3   :  { %12572 = vrcp.f32 %v7653_v33  ;;  %v15469_v33 = vld [vmem:[#allocation62_spill] sm:$0xff] }
 0x8f4   :  { %v12563_v19 = vpop.eup %12562  ;;  %10557 = vmatmul.mubr.msk.f32.vlgmr.msra.gmra.mrb[210].mxu1 %vm7096_vm2, %v7350_v51  ;;  %v15470_v51 = vpack.c.bf16 %v15468_v54, %v15469_v33  ;;  %v15480_v54 = vld [vmem:[#allocation67_spill] sm:$0xff]  ;;  %v15481_v33 = vld [vmem:[#allocation66_spill] sm:$0xff] }
 0x8f5   :  { %v12565_v1 = vpop.eup %12564  ;;  %10706 = vmatpush3.bf16.msk.msra.mxu1 %vm14387_vm8, %v10701_v24  ;;  %v7656_v16 = vpop.xlane.xlu1 %7655  ;;  %v7732_v58 = vmul.f32 %v12563_v19, %v14339_v2  ;;  %v15466_v24 = vld [vmem:[#allocation44_spill] sm:$0xff] }
 0x8f6   :  { %10479 = vmatprep.subr.bf16.mxu1 %v15464_v57  ;;  %12574 = vrcp.f32 %v7656_v16  ;;  %v7659_v45 = vpop.xlane.xlu0 %7658  ;;  %v7733_v6 = vmul.f32 %v12565_v1, %v14341_v7  ;;  %v15467_v30 = vpack.c.bf16 %v15465_v38, %v15466_v24  ;;  %v15474_v57 = vld [vmem:[#allocation65_spill] sm:$0xff] }
 0x8f7   :  { %12576 = vrcp.f32 %v7659_v45  ;;  %10563 = vmatprep.mubr.msk.f32.mxu1 %vm7096_vm2, %v7732_v58  ;;  %v15471_v58 = vld [vmem:[#allocation47_spill] sm:$0xff]  ;;  %v15475_v45 = vld [vmem:[#allocation64_spill] sm:$0xff]  ;;  %v15477_v24 = vld [vmem:[#allocation49_spill] sm:$0xff] }
 0x8f8   :  { %v12567_v53 = vpop.eup %12566  ;;  %10564 = vmatmul.mubr.msk.f32.vlgmr.msra.gmra.mrb[212].mxu1 %vm7096_vm2, %v7733_v6  ;;  %v15473_v9 = vpack.c.bf16 %v15471_v58, %v15472_v4  ;;  %v15476_v6 = vpack.c.bf16 %v15474_v57, %v15475_v45  ;;  %v15487_v58 = vld [vmem:[#allocation68_spill] sm:$0xff]  ;;  %v15489_v45 = vld [vmem:[#allocation53_spill] sm:$0xff] }
 0x8f9   :  { %v12569_v15 = vpop.eup %12568  ;;  %10480 = vmatpush3.bf16.msra.mxu1 %v15467_v30  ;;  %v7734_v2 = vmul.f32 %v12567_v53, %v14347_v11  ;;  %v15478_v30 = vld [vmem:[#allocation48_spill] sm:$0xff] }
 0x8fa   :  { %10481 = vmatprep.subr.bf16.mxu1 %v15470_v51  ;;  %v7735_v19 = vmul.f32 %v12569_v15, %v14349_v5  ;;  %v15482_v51 = vpack.c.bf16 %v15480_v54, %v15481_v33  ;;  %v15498_v54 = vld [vmem:[#allocation73_spill] sm:$0xff]  ;;  %v15499_v33 = vld [vmem:[#allocation72_spill] sm:$0xff] }
 0x8fb   :  { %10566 = vmatprep.mubr.msk.f32.mxu1 %vm7096_vm2, %v7734_v2  ;;  %v15479_v2 = vpack.c.bf16 %v15477_v24, %v15478_v30 }
 0x8fc   :  { %v12571_v7 = vpop.eup %12570  ;;  %10567 = vmatmul.mubr.msk.f32.gmra.mrb[214].mxu1 %vm7096_vm2, %v7735_v19  ;;  %v7662_v1 = vpop.xlane.xlu1 %7661 }
 0x8fd   :  { %v12573_v16 = vpop.eup %12572  ;;  %10482 = vmatpush3.bf16.msra.mxu1 %v15473_v9  ;;  %12578 = vrcp.f32 %v7662_v1  ;;  %v7736_v11 = vmul.f32 %v12571_v7, %v14357_v59  ;;  %v15484_v7 = vld [vmem:[#allocation50_spill] sm:$0xff] }
 0x8fe   :  { %10483 = vmatprep.subr.bf16.mxu1 %v15476_v6  ;;  %v7665_v53 = vpop.xlane.xlu0 %7664  ;;  %v7737_v5 = vmul.f32 %v12573_v16, %v14359_v49  ;;  %v15483_v49 = vld [vmem:[#allocation51_spill] sm:$0xff]  ;;  %v15486_v16 = vld [vmem:[#allocation69_spill] sm:$0xff]  ;;  %v15490_v6 = vld [vmem:[#allocation52_spill] sm:$0xff] }
 0x8ff   :  { %12580 = vrcp.f32 %v7665_v53  ;;  %10569 = vmatprep.mubr.msk.f32.mxu1 %vm7096_vm2, %v7736_v11  ;;  %v15485_v1 = vpack.c.bf16 %v15483_v49, %v15484_v7  ;;  %v15488_v4 = vpack.c.bf16 %v15486_v16, %v15487_v58  ;;  %v15492_v53 = vld [vmem:[#allocation71_spill] sm:$0xff]  ;;  %v15501_v7 = vld [vmem:[#allocation57_spill] sm:$0xff]  ;;  %v15505_v58 = vld [vmem:[#allocation74_spill] sm:$0xff] }
 0x900   :  { %v12575_v15 = vpop.eup %12574  ;;  %10570 = vmatmul.mubr.msk.f32.gmra.mrb[216].mxu1 %vm7096_vm2, %v7737_v5  ;;  %v15493_v5 = vld [vmem:[#allocation70_spill] sm:$0xff] }
 0x901   :  { %v12577_v38 = vpop.eup %12576  ;;  %10484 = vmatpush3.bf16.msra.mxu1 %v15479_v2  ;;  %v7738_v59 = vmul.f32 %v12575_v15, %v14365_v28  ;;  %v15494_v15 = vpack.c.bf16 %v15492_v53, %v15493_v5  ;;  %v15496_v2 = vld [vmem:[#allocation54_spill] sm:$0xff]  ;;  %v15510_v5 = vpack.c.bf16 %v14017_v12, %v14015_v27 }
 0x902   :  { %10485 = vmatprep.subr.bf16.mxu1 %v15482_v51  ;;  %v7739_v19 = vmul.f32 %v12577_v38, %v14367_v23  ;;  %v15491_v23 = vpack.c.bf16 %v15489_v45, %v15490_v6  ;;  %v15500_v51 = vpack.c.bf16 %v15498_v54, %v15499_v33  ;;  %v15507_v6 = vld [vmem:[#allocation59_spill] sm:$0xff] }
 0x903   :  { %10572 = vmatprep.mubr.msk.f32.mxu1 %vm7096_vm2, %v7738_v59 }
 0x904   :  { %10573 = vmatmul.mubr.msk.f32.gmra.mrb[218].mxu1 %vm7096_vm2, %v7739_v19 }
 0x905   :  { %10486 = vmatpush3.bf16.msra.mxu1 %v15485_v1  ;;  %v15502_v1 = vld [vmem:[#allocation56_spill] sm:$0xff] }
 0x906   :  { %10487 = vmatprep.subr.bf16.mxu1 %v15488_v4  ;;  %v15503_v16 = vpack.c.bf16 %v15501_v7, %v15502_v1 }
 0x907   :  { %v12579_v9 = vpop.eup %12578 }
 0x908   :  { %v7668_v28 = vpop.xlane.xlu1 %7667  ;;  %v7740_v11 = vmul.f32 %v12579_v9, %v14374_v34  ;;  %v15495_v34 = vld [vmem:[#allocation55_spill] sm:$0xff] }
 0x909   :  { %v12581_v57 = vpop.eup %12580  ;;  %10488 = vmatpush3.bf16.msra.mxu1 %v15491_v23  ;;  %12582 = vrcp.f32 %v7668_v28  ;;  %v15497_v59 = vpack.c.bf16 %v15495_v34, %v15496_v2  ;;  %v15508_v23 = vld [vmem:[#allocation58_spill] sm:$0xff] }
 0x90a   :  { %10489 = vmatprep.subr.bf16.mxu1 %v15494_v15  ;;  %v7671_v38 = vpop.xlane.xlu0 %7670  ;;  %10575 = vmatprep.mubr.msk.f32.mxu1 %vm7096_vm2, %v7740_v11  ;;  %v7741_v24 = vmul.f32 %v12581_v57, %v14379_v17  ;;  %v15504_v17 = vld [vmem:[#allocation75_spill] sm:$0xff]  ;;  %v15509_v53 = vpack.c.bf16 %v15507_v6, %v15508_v23  ;;  %v15518_v6 = vpack.c.bf16 %v13942_v52, %v13940_v3  ;;  %v15535_v23 = vld [vmem:[#allocation101_spill] sm:$0xff] }
 0x90b   :  { %12584 = vrcp.f32 %v7671_v38  ;;  %v15506_v4 = vpack.c.bf16 %v15504_v17, %v15505_v58  ;;  %v15525_v52 = vld [vmem:[#allocation103_spill] sm:$0xff] }
 0x90c   :  { %10576 = vmatmul.mubr.msk.f32.gmra.mrb[220].mxu1 %vm7096_vm2, %v7741_v24  ;;  %v7674_v30 = vpop.xlane.xlu1 %7673 }
 0x90d   :  { %10490 = vmatpush3.bf16.msra.mxu1 %v15497_v59  ;;  %12586 = vrcp.f32 %v7674_v30 }
 0x90e   :  { %10491 = vmatprep.subr.bf16.mxu1 %v15500_v51  ;;  %v7677_v19 = vpop.xlane.xlu0 %7676 }
 0x90f   :  { %12588 = vrcp.f32 %v7677_v19 }
 0x910   :  { %v7680_v49 = vpop.xlane.xlu1 %7679 }
 0x911   :  { %10492 = vmatpush3.bf16.msra.mxu1 %v15503_v16  ;;  %12590 = vrcp.f32 %v7680_v49 }
 0x912   :  { %10493 = vmatprep.subr.bf16.mxu1 %v15506_v4  ;;  %v7683_v9 = vpop.xlane.xlu0 %7682 }
 0x913   :  { %v12583_v28 = vpop.eup %12582  ;;  %12592 = vrcp.f32 %v7683_v9 }
 0x914   :  { %v7686_v11 = vpop.xlane.xlu1 %7685  ;;  %v7742_v57 = vmul.f32 %v12583_v28, %v14398_v31 }
 0x915   :  { %v12585_v45 = vpop.eup %12584  ;;  %10494 = vmatpush3.bf16.msra.mxu1 %v15509_v53  ;;  %12594 = vrcp.f32 %v7686_v11  ;;  %v15512_v11 = vld [vmem:[#allocation89_spill] sm:$0xff]  ;;  %v15538_v53 = vld [vmem:[#allocation88_spill] sm:$0xff] }
 0x916   :  { %10523 = vmatprep.subr.bf16.mxu1 %v15510_v5  ;;  %v7689_v15 = vpop.xlane.xlu0 %7688  ;;  %10578 = vmatprep.mubr.msk.f32.mxu1 %vm7096_vm2, %v7742_v57  ;;  %v7743_v38 = vmul.f32 %v12585_v45, %v14403_v10  ;;  %v15514_v57 = vld [vmem:[#allocation114_spill] sm:$0xff]  ;;  %v15516_v45 = vpack.c.bf16 %v13924_v35, %v13922_v29  ;;  %v15521_v29 = vpack.c.bf16 %v14053_v46, %v14051_v41  ;;  %v15534_v46 = vld [vmem:[#allocation127_spill] sm:$0xff] }
 0x917   :  { %v12587_v24 = vpop.eup %12586  ;;  %12596 = vrcp.f32 %v7689_v15  ;;  %v15522_v35 = vpack.c.bf16 %v13969_v50, %v13967_v43  ;;  %v15536_v43 = vpack.c.bf16 %v15534_v46, %v15535_v23  ;;  %v15537_v50 = vld [vmem:[#allocation90_spill] sm:$0xff]  ;;  %v12733_v5 = vld.sshfl [vmem:[#allocation10 + $0x8] sm:$0x33 pattern:$0x76325410] }
 0x918   :  { %10579 = vmatmul.mubr.msk.f32.gmra.mrb[222].mxu1 %vm7096_vm2, %v7743_v38  ;;  %v7692_v31 = vpop.xlane.xlu1 %7691  ;;  %v7744_v30 = vmul.f32 %v12587_v24, %v14408_v63 }
 0x919   :  { %v12589_v34 = vpop.eup %12588  ;;  %12598 = vrcp.f32 %v7692_v31 }
 0x91a   :  { %v7695_v2 = vpop.xlane.xlu0 %7694  ;;  %10581 = vmatprep.mubr.msk.f32.mxu1 %vm7096_vm2, %v7744_v30  ;;  %v7745_v12 = vmul.f32 %v12589_v34, %v14413_v20 }
 0x91b   :  { %v12591_v27 = vpop.eup %12590  ;;  %12600 = vrcp.f32 %v7695_v2 }
 0x91c   :  { %10582 = vmatmul.mubr.msk.f32.gmra.mrb[224].mxu1 %vm7096_vm2, %v7745_v12  ;;  %v7698_v59 = vpop.xlane.xlu1 %7697  ;;  %v7746_v10 = vmul.f32 %v12591_v27, %v14418_v39 }
 0x91d   :  { %v12593_v54 = vpop.eup %12592  ;;  %12602 = vrcp.f32 %v7698_v59 }
 0x91e   :  { %v7701_v33 = vpop.xlane.xlu0 %7700  ;;  %10584 = vmatprep.mubr.msk.f32.mxu1 %vm7096_vm2, %v7746_v10  ;;  %v7747_v63 = vmul.f32 %v12593_v54, %v14423_v47 }
 0x91f   :  { %v12595_v51 = vpop.eup %12594  ;;  %12604 = vrcp.f32 %v7701_v33 }
 0x920   :  { %10585 = vmatmul.mubr.msk.f32.gmra.mrb[226].mxu1 %vm7096_vm2, %v7747_v63  ;;  %v7748_v20 = vmul.f32 %v12595_v51, %v14427_v48 }
 0x921   :  { %v12597_v19 = vpop.eup %12596 }
 0x922   :  { %10587 = vmatprep.mubr.msk.f32.mxu1 %vm7096_vm2, %v7748_v20  ;;  %v7749_v49 = vmul.f32 %v12597_v19, %v14431_v62 }
 0x923   :  { %v12599_v7 = vpop.eup %12598 }
 0x924   :  { %10588 = vmatmul.mubr.msk.f32.gmra.mrb[228].mxu1 %vm7096_vm2, %v7749_v49  ;;  %v7750_v39 = vmul.f32 %v12599_v7, %v14435_v37 }
 0x925   :  { %v12601_v1 = vpop.eup %12600 }
 0x926   :  { %10590 = vmatprep.mubr.msk.f32.mxu1 %vm7096_vm2, %v7750_v39  ;;  %v7751_v47 = vmul.f32 %v12601_v1, %v14439_v36 }
 0x927   :  { %v12603_v16 = vpop.eup %12602 }
 0x928   :  { %10591 = vmatmul.mubr.msk.f32.gmra.mrb[230].mxu1 %vm7096_vm2, %v7751_v47  ;;  %v7752_v48 = vmul.f32 %v12603_v16, %v14443_v56  ;;  %v15511_v56 = vld [vmem:[#allocation91_spill] sm:$0xff] }
 0x929   :  { %v12605_v17 = vpop.eup %12604 }
 0x92a   :  { %10593 = vmatprep.mubr.msk.f32.mxu1 %vm7096_vm2, %v7752_v48  ;;  %v7753_v62 = vmul.f32 %v12605_v17, %v14447_v0  ;;  %v15513_v0 = vpack.c.bf16 %v13915_v40, %v13913_v32  ;;  %v15519_v32 = vpack.c.bf16 %v14044_v18, %v14042_v22  ;;  %v15520_v40 = vpack.c.bf16 %v13956_v8, %v13954_v26  ;;  %v15529_v22 = vld [vmem:[#allocation94_spill] sm:$0xff]  ;;  %v15531_v8 = vld [vmem:[#allocation108_spill] sm:$0xff]  ;;  %v15532_v18 = vld [vmem:[#allocation109_spill] sm:$0xff] }
 0x92b   :  { %v15533_v41 = vpack.c.bf16 %v15531_v8, %v15532_v18  ;;  %v13103_v17 = vmov 0.0|0.0  }
 0x92c   :  { %10594 = vmatmul.mubr.msk.f32.gmra.mrb[232].mxu1 %vm7096_vm2, %v7753_v62  ;;  %10707 = vmatprep.subr.bf16.mxu0 %v13103_v17 }
 0x94a   :  { %v7704_v58 = vpop.xlane.xlu1 %7703 }
 0x94b   :  { %12606 = vrcp.f32 %v7704_v58 }
 0x951   :  { %v7707_v37 = vpop.xlane.xlu0 %7706 }
 0x952   :  { %12608 = vrcp.f32 %v7707_v37 }
 0x955   :  { %v12607_v4 = vpop.eup %12606 }
 0x956   :  { %v7754_v9 = vmul.f32 %v12607_v4, %v14453_v14  ;;  %v15515_v14 = vpack.c.bf16 %v14029_v42, %v14027_v44  ;;  %v15523_v42 = vld [vmem:[#allocation102_spill] sm:$0xff]  ;;  %v15526_v44 = vld [vmem:[#allocation97_spill] sm:$0xff] }
 0x957   :  { %v15524_v3 = vpack.c.bf16 %v14062_v61, %v15523_v42  ;;  %v15539_v61 = vpack.c.bf16 %v15537_v50, %v15538_v53 }
 0x958   :  { %10596 = vmatprep.mubr.msk.f32.mxu1 %vm7096_vm2, %v7754_v9  ;;  %v13105_v9 = vmov 0.0  }
 0x959   :  { %10611 = vmatprep.mubr.msk.f32.mxu0 %vm13104_vm9, %v13105_v9 }
 0x95c   :  { %v12609_v36 = vpop.eup %12608 }
 0x95d   :  { %v7755_v28 = vmul.f32 %v12609_v36, %v14459_v55  ;;  %v15517_v55 = vpack.c.bf16 %v14035_v60, %v14033_v25  ;;  %v15527_v25 = vpack.c.bf16 %v15525_v52, %v15526_v44  ;;  %v15528_v60 = vld [vmem:[#allocation96_spill] sm:$0xff] }
 0x95e   :  { %v15530_v26 = vpack.c.bf16 %v15528_v60, %v15529_v22 }
 0x95f   :  { %10597 = vmatmul.mubr.msk.f32.gmra.mrb[234].mxu1 %vm7096_vm2, %v7755_v28 }
 0x960   :  { %9414 = vmatprep.mubr.bf16.mxu1 %v15511_v56  ;;  %v15540_v56 = vld [vmem:[#allocation106_spill] sm:$0xff] }
 0x963   :  { %9415 = vmatmul.mubr.bf16.vlgmr.msra.gmra.mrb[236].mxu1 %v15512_v11 }
 0x964   :  { %10524 = vmatpush3.bf16.msra.mxu1 %v15513_v0  ;;  %9494 = vmatprep.mubr.bf16.mxu1 %v15514_v57  ;;  %v15541_v57 = vld [vmem:[#allocation107_spill] sm:$0xff] }
 0x965   :  { %10525 = vmatprep.subr.bf16.mxu1 %v15515_v14  ;;  %v15542_v14 = vld [vmem:[#allocation112_spill] sm:$0xff] }
 0x968   :  { %10526 = vmatpush3.bf16.msra.mxu1 %v15516_v45  ;;  %v15543_v45 = vld [vmem:[#allocation113_spill] sm:$0xff] }
 0x969   :  { %10527 = vmatprep.subr.bf16.mxu1 %v15517_v55  ;;  %v15544_v55 = vld [vmem:[#allocation128_spill] sm:$0xff] }
 0x96c   :  { %10528 = vmatpush3.bf16.msra.mxu1 %v15518_v6 }
 0x96d   :  { %10529 = vmatprep.subr.bf16.mxu1 %v15519_v32  ;;  %v15545_v32 = vld [vmem:[#allocation129_spill] sm:$0xff] }
 0x970   :  { %10530 = vmatpush3.bf16.msra.mxu1 %v15520_v40 }
 0x971   :  { %10531 = vmatprep.subr.bf16.mxu1 %v15521_v29 }
 0x974   :  { %10532 = vmatpush3.bf16.msra.mxu1 %v15522_v35 }
 0x975   :  { %10533 = vmatprep.subr.bf16.mxu1 %v15524_v3 }
 0x978   :  { %10534 = vmatpush3.bf16.msra.mxu1 %v15527_v25 }
 0x979   :  { %10535 = vmatprep.subr.bf16.mxu1 %v15530_v26 }
 0x97c   :  { %10536 = vmatpush3.bf16.msra.mxu1 %v15533_v41 }
 0x97d   :  { %10537 = vmatprep.subr.bf16.mxu1 %v15536_v43 }
 0x980   :  { %10538 = vmatpush3.bf16.msra.mxu1 %v15539_v61 }
 0x983   :  { %9495 = vmatmul.mubr.bf16.vlgmr.msra.gmra.mrb[240].mxu1 %v12733_v5 }
 0x999   :  { %v14623_v15 = vpop.f32.mrb[208].mxu1 }
 0x99a   :  { %v14625_v38 = vpop.f32.mrb[209].mxu1 }
 0x9c7   :  { %v14627_v24 = vpop.f32.mrb[210].mxu1 }
 0x9c8   :  { %v14629_v31 = vpop.f32.mrb[211].mxu1 }
 0x9cb   :  { %v10565_v30 = vpop.f32.mrb[212].mxu1 }
 0x9cc   :  { %8017 = vst.msk [vmem:[#allocation6 + $0x8] sm:$0xff] %vm7096_vm2, %v10565_v30  ;;  %v7897_v34 = vpop.f32.mrb[213].mxu1 }
 0x9cd   :  { %8016 = vst.msk [vmem:[#allocation6] sm:$0xff] %vm7096_vm2, %v7897_v34 }
 0x9cf   :  { %v10568_v2 = vpop.f32.mrb[214].mxu1 }
 0x9d0   :  { %8019 = vst.msk [vmem:[#allocation6 + $0x18] sm:$0xff] %vm7096_vm2, %v10568_v2  ;;  %v7907_v12 = vpop.f32.mrb[215].mxu1 }
 0x9d1   :  { %8018 = vst.msk [vmem:[#allocation6 + $0x10] sm:$0xff] %vm7096_vm2, %v7907_v12 }
 0x9d3   :  { %v10571_v27 = vpop.f32.mrb[216].mxu1 }
 0x9d4   :  { %8021 = vst.msk [vmem:[#allocation6 + $0x28] sm:$0xff] %vm7096_vm2, %v10571_v27  ;;  %v7917_v59 = vpop.f32.mrb[217].mxu1 }
 0x9d5   :  { %8020 = vst.msk [vmem:[#allocation6 + $0x20] sm:$0xff] %vm7096_vm2, %v7917_v59 }
 0x9d7   :  { %v10574_v10 = vpop.f32.mrb[218].mxu1 }
 0x9d8   :  { %8030 = vrot.lane.b32.xlu0 %v10574_v10, %s13100_s1  ;;  %v7927_v54 = vpop.f32.mrb[219].mxu1 }
 0x9d9   :  { %8028 = vrot.lane.b32.xlu1 %v7927_v54, %s13100_s1 }
 0x9df   :  { %v10577_v33 = vpop.f32.mrb[220].mxu1 }
 0x9e0   :  { %8034 = vrot.lane.b32.xlu1 %v10577_v33, %s13100_s1  ;;  %v7937_v63 = vpop.f32.mrb[221].mxu1  ;;  %v8127_v33 = vld [vmem:[#allocation30] sm:$0xf] }
 0x9e1   :  { %8032 = vrot.lane.b32.xlu0 %v7937_v63, %s13100_s1 }
 0x9eb   :  { %v10580_v51 = vpop.f32.mrb[222].mxu1 }
 0x9ec   :  { %v7947_v20 = vpop.f32.mrb[223].mxu1 }
 0x9ef   :  { %v10583_v19 = vpop.f32.mrb[224].mxu1 }
 0x9f0   :  { %8061 = vrot.lane.b32.xlu1 %v10583_v19, %s13101_s2  ;;  %v7957_v49 = vpop.f32.mrb[225].mxu1 }
 0x9f3   :  { %v10586_v7 = vpop.f32.mrb[226].mxu1 }
 0x9f4   :  { %8059 = vrot.lane.b32.xlu1 %v7957_v49, %s13101_s2  ;;  %v7967_v39 = vpop.f32.mrb[227].mxu1 }
 0x9f5   :  { %8063 = vrot.lane.b32.xlu0 %v7967_v39, %s13101_s2 }
 0x9f7   :  { %v10589_v1 = vpop.f32.mrb[228].mxu1 }
 0x9f8   :  { %8065 = vrot.lane.b32.xlu1 %v10586_v7, %s13101_s2  ;;  %v7977_v47 = vpop.f32.mrb[229].mxu1 }
 0x9fb   :  { %v10592_v16 = vpop.f32.mrb[230].mxu1 }
 0x9fc   :  { %8092 = vrot.lane.b32.xlu1 %v10592_v16, %s13102_s25  ;;  %v7987_v48 = vpop.f32.mrb[231].mxu1 }
 0x9fd   :  { %8090 = vrot.lane.b32.xlu0 %v7987_v48, %s13102_s25 }
 0x9ff   :  { %v10595_v62 = vpop.f32.mrb[232].mxu1 }
 0xa00   :  { %8038 = vrot.lane.b32.xlu1 %v10580_v51, %s13100_s1  ;;  %v7997_v58 = vpop.f32.mrb[233].mxu1 }
 0xa01   :  { %8036 = vrot.lane.b32.xlu0 %v7947_v20, %s13100_s1 }
 0xa04   :  { %8096 = vrot.lane.b32.xlu1 %v10595_v62, %s13102_s25 }
 0xa05   :  { %8094 = vrot.lane.b32.xlu0 %v7997_v58, %s13102_s25 }
 0xa08   :  { %8069 = vrot.lane.b32.xlu1 %v10589_v1, %s13101_s2 }
 0xa09   :  { %8067 = vrot.lane.b32.xlu0 %v7977_v47, %s13101_s2 }
 0xa32   :  { %v10598_v37 = vpop.f32.mrb[234].mxu1 }
 0xa33   :  { %8100 = vrot.lane.b32.xlu1 %v10598_v37, %s13102_s25  ;;  %v8007_v4 = vpop.f32.mrb[235].mxu1 }
 0xa34   :  { %8098 = vrot.lane.b32.xlu0 %v8007_v4, %s13102_s25 }
 0xa4a   :  { %v8031_v36 = vpop.permute.xlu0 %8030 }
 0xa4b   :  { %8048 = vst.msk [vmem:[#allocation6 + $0x8] sm:$0xff] %vm8046_vm10, %v8031_v36  ;;  %v8029_v28 = vpop.permute.xlu1 %8028 }
 0xa4c   :  { %8047 = vst.msk [vmem:[#allocation6] sm:$0xff] %vm8046_vm10, %v8029_v28 }
 0xa52   :  { %6976 = vxpose.xlu0.b32.start [1/6] (short) (narrow) %v15540_v56, 40  ;;  %v8035_v11 = vpop.permute.xlu1 %8034 }
 0xa53   :  { %8050 = vst.msk [vmem:[#allocation6 + $0x18] sm:$0xff] %vm8046_vm10, %v8035_v11  ;;  %v8033_v0 = vpop.permute.xlu0 %8032 }
 0xa54   :  { %8049 = vst.msk [vmem:[#allocation6 + $0x10] sm:$0xff] %vm8046_vm10, %v8033_v0 }
 0xa56   :  { %6977 = vxpose.xlu0.b32.cont [2/6] (short) (narrow) %v15541_v57, 40 }
 0xa5a   :  { %6978 = vxpose.xlu0.b32.cont [3/6] (short) (narrow) %v15542_v14, 40 }
 0xa5e   :  { %6979 = vxpose.xlu0.b32.cont [4/6] (short) (narrow) %v15543_v45, 40 }
 0xa62   :  { %6980 = vxpose.xlu0.b32.cont [5/6] (short) (narrow) %v15544_v55, 40  ;;  %v8062_v6 = vpop.permute.xlu1 %8061 }
 0xa63   :  { %8079 = vst.msk [vmem:[#allocation6 + $0x8] sm:$0xff] %vm8077_vm11, %v8062_v6 }
 0xa66   :  { %6981 = vxpose.xlu0.b32.end [6/6] (short) (narrow) %v15545_v32, 40  ;;  %v8060_v40 = vpop.permute.xlu1 %8059 }
 0xa67   :  { %8078 = vst.msk [vmem:[#allocation6] sm:$0xff] %vm8077_vm11, %v8060_v40  ;;  %v8064_v29 = vpop.permute.xlu0 %8063 }
 0xa68   :  { %8080 = vst.msk [vmem:[#allocation6 + $0x10] sm:$0xff] %vm8077_vm11, %v8064_v29 }
 0xa6a   :  { %v8066_v35 = vpop.permute.xlu1 %8065 }
 0xa6b   :  { %8081 = vst.msk [vmem:[#allocation6 + $0x18] sm:$0xff] %vm8077_vm11, %v8066_v35 }
 0xa6e   :  { %v8093_v42 = vpop.permute.xlu1 %8092 }
 0xa6f   :  { %8110 = vst.msk [vmem:[#allocation6 + $0x8] sm:$0xff] %vm8108_vm12, %v8093_v42  ;;  %v8091_v3 = vpop.permute.xlu0 %8090 }
 0xa70   :  { %8109 = vst.msk [vmem:[#allocation6] sm:$0xff] %vm8108_vm12, %v8091_v3 }
 0xa72   :  { %v8039_v52 = vpop.permute.xlu1 %8038 }
 0xa73   :  { %8052 = vst.msk [vmem:[#allocation6 + $0x28] sm:$0xff] %vm8046_vm10, %v8039_v52  ;;  %v8037_v44 = vpop.permute.xlu0 %8036 }
 0xa74   :  { %8051 = vst.msk [vmem:[#allocation6 + $0x20] sm:$0xff] %vm8046_vm10, %v8037_v44 }
 0xa76   :  { %v8097_v25 = vpop.permute.xlu1 %8096  ;;  %v8116_v60 = vld [vmem:[#allocation6 + $0x8] sm:$0xff] }
 0xa77   :  { %8112 = vst.msk [vmem:[#allocation6 + $0x18] sm:$0xff] %vm8108_vm12, %v8097_v25  ;;  %v8095_v22 = vpop.permute.xlu0 %8094  ;;  %v8115_v26 = vld [vmem:[#allocation6] sm:$0xff]  ;;  %v8122_v8 = vmul.f32 %v8116_v60, %v15541_v57 }
 0xa78   :  { %8111 = vst.msk [vmem:[#allocation6 + $0x10] sm:$0xff] %vm8108_vm12, %v8095_v22  ;;  %v8121_v18 = vmul.f32 %v8115_v26, %v15540_v56 }
 0xa7a   :  { %v8070_v46 = vpop.permute.xlu1 %8069  ;;  %v10708_v23 = vpack.c.bf16 %v8122_v8, %v8121_v18 }
 0xa7b   :  { %8083 = vst.msk [vmem:[#allocation6 + $0x28] sm:$0xff] %vm8077_vm11, %v8070_v46  ;;  %v8068_v43 = vpop.permute.xlu0 %8067 }
 0xa7c   :  { %8082 = vst.msk [vmem:[#allocation6 + $0x20] sm:$0xff] %vm8077_vm11, %v8068_v43  ;;  %10710 = vmatpush3.bf16.xpose.msk.msra.mxu0 %vm14670_vm14, %v10708_v23 }
 0xa7d   :  { %10711 = vmatprep.subr.bf16.mxu0 %v13103_v17 }
 0xa7e   :  { %v8118_v50 = vld [vmem:[#allocation6 + $0x18] sm:$0xff] }
 0xa7f   :  { %v8117_v53 = vld [vmem:[#allocation6 + $0x10] sm:$0xff]  ;;  %v8124_v61 = vmul.f32 %v8118_v50, %v15543_v45 }
 0xa80   :  { %v8123_v5 = vmul.f32 %v8117_v53, %v15542_v14 }
 0xa82   :  { %v10712_v30 = vpack.c.bf16 %v8124_v61, %v8123_v5 }
 0xa84   :  { %10714 = vmatpush3.bf16.xpose.msk.msra.mxu0 %vm14670_vm14, %v10712_v30 }
 0xa85   :  { %10715 = vmatprep.subr.bf16.mxu0 %v13103_v17 }
 0xaa5   :  { %v8101_v34 = vpop.permute.xlu1 %8100 }
 0xaa6   :  { %8114 = vst.msk [vmem:[#allocation6 + $0x28] sm:$0xff] %vm8108_vm12, %v8101_v34  ;;  %v8099_v2 = vpop.permute.xlu0 %8098 }
 0xaa7   :  { %8113 = vst.msk [vmem:[#allocation6 + $0x20] sm:$0xff] %vm8108_vm12, %v8099_v2 }
 0xaad   :  { %v8120_v12 = vld [vmem:[#allocation6 + $0x28] sm:$0xff] }
 0xaae   :  { %v8119_v27 = vld [vmem:[#allocation6 + $0x20] sm:$0xff]  ;;  %v8126_v59 = vmul.f32 %v8120_v12, %v15545_v32 }
 0xaaf   :  { %v8125_v10 = vmul.f32 %v8119_v27, %v15544_v55 }
 0xab1   :  { %v10716_v54 = vpack.c.bf16 %v8126_v59, %v8125_v10 }
 0xab3   :  { %10718 = vmatpush3.bf16.xpose.msk.msra.mxu0 %vm14670_vm14, %v10716_v54 }
 0xaba   :  { %10612 = vmatmul.mubr.msk.f32.vlgmr.msra.gmra.mrb[220].mxu0 %vm8128_vm13, %v8127_v33 }
 0xad2   :  { %v14691_v63 = vpop.trf.xlu0 }
 0xad3   :  { %7011 = vst.msk [vmem:[#allocation5] sm:$0xff] %vm7010_vm3, %v14691_v63  ;;  %7074 = vrot.lane.b32.xlu0 %v14691_v63, %s13094_s9  ;;  %7026 = vrot.lane.b32.xlu1 %v14691_v63, %s13093_s13 }
 0xad6   :  { %v14699_v51 = vpop.trf.xlu0 }
 0xad7   :  { %7012 = vst.msk [vmem:[#allocation5 + $0x8] sm:$0xff] %vm7010_vm3, %v14699_v51  ;;  %7028 = vrot.lane.b32.xlu1 %v14699_v51, %s13093_s13 }
 0xada   :  { %v14705_v20 = vpop.trf.xlu0  ;;  %v8352_v36 = vld [vmem:[#allocation5] sm:$0xff] }
 0xadb   :  { %7013 = vst.msk [vmem:[#allocation5 + $0x10] sm:$0xff] %vm7010_vm3, %v14705_v20  ;;  %7030 = vrot.lane.b32.xlu1 %v14705_v20, %s13093_s13  ;;  %v14759_v11 = vmul.f32 100.0, %v8352_v36 }
 0xadd   :  { %v8392_v14 = vsel %vm7010_vm3, %v14759_v11, -inf }
 0xade   :  { %v14711_v19 = vpop.trf.xlu0  ;;  %v8353_v57 = vld [vmem:[#allocation5 + $0x8] sm:$0xff] }
 0xadf   :  { %7014 = vst.msk [vmem:[#allocation5 + $0x18] sm:$0xff] %vm7010_vm3, %v14711_v19  ;;  %v14764_v45 = vmul.f32 100.0, %v8353_v57 }
 0xae1   :  { %v8395_v35 = vsel %vm7010_vm3, %v14764_v45, -inf }
 0xae2   :  { %v14715_v49 = vpop.trf.xlu0  ;;  %v8354_v32 = vld [vmem:[#allocation5 + $0x10] sm:$0xff] }
 0xae3   :  { %7015 = vst.msk [vmem:[#allocation5 + $0x20] sm:$0xff] %vm7010_vm3, %v14715_v49  ;;  %v14776_v3 = vmul.f32 100.0, %v8354_v32 }
 0xae5   :  { %v8398_v22 = vsel %vm7010_vm3, %v14776_v3, -inf }
 0xae6   :  { %v8355_v25 = vld [vmem:[#allocation5 + $0x18] sm:$0xff] }
 0xae7   :  { %v14785_v8 = vmul.f32 100.0, %v8355_v25 }
 0xae9   :  { %v8401_v43 = vsel %vm7010_vm3, %v14785_v8, -inf }
 0xaea   :  { %v8356_v46 = vld [vmem:[#allocation5 + $0x20] sm:$0xff] }
 0xaeb   :  { %v14794_v53 = vmul.f32 100.0, %v8356_v46 }
 0xaed   :  { %v8404_v34 = vsel %vm7010_vm3, %v14794_v53, -inf }
 0xb45   :  { %v7075_v7 = vpop.permute.xlu0 %7074  ;;  %v7027_v39 = vpop.permute.xlu1 %7026 }
 0xb46   :  { %7089 = vst.msk [vmem:[#allocation5 + $0x78] sm:$0xff] %vm7010_vm3, %v7075_v7  ;;  %7041 = vst.msk [vmem:[#allocation5 + $0x28] sm:$0xff] %vm7010_vm3, %v7027_v39 }
 0xb49   :  { %v7029_v1 = vpop.permute.xlu1 %7028 }
 0xb4a   :  { %7042 = vst.msk [vmem:[#allocation5 + $0x30] sm:$0xff] %vm7010_vm3, %v7029_v1 }
 0xb4d   :  { %v7031_v47 = vpop.permute.xlu1 %7030  ;;  %v8357_v40 = vld [vmem:[#allocation5 + $0x28] sm:$0xff]  ;;  %v8367_v36 = vld [vmem:[#allocation5 + $0x78] sm:$0xff] }
 0xb4e   :  { %7043 = vst.msk [vmem:[#allocation5 + $0x38] sm:$0xff] %vm7010_vm3, %v7031_v47  ;;  %v14778_v52 = vmul.f32 100.0, %v8357_v40 }
 0xb50   :  { %v8407_v26 = vsel %vm7010_vm3, %v14778_v52, -inf }
 0xb51   :  { %v8358_v30 = vld [vmem:[#allocation5 + $0x30] sm:$0xff] }
 0xb52   :  { %v14803_v12 = vmul.f32 100.0, %v8358_v30 }
 0xb54   :  { %v8410_v33 = vsel %vm7010_vm3, %v14803_v12, -inf }
 0xb55   :  { %v8359_v60 = vld [vmem:[#allocation5 + $0x38] sm:$0xff] }
 0xb56   :  { %v14787_v18 = vmul.f32 100.0, %v8359_v60 }
 0xb58   :  { %v8413_v50 = vsel %vm7010_vm3, %v14787_v18, -inf }
 0xb8d   :  { %v8216_v16 = vpop.f32.mrb[220].mxu0 }
 0xb8e   :  { %8220 = vst.msk [vmem:[#allocation8] sm:$0xf] %vm7008_vm0, %v8216_v16  ;;  %8222 = vrot.lane.b32.xlu1 %v8216_v16, %s13093_s13  ;;  %v10613_v48 = vpop.f32.mrb[221].mxu0 }
 0xb92   :  { %8226 = vrot.lane.b32.xlu1 %v8216_v16, %s13095_s8 }
 0xb96   :  { %8230 = vrot.lane.b32.xlu1 %v8216_v16, %s13094_s9 }
 0xb9a   :  { %7032 = vrot.lane.b32.xlu1 %v14711_v19, %s13093_s13 }
 0xb9e   :  { %7034 = vrot.lane.b32.xlu1 %v14715_v49, %s13093_s13 }
 0xba2   :  { %7050 = vrot.lane.b32.xlu1 %v14691_v63, %s13095_s8 }
 0xba6   :  { %7052 = vrot.lane.b32.xlu1 %v14699_v51, %s13095_s8 }
 0xbaa   :  { %7054 = vrot.lane.b32.xlu1 %v14705_v20, %s13095_s8 }
 0xbae   :  { %7056 = vrot.lane.b32.xlu1 %v14711_v19, %s13095_s8 }
 0xbb2   :  { %7058 = vrot.lane.b32.xlu1 %v14715_v49, %s13095_s8 }
 0xbb6   :  { %7076 = vrot.lane.b32.xlu1 %v14699_v51, %s13094_s9 }
 0xbba   :  { %7078 = vrot.lane.b32.xlu1 %v14705_v20, %s13094_s9 }
 0xbbe   :  { %7080 = vrot.lane.b32.xlu1 %v14711_v19, %s13094_s9 }
 0xbc2   :  { %7082 = vrot.lane.b32.xlu1 %v14715_v49, %s13094_s9 }
 0xc00   :  { %v8223_v62 = vpop.permute.xlu1 %8222 }
 0xc01   :  { %8225 = vst.msk [vmem:[#allocation8 + $0x4] sm:$0xf] %vm7008_vm0, %v8223_v62 }
 0xc04   :  { %v8227_v58 = vpop.permute.xlu1 %8226 }
 0xc05   :  { %8229 = vst.msk [vmem:[#allocation8 + $0x8] sm:$0xf] %vm7008_vm0, %v8227_v58 }
 0xc08   :  { %v8231_v37 = vpop.permute.xlu1 %8230  ;;  %v14751_v4 = vld [vmem:[#allocation8] sm:$0xff] }
 0xc09   :  { %8233 = vst.msk [vmem:[#allocation8 + $0xc] sm:$0xf] %vm7008_vm0, %v8231_v37  ;;  %v14755_v28 = vmul.f32 100.0, %v14751_v4  ;;  %vm8891_vm0 = vcmask 294080  }
 0xc0b   :  { %v8238_v56 = vsel %vm7010_vm3, %v14755_v28, -inf }
 0xc0c   :  { %8239 = vmax.xlane.f32.xlu1 %v8238_v56  ;;  %v7033_v0 = vpop.permute.xlu1 %7032 }
 0xc0d   :  { %7044 = vst.msk [vmem:[#allocation5 + $0x40] sm:$0xff] %vm7010_vm3, %v7033_v0 }
 0xc10   :  { %8393 = vmax.xlane.f32.xlu1 %v8392_v14  ;;  %v7035_v55 = vpop.permute.xlu1 %7034  ;;  %v14766_v6 = vld [vmem:[#allocation8 + $0x8] sm:$0xff] }
 0xc11   :  { %7045 = vst.msk [vmem:[#allocation5 + $0x48] sm:$0xff] %vm7010_vm3, %v7035_v55  ;;  %v14770_v29 = vmul.f32 100.0, %v14766_v6  ;;  %v14828_v55 = vmul.f32 100.0, %v8367_v36 }
 0xc13   :  { %v8241_v42 = vsel %vm7010_vm3, %v14770_v29, -inf }
 0xc14   :  { %8396 = vmax.xlane.f32.xlu1 %v8395_v35  ;;  %8242 = vmax.xlane.f32.xlu0 %v8241_v42  ;;  %v7051_v44 = vpop.permute.xlu1 %7050  ;;  %v8360_v10 = vld [vmem:[#allocation5 + $0x40] sm:$0xff]  ;;  %v8437_v42 = vsel %vm7010_vm3, %v14828_v55, -inf }
 0xc15   :  { %7065 = vst.msk [vmem:[#allocation5 + $0x50] sm:$0xff] %vm7010_vm3, %v7051_v44  ;;  %v14812_v39 = vmul.f32 100.0, %v8360_v10 }
 0xc17   :  { %v8416_v16 = vsel %vm7010_vm3, %v14812_v39, -inf }
 0xc18   :  { %8399 = vmax.xlane.f32.xlu1 %v8398_v22  ;;  %8408 = vmax.xlane.f32.xlu0 %v8407_v26  ;;  %v7053_v41 = vpop.permute.xlu1 %7052  ;;  %v8361_v23 = vld [vmem:[#allocation5 + $0x48] sm:$0xff] }
 0xc19   :  { %7066 = vst.msk [vmem:[#allocation5 + $0x58] sm:$0xff] %vm7010_vm3, %v7053_v41  ;;  %v14796_v61 = vmul.f32 100.0, %v8361_v23 }
 0xc1b   :  { %v8419_v2 = vsel %vm7010_vm3, %v14796_v61, -inf }
 0xc1c   :  { %8402 = vmax.xlane.f32.xlu1 %v8401_v43  ;;  %8414 = vmax.xlane.f32.xlu0 %v8413_v50  ;;  %v7055_v5 = vpop.permute.xlu1 %7054  ;;  %v8362_v47 = vld [vmem:[#allocation5 + $0x50] sm:$0xff] }
 0xc1d   :  { %7067 = vst.msk [vmem:[#allocation5 + $0x60] sm:$0xff] %vm7010_vm3, %v7055_v5  ;;  %v14817_v48 = vmul.f32 100.0, %v8362_v47 }
 0xc1f   :  { %v8422_v0 = vsel %vm7010_vm3, %v14817_v48, -inf }
 0xc20   :  { %8405 = vmax.xlane.f32.xlu1 %v8404_v34  ;;  %8420 = vmax.xlane.f32.xlu0 %v8419_v2  ;;  %v7057_v27 = vpop.permute.xlu1 %7056  ;;  %v8363_v59 = vld [vmem:[#allocation5 + $0x58] sm:$0xff] }
 0xc21   :  { %7068 = vst.msk [vmem:[#allocation5 + $0x68] sm:$0xff] %vm7010_vm3, %v7057_v27  ;;  %v14806_v54 = vmul.f32 100.0, %v8363_v59 }
 0xc23   :  { %v8425_v7 = vsel %vm7010_vm3, %v14806_v54, -inf }
 0xc24   :  { %8411 = vmax.xlane.f32.xlu1 %v8410_v33  ;;  %8426 = vmax.xlane.f32.xlu0 %v8425_v7  ;;  %v7059_v1 = vpop.permute.xlu1 %7058  ;;  %v8364_v37 = vld [vmem:[#allocation5 + $0x60] sm:$0xff] }
 0xc25   :  { %7069 = vst.msk [vmem:[#allocation5 + $0x70] sm:$0xff] %vm7010_vm3, %v7059_v1  ;;  %v14826_v14 = vmul.f32 100.0, %v8364_v37 }
 0xc27   :  { %v8428_v35 = vsel %vm7010_vm3, %v14826_v14, -inf }
 0xc28   :  { %8417 = vmax.xlane.f32.xlu1 %v8416_v16  ;;  %v7077_v62 = vpop.permute.xlu1 %7076  ;;  %v8365_v58 = vld [vmem:[#allocation5 + $0x68] sm:$0xff] }
 0xc29   :  { %7090 = vst.msk [vmem:[#allocation5 + $0x80] sm:$0xff] %vm7010_vm3, %v7077_v62  ;;  %v14820_v56 = vmul.f32 100.0, %v8365_v58 }
 0xc2b   :  { %v8431_v57 = vsel %vm7010_vm3, %v14820_v56, -inf }
 0xc2c   :  { %8423 = vmax.xlane.f32.xlu1 %v8422_v0  ;;  %8432 = vmax.xlane.f32.xlu0 %v8431_v57  ;;  %v7079_v32 = vpop.permute.xlu1 %7078  ;;  %v8366_v40 = vld [vmem:[#allocation5 + $0x70] sm:$0xff] }
 0xc2d   :  { %7091 = vst.msk [vmem:[#allocation5 + $0x88] sm:$0xff] %vm7010_vm3, %v7079_v32  ;;  %v14835_v44 = vmul.f32 100.0, %v8366_v40 }
 0xc2f   :  { %v8434_v22 = vsel %vm7010_vm3, %v14835_v44, -inf }
 0xc30   :  { %8429 = vmax.xlane.f32.xlu1 %v8428_v35  ;;  %8438 = vmax.xlane.f32.xlu0 %v8437_v42  ;;  %v7081_v25 = vpop.permute.xlu1 %7080  ;;  %v8368_v60 = vld [vmem:[#allocation5 + $0x80] sm:$0xff] }
 0xc31   :  { %7092 = vst.msk [vmem:[#allocation5 + $0x90] sm:$0xff] %vm7010_vm3, %v7081_v25  ;;  %v14840_v26 = vmul.f32 100.0, %v8368_v60 }
 0xc33   :  { %v8440_v43 = vsel %vm7010_vm3, %v14840_v26, -inf }
 0xc34   :  { %8435 = vmax.xlane.f32.xlu1 %v8434_v22  ;;  %v7083_v41 = vpop.permute.xlu1 %7082  ;;  %v8369_v46 = vld [vmem:[#allocation5 + $0x88] sm:$0xff] }
 0xc35   :  { %7093 = vst.msk [vmem:[#allocation5 + $0x98] sm:$0xff] %vm7010_vm3, %v7083_v41  ;;  %v14843_v23 = vmul.f32 100.0, %v8369_v46 }
 0xc37   :  { %v8443_v50 = vsel %vm7010_vm3, %v14843_v23, -inf }
 0xc38   :  { %8441 = vmax.xlane.f32.xlu1 %v8440_v43  ;;  %8444 = vmax.xlane.f32.xlu0 %v8443_v50  ;;  %v8370_v5 = vld [vmem:[#allocation5 + $0x90] sm:$0xff] }
 0xc39   :  { %v14849_v30 = vmul.f32 100.0, %v8370_v5 }
 0xc3b   :  { %v8446_v34 = vsel %vm7010_vm3, %v14849_v30, -inf }
 0xc3c   :  { %8447 = vmax.xlane.f32.xlu1 %v8446_v34  ;;  %v8371_v2 = vld [vmem:[#allocation5 + $0x98] sm:$0xff] }
 0xc3d   :  { %v14853_v27 = vmul.f32 100.0, %v8371_v2 }
 0xc3f   :  { %v8449_v59 = vsel %vm7010_vm3, %v14853_v27, -inf }
 0xc40   :  { %8450 = vmax.xlane.f32.xlu0 %v8449_v59 }
 0xc99   :  { %v8240_v10 = vpop.xlane.xlu1 %8239 }
 0xc9a   :  { %v8244_v33 = vsub.f32 %v14755_v28, %v8240_v10 }
 0xc9c   :  { %v8246_v7 = vmul.f32 1.442695, %v8244_v33 }
 0xc9d   :  { %v8394_v1 = vpop.xlane.xlu1 %8393 }
 0xc9e   :  { %12610 = vpow2.f32 %v8246_v7  ;;  %v8452_v47 = vsub.f32 %v14759_v11, %v8394_v1 }
 0xca0   :  { %v8472_v16 = vmul.f32 1.442695, %v8452_v47 }
 0xca1   :  { %v8243_v62 = vpop.xlane.xlu0 %8242  ;;  %v8397_v58 = vpop.xlane.xlu1 %8396 }
 0xca2   :  { %12612 = vpow2.f32 %v8472_v16  ;;  %v8245_v37 = vsub.f32 %v14770_v29, %v8243_v62  ;;  %v8453_v36 = vsub.f32 %v14764_v45, %v8397_v58 }
 0xca4   :  { %v8248_v0 = vmul.f32 1.442695, %v8245_v37  ;;  %v8474_v57 = vmul.f32 1.442695, %v8453_v36 }
 0xca5   :  { %v8409_v32 = vpop.xlane.xlu0 %8408  ;;  %v8400_v40 = vpop.xlane.xlu1 %8399 }
 0xca6   :  { %12614 = vpow2.f32 %v8248_v0  ;;  %v8454_v28 = vsub.f32 %v14776_v3, %v8400_v40  ;;  %v8457_v11 = vsub.f32 %v14778_v52, %v8409_v32 }
 0xca7   :  { %12616 = vpow2.f32 %v8474_v57 }
 0xca8   :  { %v14862_v35 = vpop.eup %12610  ;;  %v8476_v42 = vmul.f32 1.442695, %v8454_v28  ;;  %v8482_v46 = vmul.f32 1.442695, %v8457_v11 }
 0xca9   :  { %v8415_v25 = vpop.xlane.xlu0 %8414  ;;  %v8403_v60 = vpop.xlane.xlu1 %8402  ;;  %v8250_v29 = vsel %vm7010_vm3, %v14862_v35, 0.0 }
 0xcaa   :  { %v8455_v45 = vsub.f32 %v14785_v8, %v8403_v60  ;;  %8251 = vadd.xlane.f32.xlu1 %v8250_v29  ;;  %12618 = vpow2.f32 %v8476_v42  ;;  %v8459_v3 = vsub.f32 %v14787_v18, %v8415_v25 }
 0xcac   :  { %v14868_v22 = vpop.eup %12612  ;;  %v8478_v41 = vmul.f32 1.442695, %v8455_v45  ;;  %v8486_v2 = vmul.f32 1.442695, %v8459_v3 }
 0xcad   :  { %v8421_v43 = vpop.xlane.xlu0 %8420  ;;  %v8406_v50 = vpop.xlane.xlu1 %8405  ;;  %v8512_v52 = vsel %vm7010_vm3, %v14868_v22, 0.0 }
 0xcae   :  { %v8456_v5 = vsub.f32 %v14794_v53, %v8406_v50  ;;  %8513 = vadd.xlane.f32.xlu1 %v8512_v52  ;;  %12620 = vpow2.f32 %v8478_v41  ;;  %v8461_v59 = vsub.f32 %v14796_v61, %v8421_v43 }
 0xcaf   :  { %12622 = vpow2.f32 %v8482_v46 }
 0xcb0   :  { %v14874_v34 = vpop.eup %12614  ;;  %v8480_v8 = vmul.f32 1.442695, %v8456_v5  ;;  %v8490_v62 = vmul.f32 1.442695, %v8461_v59 }
 0xcb1   :  { %v8427_v10 = vpop.xlane.xlu0 %8426  ;;  %v8412_v33 = vpop.xlane.xlu1 %8411  ;;  %v8253_v18 = vsel %vm7010_vm3, %v14874_v34, 0.0 }
 0xcb2   :  { %v14879_v7 = vpop.eup %12616  ;;  %v8458_v1 = vsub.f32 %v14803_v12, %v8412_v33  ;;  %8254 = vadd.xlane.f32.xlu0 %v8253_v18  ;;  %12624 = vpow2.f32 %v8480_v8  ;;  %v8463_v53 = vsub.f32 %v14806_v54, %v8427_v10 }
 0xcb3   :  { %12626 = vpow2.f32 %v8486_v2  ;;  %v8515_v61 = vsel %vm7010_vm3, %v14879_v7, 0.0 }
 0xcb4   :  { %v8484_v47 = vmul.f32 1.442695, %v8458_v1  ;;  %v14883_v16 = vpop.eup %12618  ;;  %v8494_v12 = vmul.f32 1.442695, %v8463_v53 }
 0xcb5   :  { %v8418_v58 = vpop.xlane.xlu1 %8417  ;;  %v8518_v36 = vsel %vm7010_vm3, %v14883_v16, 0.0 }
 0xcb6   :  { %v8460_v37 = vsub.f32 %v14812_v39, %v8418_v58  ;;  %8516 = vadd.xlane.f32.xlu0 %v8515_v61  ;;  %12628 = vpow2.f32 %v8484_v47  ;;  %8519 = vadd.xlane.f32.xlu1 %v8518_v36 }
 0xcb7   :  { %12630 = vpow2.f32 %v8490_v62 }
 0xcb8   :  { %v8488_v0 = vmul.f32 1.442695, %v8460_v37  ;;  %v14890_v54 = vpop.eup %12620  ;;  %v7204_v37 = vld [vmem:[#allocation28] sm:$0xff] }
 0xcb9   :  { %v8433_v57 = vpop.xlane.xlu0 %8432  ;;  %v8424_v32 = vpop.xlane.xlu1 %8423  ;;  %v8521_v39 = vsel %vm7010_vm3, %v14890_v54, 0.0 }
 0xcba   :  { %12632 = vpow2.f32 %v8488_v0  ;;  %v8465_v40 = vsub.f32 %v14820_v56, %v8433_v57  ;;  %v8462_v28 = vsub.f32 %v14817_v48, %v8424_v32  ;;  %v14896_v42 = vpop.eup %12622  ;;  %8522 = vadd.xlane.f32.xlu0 %v8521_v39  ;;  %v7205_v57 = vld [vmem:[#allocation28 + $0x8] sm:$0xf]  ;;  %v7200_v39 = vld [vmem:[#allocation25] sm:$0xff] }
 0xcbb   :  { %12634 = vpow2.f32 %v8494_v12  ;;  %v8527_v48 = vsel %vm7010_vm3, %v14896_v42, 0.0  ;;  %v10719_v32 = vpack.c.bf16 %v7205_v57, %v7204_v37 }
 0xcbc   :  { %v8492_v11 = vmul.f32 1.442695, %v8462_v28  ;;  %v14898_v25 = vpop.eup %12624  ;;  %v8498_v60 = vmul.f32 1.442695, %v8465_v40 }
 0xcbd   :  { %v8439_v29 = vpop.xlane.xlu0 %8438  ;;  %v8430_v45 = vpop.xlane.xlu1 %8429  ;;  %v8524_v56 = vsel %vm7010_vm3, %v14898_v25, 0.0  ;;  %10721 = vmatprep.subr.msk.bf16.mxu0 %vm14313_vm6, %v10719_v32 }
 0xcbe   :  { %v8467_v41 = vsub.f32 %v14828_v55, %v8439_v29  ;;  %v8464_v46 = vsub.f32 %v14826_v14, %v8430_v45  ;;  %v14906_v3 = vpop.eup %12626  ;;  %12636 = vpow2.f32 %v8492_v11  ;;  %8528 = vadd.xlane.f32.xlu0 %v8527_v48  ;;  %8525 = vadd.xlane.f32.xlu1 %v8524_v56  ;;  %v7201_v11 = vld [vmem:[#allocation25 + $0x8] sm:$0xf] }
 0xcbf   :  { %12638 = vpow2.f32 %v8498_v60  ;;  %v8533_v14 = vsel %vm7010_vm3, %v14906_v3, 0.0  ;;  %10724 = vmatpush3.bf16.msk.msra.mxu0 %vm14313_vm6, %v10719_v32 }
 0xcc0   :  { %v8496_v43 = vmul.f32 1.442695, %v8464_v46  ;;  %v14908_v50 = vpop.eup %12628  ;;  %v8502_v52 = vmul.f32 1.442695, %v8467_v41 }
 0xcc1   :  { %v8436_v5 = vpop.xlane.xlu1 %8435  ;;  %v8530_v8 = vsel %vm7010_vm3, %v14908_v50, 0.0  ;;  %v14915_v2 = vpop.eup %12630 }
 0xcc2   :  { %v8466_v55 = vsub.f32 %v14835_v44, %v8436_v5  ;;  %12640 = vpow2.f32 %v8496_v43  ;;  %8534 = vadd.xlane.f32.xlu0 %v8533_v14  ;;  %8531 = vadd.xlane.f32.xlu1 %v8530_v8  ;;  %v8539_v62 = vsel %vm7010_vm3, %v14915_v2, 0.0 }
 0xcc3   :  { %12642 = vpow2.f32 %v8502_v52 }
 0xcc4   :  { %v14917_v59 = vpop.eup %12632  ;;  %v8500_v10 = vmul.f32 1.442695, %v8466_v55 }
 0xcc5   :  { %v8445_v33 = vpop.xlane.xlu0 %8444  ;;  %v8442_v18 = vpop.xlane.xlu1 %8441  ;;  %v8536_v44 = vsel %vm7010_vm3, %v14917_v59, 0.0 }
 0xcc6   :  { %v14921_v1 = vpop.eup %12634  ;;  %12644 = vpow2.f32 %v8500_v10  ;;  %v8469_v53 = vsub.f32 %v14843_v23, %v8445_v33  ;;  %v8468_v47 = vsub.f32 %v14840_v26, %v8442_v18  ;;  %8540 = vadd.xlane.f32.xlu0 %v8539_v62  ;;  %8537 = vadd.xlane.f32.xlu1 %v8536_v44 }
 0xcc7   :  { %v8545_v0 = vsel %vm7010_vm3, %v14921_v1, 0.0 }
 0xcc8   :  { %v8506_v58 = vmul.f32 1.442695, %v8469_v53  ;;  %v8504_v61 = vmul.f32 1.442695, %v8468_v47  ;;  %v14927_v36 = vpop.eup %12636 }
 0xcc9   :  { %v8448_v12 = vpop.xlane.xlu1 %8447  ;;  %v8542_v26 = vsel %vm7010_vm3, %v14927_v36, 0.0  ;;  %v14934_v40 = vpop.eup %12638 }
 0xcca   :  { %12646 = vpow2.f32 %v8506_v58  ;;  %v8470_v23 = vsub.f32 %v14849_v30, %v8448_v12  ;;  %8546 = vadd.xlane.f32.xlu0 %v8545_v0  ;;  %8543 = vadd.xlane.f32.xlu1 %v8542_v26  ;;  %v10725_v30 = vpack.c.bf16 %v7201_v11, %v7200_v39  ;;  %v8551_v41 = vsel %vm7010_vm3, %v14934_v40, 0.0 }
 0xccb   :  { %12648 = vpow2.f32 %v8504_v61 }
 0xccc   :  { %v8508_v28 = vmul.f32 1.442695, %v8470_v23  ;;  %v14938_v60 = vpop.eup %12640  ;;  %10727 = vmatprep.subr.msk.bf16.mxu0 %vm14313_vm6, %v10725_v30 }
 0xccd   :  { %v8451_v29 = vpop.xlane.xlu0 %8450  ;;  %v8548_v46 = vsel %vm7010_vm3, %v14938_v60, 0.0  ;;  %v14947_v48 = vpop.eup %12642 }
 0xcce   :  { %12650 = vpow2.f32 %v8508_v28  ;;  %v8471_v45 = vsub.f32 %v14853_v27, %v8451_v29  ;;  %8552 = vadd.xlane.f32.xlu0 %v8551_v41  ;;  %8549 = vadd.xlane.f32.xlu1 %v8548_v46  ;;  %v8557_v27 = vsel %vm7010_vm3, %v14947_v48, 0.0 }
 0xcd0   :  { %v14949_v56 = vpop.eup %12644  ;;  %v8510_v43 = vmul.f32 1.442695, %v8471_v45 }
 0xcd1   :  { %v8554_v52 = vsel %vm7010_vm3, %v14949_v56, 0.0 }
 0xcd2   :  { %12652 = vpow2.f32 %v8510_v43  ;;  %8558 = vadd.xlane.f32.xlu0 %v8557_v27  ;;  %8555 = vadd.xlane.f32.xlu1 %v8554_v52 }
 0xcd4   :  { %v14957_v5 = vpop.eup %12646 }
 0xcd5   :  { %v14959_v55 = vpop.eup %12648  ;;  %v8563_v14 = vsel %vm7010_vm3, %v14957_v5, 0.0 }
 0xcd6   :  { %v8560_v8 = vsel %vm7010_vm3, %v14959_v55, 0.0  ;;  %8564 = vadd.xlane.f32.xlu0 %v8563_v14 }
 0xcd7   :  { %8561 = vadd.xlane.f32.xlu1 %v8560_v8 }
 0xcd8   :  { %v14965_v10 = vpop.eup %12650 }
 0xcd9   :  { %v8566_v33 = vsel %vm7010_vm3, %v14965_v10, 0.0 }
 0xcdb   :  { %8567 = vadd.xlane.f32.xlu1 %v8566_v33 }
 0xcdc   :  { %v14969_v18 = vpop.eup %12652 }
 0xcdd   :  { %v8569_v44 = vsel %vm7010_vm3, %v14969_v18, 0.0 }
 0xcde   :  { %8570 = vadd.xlane.f32.xlu0 %v8569_v44 }
 0xd37   :  { %v8252_v53 = vpop.xlane.xlu1 %8251 }
 0xd38   :  { %12654 = vrcp.f32 %v8252_v53 }
 0xd3b   :  { %v8514_v47 = vpop.xlane.xlu1 %8513 }
 0xd3c   :  { %12656 = vrcp.f32 %v8514_v47 }
 0xd3f   :  { %v8255_v62 = vpop.xlane.xlu0 %8254 }
 0xd40   :  { %12658 = vrcp.f32 %v8255_v62 }
 0xd42   :  { %v12655_v58 = vpop.eup %12654 }
 0xd43   :  { %v8517_v61 = vpop.xlane.xlu0 %8516  ;;  %v8258_v37 = vmul.f32 %v12655_v58, %v14862_v35  ;;  %v8520_v12 = vpop.xlane.xlu1 %8519 }
 0xd44   :  { %12660 = vrcp.f32 %v8517_v61 }
 0xd45   :  { %12662 = vrcp.f32 %v8520_v12  ;;  %10618 = vmatprep.mubr.msk.f32.mxu0 %vm7010_vm3, %v8258_v37 }
 0xd46   :  { %v12657_v57 = vpop.eup %12656 }
 0xd47   :  { %v8523_v0 = vpop.xlane.xlu0 %8522  ;;  %v8592_v39 = vmul.f32 %v12657_v57, %v14868_v22 }
 0xd48   :  { %12664 = vrcp.f32 %v8523_v0 }
 0xd4a   :  { %v12659_v23 = vpop.eup %12658 }
 0xd4b   :  { %v8259_v26 = vmul.f32 %v12659_v23, %v14874_v34  ;;  %v8529_v32 = vpop.xlane.xlu0 %8528  ;;  %v8526_v28 = vpop.xlane.xlu1 %8525 }
 0xd4c   :  { %12666 = vrcp.f32 %v8529_v32 }
 0xd4d   :  { %10619 = vmatmul.mubr.msk.f32.vlgmr.msra.gmra.mrb[222].mxu0 %vm7010_vm3, %v8259_v26  ;;  %12668 = vrcp.f32 %v8526_v28 }
 0xd4e   :  { %v12661_v11 = vpop.eup %12660  ;;  %10730 = vmatpush3.bf16.msk.msra.mxu0 %vm14313_vm6, %v10725_v30  ;;  %10625 = vmatprep.mubr.msk.f32.mxu0 %vm7010_vm3, %v8592_v39  ;;  %vm10733_vm6 = vmpackc.low %vm8934_vm5, %vm8934_vm5 }
 0xd4f   :  { %v12663_v35 = vpop.eup %12662  ;;  %v8593_v29 = vmul.f32 %v12661_v11, %v14879_v7  ;;  %10731 = vmatprep.subr.bf16.mxu0 %v13103_v17  ;;  %v8535_v34 = vpop.xlane.xlu0 %8534 }
 0xd50   :  { %v8532_v45 = vpop.xlane.xlu1 %8531  ;;  %v8594_v41 = vmul.f32 %v12663_v35, %v14883_v16  ;;  %12670 = vrcp.f32 %v8535_v34 }
 0xd51   :  { %10626 = vmatmul.mubr.msk.f32.vlgmr.msra.gmra.mrb[224].mxu0 %vm7010_vm3, %v8593_v29  ;;  %12672 = vrcp.f32 %v8532_v45 }
 0xd52   :  { %10628 = vmatprep.mubr.msk.f32.mxu0 %vm7010_vm3, %v8594_v41  ;;  %v12665_v22 = vpop.eup %12664 }
 0xd53   :  { %v8541_v21 = vpop.xlane.xlu0 %8540  ;;  %v8595_v46 = vmul.f32 %v12665_v22, %v14890_v54 }
 0xd54   :  { %v8538_v30 = vpop.xlane.xlu1 %8537  ;;  %12674 = vrcp.f32 %v8541_v21 }
 0xd55   :  { %12676 = vrcp.f32 %v8538_v30  ;;  %10629 = vmatmul.mubr.msk.f32.gmra.mrb[226].mxu0 %vm7010_vm3, %v8595_v46 }
 0xd56   :  { %v12667_v7 = vpop.eup %12666 }
 0xd57   :  { %v12669_v43 = vpop.eup %12668  ;;  %v8547_v52 = vpop.xlane.xlu0 %8546  ;;  %v8597_v16 = vmul.f32 %v12667_v7, %v14896_v42 }
 0xd58   :  { %v8544_v27 = vpop.xlane.xlu1 %8543  ;;  %12678 = vrcp.f32 %v8547_v52  ;;  %v8596_v14 = vmul.f32 %v12669_v43, %v14898_v25 }
 0xd59   :  { %12680 = vrcp.f32 %v8544_v27 }
 0xd5a   :  { %v12671_v8 = vpop.eup %12670  ;;  %10631 = vmatprep.mubr.msk.f32.mxu0 %vm7010_vm3, %v8596_v14 }
 0xd5b   :  { %v12673_v33 = vpop.eup %12672  ;;  %10632 = vmatmul.mubr.msk.f32.gmra.mrb[228].mxu0 %vm7010_vm3, %v8597_v16  ;;  %v8553_v54 = vpop.xlane.xlu0 %8552  ;;  %v8599_v53 = vmul.f32 %v12671_v8, %v14906_v3 }
 0xd5c   :  { %v8550_v44 = vpop.xlane.xlu1 %8549  ;;  %12682 = vrcp.f32 %v8553_v54  ;;  %v8598_v47 = vmul.f32 %v12673_v33, %v14908_v50 }
 0xd5d   :  { %12684 = vrcp.f32 %v8550_v44 }
 0xd5e   :  { %v12675_v62 = vpop.eup %12674  ;;  %10634 = vmatprep.mubr.msk.f32.mxu0 %vm7010_vm3, %v8598_v47 }
 0xd5f   :  { %v12677_v42 = vpop.eup %12676  ;;  %10635 = vmatmul.mubr.msk.f32.gmra.mrb[230].mxu0 %vm7010_vm3, %v8599_v53  ;;  %v8559_v25 = vpop.xlane.xlu0 %8558  ;;  %v8601_v61 = vmul.f32 %v12675_v62, %v14915_v2 }
 0xd60   :  { %v8556_v58 = vpop.xlane.xlu1 %8555  ;;  %12686 = vrcp.f32 %v8559_v25  ;;  %v8600_v37 = vmul.f32 %v12677_v42, %v14917_v59 }
 0xd61   :  { %12688 = vrcp.f32 %v8556_v58 }
 0xd62   :  { %v12679_v12 = vpop.eup %12678  ;;  %10637 = vmatprep.mubr.msk.f32.mxu0 %vm7010_vm3, %v8600_v37 }
 0xd63   :  { %v12681_v3 = vpop.eup %12680  ;;  %10638 = vmatmul.mubr.msk.f32.gmra.mrb[232].mxu0 %vm7010_vm3, %v8601_v61  ;;  %v8565_v50 = vpop.xlane.xlu0 %8564  ;;  %v8603_v57 = vmul.f32 %v12679_v12, %v14921_v1 }
 0xd64   :  { %v8562_v0 = vpop.xlane.xlu1 %8561  ;;  %12690 = vrcp.f32 %v8565_v50  ;;  %v8602_v23 = vmul.f32 %v12681_v3, %v14927_v36 }
 0xd65   :  { %12692 = vrcp.f32 %v8562_v0 }
 0xd66   :  { %v12683_v26 = vpop.eup %12682  ;;  %10640 = vmatprep.mubr.msk.f32.mxu0 %vm7010_vm3, %v8602_v23 }
 0xd67   :  { %v12685_v2 = vpop.eup %12684  ;;  %10641 = vmatmul.mubr.msk.f32.gmra.mrb[234].mxu0 %vm7010_vm3, %v8603_v57  ;;  %v8605_v32 = vmul.f32 %v12683_v26, %v14934_v40 }
 0xd68   :  { %v8568_v59 = vpop.xlane.xlu1 %8567  ;;  %v8604_v28 = vmul.f32 %v12685_v2, %v14938_v60 }
 0xd69   :  { %12694 = vrcp.f32 %v8568_v59 }
 0xd6a   :  { %v12687_v39 = vpop.eup %12686  ;;  %10643 = vmatprep.mubr.msk.f32.mxu0 %vm7010_vm3, %v8604_v28 }
 0xd6b   :  { %v8571_v1 = vpop.xlane.xlu0 %8570  ;;  %v12689_v11 = vpop.eup %12688  ;;  %10644 = vmatmul.mubr.msk.f32.gmra.mrb[236].mxu0 %vm7010_vm3, %v8605_v32  ;;  %v8607_v36 = vmul.f32 %v12687_v39, %v14947_v48 }
 0xd6c   :  { %12696 = vrcp.f32 %v8571_v1  ;;  %v8606_v35 = vmul.f32 %v12689_v11, %v14949_v56 }
 0xd6e   :  { %v12691_v29 = vpop.eup %12690  ;;  %10646 = vmatprep.mubr.msk.f32.mxu0 %vm7010_vm3, %v8606_v35 }
 0xd6f   :  { %v12693_v34 = vpop.eup %12692  ;;  %10647 = vmatmul.mubr.msk.f32.gmra.mrb[238].mxu0 %vm7010_vm3, %v8607_v36  ;;  %v8609_v40 = vmul.f32 %v12691_v29, %v14957_v5 }
 0xd70   :  { %v8608_v60 = vmul.f32 %v12693_v34, %v14959_v55 }
 0xd72   :  { %10649 = vmatprep.mubr.msk.f32.mxu0 %vm7010_vm3, %v8608_v60 }
 0xd73   :  { %v12695_v45 = vpop.eup %12694  ;;  %10650 = vmatmul.mubr.msk.f32.gmra.mrb[240].mxu0 %vm7010_vm3, %v8609_v40 }
 0xd74   :  { %v8610_v41 = vmul.f32 %v12695_v45, %v14965_v10 }
 0xd76   :  { %v12697_v48 = vpop.eup %12696  ;;  %10652 = vmatprep.mubr.msk.f32.mxu0 %vm7010_vm3, %v8610_v41  ;;  %v8933_v41 = vld [vmem:[#allocation31] sm:$0xf] }
 0xd77   :  { %v8611_v56 = vmul.f32 %v12697_v48, %v14969_v18 }
 0xd79   :  { %10653 = vmatmul.mubr.msk.f32.gmra.mrb[242].mxu0 %vm7010_vm3, %v8611_v56 }
 0xd7a   :  { %10665 = vmatprep.mubr.msk.f32.mxu0 %vm13104_vm9, %v13105_v9 }
 0xe20   :  { %v15022_v5 = vpop.f32.mrb[222].mxu0 }
 0xe21   :  { %v15024_v55 = vpop.f32.mrb[223].mxu0 }
 0xe24   :  { %v10627_v22 = vpop.f32.mrb[224].mxu0 }
 0xe25   :  { %8841 = vst.msk [vmem:[#allocation7 + $0x8] sm:$0xff] %vm7010_vm3, %v10627_v22  ;;  %v8741_v21 = vpop.f32.mrb[225].mxu0 }
 0xe26   :  { %8840 = vst.msk [vmem:[#allocation7] sm:$0xff] %vm7010_vm3, %v8741_v21 }
 0xe28   :  { %v10630_v10 = vpop.f32.mrb[226].mxu0 }
 0xe29   :  { %8843 = vst.msk [vmem:[#allocation7 + $0x18] sm:$0xff] %vm7010_vm3, %v10630_v10  ;;  %v8751_v30 = vpop.f32.mrb[227].mxu0 }
 0xe2a   :  { %8842 = vst.msk [vmem:[#allocation7 + $0x10] sm:$0xff] %vm7010_vm3, %v8751_v30 }
 0xe2e   :  { %v10633_v18 = vpop.f32.mrb[228].mxu0 }
 0xe2f   :  { %8850 = vrot.lane.b32.xlu1 %v10633_v18, %s13106_s3  ;;  %v8761_v46 = vpop.f32.mrb[229].mxu0 }
 0xe30   :  { %8844 = vst.msk [vmem:[#allocation7 + $0x20] sm:$0xff] %vm7010_vm3, %v8761_v46  ;;  %v8344_v46 = vmul.f32 %v15024_v55, %v14751_v4 }
 0xe32   :  { %v10636_v7 = vpop.f32.mrb[230].mxu0 }
 0xe33   :  { %8854 = vrot.lane.b32.xlu0 %v10636_v7, %s13106_s3  ;;  %v8771_v43 = vpop.f32.mrb[231].mxu0 }
 0xe36   :  { %v10639_v52 = vpop.f32.mrb[232].mxu0 }
 0xe37   :  { %8852 = vrot.lane.b32.xlu0 %v8771_v43, %s13106_s3  ;;  %v8781_v27 = vpop.f32.mrb[233].mxu0  ;;  %v8345_v43 = vmul.f32 %v15022_v5, %v14766_v6  ;;  %v12734_v6 = vld [vmem:[#allocation2] sm:$0xff] }
 0xe38   :  { %8856 = vrot.lane.b32.xlu1 %v8781_v27, %s13106_s3  ;;  %v7317_v5 = vmul.f32 %v12734_v6, %v14625_v38 }
 0xe39   :  { %v8349_v27 = vsel %vm7010_vm3, %v8345_v43, 0.0 }
 0xe3a   :  { %v10642_v16 = vpop.f32.mrb[234].mxu0 }
 0xe3b   :  { %v8791_v14 = vpop.f32.mrb[235].mxu0 }
 0xe3c   :  { %8878 = vrot.lane.b32.xlu1 %v10642_v16, %s13078_s30 }
 0xe3e   :  { %v10645_v8 = vpop.f32.mrb[236].mxu0 }
 0xe3f   :  { %v8801_v33 = vpop.f32.mrb[237].mxu0 }
 0xe40   :  { %8876 = vrot.lane.b32.xlu1 %v8791_v14, %s13078_s30 }
 0xe42   :  { %v10648_v54 = vpop.f32.mrb[238].mxu0 }
 0xe43   :  { %8902 = vrot.lane.b32.xlu0 %v10648_v54, %s13107_s0  ;;  %v8811_v44 = vpop.f32.mrb[239].mxu0 }
 0xe46   :  { %v10651_v53 = vpop.f32.mrb[240].mxu0 }
 0xe47   :  { %8880 = vrot.lane.b32.xlu0 %v8801_v33, %s13078_s30  ;;  %v8821_v47 = vpop.f32.mrb[241].mxu0 }
 0xe48   :  { %8904 = vrot.lane.b32.xlu1 %v8821_v47, %s13107_s0 }
 0xe4b   :  { %8906 = vrot.lane.b32.xlu0 %v10651_v53, %s13107_s0 }
 0xe4c   :  { %v10654_v62 = vpop.f32.mrb[242].mxu0  ;;  %8882 = vrot.lane.b32.xlu1 %v10645_v8, %s13078_s30 }
 0xe4d   :  { %v8831_v42 = vpop.f32.mrb[243].mxu0 }
 0xe4f   :  { %8858 = vrot.lane.b32.xlu0 %v10639_v52, %s13106_s3  ;;  %v8346_v52 = vsel %vm7010_vm3, %v8344_v46, 0.0 }
 0xe50   :  { %8908 = vrot.lane.b32.xlu1 %v8831_v42, %s13107_s0 }
 0xe53   :  { %8910 = vrot.lane.b32.xlu0 %v10654_v62, %s13107_s0  ;;  %v12735_v62 = vld [vmem:[#allocation2 + $0x8] sm:$0xff] }
 0xe54   :  { %8884 = vrot.lane.b32.xlu1 %v8811_v44, %s13078_s30  ;;  %v7318_v42 = vmul.f32 %v12735_v62, %v14623_v15  ;;  %v7203_v15 = vld [vmem:[#allocation27 + $0x8] sm:$0x3] }
 0xea1   :  { %v8851_v25 = vpop.permute.xlu1 %8850 }
 0xea2   :  { %8866 = vst.msk [vmem:[#allocation7] sm:$0xff] %vm8865_vm15, %v8851_v25  ;;  %v7319_v25 = vsel %vm7010_vm3, %v7317_v5, 0.0  ;;  %v15551_v5 = vld [vmem:[#allocation77_spill] sm:$0xff] }
 0xea5   :  { %v8855_v58 = vpop.permute.xlu0 %8854 }
 0xea6   :  { %8868 = vst.msk [vmem:[#allocation7 + $0x10] sm:$0xff] %vm8865_vm15, %v8855_v58  ;;  %v12736_v58 = vld [vmem:[#allocation3] sm:$0xff] }
 0xea9   :  { %v8853_v61 = vpop.permute.xlu0 %8852 }
 0xeaa   :  { %8867 = vst.msk [vmem:[#allocation7 + $0x8] sm:$0xff] %vm8865_vm15, %v8853_v61  ;;  %v8857_v37 = vpop.permute.xlu1 %8856  ;;  %v7436_v61 = vmul.f32 %v12736_v58, %v14629_v31  ;;  %v15556_v58 = vld [vmem:[#allocation110_spill] sm:$0xff] }
 0xeab   :  { %8869 = vst.msk [vmem:[#allocation7 + $0x18] sm:$0xff] %vm8865_vm15, %v8857_v37  ;;  %v7322_v37 = vsel %vm7010_vm3, %v7318_v42, 0.0  ;;  %v15554_v42 = vld [vmem:[#allocation98_spill] sm:$0xff] }
 0xeac   :  { %v7438_v38 = vsel %vm7096_vm2, %v7436_v61, 0.0 }
 0xeae   :  { %v8879_v12 = vpop.permute.xlu1 %8878 }
 0xeaf   :  { %8893 = vst.msk [vmem:[#allocation7 + $0x8] sm:$0xff] %vm8891_vm0, %v8879_v12  ;;  %v12737_v12 = vld [vmem:[#allocation3 + $0x8] sm:$0xff] }
 0xeb2   :  { %v8877_v3 = vpop.permute.xlu1 %8876 }
 0xeb3   :  { %8892 = vst.msk [vmem:[#allocation7] sm:$0xff] %vm8891_vm0, %v8877_v3  ;;  %v7437_v3 = vmul.f32 %v12737_v12, %v14627_v24  ;;  %v15559_v12 = vld [vmem:[#allocation78_spill] sm:$0xff] }
 0xeb5   :  { %v8903_v50 = vpop.permute.xlu0 %8902 }
 0xeb6   :  { %8918 = vst.msk [vmem:[#allocation7] sm:$0xff] %vm8917_vm4, %v8903_v50  ;;  %v7441_v50 = vsel %vm7096_vm2, %v7437_v3, 0.0 }
 0xeb9   :  { %v8881_v0 = vpop.permute.xlu0 %8880 }
 0xeba   :  { %8894 = vst.msk [vmem:[#allocation7 + $0x10] sm:$0xff] %vm8891_vm0, %v8881_v0  ;;  %v8905_v57 = vpop.permute.xlu1 %8904  ;;  %v7202_v0 = vld [vmem:[#allocation27] sm:$0xff] }
 0xebb   :  { %8919 = vst.msk [vmem:[#allocation7 + $0x8] sm:$0xff] %vm8917_vm4, %v8905_v57  ;;  %v10739_v57 = vpack.c.bf16 %v7203_v15, %v7202_v0  ;;  %v15564_v15 = vld [vmem:[#allocation81_spill] sm:$0xff] }
 0xebd   :  { %v8907_v23 = vpop.permute.xlu0 %8906  ;;  %v8923_v2 = vld [vmem:[#allocation7] sm:$0xff] }
 0xebe   :  { %8920 = vst.msk [vmem:[#allocation7 + $0x10] sm:$0xff] %vm8917_vm4, %v8907_v23  ;;  %v8883_v26 = vpop.permute.xlu1 %8882  ;;  %v8928_v39 = vmul.f32 %v8923_v2, %v14691_v63 }
 0xebf   :  { %8895 = vst.msk [vmem:[#allocation7 + $0x18] sm:$0xff] %vm8891_vm0, %v8883_v26 }
 0xec1   :  { %v8859_v59 = vpop.permute.xlu0 %8858 }
 0xec2   :  { %8870 = vst.msk [vmem:[#allocation7 + $0x20] sm:$0xff] %vm8865_vm15, %v8859_v59  ;;  %v8909_v32 = vpop.permute.xlu1 %8908  ;;  %v8924_v28 = vld [vmem:[#allocation7 + $0x8] sm:$0xff] }
 0xec3   :  { %8921 = vst.msk [vmem:[#allocation7 + $0x18] sm:$0xff] %vm8917_vm4, %v8909_v32  ;;  %v8929_v1 = vmul.f32 %v8924_v28, %v14699_v51 }
 0xec5   :  { %v10732_v11 = vpack.c.bf16 %v8929_v1, %v8928_v39  ;;  %v8911_v35 = vpop.permute.xlu0 %8910  ;;  %v8925_v29 = vld [vmem:[#allocation7 + $0x10] sm:$0xff] }
 0xec6   :  { %v8885_v36 = vpop.permute.xlu1 %8884  ;;  %v8930_v40 = vmul.f32 %v8925_v29, %v14705_v20 }
 0xec7   :  { %8896 = vst.msk [vmem:[#allocation7 + $0x20] sm:$0xff] %vm8891_vm0, %v8885_v36  ;;  %10734 = vmatpush3.bf16.xpose.msk.msra.mxu0 %vm10733_vm6, %v10732_v11  ;;  %v9165_v36 = vld [vmem:[%s15201_s15] sm:$0xff] }
 0xec8   :  { %8922 = vst.msk [vmem:[#allocation7 + $0x20] sm:$0xff] %vm8917_vm4, %v8911_v35  ;;  %10735 = vmatprep.subr.bf16.mxu0 %v13103_v17  ;;  %v9166_v35 = vld [vmem:[%s15201_s15 + $0x8] sm:$0xff] }
 0xec9   :  { %v10746_v29 = vpack.c.bf16 %v9166_v35, %v9165_v36 }
 0xeca   :  { %v8926_v34 = vld [vmem:[#allocation7 + $0x18] sm:$0xff] }
 0xecb   :  { %v8931_v63 = vmul.f32 %v8926_v34, %v14711_v19 }
 0xecd   :  { %v10736_v51 = vpack.c.bf16 %v8931_v63, %v8930_v40 }
 0xecf   :  { %10738 = vmatpush3.bf16.xpose.msk.msra.mxu0 %vm10733_vm6, %v10736_v51  ;;  %v8927_v60 = vld [vmem:[#allocation7 + $0x20] sm:$0xff] }
 0xed0   :  { %10663 = vmatprep.subr.mxu0 %v13105_v9  ;;  %v8932_v45 = vmul.f32 %v8927_v60, %v14715_v49 }
 0xed7   :  { %10664 = vmatpush3.xpose.msk.msra.mxu0 %vm8934_vm5, %v8932_v45  ;;  %v9163_v45 = vld [vmem:[%s15200_s14] sm:$0xff] }
 0xed8   :  { %10741 = vmatprep.subr.msk.bf16.mxu0 %vm14387_vm8, %v10739_v57 }
 0xeda   :  { %10666 = vmatmul.mubr.msk.f32.vlgmr.msra.gmra.mrb[244].mxu0 %vm8934_vm5, %v8933_v41 }
 0xedb   :  { %10744 = vmatpush3.bf16.msk.msra.mxu0 %vm14387_vm8, %v10739_v57  ;;  %v15565_v57 = vld [vmem:[#allocation80_spill] sm:$0xff]  ;;  %vm9535_vm8 = vcmask 3072  }
 0xedc   :  { %10745 = vmatprep.subr.bf16.mxu0 %v13103_v17 }
 0xfad   :  { %v9019_v48 = vpop.f32.mrb[244].mxu0 }
 0xfae   :  { %9023 = vst.msk [vmem:[#allocation9] sm:$0xf] %vm7094_vm1, %v9019_v48  ;;  %9025 = vrot.lane.b32.xlu1 %v9019_v48, %s13096_s18  ;;  %9029 = vrot.lane.b32.xlu0 %v9019_v48, %s13097_s26  ;;  %v10667_v20 = vpop.f32.mrb[245].mxu0 }
 0xfb2   :  { %9033 = vrot.lane.b32.xlu1 %v9019_v48, %s13098_s7 }
0x1020   :  { %v9026_v19 = vpop.permute.xlu1 %9025  ;;  %v9030_v56 = vpop.permute.xlu0 %9029 }
0x1021   :  { %9028 = vst.msk [vmem:[#allocation9 + $0x4] sm:$0xf] %vm7094_vm1, %v9026_v19  ;;  %9032 = vst.msk [vmem:[#allocation9 + $0x8] sm:$0xf] %vm7094_vm1, %v9030_v56  ;;  %v9164_v56 = vld [vmem:[%s15200_s14 + $0x8] sm:$0xff] }
0x1024   :  { %v9034_v49 = vpop.permute.xlu1 %9033 }
0x1025   :  { %9036 = vst.msk [vmem:[#allocation9 + $0xc] sm:$0xf] %vm7094_vm1, %v9034_v49  ;;  %vm9201_vm1 = vcmask 130048  }
0x1028   :  { %v15069_v22 = vld [vmem:[#allocation9] sm:$0xff] }
0x1029   :  { %v9039_v21 = vmul.f32 100.0, %v15069_v22 }
0x102b   :  { %v9041_v10 = vsel %vm7096_vm2, %v9039_v21, -inf }
0x102c   :  { %9042 = vmax.xlane.f32.xlu0 %v9041_v10  ;;  %v9038_v30 = vld [vmem:[#allocation9 + $0x8] sm:$0xff] }
0x102d   :  { %v9040_v18 = vmul.f32 100.0, %v9038_v30 }
0x102f   :  { %v9044_v7 = vsel %vm7096_vm2, %v9040_v18, -inf }
0x1030   :  { %9045 = vmax.xlane.f32.xlu1 %v9044_v7 }
0x1034   :  { %8347 = vadd.xlane.f32.xlu1 %v8346_v52 }
0x1038   :  { %8350 = vadd.xlane.f32.xlu1 %v8349_v27  ;;  %v10749_v27 = vpack.c.bf16 %v9164_v56, %v9163_v45 }
0x10b9   :  { %v9043_v16 = vpop.xlane.xlu0 %9042 }
0x10ba   :  { %v9047_v14 = vsub.f32 %v9039_v21, %v9043_v16  ;;  %v10495_v16 = vpop.f32.mrb[236].mxu1 }
0x10bc   :  { %v9049_v8 = vmul.f32 1.442695, %v9047_v14  ;;  %v10496_v14 = vpop.f32.mrb[237].mxu1 }
0x10bd   :  { %v9046_v33 = vpop.xlane.xlu1 %9045 }
0x10be   :  { %12698 = vpow2.f32 %v9049_v8  ;;  %v9048_v54 = vsub.f32 %v9040_v18, %v9046_v33  ;;  %v10497_v33 = vadd.f32 %v10496_v14, %v10495_v16 }
0x10c0   :  { %v9051_v44 = vmul.f32 1.442695, %v9048_v54  ;;  %v10498_v54 = vpop.f32.mrb[238].mxu1 }
0x10c1   :  { %v8348_v34 = vpop.xlane.xlu1 %8347 }
0x10c2   :  { %12700 = vpow2.f32 %v9051_v44  ;;  %v9155_v63 = vmul.f32 0.5, %v8348_v34  ;;  %v10499_v44 = vpop.f32.mrb[239].mxu1 }
0x10c5   :  { %v8351_v51 = vpop.xlane.xlu1 %8350 }
0x10c6   :  { %v9156_v48 = vmul.f32 0.5, %v8351_v51 }
0x10c8   :  { %v12699_v4 = vpop.eup %12698 }
0x10c9   :  { %v9053_v55 = vsel %vm7096_vm2, %v12699_v4, 0.0 }
0x10ca   :  { %9054 = vadd.xlane.f32.xlu0 %v9053_v55  ;;  %v15549_v55 = vld [vmem:[#allocation104_spill] sm:$0xff] }
0x10cc   :  { %v12701_v53 = vpop.eup %12700 }
0x10cd   :  { %v9056_v47 = vsel %vm7096_vm2, %v12701_v53, 0.0 }
0x10ce   :  { %9057 = vadd.xlane.f32.xlu0 %v9056_v47  ;;  %v15552_v47 = vld [vmem:[#allocation76_spill] sm:$0xff] }
0x10cf   :  { %v15553_v62 = vpack.c.bf16 %v15551_v5, %v15552_v47 }
0x10d2   :  { %7320 = vadd.xlane.f32.xlu0 %v7319_v25  ;;  %v15555_v25 = vld [vmem:[#allocation111_spill] sm:$0xff] }
0x10d3   :  { %v15557_v61 = vpack.c.bf16 %v15555_v25, %v15556_v58 }
0x10d6   :  { %7323 = vadd.xlane.f32.xlu0 %v7322_v37  ;;  %v15558_v37 = vld [vmem:[#allocation79_spill] sm:$0xff] }
0x10d7   :  { %v15560_v3 = vpack.c.bf16 %v15558_v37, %v15559_v12 }
0x10da   :  { %7439 = vadd.xlane.f32.xlu0 %v7438_v38  ;;  %v15561_v38 = vld [vmem:[#allocation116_spill] sm:$0xff] }
0x10de   :  { %7442 = vadd.xlane.f32.xlu0 %v7441_v50  ;;  %v15562_v50 = vld [vmem:[#allocation115_spill] sm:$0xff] }
0x10df   :  { %v15563_v0 = vpack.c.bf16 %v15561_v38, %v15562_v50 }
0x1157   :  { %v9055_v31 = vpop.xlane.xlu0 %9054 }
0x1158   :  { %12702 = vrcp.f32 %v9055_v31  ;;  %v15566_v31 = vpack.c.bf16 %v15564_v15, %v15565_v57 }
0x115b   :  { %v9058_v24 = vpop.xlane.xlu0 %9057 }
0x115c   :  { %12704 = vrcp.f32 %v9058_v24  ;;  %v15567_v24 = vld [vmem:[#allocation118_spill] sm:$0xff] }
0x115f   :  { %v7321_v40 = vpop.xlane.xlu0 %7320 }
0x1160   :  { %v9157_v60 = vadd.f32 %v9155_v63, %v7321_v40  ;;  %v15582_v40 = vld [vmem:[#allocation87_spill] sm:$0xff]  ;;  %v15583_v63 = vld [vmem:[#allocation86_spill] sm:$0xff] }
0x1161   :  { %v15584_v51 = vpack.c.bf16 %v15582_v40, %v15583_v63 }
0x1162   :  { %v12703_v23 = vpop.eup %12702  ;;  %v9167_v20 = vmul.f32 %v9163_v45, %v9157_v60  ;;  %v15585_v60 = vld [vmem:[#allocation124_spill] sm:$0xff]  ;;  %v15586_v45 = vld [vmem:[#allocation123_spill] sm:$0xff] }
0x1163   :  { %v9061_v26 = vmul.f32 %v12703_v23, %v12699_v4  ;;  %v7324_v41 = vpop.xlane.xlu0 %7323  ;;  %v15548_v4 = vld [vmem:[#allocation105_spill] sm:$0xff] }
0x1164   :  { %v9158_v19 = vadd.f32 %v9156_v48, %v7324_v41  ;;  %v15568_v23 = vld [vmem:[#allocation117_spill] sm:$0xff]  ;;  %v15587_v41 = vpack.c.bf16 %v15585_v60, %v15586_v45 }
0x1165   :  { %10672 = vmatprep.mubr.msk.f32.mxu0 %vm7096_vm2, %v9061_v26  ;;  %v15569_v26 = vpack.c.bf16 %v15567_v24, %v15568_v23  ;;  %v15588_v48 = vld [vmem:[#allocation93_spill] sm:$0xff] }
0x1166   :  { %v12705_v2 = vpop.eup %12704  ;;  %v9168_v49 = vmul.f32 %v9164_v56, %v9158_v19  ;;  %v15591_v56 = vld [vmem:[#allocation126_spill] sm:$0xff] }
0x1167   :  { %v9062_v59 = vmul.f32 %v12705_v2, %v12701_v53  ;;  %v15550_v53 = vpack.c.bf16 %v15548_v4, %v15549_v55  ;;  %v15570_v2 = vld [vmem:[#allocation83_spill] sm:$0xff] }
0x1169   :  { %10673 = vmatmul.mubr.msk.f32.vlgmr.msra.gmra.mrb[246].mxu0 %vm7096_vm2, %v9062_v59  ;;  %v15571_v59 = vld [vmem:[#allocation82_spill] sm:$0xff] }
0x116a   :  { %10679 = vmatprep.mubr.msk.f32.mxu0 %vm13104_vm9, %v13105_v9  ;;  %10747 = vmatpush3.bf16.msra.mxu0 %v10746_v29  ;;  %v15580_v29 = vld [vmem:[#allocation121_spill] sm:$0xff] }
0x116b   :  { %10748 = vmatprep.subr.bf16.mxu0 %v13103_v17  ;;  %v7440_v17 = vpop.xlane.xlu0 %7439 }
0x116f   :  { %v7443_v7 = vpop.xlane.xlu0 %7442 }
0x123c   :  { %v10674_v32 = vpop.f32.mrb[246].mxu0 }
0x123d   :  { %v9138_v13 = vpop.f32.mrb[247].mxu0  ;;  %v9148_v39 = vmul.f32 %v10674_v32, %v9038_v30  ;;  %v15572_v32 = vpack.c.bf16 %v15570_v2, %v15571_v59  ;;  %v15598_v59 = vlaneseq }
0x123e   :  { %v9147_v28 = vmul.f32 %v9138_v13, %v15069_v22  ;;  %v15573_v13 = vld [vmem:[#allocation120_spill] sm:$0xff] }
0x123f   :  { %v9152_v11 = vsel %vm7096_vm2, %v9148_v39, 0.0 }
0x1240   :  { %v9149_v1 = vsel %vm7096_vm2, %v9147_v28, 0.0  ;;  %v15574_v28 = vld [vmem:[#allocation119_spill] sm:$0xff]  ;;  %vm9512_vm2 = vcmask 27648  }
0x1241   :  { %9150 = vadd.xlane.f32.xlu1 %v9149_v1  ;;  %v15575_v39 = vpack.c.bf16 %v15573_v13, %v15574_v28  ;;  %v15576_v1 = vld [vmem:[#allocation85_spill] sm:$0xff]  ;;  %v15599_v13 = vld [vmem:[#allocation43_spill] sm:$0xff] }
0x1245   :  { %9153 = vadd.xlane.f32.xlu1 %v9152_v11  ;;  %v15577_v11 = vld [vmem:[#allocation84_spill] sm:$0xff] }
0x1278   :  { %9169 = vxpose.xlu1.b32.start [1/2] (short) (narrow) %v9167_v20, 8  ;;  %v15589_v20 = vld [vmem:[#allocation92_spill] sm:$0xff] }
0x1279   :  { %v15590_v19 = vpack.c.bf16 %v15588_v48, %v15589_v20 }
0x127c   :  { %9170 = vxpose.xlu1.b32.end [2/2] (short) (narrow) %v9168_v49, 8  ;;  %v15592_v49 = vld [vmem:[#allocation125_spill] sm:$0xff] }
0x12ce   :  { %v9151_v22 = vpop.xlane.xlu1 %9150 }
0x12cf   :  { %v9159_v21 = vmul.f32 0.5, %v9151_v22  ;;  %v15594_v22 = vld [vmem:[#allocation100_spill] sm:$0xff] }
0x12d1   :  { %v9161_v10 = vadd.f32 %v9159_v21, %v7440_v17  ;;  %v15593_v17 = vpack.c.bf16 %v15591_v56, %v15592_v49  ;;  %v15595_v21 = vld [vmem:[#allocation99_spill] sm:$0xff] }
0x12d2   :  { %v9154_v30 = vpop.xlane.xlu1 %9153 }
0x12d3   :  { %v9275_v18 = vmul.f32 %v9165_v36, %v9161_v10  ;;  %v9160_v46 = vmul.f32 0.5, %v9154_v30  ;;  %v15578_v36 = vpack.c.bf16 %v15576_v1, %v15577_v11  ;;  %v15596_v10 = vpack.c.bf16 %v15594_v22, %v15595_v21  ;;  %v15597_v30 = vld [vmem:[#allocation95_spill] sm:$0xff] }
0x12d5   :  { %v9162_v43 = vadd.f32 %v9160_v46, %v7443_v7  ;;  %9277 = vxpose.xlu0.b32.start [1/2] (short) (narrow) %v9275_v18, 8  ;;  %v10539_v18 = vpop.f32.mrb[240].mxu1 }
0x12d6   :  { %v10540_v46 = vpop.f32.mrb[241].mxu1 }
0x12d7   :  { %v9276_v52 = vmul.f32 %v9166_v35, %v9162_v43  ;;  %v15579_v35 = vld [vmem:[#allocation122_spill] sm:$0xff]  ;;  %v10542_v7 = vpop.f32.mrb[242].mxu1 }
0x12d8   :  { %v15581_v34 = vpack.c.bf16 %v15579_v35, %v15580_v29  ;;  %v10543_v43 = vpop.f32.mrb[243].mxu1 }
0x12d9   :  { %9278 = vxpose.xlu0.b32.end [2/2] (short) (narrow) %v9276_v52, 8  ;;  %v10541_v52 = vadd.f32 %v10540_v46, %v10539_v18 }
0x12f8   :  { %v9185_v8 = vpop.trf.xlu1 }
0x12f9   :  { %10680 = vmatmul.mubr.msk.f32.vlgmr.msra.gmra.mrb[248].mxu0 %vm9201_vm1, %v9185_v8 }
0x12fa   :  { %10750 = vmatpush3.bf16.msra.mxu0 %v10749_v27  ;;  %10686 = vmatprep.mubr.msk.f32.mxu0 %vm13104_vm9, %v13105_v9 }
0x12fb   :  { %10501 = vmatprep.subr.bf16.mxu0 %v15550_v53 }
0x1355   :  { %v9293_v6 = vpop.trf.xlu0 }
0x1356   :  { %10687 = vmatmul.mubr.msk.f32.vlgmr.msra.gmra.mrb[248].mxu0 %vm9201_vm1, %v9293_v6 }
0x1357   :  { %10502 = vmatpush3.bf16.msra.mxu0 %v15553_v62  ;;  %9454 = vmatprep.mubr.bf16.mxu0 %v15554_v42 }
0x1358   :  { %10503 = vmatprep.subr.bf16.mxu0 %v15557_v61 }
0x135b   :  { %10504 = vmatpush3.bf16.msra.mxu0 %v15560_v3 }
0x135c   :  { %10505 = vmatprep.subr.bf16.mxu0 %v15563_v0 }
0x135f   :  { %10506 = vmatpush3.bf16.msra.mxu0 %v15566_v31 }
0x1360   :  { %10507 = vmatprep.subr.bf16.mxu0 %v15569_v26 }
0x1363   :  { %10508 = vmatpush3.bf16.msra.mxu0 %v15572_v32  ;;  %v9507_v32 = vand.u32 127, %v15598_v59 }
0x1364   :  { %10509 = vmatprep.subr.bf16.mxu0 %v15575_v39 }
0x1365   :  { %vm9508_vm3 = vcmp.eq.s32.totalorder %v15599_v13, %v9507_v32 }
0x1366   :  { %v10293_v39 = vsel %vm9508_vm3, 1.0, %v13105_v9 }
0x1367   :  { %10510 = vmatpush3.bf16.msra.mxu0 %v15578_v36 }
0x1368   :  { %10511 = vmatprep.subr.bf16.mxu0 %v15581_v34 }
0x136b   :  { %10512 = vmatpush3.bf16.msra.mxu0 %v15584_v51 }
0x136c   :  { %10513 = vmatprep.subr.bf16.mxu0 %v15587_v41 }
0x136f   :  { %10514 = vmatpush3.bf16.msra.mxu0 %v15590_v19 }
0x1370   :  { %10515 = vmatprep.subr.bf16.mxu0 %v15593_v17 }
0x1373   :  { %10516 = vmatpush3.bf16.msra.mxu0 %v15596_v10 }
0x1376   :  { %9455 = vmatmul.mubr.bf16.vlgmr.msra.gmra.mrb[252].mxu0 %v15597_v30 }
0x1429   :  { %v9378_v27 = vpop.f32.mrb[248].mxu0 }
0x142a   :  { %v10751_v16 = vadd.f32 %v10497_v33, %v9378_v27  ;;  %v10688_v14 = vpop.f32.mrb[249].mxu0 }
0x1449   :  { %v10517_v8 = vpop.f32.mrb[252].mxu0 }
0x144a   :  { %v10518_v54 = vpop.f32.mrb[253].mxu0 }
0x144b   :  { %v10519_v44 = vadd.f32 %v10518_v54, %v10517_v8  ;;  %v10520_v4 = vpop.f32.mrb[254].mxu0 }
0x144c   :  { %v10521_v55 = vpop.f32.mrb[255].mxu0 }
0x144d   :  { %v10752_v53 = vadd.f32 %v10751_v16, %v10519_v44 }
0x144f   :  { %v10753_v6 = vadd.f32 %v10752_v53, %v10541_v52 }
0x1451   :  { %v9503_v5 = vmul.f32 0.25, %v10753_v6 }
0x1453   :  { %v9523_v47 = vsel %vm9512_vm2, %v9503_v5, -inf  ;;  %v9511_v36 = vmul.f32 %v10293_v39, %v9503_v5 }
0x1454   :  { %9524 = vmax.xlane.f32.xlu0 %v9523_v47  ;;  %v9546_v62 = vrot.slane %v9523_v47, 4 }
0x1455   :  { %v9513_v29 = vsel %vm9512_vm2, %v9511_v36, 0.0 }
0x1456   :  { %v9547_v42 = vmax.f32 %v9523_v47, %v9546_v62 }
0x1458   :  { %v9548_v25 = vrot.slane %v9547_v42, 2 }
0x145a   :  { %v9549_v58 = vmax.f32 %v9547_v42, %v9548_v25 }
0x145c   :  { %v9550_v61 = vrot.slane %v9549_v58, 1 }
0x145e   :  { %v9551_v37 = vmax.f32 %v9549_v58, %v9550_v61 }
0x1460   :  { %v9552_v33 = vsub.f32 %v9503_v5, %v9551_v37 }
0x1462   :  { %v9553_v12 = vmul.f32 1.442695, %v9552_v33 }
0x1464   :  { %12706 = vpow2.f32 %v9553_v12 }
0x146e   :  { %v12707_v3 = vpop.eup %12706 }
0x146f   :  { %v9555_v38 = vsel %vm9512_vm2, %v12707_v3, 0.0 }
0x1470   :  { %v9556_v50 = vrot.slane %v9555_v38, 4 }
0x1472   :  { %v9557_v0 = vadd.f32 %v9556_v50, %v9555_v38 }
0x1474   :  { %v9558_v15 = vrot.slane %v9557_v0, 2 }
0x1476   :  { %v9559_v57 = vadd.f32 %v9558_v15, %v9557_v0 }
0x1478   :  { %v9560_v31 = vrot.slane %v9559_v57, 1 }
0x147a   :  { %v9561_v24 = vadd.f32 %v9560_v31, %v9559_v57 }
0x147c   :  { %12708 = vlog2.f32 %v9561_v24 }
0x1486   :  { %v12709_v28 = vpop.eup %12708 }
0x1487   :  { %v9563_v35 = vmul.f32 0.6931472, %v12709_v28 }
0x1489   :  { %v9564_v34 = vadd.f32 %v9563_v35, %v9551_v37 }
0x148b   :  { %v9566_v40 = vsel %vm9565_vm7, %v9564_v34, 0.0 }
0x14e1   :  { %v9525_v23 = vpop.xlane.xlu0 %9524 }
0x14e2   :  { %v9526_v26 = vsub.f32 %v9503_v5, %v9525_v23 }
0x14e4   :  { %v9527_v2 = vmul.f32 1.442695, %v9526_v26 }
0x14e6   :  { %12710 = vpow2.f32 %v9527_v2 }
0x14f0   :  { %v12711_v1 = vpop.eup %12710 }
0x14f1   :  { %v9529_v11 = vsel %vm9512_vm2, %v12711_v1, 0.0 }
0x14f2   :  { %9530 = vadd.xlane.f32.xlu1 %v9529_v11 }
0x14f6   :  { %9514 = vadd.xlane.f32.xlu1 %v9513_v29 }
0x14fa   :  { %9567 = vadd.xlane.f32.xlu1 %v9566_v40 }
0x157f   :  { %v9531_v63 = vpop.xlane.xlu1 %9530 }
0x1580   :  { %12712 = vlog2.f32 %v9531_v63 }
0x1583   :  { %v9515_v51 = vpop.xlane.xlu1 %9514 }
0x1584   :  { %v9516_v60 = vrot.slane %v9515_v51, 4 }
0x1586   :  { %v9517_v45 = vadd.f32 %v9516_v60, %v9515_v51 }
0x1587   :  { %v9568_v22 = vpop.xlane.xlu1 %9567 }
0x1588   :  { %v9518_v41 = vrot.slane %v9517_v45, 2  ;;  %v9569_v21 = vrot.slane %v9568_v22, 4 }
0x158a   :  { %v12713_v9 = vpop.eup %12712  ;;  %v9519_v48 = vadd.f32 %v9518_v41, %v9517_v45  ;;  %v9570_v10 = vadd.f32 %v9569_v21, %v9568_v22 }
0x158b   :  { %v9533_v20 = vmul.f32 0.6931472, %v12713_v9 }
0x158c   :  { %v9520_v19 = vrot.slane %v9519_v48, 1  ;;  %v9571_v30 = vrot.slane %v9570_v10, 2 }
0x158d   :  { %v9534_v56 = vadd.f32 %v9533_v20, %v9525_v23 }
0x158e   :  { %v9521_v49 = vadd.f32 %v9520_v19, %v9519_v48  ;;  %v9572_v43 = vadd.f32 %v9571_v30, %v9570_v10 }
0x158f   :  { %v9536_v17 = vsel %vm9535_vm8, %v9534_v56, 0.0 }
0x1590   :  { %9537 = vadd.xlane.f32.xlu0 %v9536_v17  ;;  %11540 = vpush %v9521_v49  ;;  %v9573_v16 = vrot.slane %v9572_v43, 1 }
0x1592   :  { %v9574_v54 = vadd.f32 %v9573_v16, %v9572_v43 }
0x15c1   :  { %s11541_s14 = spop %11540 }
0x161d   :  { %v9538_v18 = vpop.xlane.xlu0 %9537 }
0x161e   :  { %v9539_v46 = vrot.slane %v9538_v18, 4 }
0x1620   :  { %v9540_v7 = vadd.f32 %v9539_v46, %v9538_v18 }
0x1622   :  { %v9541_v52 = vrot.slane %v9540_v7, 2 }
0x1624   :  { %v9542_v27 = vadd.f32 %v9541_v52, %v9540_v7 }
0x1626   :  { %v9543_v14 = vrot.slane %v9542_v27, 1 }
0x1628   :  { %v9544_v8 = vadd.f32 %v9543_v14, %v9542_v27 }
0x162a   :  { %11542 = vpush %v9544_v8 }
0x162b   :  { %11544 = vpush %v9574_v54 }
0x165b   :  { %s11543_s15 = spop %11542 }
0x165c   :  { %s9576_s20 = ssub.f32 %s11543_s15, %s11541_s14  ;;  %s11545_s11 = spop %11544 }
0x165d   :  { %s9577_s5 = ssub.f32 %s11545_s11, %s11541_s14 }
0x165f   :  { %s9578_s24 = sadd.f32 %s9577_s5, %s9576_s20 }
0x1661   :  { %s9579_s4 = smul.f32 0.5, %s9578_s24 }
0x1663   :  { %s9582_s22 = smul.f32 0.25, %s9579_s4 }
0x1665   :  { %9584 = sst [smem:[#allocation33]] %s9582_s22 }
0x1666   :  { %13055 = shalt.err (!%p13052_p2)
}
0x1667   :  { %s13108_s26 = smov [#allocation33]  }
0x1668   :  { %9592 = dma.smem_to_hbm %s13108_s26, 16, %s15202_s16, [#allocation12]  }
0x1669   :  { %13072 = dma.done.wait [#allocation12], 16  }
0x166a   :  { %13073 = vsyncadd [#allocation12], 4294967280 }
0x166b   :  { %9596 = sfence }
0x166c   :  { %9597 = vsyncpa [#allocation11], 1 }
0x166d   :  { %9598 = vsyncpa [#allocation14], 1 }
0x166e   :  { %9599 = vsyncpa [#allocation17], 1 }
0x166f   :  { %9600 = vsyncpa [#allocation20], 1 }
0x1670   :  { %9601 = vsyncpa [#allocation23], 1 }
0x1671   :  { %9602 = vsyncpa [#allocation26], 1 }
0x1672   :  { %9603 = vsyncpa [#allocation29], 1 }
0x1673   :  { %9604 = vsyncpa [#allocation32], 1 }
0x1674   :  { %9605 = vsyncpa [#allocation12], 1 }

</bundles_post_ra>
